<compile_context>
chip_gen: v6e
topology: v6e:2x2x1
jax: 0.10.0
libtpu: 0.0.40
codegen_flags: <defaults>
</compile_context>

<pallas_src>
import functools

import jax
import jax.numpy as jnp
from jax import lax
from jax.experimental import pallas as pl
from jax.experimental.pallas import tpu as pltpu

_EPS = 1e-5                        # F.layer_norm default eps
_SQRT_HALF = 0.7071067811865476    # 1/sqrt(2) for exact GELU
_VMEM_LIMIT = 32 * 1024 * 1024     # explicit scoped-VMEM budget (safe on v5e/v6e/v7x)
_MATMUL_DTYPE = jnp.bfloat16       # MXU operand dtype (f32 accumulation everywhere)


# ----------------------------------------------------------------------------
# Tiling helper
# ----------------------------------------------------------------------------
def _pick_batch_tile(batch, seq, target_rows=256, min_steps=8):
    """Largest divisor of `batch` with tile*seq <= target_rows and >= min_steps grid
    steps (when batch allows), so the BlockSpec pipeline has work to overlap."""
    cap_rows = max(1, target_rows // max(seq, 1))
    cap_steps = max(1, batch // min_steps) if batch >= min_steps else batch
    t = max(1, min(batch, cap_rows, cap_steps))
    while batch % t:
        t -= 1
    return t


# ----------------------------------------------------------------------------
# In-kernel math helpers (f32 statistics, bf16 MXU operands)
# ----------------------------------------------------------------------------
def _ln(x, gamma):
    """F.layer_norm over the last axis, gamma scale, beta == 0."""
    xf = x.astype(jnp.float32)
    mu = jnp.mean(xf, axis=-1, keepdims=True)
    var = jnp.mean(jnp.square(xf - mu), axis=-1, keepdims=True)
    return (xf - mu) * lax.rsqrt(var + _EPS) * gamma.astype(jnp.float32)


def _erf(x):
    """Abramowitz & Stegun 7.1.26 rational erf approximation (|err| <= 1.5e-7).
    Uses only exp/mul/add/where so it lowers on every Mosaic generation."""
    a1, a2, a3, a4, a5 = 0.254829592, -0.284496736, 1.421413741, -1.453152027, 1.061405429
    p = 0.3275911
    z = jnp.abs(x)
    t = 1.0 / (1.0 + p * z)
    poly = ((((a5 * t + a4) * t + a3) * t + a2) * t + a1) * t
    e = 1.0 - poly * jnp.exp(-z * z)
    return jnp.where(x < 0.0, -e, e)


def _gelu(x):
    """Exact GELU (torch nn.GELU default) via the erf approximation above."""
    return 0.5 * x * (1.0 + _erf(x * _SQRT_HALF))


# ----------------------------------------------------------------------------
# Kernel A: fused LayerNorm + spatial self-attention + residual
#   rows = (b*n) tiles, sequence length = c.  Residual is the POST-norm tensor,
#   exactly as in the reference (`x = norm(x); x = attn(x,x,x) + x`).
# ----------------------------------------------------------------------------
def _spatial_attn_kernel(x_ref, g_ref, wq_ref, wk_ref, wv_ref, wo_ref, o_ref, *, heads):
    TB, S, D = x_ref.shape
    dh = D // heads

    x = x_ref[...]
    y = _ln(x, g_ref[...])                                   # (TB, S, D) f32
    y2 = y.reshape(TB * S, D).astype(_MATMUL_DTYPE)

    # Head-fused, lane-dense (D, D) projections (dh**-0.5 already folded into wq).
    q = jnp.dot(y2, wq_ref[...], preferred_element_type=jnp.float32)
    k = jnp.dot(y2, wk_ref[...], preferred_element_type=jnp.float32)
    v = jnp.dot(y2, wv_ref[...], preferred_element_type=jnp.float32)

    houts = []
    for h in range(heads):                                   # static unroll; tiny live set
        sl = slice(h * dh, (h + 1) * dh)
        qh = q[:, sl].astype(_MATMUL_DTYPE).reshape(TB, S, dh)
        kh = k[:, sl].astype(_MATMUL_DTYPE).reshape(TB, S, dh)
        vh = v[:, sl].astype(_MATMUL_DTYPE).reshape(TB, S, dh)
        s = jnp.einsum('bqe,bke->bqk', qh, kh, preferred_element_type=jnp.float32)
        m = jnp.max(s, axis=-1, keepdims=True)
        p = jnp.exp(s - m)
        inv = pl.reciprocal(jnp.sum(p, axis=-1, keepdims=True), approx=True)
        o = jnp.einsum('bqk,bke->bqe', p.astype(_MATMUL_DTYPE), vh,
                       preferred_element_type=jnp.float32) * inv
        houts.append(o.reshape(TB * S, dh))

    # Single lane-dense (rows, D) @ (D, D) output projection.
    o_all = jnp.concatenate(houts, axis=-1).astype(_MATMUL_DTYPE)
    att = jnp.dot(o_all, wo_ref[...], preferred_element_type=jnp.float32).reshape(TB, S, D)
    o_ref[...] = (att + y).astype(o_ref.dtype)


def _spatial_attention(x3, gamma, sp_w, heads):
    """x3: (b*n, c, d).  Tiled over rows; c and d blocks are full."""
    B, S, D = x3.shape
    TB = _pick_batch_tile(B, S)
    kernel = functools.partial(_spatial_attn_kernel, heads=heads)

    def wmap(i):
        return (0, 0)

    return pl.pallas_call(
        kernel,
        out_shape=jax.ShapeDtypeStruct((B, S, D), x3.dtype),
        grid=(B // TB,),
        in_specs=[
            pl.BlockSpec((TB, S, D), lambda i: (i, 0, 0)),
            pl.BlockSpec((1, D), wmap),
            pl.BlockSpec((D, D), wmap), pl.BlockSpec((D, D), wmap),
            pl.BlockSpec((D, D), wmap), pl.BlockSpec((D, D), wmap),
        ],
        out_specs=pl.BlockSpec((TB, S, D), lambda i: (i, 0, 0)),
        compiler_params=pltpu.CompilerParams(
            dimension_semantics=("parallel",),
            vmem_limit_bytes=_VMEM_LIMIT),
    )(x3, gamma.reshape(1, D), *sp_w)


# ----------------------------------------------------------------------------
# Kernel B: fused temporal self-attn + cross-attn (+ null K/V) + FeedForward,
#   with all LayerNorms and residuals.  One (b, c) grid step = one (n, d) row;
#   every matmul is a plain 2-D MXU matmul.
# ----------------------------------------------------------------------------
def _temporal_cross_ff_kernel(
        x_ref, ctx_ref,
        gt_ref, tq_ref, tk_ref, tv_ref, to_ref,
        gc_ref, cq_ref, ck_ref, cv_ref, co_ref, nk_ref, nv_ref,
        w1_ref, gi_ref, w2_ref, go_ref,
        o_ref, *, heads):
    N, D = x_ref.shape[2], x_ref.shape[3]
    dh = D // heads

    x = x_ref[0, 0]                                          # (N, D)

    # ---------------- temporal self-attention (residual = post-norm y) -------------
    y = _ln(x, gt_ref[...])
    y_mm = y.astype(_MATMUL_DTYPE)
    q = jnp.dot(y_mm, tq_ref[...], preferred_element_type=jnp.float32)
    k = jnp.dot(y_mm, tk_ref[...], preferred_element_type=jnp.float32)
    v = jnp.dot(y_mm, tv_ref[...], preferred_element_type=jnp.float32)
    houts = []
    for h in range(heads):
        sl = slice(h * dh, (h + 1) * dh)
        qh = q[:, sl].astype(_MATMUL_DTYPE)
        kh = k[:, sl].astype(_MATMUL_DTYPE)
        vh = v[:, sl].astype(_MATMUL_DTYPE)
        s = jnp.dot(qh, kh.T, preferred_element_type=jnp.float32)        # (N, N)
        m = jnp.max(s, axis=-1, keepdims=True)
        p = jnp.exp(s - m)
        inv = pl.reciprocal(jnp.sum(p, axis=-1, keepdims=True), approx=True)
        houts.append(jnp.dot(p.astype(_MATMUL_DTYPE), vh,
                             preferred_element_type=jnp.float32) * inv)
    att = jnp.dot(jnp.concatenate(houts, axis=-1).astype(_MATMUL_DTYPE), to_ref[...],
                  preferred_element_type=jnp.float32)
    x1 = att + y

    # ---------------- cross-attention (shared context, learned null K/V) -----------
    # Residual is the pre-norm x1 (reference: `x = cross(norm(x), ctx, ctx) + x`).
    yc = _ln(x1, gc_ref[...])
    q = jnp.dot(yc.astype(_MATMUL_DTYPE), cq_ref[...], preferred_element_type=jnp.float32)
    ctx = ctx_ref[0].astype(_MATMUL_DTYPE)                   # (M, D) shared across c rows
    kc = jnp.dot(ctx, ck_ref[...], preferred_element_type=jnp.float32)
    vc = jnp.dot(ctx, cv_ref[...], preferred_element_type=jnp.float32)
    nk = nk_ref[...].astype(jnp.float32)                     # (heads, dh)
    nv = nv_ref[...].astype(jnp.float32)
    houts = []
    for h in range(heads):
        sl = slice(h * dh, (h + 1) * dh)
        qh = q[:, sl]                                        # f32, scale folded into cq
        kh = kc[:, sl].astype(_MATMUL_DTYPE)
        vh = vc[:, sl].astype(_MATMUL_DTYPE)
        s = jnp.dot(qh.astype(_MATMUL_DTYPE), kh.T,
                    preferred_element_type=jnp.float32)      # (N, M)
        # learned null K/V token folded into the softmax as a fused side term
        s0 = jnp.sum(qh * nk[h:h + 1, :], axis=-1, keepdims=True)        # (N, 1)
        m = jnp.maximum(jnp.max(s, axis=-1, keepdims=True), s0)
        p = jnp.exp(s - m)
        p0 = jnp.exp(s0 - m)
        inv = pl.reciprocal(jnp.sum(p, axis=-1, keepdims=True) + p0, approx=True)
        o = (jnp.dot(p.astype(_MATMUL_DTYPE), vh, preferred_element_type=jnp.float32)
             + p0 * nv[h:h + 1, :]) * inv
        houts.append(o)
    att = jnp.dot(jnp.concatenate(houts, axis=-1).astype(_MATMUL_DTYPE), co_ref[...],
                  preferred_element_type=jnp.float32)
    x2 = att + x1

    # ---------------- FiLM is nn.Identity (film_skip=0 / last layer) ---------------
    # ---------------- FeedForward + residual + norm_out ----------------------------
    h1 = jnp.dot(x2.astype(_MATMUL_DTYPE), w1_ref[...], preferred_element_type=jnp.float32)
    h1 = _gelu(h1)
    h1 = _ln(h1, gi_ref[...])                                # inner LayerNorm of FeedForward
    yff = jnp.dot(h1.astype(_MATMUL_DTYPE), w2_ref[...], preferred_element_type=jnp.float32)
    out = _ln(yff + x2, go_ref[...])                         # norm_out(ff(x) + x)
    o_ref[0, 0] = out.astype(o_ref.dtype)


def _temporal_cross_ff(x4, ctx, g_temporal, tp_w, g_cross, cr_w, nk, nv,
                       w1, g_inner, w2, g_out, heads):
    """x4: (b, c, n, d) (temporal layout), ctx: (b, M, d).  Grid (b, c); the per-b
    context block has a constant index over c so it stays resident across the inner
    grid steps (the reference's repeat of the context is never materialized)."""
    b, c, N, D = x4.shape
    M = ctx.shape[1]
    inner = w1.shape[1]
    dh = D // heads
    kernel = functools.partial(_temporal_cross_ff_kernel, heads=heads)

    def wmap(i, j):  # resident weights / gains
        return (0, 0)

    return pl.pallas_call(
        kernel,
        out_shape=jax.ShapeDtypeStruct((b, c, N, D), x4.dtype),
        grid=(b, c),
        in_specs=[
            pl.BlockSpec((1, 1, N, D), lambda i, j: (i, j, 0, 0)),   # activation row
            pl.BlockSpec((1, M, D), lambda i, j: (i, 0, 0)),         # per-b context
            pl.BlockSpec((1, D), wmap),                              # g_temporal
            pl.BlockSpec((D, D), wmap), pl.BlockSpec((D, D), wmap),
            pl.BlockSpec((D, D), wmap), pl.BlockSpec((D, D), wmap),  # temporal q/k/v/o
            pl.BlockSpec((1, D), wmap),                              # g_cross
            pl.BlockSpec((D, D), wmap), pl.BlockSpec((D, D), wmap),
            pl.BlockSpec((D, D), wmap), pl.BlockSpec((D, D), wmap),  # cross q/k/v/o
            pl.BlockSpec((heads, dh), wmap),                         # null K
            pl.BlockSpec((heads, dh), wmap),                         # null V
            pl.BlockSpec((D, inner), wmap),                          # FF w1
            pl.BlockSpec((1, inner), wmap),                          # FF inner LN gamma
            pl.BlockSpec((inner, D), wmap),                          # FF w2
            pl.BlockSpec((1, D), wmap),                              # norm_out gamma
        ],
        out_specs=pl.BlockSpec((1, 1, N, D), lambda i, j: (i, j, 0, 0)),
        compiler_params=pltpu.CompilerParams(
            dimension_semantics=("parallel", "parallel"),
            vmem_limit_bytes=_VMEM_LIMIT),
    )(x4, ctx,
      g_temporal.reshape(1, D), *tp_w,
      g_cross.reshape(1, D), *cr_w, nk, nv,
      w1, g_inner.reshape(1, inner), w2, g_out.reshape(1, D))


# ----------------------------------------------------------------------------
# Parameter prep (weight-side, outside the kernels)
# ----------------------------------------------------------------------------
def _prep_attn(p, dh):
    """Fold the softmax scale into Wq and cast MXU weights to the matmul dtype."""
    scale = dh ** -0.5
    return ((p["wq"] * scale).astype(_MATMUL_DTYPE),
            p["wk"].astype(_MATMUL_DTYPE),
            p["wv"].astype(_MATMUL_DTYPE),
            p["wo"].astype(_MATMUL_DTYPE))


# ----------------------------------------------------------------------------
# Full block forward (mirrors the PyTorch forward, default config)
# ----------------------------------------------------------------------------
def transformer_block_forward(params, x, context, heads):
    b, n, c, d = x.shape
    dh = d // heads
    num_layers = len(params["layers"])

    # spatial layout '(b n) c d' is a free reshape of the (b, n, c, d) input
    x_sp = x.reshape(b * n, c, d)
    out = None
    for li, lp in enumerate(params["layers"]):
        sp_w = _prep_attn(lp["sp"], dh)
        tp_w = _prep_attn(lp["tp"], dh)
        cr_w = _prep_attn(lp["cross"], dh)
        ff = lp["ff"]

        # ---- Kernel A: LN_spatial + spatial MHA + residual ----
        x_sp = _spatial_attention(x_sp, params["g_spatial"], sp_w, heads)

        # ---- single layout switch per layer: '(b n) c d -> (b c) n d' ----
        x_tp = x_sp.reshape(b, n, c, d).transpose(0, 2, 1, 3)     # (b, c, n, d)

        # ---- Kernel B: temporal MHA + cross MHA (+null kv) + FF, all norms/residuals ----
        x_bc = _temporal_cross_ff(
            x_tp, context,
            params["g_temporal"], tp_w,
            params["g_cross"], cr_w, lp["cross"]["nk"], lp["cross"]["nv"],
            ff["w1"].astype(_MATMUL_DTYPE), ff["g"],
            ff["w2"].astype(_MATMUL_DTYPE), params["g_out"], heads)

        if li + 1 < num_layers:
            # back to the spatial layout for the next layer
            x_sp = x_bc.transpose(0, 2, 1, 3).reshape(b * n, c, d)
        out = x_bc
    # Kernel B already wrote the final '(b c) n d -> b c n d' layout
    return out


# ----------------------------------------------------------------------------
# Deterministic synthetic parameters
# ----------------------------------------------------------------------------
def init_params(key, dim, heads, ff_mult, depth):
    inner = dim * ff_mult
    dh = dim // heads

    def dense(k, shape):
        return jax.random.normal(k, shape, jnp.float32) * 0.02

    def mha(k, add_null_kv=False):
        ks = jax.random.split(k, 6)
        p = dict(wq=dense(ks[0], (dim, dim)), wk=dense(ks[1], (dim, dim)),
                 wv=dense(ks[2], (dim, dim)), wo=dense(ks[3], (dim, dim)))
        if add_null_kv:
            p["nk"] = dense(ks[4], (heads, dh))
            p["nv"] = dense(ks[5], (heads, dh))
        return p

    layers = []
    for li in range(depth):
        ks = jax.random.split(jax.random.fold_in(key, li), 5)
        layers.append(dict(
            sp=mha(ks[0]),
            tp=mha(ks[1]),
            cross=mha(ks[2], add_null_kv=True),
            ff=dict(w1=dense(ks[3], (dim, inner)),
                    g=jnp.ones((inner,), jnp.float32),
                    w2=dense(ks[4], (inner, dim)))))

    ones = jnp.ones((dim,), jnp.float32)
    # norm weights live at module level in the reference (shared across depth layers)
    return dict(layers=layers, g_spatial=ones, g_temporal=ones,
                g_cross=ones, g_out=ones)


if __name__ == "__main__":
    key = jax.random.PRNGKey(0)
    b, n, c, d = 2, 32, 4, 128      # (batch, temporal len, spatial/codebook channels, hidden)
    heads = 4
    ctx_len = 16
    depth = 1
    assert d % heads == 0

    kx, kc, kp = jax.random.split(key, 3)
    x = jax.random.normal(kx, (b, n, c, d), jnp.float32)
    context = jax.random.normal(kc, (b, ctx_len, d), jnp.float32)
    params = init_params(kp, d, heads, ff_mult=4, depth=depth)

    fwd = jax.jit(functools.partial(transformer_block_forward, heads=heads))
    out = jax.block_until_ready(fwd(params, x, context))
    assert out.shape == (b, c, n, d), out.shape
    assert bool(jnp.all(jnp.isfinite(out)))
    print("KERNEL_OK")
</pallas_src>

<mosaic_0001>
module attributes {stable_mosaic.version = 11 : i64} {
  func.func @_spatial_attn_kernel(%arg0: i32, %arg1: memref<8x4x128xf32, #tpu.memory_space<vmem>>, %arg2: memref<1x128xf32, #tpu.memory_space<vmem>>, %arg3: memref<128x128xbf16, #tpu.memory_space<vmem>>, %arg4: memref<128x128xbf16, #tpu.memory_space<vmem>>, %arg5: memref<128x128xbf16, #tpu.memory_space<vmem>>, %arg6: memref<128x128xbf16, #tpu.memory_space<vmem>>, %arg7: memref<8x4x128xf32, #tpu.memory_space<vmem>>) attributes {dimension_semantics = [#tpu.dimension_semantics<parallel>], iteration_bounds = array<i64: 8>, scalar_prefetch = 0 : i64, scratch_operands = 0 : i64, tpu.core_type = #tpu.core_type<tc>, window_params = [{transform_indices = @transform_0, window_bounds = array<i64: 8, 4, 128>}, {pipeline_mode = #tpu.pipeline_mode<synchronous>, transform_indices = @transform_1, window_bounds = array<i64: 1, 128>}, {pipeline_mode = #tpu.pipeline_mode<synchronous>, transform_indices = @transform_2, window_bounds = array<i64: 128, 128>}, {pipeline_mode = #tpu.pipeline_mode<synchronous>, transform_indices = @transform_3, window_bounds = array<i64: 128, 128>}, {pipeline_mode = #tpu.pipeline_mode<synchronous>, transform_indices = @transform_4, window_bounds = array<i64: 128, 128>}, {pipeline_mode = #tpu.pipeline_mode<synchronous>, transform_indices = @transform_5, window_bounds = array<i64: 128, 128>}, {transform_indices = @transform_6, window_bounds = array<i64: 8, 4, 128>}]} {
    %c0 = arith.constant 0 : index
    %c0_0 = arith.constant 0 : index
    %c0_1 = arith.constant 0 : index
    %0 = vector.load %arg1[%c0, %c0_0, %c0_1] : memref<8x4x128xf32, #tpu.memory_space<vmem>>, vector<8x4x128xf32>
    %c0_2 = arith.constant 0 : index
    %c0_3 = arith.constant 0 : index
    %1 = vector.load %arg2[%c0_2, %c0_3] : memref<1x128xf32, #tpu.memory_space<vmem>>, vector<1x128xf32>
    %cst = arith.constant dense<0.000000e+00> : vector<8x4xf32>
    %2 = vector.multi_reduction <add>, %0, %cst [2] : vector<8x4x128xf32> to vector<8x4xf32>
    %3 = vector.shape_cast %2 : vector<8x4xf32> to vector<8x4x1xf32>
    %cst_4 = arith.constant 1.280000e+02 : f32
    %4 = vector.broadcast %cst_4 : f32 to vector<8x4x1xf32>
    %5 = arith.divf %3, %4 : vector<8x4x1xf32>
    %6 = vector.broadcast %5 : vector<8x4x1xf32> to vector<8x4x128xf32>
    %7 = arith.subf %0, %6 : vector<8x4x128xf32>
    %8 = arith.mulf %7, %7 : vector<8x4x128xf32>
    %cst_5 = arith.constant dense<0.000000e+00> : vector<8x4xf32>
    %9 = vector.multi_reduction <add>, %8, %cst_5 [2] : vector<8x4x128xf32> to vector<8x4xf32>
    %10 = vector.shape_cast %9 : vector<8x4xf32> to vector<8x4x1xf32>
    %cst_6 = arith.constant 1.280000e+02 : f32
    %11 = vector.broadcast %cst_6 : f32 to vector<8x4x1xf32>
    %12 = arith.divf %10, %11 : vector<8x4x1xf32>
    %13 = vector.broadcast %5 : vector<8x4x1xf32> to vector<8x4x128xf32>
    %14 = arith.subf %0, %13 : vector<8x4x128xf32>
    %cst_7 = arith.constant 9.99999974E-6 : f32
    %15 = vector.broadcast %cst_7 : f32 to vector<8x4x1xf32>
    %16 = arith.addf %12, %15 : vector<8x4x1xf32>
    %17 = math.rsqrt %16 : vector<8x4x1xf32>
    %18 = vector.broadcast %17 : vector<8x4x1xf32> to vector<8x4x128xf32>
    %19 = arith.mulf %14, %18 : vector<8x4x128xf32>
    %20 = vector.shape_cast %1 : vector<1x128xf32> to vector<1x1x128xf32>
    %21 = vector.broadcast %20 : vector<1x1x128xf32> to vector<8x4x128xf32>
    %22 = arith.mulf %19, %21 : vector<8x4x128xf32>
    %23 = vector.shape_cast %22 : vector<8x4x128xf32> to vector<32x128xf32>
    %24 = arith.truncf %23 : vector<32x128xf32> to vector<32x128xbf16>
    %c0_8 = arith.constant 0 : index
    %c0_9 = arith.constant 0 : index
    %25 = vector.load %arg3[%c0_8, %c0_9] : memref<128x128xbf16, #tpu.memory_space<vmem>>, vector<128x128xbf16>
    %cst_10 = arith.constant dense<0.000000e+00> : vector<32x128xf32>
    %26 = tpu.matmul %24, %25, %cst_10 {dimension_numbers = #tpu.dot_dimension_numbers<[1], [0], [0], [1], [0, 0, 1, 1], [], []>} : vector<32x128xbf16>, vector<128x128xbf16>, vector<32x128xf32> -> vector<32x128xf32>
    %c0_11 = arith.constant 0 : index
    %c0_12 = arith.constant 0 : index
    %27 = vector.load %arg4[%c0_11, %c0_12] : memref<128x128xbf16, #tpu.memory_space<vmem>>, vector<128x128xbf16>
    %cst_13 = arith.constant dense<0.000000e+00> : vector<32x128xf32>
    %28 = tpu.matmul %24, %27, %cst_13 {dimension_numbers = #tpu.dot_dimension_numbers<[1], [0], [0], [1], [0, 0, 1, 1], [], []>} : vector<32x128xbf16>, vector<128x128xbf16>, vector<32x128xf32> -> vector<32x128xf32>
    %c0_14 = arith.constant 0 : index
    %c0_15 = arith.constant 0 : index
    %29 = vector.load %arg5[%c0_14, %c0_15] : memref<128x128xbf16, #tpu.memory_space<vmem>>, vector<128x128xbf16>
    %cst_16 = arith.constant dense<0.000000e+00> : vector<32x128xf32>
    %30 = tpu.matmul %24, %29, %cst_16 {dimension_numbers = #tpu.dot_dimension_numbers<[1], [0], [0], [1], [0, 0, 1, 1], [], []>} : vector<32x128xbf16>, vector<128x128xbf16>, vector<32x128xf32> -> vector<32x128xf32>
    %31 = vector.extract_strided_slice %26 {offsets = [0, 0], sizes = [32, 32], strides = [1, 1]} : vector<32x128xf32> to vector<32x32xf32>
    %32 = arith.truncf %31 : vector<32x32xf32> to vector<32x32xbf16>
    %33 = vector.shape_cast %32 : vector<32x32xbf16> to vector<8x4x32xbf16>
    %34 = vector.extract_strided_slice %28 {offsets = [0, 0], sizes = [32, 32], strides = [1, 1]} : vector<32x128xf32> to vector<32x32xf32>
    %35 = arith.truncf %34 : vector<32x32xf32> to vector<32x32xbf16>
    %36 = vector.shape_cast %35 : vector<32x32xbf16> to vector<8x4x32xbf16>
    %37 = vector.extract_strided_slice %30 {offsets = [0, 0], sizes = [32, 32], strides = [1, 1]} : vector<32x128xf32> to vector<32x32xf32>
    %38 = arith.truncf %37 : vector<32x32xf32> to vector<32x32xbf16>
    %39 = vector.shape_cast %38 : vector<32x32xbf16> to vector<8x4x32xbf16>
    "tpu.trace_start"() <{level = 10 : i32, message = "bqe,bke->bqk"}> : () -> ()
    %cst_17 = arith.constant dense<0.000000e+00> : vector<8x4x4xf32>
    %40 = tpu.matmul %33, %36, %cst_17 {dimension_numbers = #tpu.dot_dimension_numbers<[2], [2], [1], [1], [0, 0, 0, 1, 1, 1], [0], [0]>} : vector<8x4x32xbf16>, vector<8x4x32xbf16>, vector<8x4x4xf32> -> vector<8x4x4xf32>
    "tpu.trace_stop"() : () -> ()
    %cst_18 = arith.constant dense<0xFF800000> : vector<8x4xf32>
    %41 = vector.multi_reduction <maximumf>, %40, %cst_18 [2] : vector<8x4x4xf32> to vector<8x4xf32>
    %42 = vector.shape_cast %41 : vector<8x4xf32> to vector<8x4x1xf32>
    %43 = vector.broadcast %42 : vector<8x4x1xf32> to vector<8x4x4xf32>
    %44 = arith.subf %40, %43 : vector<8x4x4xf32>
    %45 = math.exp %44 : vector<8x4x4xf32>
    %cst_19 = arith.constant dense<0.000000e+00> : vector<8x4xf32>
    %46 = vector.multi_reduction <add>, %45, %cst_19 [2] : vector<8x4x4xf32> to vector<8x4xf32>
    %47 = vector.shape_cast %46 : vector<8x4xf32> to vector<8x4x1xf32>
    %48 = tpu.reciprocal %47 {approx = true} : vector<8x4x1xf32> -> vector<8x4x1xf32>
    %49 = arith.truncf %45 : vector<8x4x4xf32> to vector<8x4x4xbf16>
    "tpu.trace_start"() <{level = 10 : i32, message = "bqk,bke->bqe"}> : () -> ()
    %cst_20 = arith.constant dense<0.000000e+00> : vector<8x4x32xf32>
    %50 = tpu.matmul %49, %39, %cst_20 {dimension_numbers = #tpu.dot_dimension_numbers<[2], [1], [1], [2], [0, 0, 0, 1, 1, 2], [0], [0]>} : vector<8x4x4xbf16>, vector<8x4x32xbf16>, vector<8x4x32xf32> -> vector<8x4x32xf32>
    "tpu.trace_stop"() : () -> ()
    %51 = vector.broadcast %48 : vector<8x4x1xf32> to vector<8x4x32xf32>
    %52 = arith.mulf %50, %51 : vector<8x4x32xf32>
    %53 = vector.shape_cast %52 : vector<8x4x32xf32> to vector<32x32xf32>
    %54 = vector.extract_strided_slice %26 {offsets = [0, 32], sizes = [32, 32], strides = [1, 1]} : vector<32x128xf32> to vector<32x32xf32>
    %55 = arith.truncf %54 : vector<32x32xf32> to vector<32x32xbf16>
    %56 = vector.shape_cast %55 : vector<32x32xbf16> to vector<8x4x32xbf16>
    %57 = vector.extract_strided_slice %28 {offsets = [0, 32], sizes = [32, 32], strides = [1, 1]} : vector<32x128xf32> to vector<32x32xf32>
    %58 = arith.truncf %57 : vector<32x32xf32> to vector<32x32xbf16>
    %59 = vector.shape_cast %58 : vector<32x32xbf16> to vector<8x4x32xbf16>
    %60 = vector.extract_strided_slice %30 {offsets = [0, 32], sizes = [32, 32], strides = [1, 1]} : vector<32x128xf32> to vector<32x32xf32>
    %61 = arith.truncf %60 : vector<32x32xf32> to vector<32x32xbf16>
    %62 = vector.shape_cast %61 : vector<32x32xbf16> to vector<8x4x32xbf16>
    "tpu.trace_start"() <{level = 10 : i32, message = "bqe,bke->bqk"}> : () -> ()
    %cst_21 = arith.constant dense<0.000000e+00> : vector<8x4x4xf32>
    %63 = tpu.matmul %56, %59, %cst_21 {dimension_numbers = #tpu.dot_dimension_numbers<[2], [2], [1], [1], [0, 0, 0, 1, 1, 1], [0], [0]>} : vector<8x4x32xbf16>, vector<8x4x32xbf16>, vector<8x4x4xf32> -> vector<8x4x4xf32>
    "tpu.trace_stop"() : () -> ()
    %cst_22 = arith.constant dense<0xFF800000> : vector<8x4xf32>
    %64 = vector.multi_reduction <maximumf>, %63, %cst_22 [2] : vector<8x4x4xf32> to vector<8x4xf32>
    %65 = vector.shape_cast %64 : vector<8x4xf32> to vector<8x4x1xf32>
    %66 = vector.broadcast %65 : vector<8x4x1xf32> to vector<8x4x4xf32>
    %67 = arith.subf %63, %66 : vector<8x4x4xf32>
    %68 = math.exp %67 : vector<8x4x4xf32>
    %cst_23 = arith.constant dense<0.000000e+00> : vector<8x4xf32>
    %69 = vector.multi_reduction <add>, %68, %cst_23 [2] : vector<8x4x4xf32> to vector<8x4xf32>
    %70 = vector.shape_cast %69 : vector<8x4xf32> to vector<8x4x1xf32>
    %71 = tpu.reciprocal %70 {approx = true} : vector<8x4x1xf32> -> vector<8x4x1xf32>
    %72 = arith.truncf %68 : vector<8x4x4xf32> to vector<8x4x4xbf16>
    "tpu.trace_start"() <{level = 10 : i32, message = "bqk,bke->bqe"}> : () -> ()
    %cst_24 = arith.constant dense<0.000000e+00> : vector<8x4x32xf32>
    %73 = tpu.matmul %72, %62, %cst_24 {dimension_numbers = #tpu.dot_dimension_numbers<[2], [1], [1], [2], [0, 0, 0, 1, 1, 2], [0], [0]>} : vector<8x4x4xbf16>, vector<8x4x32xbf16>, vector<8x4x32xf32> -> vector<8x4x32xf32>
    "tpu.trace_stop"() : () -> ()
    %74 = vector.broadcast %71 : vector<8x4x1xf32> to vector<8x4x32xf32>
    %75 = arith.mulf %73, %74 : vector<8x4x32xf32>
    %76 = vector.shape_cast %75 : vector<8x4x32xf32> to vector<32x32xf32>
    %77 = vector.extract_strided_slice %26 {offsets = [0, 64], sizes = [32, 32], strides = [1, 1]} : vector<32x128xf32> to vector<32x32xf32>
    %78 = arith.truncf %77 : vector<32x32xf32> to vector<32x32xbf16>
    %79 = vector.shape_cast %78 : vector<32x32xbf16> to vector<8x4x32xbf16>
    %80 = vector.extract_strided_slice %28 {offsets = [0, 64], sizes = [32, 32], strides = [1, 1]} : vector<32x128xf32> to vector<32x32xf32>
    %81 = arith.truncf %80 : vector<32x32xf32> to vector<32x32xbf16>
    %82 = vector.shape_cast %81 : vector<32x32xbf16> to vector<8x4x32xbf16>
    %83 = vector.extract_strided_slice %30 {offsets = [0, 64], sizes = [32, 32], strides = [1, 1]} : vector<32x128xf32> to vector<32x32xf32>
    %84 = arith.truncf %83 : vector<32x32xf32> to vector<32x32xbf16>
    %85 = vector.shape_cast %84 : vector<32x32xbf16> to vector<8x4x32xbf16>
    "tpu.trace_start"() <{level = 10 : i32, message = "bqe,bke->bqk"}> : () -> ()
    %cst_25 = arith.constant dense<0.000000e+00> : vector<8x4x4xf32>
    %86 = tpu.matmul %79, %82, %cst_25 {dimension_numbers = #tpu.dot_dimension_numbers<[2], [2], [1], [1], [0, 0, 0, 1, 1, 1], [0], [0]>} : vector<8x4x32xbf16>, vector<8x4x32xbf16>, vector<8x4x4xf32> -> vector<8x4x4xf32>
    "tpu.trace_stop"() : () -> ()
    %cst_26 = arith.constant dense<0xFF800000> : vector<8x4xf32>
    %87 = vector.multi_reduction <maximumf>, %86, %cst_26 [2] : vector<8x4x4xf32> to vector<8x4xf32>
    %88 = vector.shape_cast %87 : vector<8x4xf32> to vector<8x4x1xf32>
    %89 = vector.broadcast %88 : vector<8x4x1xf32> to vector<8x4x4xf32>
    %90 = arith.subf %86, %89 : vector<8x4x4xf32>
    %91 = math.exp %90 : vector<8x4x4xf32>
    %cst_27 = arith.constant dense<0.000000e+00> : vector<8x4xf32>
    %92 = vector.multi_reduction <add>, %91, %cst_27 [2] : vector<8x4x4xf32> to vector<8x4xf32>
    %93 = vector.shape_cast %92 : vector<8x4xf32> to vector<8x4x1xf32>
    %94 = tpu.reciprocal %93 {approx = true} : vector<8x4x1xf32> -> vector<8x4x1xf32>
    %95 = arith.truncf %91 : vector<8x4x4xf32> to vector<8x4x4xbf16>
    "tpu.trace_start"() <{level = 10 : i32, message = "bqk,bke->bqe"}> : () -> ()
    %cst_28 = arith.constant dense<0.000000e+00> : vector<8x4x32xf32>
    %96 = tpu.matmul %95, %85, %cst_28 {dimension_numbers = #tpu.dot_dimension_numbers<[2], [1], [1], [2], [0, 0, 0, 1, 1, 2], [0], [0]>} : vector<8x4x4xbf16>, vector<8x4x32xbf16>, vector<8x4x32xf32> -> vector<8x4x32xf32>
    "tpu.trace_stop"() : () -> ()
    %97 = vector.broadcast %94 : vector<8x4x1xf32> to vector<8x4x32xf32>
    %98 = arith.mulf %96, %97 : vector<8x4x32xf32>
    %99 = vector.shape_cast %98 : vector<8x4x32xf32> to vector<32x32xf32>
    %100 = vector.extract_strided_slice %26 {offsets = [0, 96], sizes = [32, 32], strides = [1, 1]} : vector<32x128xf32> to vector<32x32xf32>
    %101 = arith.truncf %100 : vector<32x32xf32> to vector<32x32xbf16>
    %102 = vector.shape_cast %101 : vector<32x32xbf16> to vector<8x4x32xbf16>
    %103 = vector.extract_strided_slice %28 {offsets = [0, 96], sizes = [32, 32], strides = [1, 1]} : vector<32x128xf32> to vector<32x32xf32>
    %104 = arith.truncf %103 : vector<32x32xf32> to vector<32x32xbf16>
    %105 = vector.shape_cast %104 : vector<32x32xbf16> to vector<8x4x32xbf16>
    %106 = vector.extract_strided_slice %30 {offsets = [0, 96], sizes = [32, 32], strides = [1, 1]} : vector<32x128xf32> to vector<32x32xf32>
    %107 = arith.truncf %106 : vector<32x32xf32> to vector<32x32xbf16>
    %108 = vector.shape_cast %107 : vector<32x32xbf16> to vector<8x4x32xbf16>
    "tpu.trace_start"() <{level = 10 : i32, message = "bqe,bke->bqk"}> : () -> ()
    %cst_29 = arith.constant dense<0.000000e+00> : vector<8x4x4xf32>
    %109 = tpu.matmul %102, %105, %cst_29 {dimension_numbers = #tpu.dot_dimension_numbers<[2], [2], [1], [1], [0, 0, 0, 1, 1, 1], [0], [0]>} : vector<8x4x32xbf16>, vector<8x4x32xbf16>, vector<8x4x4xf32> -> vector<8x4x4xf32>
    "tpu.trace_stop"() : () -> ()
    %cst_30 = arith.constant dense<0xFF800000> : vector<8x4xf32>
    %110 = vector.multi_reduction <maximumf>, %109, %cst_30 [2] : vector<8x4x4xf32> to vector<8x4xf32>
    %111 = vector.shape_cast %110 : vector<8x4xf32> to vector<8x4x1xf32>
    %112 = vector.broadcast %111 : vector<8x4x1xf32> to vector<8x4x4xf32>
    %113 = arith.subf %109, %112 : vector<8x4x4xf32>
    %114 = math.exp %113 : vector<8x4x4xf32>
    %cst_31 = arith.constant dense<0.000000e+00> : vector<8x4xf32>
    %115 = vector.multi_reduction <add>, %114, %cst_31 [2] : vector<8x4x4xf32> to vector<8x4xf32>
    %116 = vector.shape_cast %115 : vector<8x4xf32> to vector<8x4x1xf32>
    %117 = tpu.reciprocal %116 {approx = true} : vector<8x4x1xf32> -> vector<8x4x1xf32>
    %118 = arith.truncf %114 : vector<8x4x4xf32> to vector<8x4x4xbf16>
    "tpu.trace_start"() <{level = 10 : i32, message = "bqk,bke->bqe"}> : () -> ()
    %cst_32 = arith.constant dense<0.000000e+00> : vector<8x4x32xf32>
    %119 = tpu.matmul %118, %108, %cst_32 {dimension_numbers = #tpu.dot_dimension_numbers<[2], [1], [1], [2], [0, 0, 0, 1, 1, 2], [0], [0]>} : vector<8x4x4xbf16>, vector<8x4x32xbf16>, vector<8x4x32xf32> -> vector<8x4x32xf32>
    "tpu.trace_stop"() : () -> ()
    %120 = vector.broadcast %117 : vector<8x4x1xf32> to vector<8x4x32xf32>
    %121 = arith.mulf %119, %120 : vector<8x4x32xf32>
    %122 = vector.shape_cast %121 : vector<8x4x32xf32> to vector<32x32xf32>
    %123 = tpu.concatenate %53, %76, %99, %122 in 1 : vector<32x32xf32>, vector<32x32xf32>, vector<32x32xf32>, vector<32x32xf32> -> vector<32x128xf32>
    %124 = arith.truncf %123 : vector<32x128xf32> to vector<32x128xbf16>
    %c0_33 = arith.constant 0 : index
    %c0_34 = arith.constant 0 : index
    %125 = vector.load %arg6[%c0_33, %c0_34] : memref<128x128xbf16, #tpu.memory_space<vmem>>, vector<128x128xbf16>
    %cst_35 = arith.constant dense<0.000000e+00> : vector<32x128xf32>
    %126 = tpu.matmul %124, %125, %cst_35 {dimension_numbers = #tpu.dot_dimension_numbers<[1], [0], [0], [1], [0, 0, 1, 1], [], []>} : vector<32x128xbf16>, vector<128x128xbf16>, vector<32x128xf32> -> vector<32x128xf32>
    %127 = vector.shape_cast %126 : vector<32x128xf32> to vector<8x4x128xf32>
    %128 = arith.addf %127, %22 : vector<8x4x128xf32>
    %c0_36 = arith.constant 0 : index
    %c0_37 = arith.constant 0 : index
    %c0_38 = arith.constant 0 : index
    %129 = vector.load %arg7[%c0_36, %c0_37, %c0_38] : memref<8x4x128xf32, #tpu.memory_space<vmem>>, vector<8x4x128xf32>
    tpu.vector_store %arg7[%c0_36, %c0_37, %c0_38], %128 {strides = array<i32>} : memref<8x4x128xf32, #tpu.memory_space<vmem>>, vector<8x4x128xf32>,
    return
  }
  func.func @transform_0(%arg0: i32) -> (i32, i32, i32) {
    %c0_i32 = arith.constant 0 : i32
    %c0_i32_0 = arith.constant 0 : i32
    %c0_i32_1 = arith.constant 0 : i32
    return %arg0, %c0_i32, %c0_i32_0 : i32, i32, i32
  }
  func.func @transform_1(%arg0: i32) -> (i32, i32) {
    %c0_i32 = arith.constant 0 : i32
    %c0_i32_0 = arith.constant 0 : i32
    %c0_i32_1 = arith.constant 0 : i32
    return %c0_i32, %c0_i32_0 : i32, i32
  }
  func.func @transform_2(%arg0: i32) -> (i32, i32) {
    %c0_i32 = arith.constant 0 : i32
    %c0_i32_0 = arith.constant 0 : i32
    %c0_i32_1 = arith.constant 0 : i32
    return %c0_i32, %c0_i32_0 : i32, i32
  }
  func.func @transform_3(%arg0: i32) -> (i32, i32) {
    %c0_i32 = arith.constant 0 : i32
    %c0_i32_0 = arith.constant 0 : i32
    %c0_i32_1 = arith.constant 0 : i32
    return %c0_i32, %c0_i32_0 : i32, i32
  }
  func.func @transform_4(%arg0: i32) -> (i32, i32) {
    %c0_i32 = arith.constant 0 : i32
    %c0_i32_0 = arith.constant 0 : i32
    %c0_i32_1 = arith.constant 0 : i32
    return %c0_i32, %c0_i32_0 : i32, i32
  }
  func.func @transform_5(%arg0: i32) -> (i32, i32) {
    %c0_i32 = arith.constant 0 : i32
    %c0_i32_0 = arith.constant 0 : i32
    %c0_i32_1 = arith.constant 0 : i32
    return %c0_i32, %c0_i32_0 : i32, i32
  }
  func.func @transform_6(%arg0: i32) -> (i32, i32, i32) {
    %c0_i32 = arith.constant 0 : i32
    %c0_i32_0 = arith.constant 0 : i32
    %c0_i32_1 = arith.constant 0 : i32
    return %arg0, %c0_i32, %c0_i32_0 : i32, i32, i32
  }
}

module attributes {stable_mosaic.version = 11 : i64} {
  func.func @_temporal_cross_ff_kernel(%arg0: i32, %arg1: i32, %arg2: memref<1x1x32x128xf32, #tpu.memory_space<vmem>>, %arg3: memref<1x16x128xf32, #tpu.memory_space<vmem>>, %arg4: memref<1x128xf32, #tpu.memory_space<vmem>>, %arg5: memref<128x128xbf16, #tpu.memory_space<vmem>>, %arg6: memref<128x128xbf16, #tpu.memory_space<vmem>>, %arg7: memref<128x128xbf16, #tpu.memory_space<vmem>>, %arg8: memref<128x128xbf16, #tpu.memory_space<vmem>>, %arg9: memref<1x128xf32, #tpu.memory_space<vmem>>, %arg10: memref<128x128xbf16, #tpu.memory_space<vmem>>, %arg11: memref<128x128xbf16, #tpu.memory_space<vmem>>, %arg12: memref<128x128xbf16, #tpu.memory_space<vmem>>, %arg13: memref<128x128xbf16, #tpu.memory_space<vmem>>, %arg14: memref<4x32xf32, #tpu.memory_space<vmem>>, %arg15: memref<4x32xf32, #tpu.memory_space<vmem>>, %arg16: memref<128x512xbf16, #tpu.memory_space<vmem>>, %arg17: memref<1x512xf32, #tpu.memory_space<vmem>>, %arg18: memref<512x128xbf16, #tpu.memory_space<vmem>>, %arg19: memref<1x128xf32, #tpu.memory_space<vmem>>, %arg20: memref<1x1x32x128xf32, #tpu.memory_space<vmem>>) attributes {dimension_semantics = [#tpu.dimension_semantics<parallel>, #tpu.dimension_semantics<parallel>], iteration_bounds = array<i64: 2, 4>, scalar_prefetch = 0 : i64, scratch_operands = 0 : i64, tpu.core_type = #tpu.core_type<tc>, window_params = [{transform_indices = @transform_0, window_bounds = array<i64: 1, 1, 32, 128>}, {transform_indices = @transform_1, window_bounds = array<i64: 1, 16, 128>}, {pipeline_mode = #tpu.pipeline_mode<synchronous>, transform_indices = @transform_2, window_bounds = array<i64: 1, 128>}, {pipeline_mode = #tpu.pipeline_mode<synchronous>, transform_indices = @transform_3, window_bounds = array<i64: 128, 128>}, {pipeline_mode = #tpu.pipeline_mode<synchronous>, transform_indices = @transform_4, window_bounds = array<i64: 128, 128>}, {pipeline_mode = #tpu.pipeline_mode<synchronous>, transform_indices = @transform_5, window_bounds = array<i64: 128, 128>}, {pipeline_mode = #tpu.pipeline_mode<synchronous>, transform_indices = @transform_6, window_bounds = array<i64: 128, 128>}, {pipeline_mode = #tpu.pipeline_mode<synchronous>, transform_indices = @transform_7, window_bounds = array<i64: 1, 128>}, {pipeline_mode = #tpu.pipeline_mode<synchronous>, transform_indices = @transform_8, window_bounds = array<i64: 128, 128>}, {pipeline_mode = #tpu.pipeline_mode<synchronous>, transform_indices = @transform_9, window_bounds = array<i64: 128, 128>}, {pipeline_mode = #tpu.pipeline_mode<synchronous>, transform_indices = @transform_10, window_bounds = array<i64: 128, 128>}, {pipeline_mode = #tpu.pipeline_mode<synchronous>, transform_indices = @transform_11, window_bounds = array<i64: 128, 128>}, {pipeline_mode = #tpu.pipeline_mode<synchronous>, transform_indices = @transform_12, window_bounds = array<i64: 4, 32>}, {pipeline_mode = #tpu.pipeline_mode<synchronous>, transform_indices = @transform_13, window_bounds = array<i64: 4, 32>}, {pipeline_mode = #tpu.pipeline_mode<synchronous>, transform_indices = @transform_14, window_bounds = array<i64: 128, 512>}, {pipeline_mode = #tpu.pipeline_mode<synchronous>, transform_indices = @transform_15, window_bounds = array<i64: 1, 512>}, {pipeline_mode = #tpu.pipeline_mode<synchronous>, transform_indices = @transform_16, window_bounds = array<i64: 512, 128>}, {pipeline_mode = #tpu.pipeline_mode<synchronous>, transform_indices = @transform_17, window_bounds = array<i64: 1, 128>}, {transform_indices = @transform_18, window_bounds = array<i64: 1, 1, 32, 128>}]} {
    %c0 = arith.constant 0 : index
    %c0_0 = arith.constant 0 : index
    %c0_1 = arith.constant 0 : index
    %c0_2 = arith.constant 0 : index
    %0 = vector.load %arg2[%c0, %c0_0, %c0_1, %c0_2] : memref<1x1x32x128xf32, #tpu.memory_space<vmem>>, vector<1x1x32x128xf32>
    %1 = vector.shape_cast %0 : vector<1x1x32x128xf32> to vector<32x128xf32>
    %c0_3 = arith.constant 0 : index
    %c0_4 = arith.constant 0 : index
    %2 = vector.load %arg4[%c0_3, %c0_4] : memref<1x128xf32, #tpu.memory_space<vmem>>, vector<1x128xf32>
    %cst = arith.constant dense<0.000000e+00> : vector<32xf32>
    %3 = vector.multi_reduction <add>, %1, %cst [1] : vector<32x128xf32> to vector<32xf32>
    %4 = vector.shape_cast %3 : vector<32xf32> to vector<32x1xf32>
    %cst_5 = arith.constant 1.280000e+02 : f32
    %5 = vector.broadcast %cst_5 : f32 to vector<32x1xf32>
    %6 = arith.divf %4, %5 : vector<32x1xf32>
    %7 = vector.broadcast %6 : vector<32x1xf32> to vector<32x128xf32>
    %8 = arith.subf %1, %7 : vector<32x128xf32>
    %9 = arith.mulf %8, %8 : vector<32x128xf32>
    %cst_6 = arith.constant dense<0.000000e+00> : vector<32xf32>
    %10 = vector.multi_reduction <add>, %9, %cst_6 [1] : vector<32x128xf32> to vector<32xf32>
    %11 = vector.shape_cast %10 : vector<32xf32> to vector<32x1xf32>
    %cst_7 = arith.constant 1.280000e+02 : f32
    %12 = vector.broadcast %cst_7 : f32 to vector<32x1xf32>
    %13 = arith.divf %11, %12 : vector<32x1xf32>
    %14 = vector.broadcast %6 : vector<32x1xf32> to vector<32x128xf32>
    %15 = arith.subf %1, %14 : vector<32x128xf32>
    %cst_8 = arith.constant 9.99999974E-6 : f32
    %16 = vector.broadcast %cst_8 : f32 to vector<32x1xf32>
    %17 = arith.addf %13, %16 : vector<32x1xf32>
    %18 = math.rsqrt %17 : vector<32x1xf32>
    %19 = vector.broadcast %18 : vector<32x1xf32> to vector<32x128xf32>
    %20 = arith.mulf %15, %19 : vector<32x128xf32>
    %21 = vector.broadcast %2 : vector<1x128xf32> to vector<32x128xf32>
    %22 = arith.mulf %20, %21 : vector<32x128xf32>
    %23 = arith.truncf %22 : vector<32x128xf32> to vector<32x128xbf16>
    %c0_9 = arith.constant 0 : index
    %c0_10 = arith.constant 0 : index
    %24 = vector.load %arg5[%c0_9, %c0_10] : memref<128x128xbf16, #tpu.memory_space<vmem>>, vector<128x128xbf16>
    %cst_11 = arith.constant dense<0.000000e+00> : vector<32x128xf32>
    %25 = tpu.matmul %23, %24, %cst_11 {dimension_numbers = #tpu.dot_dimension_numbers<[1], [0], [0], [1], [0, 0, 1, 1], [], []>} : vector<32x128xbf16>, vector<128x128xbf16>, vector<32x128xf32> -> vector<32x128xf32>
    %c0_12 = arith.constant 0 : index
    %c0_13 = arith.constant 0 : index
    %26 = vector.load %arg6[%c0_12, %c0_13] : memref<128x128xbf16, #tpu.memory_space<vmem>>, vector<128x128xbf16>
    %cst_14 = arith.constant dense<0.000000e+00> : vector<32x128xf32>
    %27 = tpu.matmul %23, %26, %cst_14 {dimension_numbers = #tpu.dot_dimension_numbers<[1], [0], [0], [1], [0, 0, 1, 1], [], []>} : vector<32x128xbf16>, vector<128x128xbf16>, vector<32x128xf32> -> vector<32x128xf32>
    %c0_15 = arith.constant 0 : index
    %c0_16 = arith.constant 0 : index
    %28 = vector.load %arg7[%c0_15, %c0_16] : memref<128x128xbf16, #tpu.memory_space<vmem>>, vector<128x128xbf16>
    %cst_17 = arith.constant dense<0.000000e+00> : vector<32x128xf32>
    %29 = tpu.matmul %23, %28, %cst_17 {dimension_numbers = #tpu.dot_dimension_numbers<[1], [0], [0], [1], [0, 0, 1, 1], [], []>} : vector<32x128xbf16>, vector<128x128xbf16>, vector<32x128xf32> -> vector<32x128xf32>
    %30 = vector.extract_strided_slice %25 {offsets = [0, 0], sizes = [32, 32], strides = [1, 1]} : vector<32x128xf32> to vector<32x32xf32>
    %31 = arith.truncf %30 : vector<32x32xf32> to vector<32x32xbf16>
    %32 = vector.extract_strided_slice %27 {offsets = [0, 0], sizes = [32, 32], strides = [1, 1]} : vector<32x128xf32> to vector<32x32xf32>
    %33 = arith.truncf %32 : vector<32x32xf32> to vector<32x32xbf16>
    %34 = vector.extract_strided_slice %29 {offsets = [0, 0], sizes = [32, 32], strides = [1, 1]} : vector<32x128xf32> to vector<32x32xf32>
    %35 = arith.truncf %34 : vector<32x32xf32> to vector<32x32xbf16>
    %36 = tpu.transpose %33, [1, 0] : vector<32x32xbf16> -> vector<32x32xbf16>
    %cst_18 = arith.constant dense<0.000000e+00> : vector<32x32xf32>
    %37 = tpu.matmul %31, %36, %cst_18 {dimension_numbers = #tpu.dot_dimension_numbers<[1], [0], [0], [1], [0, 0, 1, 1], [], []>} : vector<32x32xbf16>, vector<32x32xbf16>, vector<32x32xf32> -> vector<32x32xf32>
    %cst_19 = arith.constant dense<0xFF800000> : vector<32xf32>
    %38 = vector.multi_reduction <maximumf>, %37, %cst_19 [1] : vector<32x32xf32> to vector<32xf32>
    %39 = vector.shape_cast %38 : vector<32xf32> to vector<32x1xf32>
    %40 = vector.broadcast %39 : vector<32x1xf32> to vector<32x32xf32>
    %41 = arith.subf %37, %40 : vector<32x32xf32>
    %42 = math.exp %41 : vector<32x32xf32>
    %cst_20 = arith.constant dense<0.000000e+00> : vector<32xf32>
    %43 = vector.multi_reduction <add>, %42, %cst_20 [1] : vector<32x32xf32> to vector<32xf32>
    %44 = vector.shape_cast %43 : vector<32xf32> to vector<32x1xf32>
    %45 = tpu.reciprocal %44 {approx = true} : vector<32x1xf32> -> vector<32x1xf32>
    %46 = arith.truncf %42 : vector<32x32xf32> to vector<32x32xbf16>
    %cst_21 = arith.constant dense<0.000000e+00> : vector<32x32xf32>
    %47 = tpu.matmul %46, %35, %cst_21 {dimension_numbers = #tpu.dot_dimension_numbers<[1], [0], [0], [1], [0, 0, 1, 1], [], []>} : vector<32x32xbf16>, vector<32x32xbf16>, vector<32x32xf32> -> vector<32x32xf32>
    %48 = vector.broadcast %45 : vector<32x1xf32> to vector<32x32xf32>
    %49 = arith.mulf %47, %48 : vector<32x32xf32>
    %50 = vector.extract_strided_slice %25 {offsets = [0, 32], sizes = [32, 32], strides = [1, 1]} : vector<32x128xf32> to vector<32x32xf32>
    %51 = arith.truncf %50 : vector<32x32xf32> to vector<32x32xbf16>
    %52 = vector.extract_strided_slice %27 {offsets = [0, 32], sizes = [32, 32], strides = [1, 1]} : vector<32x128xf32> to vector<32x32xf32>
    %53 = arith.truncf %52 : vector<32x32xf32> to vector<32x32xbf16>
    %54 = vector.extract_strided_slice %29 {offsets = [0, 32], sizes = [32, 32], strides = [1, 1]} : vector<32x128xf32> to vector<32x32xf32>
    %55 = arith.truncf %54 : vector<32x32xf32> to vector<32x32xbf16>
    %56 = tpu.transpose %53, [1, 0] : vector<32x32xbf16> -> vector<32x32xbf16>
    %cst_22 = arith.constant dense<0.000000e+00> : vector<32x32xf32>
    %57 = tpu.matmul %51, %56, %cst_22 {dimension_numbers = #tpu.dot_dimension_numbers<[1], [0], [0], [1], [0, 0, 1, 1], [], []>} : vector<32x32xbf16>, vector<32x32xbf16>, vector<32x32xf32> -> vector<32x32xf32>
    %cst_23 = arith.constant dense<0xFF800000> : vector<32xf32>
    %58 = vector.multi_reduction <maximumf>, %57, %cst_23 [1] : vector<32x32xf32> to vector<32xf32>
    %59 = vector.shape_cast %58 : vector<32xf32> to vector<32x1xf32>
    %60 = vector.broadcast %59 : vector<32x1xf32> to vector<32x32xf32>
    %61 = arith.subf %57, %60 : vector<32x32xf32>
    %62 = math.exp %61 : vector<32x32xf32>
    %cst_24 = arith.constant dense<0.000000e+00> : vector<32xf32>
    %63 = vector.multi_reduction <add>, %62, %cst_24 [1] : vector<32x32xf32> to vector<32xf32>
    %64 = vector.shape_cast %63 : vector<32xf32> to vector<32x1xf32>
    %65 = tpu.reciprocal %64 {approx = true} : vector<32x1xf32> -> vector<32x1xf32>
    %66 = arith.truncf %62 : vector<32x32xf32> to vector<32x32xbf16>
    %cst_25 = arith.constant dense<0.000000e+00> : vector<32x32xf32>
    %67 = tpu.matmul %66, %55, %cst_25 {dimension_numbers = #tpu.dot_dimension_numbers<[1], [0], [0], [1], [0, 0, 1, 1], [], []>} : vector<32x32xbf16>, vector<32x32xbf16>, vector<32x32xf32> -> vector<32x32xf32>
    %68 = vector.broadcast %65 : vector<32x1xf32> to vector<32x32xf32>
    %69 = arith.mulf %67, %68 : vector<32x32xf32>
    %70 = vector.extract_strided_slice %25 {offsets = [0, 64], sizes = [32, 32], strides = [1, 1]} : vector<32x128xf32> to vector<32x32xf32>
    %71 = arith.truncf %70 : vector<32x32xf32> to vector<32x32xbf16>
    %72 = vector.extract_strided_slice %27 {offsets = [0, 64], sizes = [32, 32], strides = [1, 1]} : vector<32x128xf32> to vector<32x32xf32>
    %73 = arith.truncf %72 : vector<32x32xf32> to vector<32x32xbf16>
    %74 = vector.extract_strided_slice %29 {offsets = [0, 64], sizes = [32, 32], strides = [1, 1]} : vector<32x128xf32> to vector<32x32xf32>
    %75 = arith.truncf %74 : vector<32x32xf32> to vector<32x32xbf16>
    %76 = tpu.transpose %73, [1, 0] : vector<32x32xbf16> -> vector<32x32xbf16>
    %cst_26 = arith.constant dense<0.000000e+00> : vector<32x32xf32>
    %77 = tpu.matmul %71, %76, %cst_26 {dimension_numbers = #tpu.dot_dimension_numbers<[1], [0], [0], [1], [0, 0, 1, 1], [], []>} : vector<32x32xbf16>, vector<32x32xbf16>, vector<32x32xf32> -> vector<32x32xf32>
    %cst_27 = arith.constant dense<0xFF800000> : vector<32xf32>
    %78 = vector.multi_reduction <maximumf>, %77, %cst_27 [1] : vector<32x32xf32> to vector<32xf32>
    %79 = vector.shape_cast %78 : vector<32xf32> to vector<32x1xf32>
    %80 = vector.broadcast %79 : vector<32x1xf32> to vector<32x32xf32>
    %81 = arith.subf %77, %80 : vector<32x32xf32>
    %82 = math.exp %81 : vector<32x32xf32>
    %cst_28 = arith.constant dense<0.000000e+00> : vector<32xf32>
    %83 = vector.multi_reduction <add>, %82, %cst_28 [1] : vector<32x32xf32> to vector<32xf32>
    %84 = vector.shape_cast %83 : vector<32xf32> to vector<32x1xf32>
    %85 = tpu.reciprocal %84 {approx = true} : vector<32x1xf32> -> vector<32x1xf32>
    %86 = arith.truncf %82 : vector<32x32xf32> to vector<32x32xbf16>
    %cst_29 = arith.constant dense<0.000000e+00> : vector<32x32xf32>
    %87 = tpu.matmul %86, %75, %cst_29 {dimension_numbers = #tpu.dot_dimension_numbers<[1], [0], [0], [1], [0, 0, 1, 1], [], []>} : vector<32x32xbf16>, vector<32x32xbf16>, vector<32x32xf32> -> vector<32x32xf32>
    %88 = vector.broadcast %85 : vector<32x1xf32> to vector<32x32xf32>
    %89 = arith.mulf %87, %88 : vector<32x32xf32>
    %90 = vector.extract_strided_slice %25 {offsets = [0, 96], sizes = [32, 32], strides = [1, 1]} : vector<32x128xf32> to vector<32x32xf32>
    %91 = arith.truncf %90 : vector<32x32xf32> to vector<32x32xbf16>
    %92 = vector.extract_strided_slice %27 {offsets = [0, 96], sizes = [32, 32], strides = [1, 1]} : vector<32x128xf32> to vector<32x32xf32>
    %93 = arith.truncf %92 : vector<32x32xf32> to vector<32x32xbf16>
    %94 = vector.extract_strided_slice %29 {offsets = [0, 96], sizes = [32, 32], strides = [1, 1]} : vector<32x128xf32> to vector<32x32xf32>
    %95 = arith.truncf %94 : vector<32x32xf32> to vector<32x32xbf16>
    %96 = tpu.transpose %93, [1, 0] : vector<32x32xbf16> -> vector<32x32xbf16>
    %cst_30 = arith.constant dense<0.000000e+00> : vector<32x32xf32>
    %97 = tpu.matmul %91, %96, %cst_30 {dimension_numbers = #tpu.dot_dimension_numbers<[1], [0], [0], [1], [0, 0, 1, 1], [], []>} : vector<32x32xbf16>, vector<32x32xbf16>, vector<32x32xf32> -> vector<32x32xf32>
    %cst_31 = arith.constant dense<0xFF800000> : vector<32xf32>
    %98 = vector.multi_reduction <maximumf>, %97, %cst_31 [1] : vector<32x32xf32> to vector<32xf32>
    %99 = vector.shape_cast %98 : vector<32xf32> to vector<32x1xf32>
    %100 = vector.broadcast %99 : vector<32x1xf32> to vector<32x32xf32>
    %101 = arith.subf %97, %100 : vector<32x32xf32>
    %102 = math.exp %101 : vector<32x32xf32>
    %cst_32 = arith.constant dense<0.000000e+00> : vector<32xf32>
    %103 = vector.multi_reduction <add>, %102, %cst_32 [1] : vector<32x32xf32> to vector<32xf32>
    %104 = vector.shape_cast %103 : vector<32xf32> to vector<32x1xf32>
    %105 = tpu.reciprocal %104 {approx = true} : vector<32x1xf32> -> vector<32x1xf32>
    %106 = arith.truncf %102 : vector<32x32xf32> to vector<32x32xbf16>
    %cst_33 = arith.constant dense<0.000000e+00> : vector<32x32xf32>
    %107 = tpu.matmul %106, %95, %cst_33 {dimension_numbers = #tpu.dot_dimension_numbers<[1], [0], [0], [1], [0, 0, 1, 1], [], []>} : vector<32x32xbf16>, vector<32x32xbf16>, vector<32x32xf32> -> vector<32x32xf32>
    %108 = vector.broadcast %105 : vector<32x1xf32> to vector<32x32xf32>
    %109 = arith.mulf %107, %108 : vector<32x32xf32>
    %110 = tpu.concatenate %49, %69, %89, %109 in 1 : vector<32x32xf32>, vector<32x32xf32>, vector<32x32xf32>, vector<32x32xf32> -> vector<32x128xf32>
    %111 = arith.truncf %110 : vector<32x128xf32> to vector<32x128xbf16>
    %c0_34 = arith.constant 0 : index
    %c0_35 = arith.constant 0 : index
    %112 = vector.load %arg8[%c0_34, %c0_35] : memref<128x128xbf16, #tpu.memory_space<vmem>>, vector<128x128xbf16>
    %cst_36 = arith.constant dense<0.000000e+00> : vector<32x128xf32>
    %113 = tpu.matmul %111, %112, %cst_36 {dimension_numbers = #tpu.dot_dimension_numbers<[1], [0], [0], [1], [0, 0, 1, 1], [], []>} : vector<32x128xbf16>, vector<128x128xbf16>, vector<32x128xf32> -> vector<32x128xf32>
    %114 = arith.addf %113, %22 : vector<32x128xf32>
    %c0_37 = arith.constant 0 : index
    %c0_38 = arith.constant 0 : index
    %115 = vector.load %arg9[%c0_37, %c0_38] : memref<1x128xf32, #tpu.memory_space<vmem>>, vector<1x128xf32>
    %cst_39 = arith.constant dense<0.000000e+00> : vector<32xf32>
    %116 = vector.multi_reduction <add>, %114, %cst_39 [1] : vector<32x128xf32> to vector<32xf32>
    %117 = vector.shape_cast %116 : vector<32xf32> to vector<32x1xf32>
    %cst_40 = arith.constant 1.280000e+02 : f32
    %118 = vector.broadcast %cst_40 : f32 to vector<32x1xf32>
    %119 = arith.divf %117, %118 : vector<32x1xf32>
    %120 = vector.broadcast %119 : vector<32x1xf32> to vector<32x128xf32>
    %121 = arith.subf %114, %120 : vector<32x128xf32>
    %122 = arith.mulf %121, %121 : vector<32x128xf32>
    %cst_41 = arith.constant dense<0.000000e+00> : vector<32xf32>
    %123 = vector.multi_reduction <add>, %122, %cst_41 [1] : vector<32x128xf32> to vector<32xf32>
    %124 = vector.shape_cast %123 : vector<32xf32> to vector<32x1xf32>
    %cst_42 = arith.constant 1.280000e+02 : f32
    %125 = vector.broadcast %cst_42 : f32 to vector<32x1xf32>
    %126 = arith.divf %124, %125 : vector<32x1xf32>
    %127 = vector.broadcast %119 : vector<32x1xf32> to vector<32x128xf32>
    %128 = arith.subf %114, %127 : vector<32x128xf32>
    %cst_43 = arith.constant 9.99999974E-6 : f32
    %129 = vector.broadcast %cst_43 : f32 to vector<32x1xf32>
    %130 = arith.addf %126, %129 : vector<32x1xf32>
    %131 = math.rsqrt %130 : vector<32x1xf32>
    %132 = vector.broadcast %131 : vector<32x1xf32> to vector<32x128xf32>
    %133 = arith.mulf %128, %132 : vector<32x128xf32>
    %134 = vector.broadcast %115 : vector<1x128xf32> to vector<32x128xf32>
    %135 = arith.mulf %133, %134 : vector<32x128xf32>
    %136 = arith.truncf %135 : vector<32x128xf32> to vector<32x128xbf16>
    %c0_44 = arith.constant 0 : index
    %c0_45 = arith.constant 0 : index
    %137 = vector.load %arg10[%c0_44, %c0_45] : memref<128x128xbf16, #tpu.memory_space<vmem>>, vector<128x128xbf16>
    %cst_46 = arith.constant dense<0.000000e+00> : vector<32x128xf32>
    %138 = tpu.matmul %136, %137, %cst_46 {dimension_numbers = #tpu.dot_dimension_numbers<[1], [0], [0], [1], [0, 0, 1, 1], [], []>} : vector<32x128xbf16>, vector<128x128xbf16>, vector<32x128xf32> -> vector<32x128xf32>
    %c0_47 = arith.constant 0 : index
    %c0_48 = arith.constant 0 : index
    %c0_49 = arith.constant 0 : index
    %139 = vector.load %arg3[%c0_47, %c0_48, %c0_49] : memref<1x16x128xf32, #tpu.memory_space<vmem>>, vector<1x16x128xf32>
    %140 = vector.shape_cast %139 : vector<1x16x128xf32> to vector<16x128xf32>
    %141 = arith.truncf %140 : vector<16x128xf32> to vector<16x128xbf16>
    %c0_50 = arith.constant 0 : index
    %c0_51 = arith.constant 0 : index
    %142 = vector.load %arg11[%c0_50, %c0_51] : memref<128x128xbf16, #tpu.memory_space<vmem>>, vector<128x128xbf16>
    %cst_52 = arith.constant dense<0.000000e+00> : vector<16x128xf32>
    %143 = tpu.matmul %141, %142, %cst_52 {dimension_numbers = #tpu.dot_dimension_numbers<[1], [0], [0], [1], [0, 0, 1, 1], [], []>} : vector<16x128xbf16>, vector<128x128xbf16>, vector<16x128xf32> -> vector<16x128xf32>
    %c0_53 = arith.constant 0 : index
    %c0_54 = arith.constant 0 : index
    %144 = vector.load %arg12[%c0_53, %c0_54] : memref<128x128xbf16, #tpu.memory_space<vmem>>, vector<128x128xbf16>
    %cst_55 = arith.constant dense<0.000000e+00> : vector<16x128xf32>
    %145 = tpu.matmul %141, %144, %cst_55 {dimension_numbers = #tpu.dot_dimension_numbers<[1], [0], [0], [1], [0, 0, 1, 1], [], []>} : vector<16x128xbf16>, vector<128x128xbf16>, vector<16x128xf32> -> vector<16x128xf32>
    %c0_56 = arith.constant 0 : index
    %c0_57 = arith.constant 0 : index
    %146 = vector.load %arg14[%c0_56, %c0_57] : memref<4x32xf32, #tpu.memory_space<vmem>>, vector<4x32xf32>
    %c0_58 = arith.constant 0 : index
    %c0_59 = arith.constant 0 : index
    %147 = vector.load %arg15[%c0_58, %c0_59] : memref<4x32xf32, #tpu.memory_space<vmem>>, vector<4x32xf32>
    %148 = vector.extract_strided_slice %138 {offsets = [0, 0], sizes = [32, 32], strides = [1, 1]} : vector<32x128xf32> to vector<32x32xf32>
    %149 = vector.extract_strided_slice %143 {offsets = [0, 0], sizes = [16, 32], strides = [1, 1]} : vector<16x128xf32> to vector<16x32xf32>
    %150 = arith.truncf %149 : vector<16x32xf32> to vector<16x32xbf16>
    %151 = vector.extract_strided_slice %145 {offsets = [0, 0], sizes = [16, 32], strides = [1, 1]} : vector<16x128xf32> to vector<16x32xf32>
    %152 = arith.truncf %151 : vector<16x32xf32> to vector<16x32xbf16>
    %153 = arith.truncf %148 : vector<32x32xf32> to vector<32x32xbf16>
    %154 = tpu.transpose %150, [1, 0] : vector<16x32xbf16> -> vector<32x16xbf16>
    %cst_60 = arith.constant dense<0.000000e+00> : vector<32x16xf32>
    %155 = tpu.matmul %153, %154, %cst_60 {dimension_numbers = #tpu.dot_dimension_numbers<[1], [0], [0], [1], [0, 0, 1, 1], [], []>} : vector<32x32xbf16>, vector<32x16xbf16>, vector<32x16xf32> -> vector<32x16xf32>
    %156 = vector.extract_strided_slice %146 {offsets = [0, 0], sizes = [1, 32], strides = [1, 1]} : vector<4x32xf32> to vector<1x32xf32>
    %157 = vector.broadcast %156 : vector<1x32xf32> to vector<32x32xf32>
    %158 = arith.mulf %148, %157 : vector<32x32xf32>
    %cst_61 = arith.constant dense<0.000000e+00> : vector<32xf32>
    %159 = vector.multi_reduction <add>, %158, %cst_61 [1] : vector<32x32xf32> to vector<32xf32>
    %160 = vector.shape_cast %159 : vector<32xf32> to vector<32x1xf32>
    %cst_62 = arith.constant dense<0xFF800000> : vector<32xf32>
    %161 = vector.multi_reduction <maximumf>, %155, %cst_62 [1] : vector<32x16xf32> to vector<32xf32>
    %162 = vector.shape_cast %161 : vector<32xf32> to vector<32x1xf32>
    %163 = arith.maximumf %162, %160 : vector<32x1xf32>
    %164 = vector.broadcast %163 : vector<32x1xf32> to vector<32x16xf32>
    %165 = arith.subf %155, %164 : vector<32x16xf32>
    %166 = math.exp %165 : vector<32x16xf32>
    %167 = arith.subf %160, %163 : vector<32x1xf32>
    %168 = math.exp %167 : vector<32x1xf32>
    %cst_63 = arith.constant dense<0.000000e+00> : vector<32xf32>
    %169 = vector.multi_reduction <add>, %166, %cst_63 [1] : vector<32x16xf32> to vector<32xf32>
    %170 = vector.shape_cast %169 : vector<32xf32> to vector<32x1xf32>
    %171 = arith.addf %170, %168 : vector<32x1xf32>
    %172 = tpu.reciprocal %171 {approx = true} : vector<32x1xf32> -> vector<32x1xf32>
    %173 = arith.truncf %166 : vector<32x16xf32> to vector<32x16xbf16>
    %cst_64 = arith.constant dense<0.000000e+00> : vector<32x32xf32>
    %174 = tpu.matmul %173, %152, %cst_64 {dimension_numbers = #tpu.dot_dimension_numbers<[1], [0], [0], [1], [0, 0, 1, 1], [], []>} : vector<32x16xbf16>, vector<16x32xbf16>, vector<32x32xf32> -> vector<32x32xf32>
    %175 = vector.extract_strided_slice %147 {offsets = [0, 0], sizes = [1, 32], strides = [1, 1]} : vector<4x32xf32> to vector<1x32xf32>
    %176 = vector.broadcast %168 : vector<32x1xf32> to vector<32x32xf32>
    %177 = vector.broadcast %175 : vector<1x32xf32> to vector<32x32xf32>
    %178 = arith.mulf %176, %177 : vector<32x32xf32>
    %179 = arith.addf %174, %178 : vector<32x32xf32>
    %180 = vector.broadcast %172 : vector<32x1xf32> to vector<32x32xf32>
    %181 = arith.mulf %179, %180 : vector<32x32xf32>
    %182 = vector.extract_strided_slice %138 {offsets = [0, 32], sizes = [32, 32], strides = [1, 1]} : vector<32x128xf32> to vector<32x32xf32>
    %183 = vector.extract_strided_slice %143 {offsets = [0, 32], sizes = [16, 32], strides = [1, 1]} : vector<16x128xf32> to vector<16x32xf32>
    %184 = arith.truncf %183 : vector<16x32xf32> to vector<16x32xbf16>
    %185 = vector.extract_strided_slice %145 {offsets = [0, 32], sizes = [16, 32], strides = [1, 1]} : vector<16x128xf32> to vector<16x32xf32>
    %186 = arith.truncf %185 : vector<16x32xf32> to vector<16x32xbf16>
    %187 = arith.truncf %182 : vector<32x32xf32> to vector<32x32xbf16>
    %188 = tpu.transpose %184, [1, 0] : vector<16x32xbf16> -> vector<32x16xbf16>
    %cst_65 = arith.constant dense<0.000000e+00> : vector<32x16xf32>
    %189 = tpu.matmul %187, %188, %cst_65 {dimension_numbers = #tpu.dot_dimension_numbers<[1], [0], [0], [1], [0, 0, 1, 1], [], []>} : vector<32x32xbf16>, vector<32x16xbf16>, vector<32x16xf32> -> vector<32x16xf32>
    %190 = vector.extract_strided_slice %146 {offsets = [1, 0], sizes = [1, 32], strides = [1, 1]} : vector<4x32xf32> to vector<1x32xf32>
    %191 = vector.broadcast %190 : vector<1x32xf32> to vector<32x32xf32>
    %192 = arith.mulf %182, %191 : vector<32x32xf32>
    %cst_66 = arith.constant dense<0.000000e+00> : vector<32xf32>
    %193 = vector.multi_reduction <add>, %192, %cst_66 [1] : vector<32x32xf32> to vector<32xf32>
    %194 = vector.shape_cast %193 : vector<32xf32> to vector<32x1xf32>
    %cst_67 = arith.constant dense<0xFF800000> : vector<32xf32>
    %195 = vector.multi_reduction <maximumf>, %189, %cst_67 [1] : vector<32x16xf32> to vector<32xf32>
    %196 = vector.shape_cast %195 : vector<32xf32> to vector<32x1xf32>
    %197 = arith.maximumf %196, %194 : vector<32x1xf32>
    %198 = vector.broadcast %197 : vector<32x1xf32> to vector<32x16xf32>
    %199 = arith.subf %189, %198 : vector<32x16xf32>
    %200 = math.exp %199 : vector<32x16xf32>
    %201 = arith.subf %194, %197 : vector<32x1xf32>
    %202 = math.exp %201 : vector<32x1xf32>
    %cst_68 = arith.constant dense<0.000000e+00> : vector<32xf32>
    %203 = vector.multi_reduction <add>, %200, %cst_68 [1] : vector<32x16xf32> to vector<32xf32>
    %204 = vector.shape_cast %203 : vector<32xf32> to vector<32x1xf32>
    %205 = arith.addf %204, %202 : vector<32x1xf32>
    %206 = tpu.reciprocal %205 {approx = true} : vector<32x1xf32> -> vector<32x1xf32>
    %207 = arith.truncf %200 : vector<32x16xf32> to vector<32x16xbf16>
    %cst_69 = arith.constant dense<0.000000e+00> : vector<32x32xf32>
    %208 = tpu.matmul %207, %186, %cst_69 {dimension_numbers = #tpu.dot_dimension_numbers<[1], [0], [0], [1], [0, 0, 1, 1], [], []>} : vector<32x16xbf16>, vector<16x32xbf16>, vector<32x32xf32> -> vector<32x32xf32>
    %209 = vector.extract_strided_slice %147 {offsets = [1, 0], sizes = [1, 32], strides = [1, 1]} : vector<4x32xf32> to vector<1x32xf32>
    %210 = vector.broadcast %202 : vector<32x1xf32> to vector<32x32xf32>
    %211 = vector.broadcast %209 : vector<1x32xf32> to vector<32x32xf32>
    %212 = arith.mulf %210, %211 : vector<32x32xf32>
    %213 = arith.addf %208, %212 : vector<32x32xf32>
    %214 = vector.broadcast %206 : vector<32x1xf32> to vector<32x32xf32>
    %215 = arith.mulf %213, %214 : vector<32x32xf32>
    %216 = vector.extract_strided_slice %138 {offsets = [0, 64], sizes = [32, 32], strides = [1, 1]} : vector<32x128xf32> to vector<32x32xf32>
    %217 = vector.extract_strided_slice %143 {offsets = [0, 64], sizes = [16, 32], strides = [1, 1]} : vector<16x128xf32> to vector<16x32xf32>
    %218 = arith.truncf %217 : vector<16x32xf32> to vector<16x32xbf16>
    %219 = vector.extract_strided_slice %145 {offsets = [0, 64], sizes = [16, 32], strides = [1, 1]} : vector<16x128xf32> to vector<16x32xf32>
    %220 = arith.truncf %219 : vector<16x32xf32> to vector<16x32xbf16>
    %221 = arith.truncf %216 : vector<32x32xf32> to vector<32x32xbf16>
    %222 = tpu.transpose %218, [1, 0] : vector<16x32xbf16> -> vector<32x16xbf16>
    %cst_70 = arith.constant dense<0.000000e+00> : vector<32x16xf32>
    %223 = tpu.matmul %221, %222, %cst_70 {dimension_numbers = #tpu.dot_dimension_numbers<[1], [0], [0], [1], [0, 0, 1, 1], [], []>} : vector<32x32xbf16>, vector<32x16xbf16>, vector<32x16xf32> -> vector<32x16xf32>
    %224 = vector.extract_strided_slice %146 {offsets = [2, 0], sizes = [1, 32], strides = [1, 1]} : vector<4x32xf32> to vector<1x32xf32>
    %225 = vector.broadcast %224 : vector<1x32xf32> to vector<32x32xf32>
    %226 = arith.mulf %216, %225 : vector<32x32xf32>
    %cst_71 = arith.constant dense<0.000000e+00> : vector<32xf32>
    %227 = vector.multi_reduction <add>, %226, %cst_71 [1] : vector<32x32xf32> to vector<32xf32>
    %228 = vector.shape_cast %227 : vector<32xf32> to vector<32x1xf32>
    %cst_72 = arith.constant dense<0xFF800000> : vector<32xf32>
    %229 = vector.multi_reduction <maximumf>, %223, %cst_72 [1] : vector<32x16xf32> to vector<32xf32>
    %230 = vector.shape_cast %229 : vector<32xf32> to vector<32x1xf32>
    %231 = arith.maximumf %230, %228 : vector<32x1xf32>
    %232 = vector.broadcast %231 : vector<32x1xf32> to vector<32x16xf32>
    %233 = arith.subf %223, %232 : vector<32x16xf32>
    %234 = math.exp %233 : vector<32x16xf32>
    %235 = arith.subf %228, %231 : vector<32x1xf32>
    %236 = math.exp %235 : vector<32x1xf32>
    %cst_73 = arith.constant dense<0.000000e+00> : vector<32xf32>
    %237 = vector.multi_reduction <add>, %234, %cst_73 [1] : vector<32x16xf32> to vector<32xf32>
    %238 = vector.shape_cast %237 : vector<32xf32> to vector<32x1xf32>
    %239 = arith.addf %238, %236 : vector<32x1xf32>
    %240 = tpu.reciprocal %239 {approx = true} : vector<32x1xf32> -> vector<32x1xf32>
    %241 = arith.truncf %234 : vector<32x16xf32> to vector<32x16xbf16>
    %cst_74 = arith.constant dense<0.000000e+00> : vector<32x32xf32>
    %242 = tpu.matmul %241, %220, %cst_74 {dimension_numbers = #tpu.dot_dimension_numbers<[1], [0], [0], [1], [0, 0, 1, 1], [], []>} : vector<32x16xbf16>, vector<16x32xbf16>, vector<32x32xf32> -> vector<32x32xf32>
    %243 = vector.extract_strided_slice %147 {offsets = [2, 0], sizes = [1, 32], strides = [1, 1]} : vector<4x32xf32> to vector<1x32xf32>
    %244 = vector.broadcast %236 : vector<32x1xf32> to vector<32x32xf32>
    %245 = vector.broadcast %243 : vector<1x32xf32> to vector<32x32xf32>
    %246 = arith.mulf %244, %245 : vector<32x32xf32>
    %247 = arith.addf %242, %246 : vector<32x32xf32>
    %248 = vector.broadcast %240 : vector<32x1xf32> to vector<32x32xf32>
    %249 = arith.mulf %247, %248 : vector<32x32xf32>
    %250 = vector.extract_strided_slice %138 {offsets = [0, 96], sizes = [32, 32], strides = [1, 1]} : vector<32x128xf32> to vector<32x32xf32>
    %251 = vector.extract_strided_slice %143 {offsets = [0, 96], sizes = [16, 32], strides = [1, 1]} : vector<16x128xf32> to vector<16x32xf32>
    %252 = arith.truncf %251 : vector<16x32xf32> to vector<16x32xbf16>
    %253 = vector.extract_strided_slice %145 {offsets = [0, 96], sizes = [16, 32], strides = [1, 1]} : vector<16x128xf32> to vector<16x32xf32>
    %254 = arith.truncf %253 : vector<16x32xf32> to vector<16x32xbf16>
    %255 = arith.truncf %250 : vector<32x32xf32> to vector<32x32xbf16>
    %256 = tpu.transpose %252, [1, 0] : vector<16x32xbf16> -> vector<32x16xbf16>
    %cst_75 = arith.constant dense<0.000000e+00> : vector<32x16xf32>
    %257 = tpu.matmul %255, %256, %cst_75 {dimension_numbers = #tpu.dot_dimension_numbers<[1], [0], [0], [1], [0, 0, 1, 1], [], []>} : vector<32x32xbf16>, vector<32x16xbf16>, vector<32x16xf32> -> vector<32x16xf32>
    %258 = vector.extract_strided_slice %146 {offsets = [3, 0], sizes = [1, 32], strides = [1, 1]} : vector<4x32xf32> to vector<1x32xf32>
    %259 = vector.broadcast %258 : vector<1x32xf32> to vector<32x32xf32>
    %260 = arith.mulf %250, %259 : vector<32x32xf32>
    %cst_76 = arith.constant dense<0.000000e+00> : vector<32xf32>
    %261 = vector.multi_reduction <add>, %260, %cst_76 [1] : vector<32x32xf32> to vector<32xf32>
    %262 = vector.shape_cast %261 : vector<32xf32> to vector<32x1xf32>
    %cst_77 = arith.constant dense<0xFF800000> : vector<32xf32>
    %263 = vector.multi_reduction <maximumf>, %257, %cst_77 [1] : vector<32x16xf32> to vector<32xf32>
    %264 = vector.shape_cast %263 : vector<32xf32> to vector<32x1xf32>
    %265 = arith.maximumf %264, %262 : vector<32x1xf32>
    %266 = vector.broadcast %265 : vector<32x1xf32> to vector<32x16xf32>
    %267 = arith.subf %257, %266 : vector<32x16xf32>
    %268 = math.exp %267 : vector<32x16xf32>
    %269 = arith.subf %262, %265 : vector<32x1xf32>
    %270 = math.exp %269 : vector<32x1xf32>
    %cst_78 = arith.constant dense<0.000000e+00> : vector<32xf32>
    %271 = vector.multi_reduction <add>, %268, %cst_78 [1] : vector<32x16xf32> to vector<32xf32>
    %272 = vector.shape_cast %271 : vector<32xf32> to vector<32x1xf32>
    %273 = arith.addf %272, %270 : vector<32x1xf32>
    %274 = tpu.reciprocal %273 {approx = true} : vector<32x1xf32> -> vector<32x1xf32>
    %275 = arith.truncf %268 : vector<32x16xf32> to vector<32x16xbf16>
    %cst_79 = arith.constant dense<0.000000e+00> : vector<32x32xf32>
    %276 = tpu.matmul %275, %254, %cst_79 {dimension_numbers = #tpu.dot_dimension_numbers<[1], [0], [0], [1], [0, 0, 1, 1], [], []>} : vector<32x16xbf16>, vector<16x32xbf16>, vector<32x32xf32> -> vector<32x32xf32>
    %277 = vector.extract_strided_slice %147 {offsets = [3, 0], sizes = [1, 32], strides = [1, 1]} : vector<4x32xf32> to vector<1x32xf32>
    %278 = vector.broadcast %270 : vector<32x1xf32> to vector<32x32xf32>
    %279 = vector.broadcast %277 : vector<1x32xf32> to vector<32x32xf32>
    %280 = arith.mulf %278, %279 : vector<32x32xf32>
    %281 = arith.addf %276, %280 : vector<32x32xf32>
    %282 = vector.broadcast %274 : vector<32x1xf32> to vector<32x32xf32>
    %283 = arith.mulf %281, %282 : vector<32x32xf32>
    %284 = tpu.concatenate %181, %215, %249, %283 in 1 : vector<32x32xf32>, vector<32x32xf32>, vector<32x32xf32>, vector<32x32xf32> -> vector<32x128xf32>
    %285 = arith.truncf %284 : vector<32x128xf32> to vector<32x128xbf16>
    %c0_80 = arith.constant 0 : index
    %c0_81 = arith.constant 0 : index
    %286 = vector.load %arg13[%c0_80, %c0_81] : memref<128x128xbf16, #tpu.memory_space<vmem>>, vector<128x128xbf16>
    %cst_82 = arith.constant dense<0.000000e+00> : vector<32x128xf32>
    %287 = tpu.matmul %285, %286, %cst_82 {dimension_numbers = #tpu.dot_dimension_numbers<[1], [0], [0], [1], [0, 0, 1, 1], [], []>} : vector<32x128xbf16>, vector<128x128xbf16>, vector<32x128xf32> -> vector<32x128xf32>
    %288 = arith.addf %287, %114 : vector<32x128xf32>
    %289 = arith.truncf %288 : vector<32x128xf32> to vector<32x128xbf16>
    %c0_83 = arith.constant 0 : index
    %c0_84 = arith.constant 0 : index
    %290 = vector.load %arg16[%c0_83, %c0_84] : memref<128x512xbf16, #tpu.memory_space<vmem>>, vector<128x512xbf16>
    %cst_85 = arith.constant dense<0.000000e+00> : vector<32x512xf32>
    %291 = tpu.matmul %289, %290, %cst_85 {dimension_numbers = #tpu.dot_dimension_numbers<[1], [0], [0], [1], [0, 0, 1, 1], [], []>} : vector<32x128xbf16>, vector<128x512xbf16>, vector<32x512xf32> -> vector<32x512xf32>
    %cst_86 = arith.constant 5.000000e-01 : f32
    %292 = vector.broadcast %cst_86 : f32 to vector<32x512xf32>
    %293 = arith.mulf %292, %291 : vector<32x512xf32>
    %cst_87 = arith.constant 0.707106769 : f32
    %294 = vector.broadcast %cst_87 : f32 to vector<32x512xf32>
    %295 = arith.mulf %291, %294 : vector<32x512xf32>
    %296 = math.absf %295 : vector<32x512xf32>
    %cst_88 = arith.constant 0.327591091 : f32
    %297 = vector.broadcast %cst_88 : f32 to vector<32x512xf32>
    %298 = arith.mulf %297, %296 : vector<32x512xf32>
    %cst_89 = arith.constant 1.000000e+00 : f32
    %299 = vector.broadcast %cst_89 : f32 to vector<32x512xf32>
    %300 = arith.addf %299, %298 : vector<32x512xf32>
    %cst_90 = arith.constant 1.000000e+00 : f32
    %301 = vector.broadcast %cst_90 : f32 to vector<32x512xf32>
    %302 = arith.divf %301, %300 : vector<32x512xf32>
    %cst_91 = arith.constant 1.06140542 : f32
    %303 = vector.broadcast %cst_91 : f32 to vector<32x512xf32>
    %304 = arith.mulf %303, %302 : vector<32x512xf32>
    %cst_92 = arith.constant -1.45315206 : f32
    %305 = vector.broadcast %cst_92 : f32 to vector<32x512xf32>
    %306 = arith.addf %304, %305 : vector<32x512xf32>
    %307 = arith.mulf %306, %302 : vector<32x512xf32>
    %cst_93 = arith.constant 1.42141378 : f32
    %308 = vector.broadcast %cst_93 : f32 to vector<32x512xf32>
    %309 = arith.addf %307, %308 : vector<32x512xf32>
    %310 = arith.mulf %309, %302 : vector<32x512xf32>
    %cst_94 = arith.constant -0.284496725 : f32
    %311 = vector.broadcast %cst_94 : f32 to vector<32x512xf32>
    %312 = arith.addf %310, %311 : vector<32x512xf32>
    %313 = arith.mulf %312, %302 : vector<32x512xf32>
    %cst_95 = arith.constant 0.254829586 : f32
    %314 = vector.broadcast %cst_95 : f32 to vector<32x512xf32>
    %315 = arith.addf %313, %314 : vector<32x512xf32>
    %316 = arith.mulf %315, %302 : vector<32x512xf32>
    %cst_96 = arith.constant 0.000000e+00 : f32
    %317 = vector.broadcast %cst_96 : f32 to vector<32x512xf32>
    %318 = arith.subf %317, %296 : vector<32x512xf32>
    %319 = arith.mulf %318, %296 : vector<32x512xf32>
    %320 = math.exp %319 : vector<32x512xf32>
    %321 = arith.mulf %316, %320 : vector<32x512xf32>
    %cst_97 = arith.constant 1.000000e+00 : f32
    %322 = vector.broadcast %cst_97 : f32 to vector<32x512xf32>
    %323 = arith.subf %322, %321 : vector<32x512xf32>
    %cst_98 = arith.constant 0.000000e+00 : f32
    %324 = vector.broadcast %cst_98 : f32 to vector<32x512xf32>
    %325 = arith.cmpf olt, %295, %324 : vector<32x512xf32>
    %cst_99 = arith.constant 0.000000e+00 : f32
    %326 = vector.broadcast %cst_99 : f32 to vector<32x512xf32>
    %327 = arith.subf %326, %323 : vector<32x512xf32>
    %328 = arith.select %325, %327, %323 : vector<32x512xi1>, vector<32x512xf32>
    %cst_100 = arith.constant 1.000000e+00 : f32
    %329 = vector.broadcast %cst_100 : f32 to vector<32x512xf32>
    %330 = arith.addf %329, %328 : vector<32x512xf32>
    %331 = arith.mulf %293, %330 : vector<32x512xf32>
    %c0_101 = arith.constant 0 : index
    %c0_102 = arith.constant 0 : index
    %332 = vector.load %arg17[%c0_101, %c0_102] : memref<1x512xf32, #tpu.memory_space<vmem>>, vector<1x512xf32>
    %cst_103 = arith.constant dense<0.000000e+00> : vector<32xf32>
    %333 = vector.multi_reduction <add>, %331, %cst_103 [1] : vector<32x512xf32> to vector<32xf32>
    %334 = vector.shape_cast %333 : vector<32xf32> to vector<32x1xf32>
    %cst_104 = arith.constant 5.120000e+02 : f32
    %335 = vector.broadcast %cst_104 : f32 to vector<32x1xf32>
    %336 = arith.divf %334, %335 : vector<32x1xf32>
    %337 = vector.broadcast %336 : vector<32x1xf32> to vector<32x512xf32>
    %338 = arith.subf %331, %337 : vector<32x512xf32>
    %339 = arith.mulf %338, %338 : vector<32x512xf32>
    %cst_105 = arith.constant dense<0.000000e+00> : vector<32xf32>
    %340 = vector.multi_reduction <add>, %339, %cst_105 [1] : vector<32x512xf32> to vector<32xf32>
    %341 = vector.shape_cast %340 : vector<32xf32> to vector<32x1xf32>
    %cst_106 = arith.constant 5.120000e+02 : f32
    %342 = vector.broadcast %cst_106 : f32 to vector<32x1xf32>
    %343 = arith.divf %341, %342 : vector<32x1xf32>
    %344 = vector.broadcast %336 : vector<32x1xf32> to vector<32x512xf32>
    %345 = arith.subf %331, %344 : vector<32x512xf32>
    %cst_107 = arith.constant 9.99999974E-6 : f32
    %346 = vector.broadcast %cst_107 : f32 to vector<32x1xf32>
    %347 = arith.addf %343, %346 : vector<32x1xf32>
    %348 = math.rsqrt %347 : vector<32x1xf32>
    %349 = vector.broadcast %348 : vector<32x1xf32> to vector<32x512xf32>
    %350 = arith.mulf %345, %349 : vector<32x512xf32>
    %351 = vector.broadcast %332 : vector<1x512xf32> to vector<32x512xf32>
    %352 = arith.mulf %350, %351 : vector<32x512xf32>
    %353 = arith.truncf %352 : vector<32x512xf32> to vector<32x512xbf16>
    %c0_108 = arith.constant 0 : index
    %c0_109 = arith.constant 0 : index
    %354 = vector.load %arg18[%c0_108, %c0_109] : memref<512x128xbf16, #tpu.memory_space<vmem>>, vector<512x128xbf16>
    %cst_110 = arith.constant dense<0.000000e+00> : vector<32x128xf32>
    %355 = tpu.matmul %353, %354, %cst_110 {dimension_numbers = #tpu.dot_dimension_numbers<[1], [0], [0], [1], [0, 0, 1, 1], [], []>} : vector<32x512xbf16>, vector<512x128xbf16>, vector<32x128xf32> -> vector<32x128xf32>
    %356 = arith.addf %355, %288 : vector<32x128xf32>
    %c0_111 = arith.constant 0 : index
    %c0_112 = arith.constant 0 : index
    %357 = vector.load %arg19[%c0_111, %c0_112] : memref<1x128xf32, #tpu.memory_space<vmem>>, vector<1x128xf32>
    %cst_113 = arith.constant dense<0.000000e+00> : vector<32xf32>
    %358 = vector.multi_reduction <add>, %356, %cst_113 [1] : vector<32x128xf32> to vector<32xf32>
    %359 = vector.shape_cast %358 : vector<32xf32> to vector<32x1xf32>
    %cst_114 = arith.constant 1.280000e+02 : f32
    %360 = vector.broadcast %cst_114 : f32 to vector<32x1xf32>
    %361 = arith.divf %359, %360 : vector<32x1xf32>
    %362 = vector.broadcast %361 : vector<32x1xf32> to vector<32x128xf32>
    %363 = arith.subf %356, %362 : vector<32x128xf32>
    %364 = arith.mulf %363, %363 : vector<32x128xf32>
    %cst_115 = arith.constant dense<0.000000e+00> : vector<32xf32>
    %365 = vector.multi_reduction <add>, %364, %cst_115 [1] : vector<32x128xf32> to vector<32xf32>
    %366 = vector.shape_cast %365 : vector<32xf32> to vector<32x1xf32>
    %cst_116 = arith.constant 1.280000e+02 : f32
    %367 = vector.broadcast %cst_116 : f32 to vector<32x1xf32>
    %368 = arith.divf %366, %367 : vector<32x1xf32>
    %369 = vector.broadcast %361 : vector<32x1xf32> to vector<32x128xf32>
    %370 = arith.subf %356, %369 : vector<32x128xf32>
    %cst_117 = arith.constant 9.99999974E-6 : f32
    %371 = vector.broadcast %cst_117 : f32 to vector<32x1xf32>
    %372 = arith.addf %368, %371 : vector<32x1xf32>
    %373 = math.rsqrt %372 : vector<32x1xf32>
    %374 = vector.broadcast %373 : vector<32x1xf32> to vector<32x128xf32>
    %375 = arith.mulf %370, %374 : vector<32x128xf32>
    %376 = vector.broadcast %357 : vector<1x128xf32> to vector<32x128xf32>
    %377 = arith.mulf %375, %376 : vector<32x128xf32>
    %c0_118 = arith.constant 0 : index
    %c0_119 = arith.constant 0 : index
    %c0_120 = arith.constant 0 : index
    %c0_121 = arith.constant 0 : index
    %378 = vector.load %arg20[%c0_118, %c0_119, %c0_120, %c0_121] : memref<1x1x32x128xf32, #tpu.memory_space<vmem>>, vector<1x1x32x128xf32>
    %379 = vector.shape_cast %378 : vector<1x1x32x128xf32> to vector<32x128xf32>
    %380 = vector.shape_cast %377 : vector<32x128xf32> to vector<1x1x32x128xf32>
    tpu.vector_store %arg20[%c0_118, %c0_119, %c0_120, %c0_121], %380 {strides = array<i32>} : memref<1x1x32x128xf32, #tpu.memory_space<vmem>>, vector<1x1x32x128xf32>,
    return
  }
  func.func @transform_0(%arg0: i32, %arg1: i32) -> (i32, i32, i32, i32) {
    %c0_i32 = arith.constant 0 : i32
    %c0_i32_0 = arith.constant 0 : i32
    %c0_i32_1 = arith.constant 0 : i32
    return %arg0, %arg1, %c0_i32, %c0_i32_0 : i32, i32, i32, i32
  }
  func.func @transform_1(%arg0: i32, %arg1: i32) -> (i32, i32, i32) {
    %c0_i32 = arith.constant 0 : i32
    %c0_i32_0 = arith.constant 0 : i32
    %c0_i32_1 = arith.constant 0 : i32
    return %arg0, %c0_i32, %c0_i32_0 : i32, i32, i32
  }
  func.func @transform_2(%arg0: i32, %arg1: i32) -> (i32, i32) {
    %c0_i32 = arith.constant 0 : i32
    %c0_i32_0 = arith.constant 0 : i32
    %c0_i32_1 = arith.constant 0 : i32
    return %c0_i32, %c0_i32_0 : i32, i32
  }
  func.func @transform_3(%arg0: i32, %arg1: i32) -> (i32, i32) {
    %c0_i32 = arith.constant 0 : i32
    %c0_i32_0 = arith.constant 0 : i32
    %c0_i32_1 = arith.constant 0 : i32
    return %c0_i32, %c0_i32_0 : i32, i32
  }
  func.func @transform_4(%arg0: i32, %arg1: i32) -> (i32, i32) {
    %c0_i32 = arith.constant 0 : i32
    %c0_i32_0 = arith.constant 0 : i32
    %c0_i32_1 = arith.constant 0 : i32
    return %c0_i32, %c0_i32_0 : i32, i32
  }
  func.func @transform_5(%arg0: i32, %arg1: i32) -> (i32, i32) {
    %c0_i32 = arith.constant 0 : i32
    %c0_i32_0 = arith.constant 0 : i32
    %c0_i32_1 = arith.constant 0 : i32
    return %c0_i32, %c0_i32_0 : i32, i32
  }
  func.func @transform_6(%arg0: i32, %arg1: i32) -> (i32, i32) {
    %c0_i32 = arith.constant 0 : i32
    %c0_i32_0 = arith.constant 0 : i32
    %c0_i32_1 = arith.constant 0 : i32
    return %c0_i32, %c0_i32_0 : i32, i32
  }
  func.func @transform_7(%arg0: i32, %arg1: i32) -> (i32, i32) {
    %c0_i32 = arith.constant 0 : i32
    %c0_i32_0 = arith.constant 0 : i32
    %c0_i32_1 = arith.constant 0 : i32
    return %c0_i32, %c0_i32_0 : i32, i32
  }
  func.func @transform_8(%arg0: i32, %arg1: i32) -> (i32, i32) {
    %c0_i32 = arith.constant 0 : i32
    %c0_i32_0 = arith.constant 0 : i32
    %c0_i32_1 = arith.constant 0 : i32
    return %c0_i32, %c0_i32_0 : i32, i32
  }
  func.func @transform_9(%arg0: i32, %arg1: i32) -> (i32, i32) {
    %c0_i32 = arith.constant 0 : i32
    %c0_i32_0 = arith.constant 0 : i32
    %c0_i32_1 = arith.constant 0 : i32
    return %c0_i32, %c0_i32_0 : i32, i32
  }
  func.func @transform_10(%arg0: i32, %arg1: i32) -> (i32, i32) {
    %c0_i32 = arith.constant 0 : i32
    %c0_i32_0 = arith.constant 0 : i32
    %c0_i32_1 = arith.constant 0 : i32
    return %c0_i32, %c0_i32_0 : i32, i32
  }
  func.func @transform_11(%arg0: i32, %arg1: i32) -> (i32, i32) {
    %c0_i32 = arith.constant 0 : i32
    %c0_i32_0 = arith.constant 0 : i32
    %c0_i32_1 = arith.constant 0 : i32
    return %c0_i32, %c0_i32_0 : i32, i32
  }
  func.func @transform_12(%arg0: i32, %arg1: i32) -> (i32, i32) {
    %c0_i32 = arith.constant 0 : i32
    %c0_i32_0 = arith.constant 0 : i32
    %c0_i32_1 = arith.constant 0 : i32
    return %c0_i32, %c0_i32_0 : i32, i32
  }
  func.func @transform_13(%arg0: i32, %arg1: i32) -> (i32, i32) {
    %c0_i32 = arith.constant 0 : i32
    %c0_i32_0 = arith.constant 0 : i32
    %c0_i32_1 = arith.constant 0 : i32
    return %c0_i32, %c0_i32_0 : i32, i32
  }
  func.func @transform_14(%arg0: i32, %arg1: i32) -> (i32, i32) {
    %c0_i32 = arith.constant 0 : i32
    %c0_i32_0 = arith.constant 0 : i32
    %c0_i32_1 = arith.constant 0 : i32
    return %c0_i32, %c0_i32_0 : i32, i32
  }
  func.func @transform_15(%arg0: i32, %arg1: i32) -> (i32, i32) {
    %c0_i32 = arith.constant 0 : i32
    %c0_i32_0 = arith.constant 0 : i32
    %c0_i32_1 = arith.constant 0 : i32
    return %c0_i32, %c0_i32_0 : i32, i32
  }
  func.func @transform_16(%arg0: i32, %arg1: i32) -> (i32, i32) {
    %c0_i32 = arith.constant 0 : i32
    %c0_i32_0 = arith.constant 0 : i32
    %c0_i32_1 = arith.constant 0 : i32
    return %c0_i32, %c0_i32_0 : i32, i32
  }
  func.func @transform_17(%arg0: i32, %arg1: i32) -> (i32, i32) {
    %c0_i32 = arith.constant 0 : i32
    %c0_i32_0 = arith.constant 0 : i32
    %c0_i32_1 = arith.constant 0 : i32
    return %c0_i32, %c0_i32_0 : i32, i32
  }
  func.func @transform_18(%arg0: i32, %arg1: i32) -> (i32, i32, i32, i32) {
    %c0_i32 = arith.constant 0 : i32
    %c0_i32_0 = arith.constant 0 : i32
    %c0_i32_1 = arith.constant 0 : i32
    return %arg0, %arg1, %c0_i32, %c0_i32_0 : i32, i32, i32, i32
  }
}

</mosaic_0001>

<bundles_post_ra>
// kernel: transformer_block_forward.2
= control target key start
LH: loop header
LB: loop body
LE: loop exit
PB: predicated region body
PF: predicated region fallthrough
CT: control target
= control target key end

     0   :  { %s5816_s21 = smov 0   ;;  %s7020_s0 = inlined_call_operand.vmem [shape: f32[64,4,128], index: 0, kind: input, shape index: {}]   ;;  %s7021_s1 = inlined_call_operand.vmem [shape: f32[1,128], index: 1, kind: input, shape index: {}]   ;;  %s7022_s2 = inlined_call_operand.vmem [shape: bf16[128,128], index: 2, kind: input, shape index: {}]   ;;  %s7023_s3 = inlined_call_operand.vmem [shape: bf16[128,128], index: 3, kind: input, shape index: {}]   ;;  %s7024_s4 = inlined_call_operand.vmem [shape: bf16[128,128], index: 4, kind: input, shape index: {}]   ;;  %s7025_s5 = inlined_call_operand.vmem [shape: bf16[128,128], index: 5, kind: input, shape index: {}]   ;;  %s7026_s6 = inlined_call_operand.vmem [shape: f32[64,4,128], index: 6, kind: output, shape index: {}]  }
   0x1 LB: > { %s4801_s22 = sadd.s32 4294967295, %s5773_s21   ;;  %p4805_p0 = scmp.ge.s32.totalorder %s5773_s21, 1  ;;  %s5773_s21 = sphi %s5816_s21, %s16_s21  }
   0x2   : > { %p213_p1 = scmp.lt.s32.totalorder %s5773_s21, 9 }
   0x4   : > { %p214_p2 = pnand %p4805_p0, %p213_p1 }
   0x6   : > { %217 = sbr.rel (%p214_p2) target bundleno = 2893 (0xb4d), region = 44 }
   0xb   : > { %s4806_s23 = sshll.u32 %s4801_s22, 3  ;;  %vm265_vm0 = vcmask 1043456   ;;  %v5591_v56 = vld [vmem:[%s7022_s2 + $0x38] sm:$0xff]   ;;  %v5593_v58 = vld [vmem:[%s7022_s2 + $0x30] sm:$0xff]   ;;  %v5595_v60 = vld [vmem:[%s7022_s2 + $0x28] sm:$0xff]   ;;  %vm5776_vm1 = vmmov 0  }
   0xc   : > { %p244_p3 = scmp.lt.s32.totalorder %s4806_s23, 63  ;;  %v5592_v57 = vld [vmem:[%s7023_s3 + $0x38] sm:$0xff]   ;;  %5083 = vmatprep.subr.bf16.mxu0 %v5591_v56  ;;  %v5594_v59 = vld [vmem:[%s7023_s3 + $0x30] sm:$0xff]   ;;  %v5596_v61 = vld [vmem:[%s7023_s3 + $0x28] sm:$0xff]   ;;  %vm856_vm2 = vcmask 261120   ;;  %vm1318_vm3 = vcmask 1041408  }
   0xd   : > { %5084 = vmatpush3.bf16.msra.mxu0 %v5591_v56  ;;  %5103 = vmatprep.subr.bf16.mxu1 %v5592_v57  ;;  %v5597_v62 = vld [vmem:[%s7022_s2 + $0x20] sm:$0xff]   ;;  %vm1225_vm4 = vcmask 27648   ;;  %s5778_s12 = smov 96   ;;  %vm1314_vm5 = vcmask 31744   ;;  %s5779_s13 = smov 64   ;;  %vm4592_vm6 = vcmask 523264  }
   0xe   : > { %s7077_s23 = smov (!%p244_p3, %s4806_s23), 63  ;;  %5104 = vmatpush3.bf16.msra.mxu1 %v5592_v57  ;;  %5085 = vmatprep.subr.bf16.mxu0 %v5593_v58  ;;  %v5598_v63 = vld [vmem:[%s7023_s3 + $0x20] sm:$0xff]   ;;  %s5780_s14 = smov 32   ;;  %vm4597_vm7 = vcmask 785408  }
   0xf   : > { %s4807_s24 = sshll.u32 %s7077_s23, 2  ;;  %5105 = vmatprep.subr.bf16.mxu1 %v5594_v59 }
  0x10   : > { %s247_s27 = scalar_lea.vmem %s7020_s0, %s4807_s24 }
  0x11   : > { %v256_v0 = vld [vmem:[%s247_s27] sm:$0xf]  ;;  %v258_v1 = vld [vmem:[%s247_s27 + $0x8] sm:$0xf]  ;;  %v257_v2 = vld [vmem:[%s247_s27 + $0x4] sm:$0xf]  ;;  %5086 = vmatpush3.bf16.msra.mxu0 %v5593_v58 }
  0x12   : > { %v266_v3 = vsel %vm265_vm0, %v256_v0, 0.0  ;;  %v272_v4 = vsel %vm265_vm0, %v258_v1, 0.0  ;;  %v259_v5 = vld [vmem:[%s247_s27 + $0xc] sm:$0xf]  ;;  %v269_v6 = vsel %vm265_vm0, %v257_v2, 0.0  ;;  %5106 = vmatpush3.bf16.msra.mxu1 %v5594_v59  ;;  %5087 = vmatprep.subr.bf16.mxu0 %v5595_v60 }
  0x13   : > { %267 = vadd.xlane.f32.xlu0 %v266_v3  ;;  %273 = vadd.xlane.f32.xlu1 %v272_v4  ;;  %v275_v7 = vsel %vm265_vm0, %v259_v5, 0.0  ;;  %v260_v8 = vld [vmem:[%s247_s27 + $0x10] sm:$0xf]  ;;  %v261_v9 = vld [vmem:[%s247_s27 + $0x14] sm:$0xf]  ;;  %v5603_v4 = vld [vmem:[%s7022_s2 + $0x8] sm:$0xff]  }
  0x14   : > { %v278_v10 = vsel %vm265_vm0, %v260_v8, 0.0  ;;  %v281_v11 = vsel %vm265_vm0, %v261_v9, 0.0  ;;  %v262_v12 = vld [vmem:[%s247_s27 + $0x18] sm:$0xf]  ;;  %v263_v13 = vld [vmem:[%s247_s27 + $0x1c] sm:$0xf]  ;;  %5107 = vmatprep.subr.bf16.mxu1 %v5596_v61 }
  0x15   : > { %v284_v14 = vsel %vm265_vm0, %v262_v12, 0.0  ;;  %v287_v15 = vsel %vm265_vm0, %v263_v13, 0.0  ;;  %5088 = vmatpush3.bf16.msra.mxu0 %v5595_v60  ;;  %v5602_v3 = vld [vmem:[%s7023_s3 + $0x10] sm:$0xff]  }
  0x16   : > { %5108 = vmatpush3.bf16.msra.mxu1 %v5596_v61  ;;  %5089 = vmatprep.subr.bf16.mxu0 %v5597_v62 }
  0x17   : > { %270 = vadd.xlane.f32.xlu0 %v269_v6  ;;  %276 = vadd.xlane.f32.xlu1 %v275_v7  ;;  %v5605_v6 = vld [vmem:[%s7022_s2] sm:$0xff]  }
  0x18   : > { %5109 = vmatprep.subr.bf16.mxu1 %v5598_v63  ;;  %v5606_v7 = vld [vmem:[%s7023_s3] sm:$0xff]  }
  0x19   : > { %5090 = vmatpush3.bf16.msra.mxu0 %v5597_v62 }
  0x1a   : > { %5110 = vmatpush3.bf16.msra.mxu1 %v5598_v63 }
  0x1b   : > { %279 = vadd.xlane.f32.xlu0 %v278_v10  ;;  %282 = vadd.xlane.f32.xlu1 %v281_v11 }
  0x1f   : > { %285 = vadd.xlane.f32.xlu0 %v284_v14  ;;  %288 = vadd.xlane.f32.xlu1 %v287_v15 }
  0x9c   : > { %v268_v16 = vpop.xlane.xlu0 %267  ;;  %v274_v17 = vpop.xlane.xlu1 %273 }
  0x9d   : > { %v291_v18 = vmul.f32 0.0078125, %v268_v16  ;;  %v293_v19 = vmul.f32 0.0078125, %v274_v17 }
  0x9f   : > { %v5840_v20 = vsub.f32 %v256_v0, %v291_v18  ;;  %v5842_v21 = vsub.f32 %v258_v1, %v293_v19  ;;  %v5599_v0 = vld [vmem:[%s7022_s2 + $0x18] sm:$0xff]  }
  0xa0   : > { %v271_v22 = vpop.xlane.xlu0 %270  ;;  %v277_v23 = vpop.xlane.xlu1 %276  ;;  %v5600_v1 = vld [vmem:[%s7023_s3 + $0x18] sm:$0xff]   ;;  %5091 = vmatprep.subr.bf16.mxu0 %v5599_v0 }
  0xa1   : > { %v292_v24 = vmul.f32 0.0078125, %v271_v22  ;;  %v294_v25 = vmul.f32 0.0078125, %v277_v23  ;;  %v307_v26 = vmul.f32 %v5840_v20, %v5840_v20  ;;  %v309_v27 = vmul.f32 %v5842_v21, %v5842_v21  ;;  %5111 = vmatprep.subr.bf16.mxu1 %v5600_v1  ;;  %5092 = vmatpush3.bf16.msra.mxu0 %v5599_v0 }
  0xa2   : > { %5112 = vmatpush3.bf16.msra.mxu1 %v5600_v1  ;;  %v5608_v1 = vld [vmem:[%s7024_s4 + $0x30] sm:$0xff]  }
  0xa3   : > { %v5848_v28 = vsub.f32 %v257_v2, %v292_v24  ;;  %v5850_v29 = vsub.f32 %v259_v5, %v294_v25  ;;  %v315_v30 = vsel %vm265_vm0, %v307_v26, 0.0  ;;  %v321_v33 = vsel %vm265_vm0, %v309_v27, 0.0  ;;  %v5601_v2 = vld [vmem:[%s7022_s2 + $0x10] sm:$0xff]   ;;  %5113 = vmatprep.subr.bf16.mxu1 %v5602_v3  ;;  %v5604_v5 = vld [vmem:[%s7023_s3 + $0x8] sm:$0xff]  }
  0xa4   : > { %316 = vadd.xlane.f32.xlu0 %v315_v30  ;;  %v280_v31 = vpop.xlane.xlu0 %279  ;;  %v283_v32 = vpop.xlane.xlu1 %282  ;;  %5093 = vmatprep.subr.bf16.mxu0 %v5601_v2 }
  0xa5   : > { %v295_v34 = vmul.f32 0.0078125, %v280_v31  ;;  %v296_v35 = vmul.f32 0.0078125, %v283_v32  ;;  %v308_v36 = vmul.f32 %v5848_v28, %v5848_v28  ;;  %v310_v37 = vmul.f32 %v5850_v29, %v5850_v29  ;;  %5094 = vmatpush3.bf16.msra.mxu0 %v5601_v2  ;;  %v5610_v2 = vld [vmem:[%s7024_s4 + $0x20] sm:$0xff]  }
  0xa6   : > { %5114 = vmatpush3.bf16.msra.mxu1 %v5602_v3  ;;  %5095 = vmatprep.subr.bf16.mxu0 %v5603_v4  ;;  %v5611_v3 = vld [vmem:[%s7024_s4 + $0x18] sm:$0xff]  }
  0xa7   : > { %v5858_v38 = vsub.f32 %v260_v8, %v295_v34  ;;  %v5860_v39 = vsub.f32 %v261_v9, %v296_v35  ;;  %v318_v40 = vsel %vm265_vm0, %v308_v36, 0.0  ;;  %v324_v43 = vsel %vm265_vm0, %v310_v37, 0.0  ;;  %5115 = vmatprep.subr.bf16.mxu1 %v5604_v5  ;;  %v5931_v8 = vld [vmem:[%s7024_s4 + $0x38] sm:$0xff]  }
  0xa8   : > { %322 = vadd.xlane.f32.xlu0 %v321_v33  ;;  %319 = vadd.xlane.f32.xlu1 %v318_v40  ;;  %v286_v41 = vpop.xlane.xlu0 %285  ;;  %v289_v42 = vpop.xlane.xlu1 %288 }
  0xa9   : > { %v297_v44 = vmul.f32 0.0078125, %v286_v41  ;;  %v298_v45 = vmul.f32 0.0078125, %v289_v42  ;;  %v311_v46 = vmul.f32 %v5858_v38, %v5858_v38  ;;  %v312_v47 = vmul.f32 %v5860_v39, %v5860_v39  ;;  %5096 = vmatpush3.bf16.msra.mxu0 %v5603_v4  ;;  %v5612_v4 = vld [vmem:[%s7024_s4 + $0x10] sm:$0xff]  }
  0xaa   : > { %5116 = vmatpush3.bf16.msra.mxu1 %v5604_v5  ;;  %5097 = vmatprep.subr.bf16.mxu0 %v5605_v6  ;;  %v5613_v5 = vld [vmem:[%s7024_s4 + $0x8] sm:$0xff]  }
  0xab   : > { %v5868_v48 = vsub.f32 %v262_v12, %v297_v44  ;;  %v5870_v49 = vsub.f32 %v263_v13, %v298_v45  ;;  %v327_v50 = vsel %vm265_vm0, %v311_v46, 0.0  ;;  %v330_v51 = vsel %vm265_vm0, %v312_v47, 0.0  ;;  %5117 = vmatprep.subr.bf16.mxu1 %v5606_v7  ;;  %v4810_v46 = vld [vmem:[%s7021_s1] ss:$0 sm:$0xff] }
  0xac   : > { %325 = vadd.xlane.f32.xlu1 %v324_v43  ;;  %328 = vadd.xlane.f32.xlu0 %v327_v50 }
  0xad   : > { %v313_v52 = vmul.f32 %v5868_v48, %v5868_v48  ;;  %v314_v53 = vmul.f32 %v5870_v49, %v5870_v49  ;;  %5098 = vmatpush3.bf16.msra.mxu0 %v5605_v6  ;;  %v5614_v6 = vld [vmem:[%s7024_s4] sm:$0xff]  }
  0xae   : > { %5118 = vmatpush3.bf16.msra.mxu1 %v5606_v7  ;;  %5123 = vmatprep.subr.bf16.mxu0 %v5931_v8  ;;  %v7027_v7 = vmov 0.0  }
  0xaf   : > { %v333_v54 = vsel %vm265_vm0, %v313_v52, 0.0  ;;  %v336_v55 = vsel %vm265_vm0, %v314_v53, 0.0  ;;  %5143 = vmatprep.subr.bf16.mxu1 %v7027_v7 }
  0xb0   : > { %331 = vadd.xlane.f32.xlu1 %v330_v51  ;;  %334 = vadd.xlane.f32.xlu0 %v333_v54 }
  0xb4   : > { %337 = vadd.xlane.f32.xlu1 %v336_v55 }
 0x12d   : > { %v317_v9 = vpop.xlane.xlu0 %316 }
 0x12e   : > { %v339_v10 = vmul.f32 0.0078125, %v317_v9 }
 0x130   : > { %v347_v11 = vadd.f32 1e-05, %v339_v10  ;;  %v750_v10 = vlaneseq }
 0x131   : > { %v320_v12 = vpop.xlane.xlu1 %319  ;;  %v323_v13 = vpop.xlane.xlu0 %322 }
 0x132   : > { %v340_v14 = vmul.f32 0.0078125, %v320_v12  ;;  %v341_v15 = vmul.f32 0.0078125, %v323_v13  ;;  %5623 = vrsqrt.f32 %v347_v11  ;;  %v751_v12 = vshrl.u32 %v750_v10, 7 }
 0x134   : > { %v348_v16 = vadd.f32 1e-05, %v340_v14  ;;  %v349_v17 = vadd.f32 1e-05, %v341_v15 }
 0x135   : > { %v326_v18 = vpop.xlane.xlu1 %325  ;;  %v329_v19 = vpop.xlane.xlu0 %328 }
 0x136   : > { %5625 = vrsqrt.f32 %v348_v16  ;;  %v342_v22 = vmul.f32 0.0078125, %v326_v18  ;;  %v343_v23 = vmul.f32 0.0078125, %v329_v19 }
 0x137   : > { %5627 = vrsqrt.f32 %v349_v17 }
 0x138   : > { %v350_v24 = vadd.f32 1e-05, %v342_v22  ;;  %v351_v25 = vadd.f32 1e-05, %v343_v23 }
 0x139   : > { %v332_v26 = vpop.xlane.xlu1 %331  ;;  %v335_v27 = vpop.xlane.xlu0 %334 }
 0x13a   : > { %5629 = vrsqrt.f32 %v350_v24  ;;  %v344_v30 = vmul.f32 0.0078125, %v332_v26  ;;  %v345_v31 = vmul.f32 0.0078125, %v335_v27 }
 0x13b   : > { %5631 = vrsqrt.f32 %v351_v25 }
 0x13c   : > { %v352_v32 = vadd.f32 1e-05, %v344_v30  ;;  %v353_v33 = vadd.f32 1e-05, %v345_v31 }
 0x13d   : > { %v338_v34 = vpop.xlane.xlu1 %337 }
 0x13e   : > { %5633 = vrsqrt.f32 %v352_v32  ;;  %v346_v35 = vmul.f32 0.0078125, %v338_v34 }
 0x13f   : > { %5635 = vrsqrt.f32 %v353_v33  ;;  %v5624_v37 = vpop.eup %5623 }
 0x140   : > { %v354_v36 = vadd.f32 1e-05, %v346_v35  ;;  %v363_v43 = vmul.f32 %v5624_v37, %v5840_v20 }
 0x142   : > { %5637 = vrsqrt.f32 %v354_v36  ;;  %v5943_v52 = vmul.f32 %v4810_v46, %v363_v43 }
 0x143   : > { %v5626_v40 = vpop.eup %5625 }
 0x144   : > { %v5628_v41 = vpop.eup %5627  ;;  %v364_v42 = vmul.f32 %v5626_v40, %v5848_v28  ;;  %7038 = vst [vmem:[#allocation3_spill] sm:$0xff] %v5943_v52 }
 0x145   : > { %v365_v44 = vmul.f32 %v5628_v41, %v5842_v21 }
 0x146   : > { %v5941_v50 = vmul.f32 %v4810_v46, %v364_v42 }
 0x147   : > { %v5630_v45 = vpop.eup %5629  ;;  %v5945_v53 = vmul.f32 %v4810_v46, %v365_v44 }
 0x148   : > { %v366_v47 = vmul.f32 %v5630_v45, %v5850_v29  ;;  %7037 = vst [vmem:[#allocation2_spill] sm:$0xff] %v5941_v50  ;;  %v5632_v51 = vpop.eup %5631  ;;  %v393_v21 = vcombine.low %v5943_v52, %v5941_v50 }
 0x149   : > { %7039 = vst [vmem:[#allocation4_spill] sm:$0xff] %v5945_v53  ;;  %v367_v57 = vmul.f32 %v5632_v51, %v5858_v38 }
 0x14a   : > { %v5947_v54 = vmul.f32 %v4810_v46, %v366_v47 }
 0x14b   : > { %v5634_v28 = vpop.eup %5633  ;;  %v5959_v62 = vmul.f32 %v4810_v46, %v367_v57 }
 0x14c   : > { %7040 = vst [vmem:[#allocation5_spill] sm:$0xff] %v5947_v54  ;;  %v5636_v20 = vpop.eup %5635  ;;  %v394_v55 = vcombine.low %v5945_v53, %v5947_v54  ;;  %v368_v56 = vmul.f32 %v5634_v28, %v5860_v39 }
 0x14d   : > { %v369_v58 = vmul.f32 %v5636_v20, %v5868_v48  ;;  %7042 = vst [vmem:[#allocation7_spill] sm:$0xff] %v5959_v62 }
 0x14e   : > { %v401_v29 = vpack.c.bf16 %v394_v55, %v393_v21  ;;  %v5957_v61 = vmul.f32 %v4810_v46, %v368_v56 }
 0x14f   : > { %v5638_v59 = vpop.eup %5637  ;;  %v5961_v63 = vmul.f32 %v4810_v46, %v369_v58 }
 0x150   : > { %5099 = vmatprep.mubr.bf16.mxu0 %v401_v29  ;;  %5119 = vmatprep.mubr.bf16.mxu1 %v401_v29  ;;  %v370_v60 = vmul.f32 %v5638_v59, %v5870_v49  ;;  %7041 = vst [vmem:[#allocation6_spill] sm:$0xff] %v5957_v61  ;;  %v395_v39 = vcombine.low %v5959_v62, %v5957_v61  ;;  %v5609_v49 = vld [vmem:[%s7024_s4 + $0x28] sm:$0xff]  }
 0x151   : > { %7043 = vst [vmem:[#allocation8_spill] sm:$0xff] %v5961_v63 }
 0x152   : > { %v5963_v0 = vmul.f32 %v4810_v46, %v370_v60 }
 0x154   : > { %7044 = vst [vmem:[#allocation9_spill] sm:$0xff] %v5963_v0  ;;  %v396_v38 = vcombine.low %v5961_v63, %v5963_v0 }
 0x156   : > { %v402_v48 = vpack.c.bf16 %v396_v38, %v395_v39 }
 0x158   : > { %5100 = vmatmul.mubr.bf16.vlgmr.msra.gmra.mxu0 %v402_v48  ;;  %5120 = vmatmul.mubr.bf16.vlgmr.msra.gmra.mxu1 %v402_v48 }
 0x159   : > { %5124 = vmatpush3.bf16.msra.mxu0 %v5931_v8  ;;  %5139 = vmatprep.mubr.bf16.mxu0 %v401_v29  ;;  %v5777_v8 = vmov 1983009808  }
 0x15a   : > { %5125 = vmatprep.subr.bf16.mxu0 %v5608_v1  ;;  %5145 = vmatprep.mubr.msk.bf16.mxu1 %vm5776_vm1, %v7027_v7  ;;  %v748_v9 = vunpack.c.l.s4 %v5777_v8 }
 0x15c   : > { %v749_v11 = vunpack.c.0.s8 %v748_v9 }
 0x15d   : > { %5126 = vmatpush3.bf16.msra.mxu0 %v5608_v1 }
 0x15e   : > { %5127 = vmatprep.subr.bf16.mxu0 %v5609_v49  ;;  %v5997_v17 = vsub.s32 %v749_v11, %v751_v12 }
 0x161   : > { %5128 = vmatpush3.bf16.msra.mxu0 %v5609_v49 }
 0x162   : > { %5129 = vmatprep.subr.bf16.mxu0 %v5610_v2 }
 0x165   : > { %5130 = vmatpush3.bf16.msra.mxu0 %v5610_v2 }
 0x166   : > { %5131 = vmatprep.subr.bf16.mxu0 %v5611_v3 }
 0x169   : > { %5132 = vmatpush3.bf16.msra.mxu0 %v5611_v3 }
 0x16a   : > { %5133 = vmatprep.subr.bf16.mxu0 %v5612_v4 }
 0x16d   : > { %5134 = vmatpush3.bf16.msra.mxu0 %v5612_v4 }
 0x16e   : > { %5135 = vmatprep.subr.bf16.mxu0 %v5613_v5 }
 0x171   : > { %5136 = vmatpush3.bf16.msra.mxu0 %v5613_v5 }
 0x172   : > { %5137 = vmatprep.subr.bf16.mxu0 %v5614_v6 }
 0x175   : > { %5138 = vmatpush3.bf16.msra.mxu0 %v5614_v6 }
 0x176   : > { %5191 = vmatprep.subr.bf16.mxu0 %v7027_v7 }
 0x178   : > { %5140 = vmatmul.mubr.bf16.vlgmr.msra.gmra.mxu0 %v402_v48 }
 0x179   : > { %5193 = vmatprep.mubr.msk.bf16.mxu0 %vm5776_vm1, %v7027_v7 }
 0x218   : > { %v5101_v13 = vpop.f32.mrf.mxu0  ;;  %v5121_v14 = vpop.f32.mrf.mxu1 }
 0x21a   : > { %v501_v15 = vpop.f32.mrf.mxu0  ;;  %v614_v16 = vpop.f32.mrf.mxu1 }
 0x21c   : > { %v5102_v18 = vpop.f32.mrf.mxu0  ;;  %v5122_v19 = vpop.f32.mrf.mxu1 }
 0x21d   : > { %v743_v22 = vpack.c.bf16 %v5102_v18, %v5101_v13  ;;  %v4836_v23 = vpack.c.bf16 %v5102_v18, %v5102_v18  ;;  %v781_v24 = vpack.c.bf16 %v5122_v19, %v5121_v14  ;;  %v4838_v25 = vpack.c.bf16 %v5122_v19, %v5122_v19 }
 0x21e   : > { %v504_v26 = vpop.f32.mrf.mxu0  ;;  %v617_v27 = vpop.f32.mrf.mxu1 }
 0x21f   : > { %v6000_v30 = vrot.slane %v743_v22, %v5997_v17  ;;  %v6003_v31 = vrot.slane %v4836_v23, %v5997_v17  ;;  %v6006_v32 = vrot.slane %v781_v24, %v5997_v17  ;;  %v742_v33 = vpack.c.bf16 %v504_v26, %v501_v15 }
 0x220   : > { %v4835_v34 = vpack.c.bf16 %v504_v26, %v504_v26  ;;  %v780_v35 = vpack.c.bf16 %v617_v27, %v614_v16  ;;  %v4837_v36 = vpack.c.bf16 %v617_v27, %v617_v27  ;;  %v6009_v37 = vrot.slane %v4838_v25, %v5997_v17 }
 0x221   : > { %v753_v40 = vrot.slane %v742_v33, %v5997_v17  ;;  %v6017_v44 = vcombine.high %v6000_v30, %v6000_v30  ;;  %v6021_v45 = vcombine.high %v6003_v31, %v6003_v31  ;;  %v6025_v46 = vrot.slane %v6006_v32, %v5997_v17 }
 0x222   : > { %v760_v41 = vrot.slane %v4835_v34, %v5997_v17  ;;  %v791_v42 = vrot.slane %v780_v35, %v5997_v17  ;;  %v798_v43 = vrot.slane %v4837_v36, %v5997_v17  ;;  %v816_v55 = vcombine.high %v6006_v32, %v6006_v32 }
 0x223   : > { %v761_v47 = vcombine.high %v753_v40, %v753_v40  ;;  %v6032_v56 = vcombine.high %v6009_v37, %v6009_v37  ;;  %v6035_v29 = vrot.slane %v753_v40, %v5997_v17  ;;  %v6052_v39 = vrot.slane %v6000_v30, %v5997_v17 }
 0x224   : > { %v762_v51 = vcombine.high %v760_v41, %v760_v41  ;;  %v861_v28 = vsel %vm856_vm2, %v791_v42, 0  ;;  %v799_v20 = vcombine.high %v791_v42, %v791_v42  ;;  %v800_v21 = vcombine.high %v798_v43, %v798_v43 }
 0x225   : > { %5144 = vmatpush3.bf16.xpose.msra.mxu1 %v861_v28  ;;  %v6042_v58 = vrot.slane %v791_v42, %v5997_v17  ;;  %v6045_v59 = vrot.slane %v798_v43, %v5997_v17  ;;  %v6048_v60 = vrot.slane %v760_v41, %v5997_v17  ;;  %v6056_v38 = vrot.slane %v6009_v37, %v5997_v17 }
 0x226   : > { %5149 = vmatprep.subr.bf16.mxu1 %v7027_v7  ;;  %v6039_v57 = vrot.slane %v799_v20, %v5997_v17  ;;  %v6060_v48 = vrot.slane %v6003_v31, %v5997_v17  ;;  %v6063_v1 = vrot.slane %v761_v47, %v5997_v17  ;;  %v6066_v49 = vrot.slane %v800_v21, %v5997_v17 }
 0x227   : > { %v6069_v2 = vrot.slane %v762_v51, %v5997_v17  ;;  %v6072_v3 = vrot.slane %v816_v55, %v5997_v17  ;;  %v6076_v4 = vrot.slane %v6017_v44, %v5997_v17  ;;  %v6080_v5 = vrot.slane %v6032_v56, %v5997_v17 }
 0x228   : > { %v6084_v6 = vrot.slane %v6021_v45, %v5997_v17  ;;  %v907_v8 = vsel %vm856_vm2, %v799_v20, 0  ;;  %v953_v9 = vsel %vm856_vm2, %v798_v43, 0  ;;  %v999_v13 = vsel %vm856_vm2, %v800_v21, 0 }
 0x229   : > { %v1045_v36 = vsel %vm856_vm2, %v6006_v32, 0  ;;  %v1091_v32 = vsel %vm856_vm2, %v816_v55, 0  ;;  %v1137_v43 = vsel %vm856_vm2, %v6009_v37, 0 }
 0x22c   : > { %5146 = vmatmul.mubr.msk.bf16.vlgmr.msra.gmra.mxu1 %vm856_vm2, %v753_v40 }
 0x22d   : > { %5150 = vmatpush3.bf16.xpose.msra.mxu1 %v907_v8  ;;  %5151 = vmatprep.mubr.msk.bf16.mxu1 %vm5776_vm1, %v7027_v7 }
 0x22e   : > { %5155 = vmatprep.subr.bf16.mxu1 %v7027_v7 }
 0x234   : > { %5152 = vmatmul.mubr.msk.bf16.vlgmr.msra.gmra.mxu1 %vm856_vm2, %v761_v47 }
 0x235   : > { %5156 = vmatpush3.bf16.xpose.msra.mxu1 %v953_v9  ;;  %5157 = vmatprep.mubr.msk.bf16.mxu1 %vm5776_vm1, %v7027_v7 }
 0x236   : > { %5161 = vmatprep.subr.bf16.mxu1 %v7027_v7 }
 0x238   : > { %v5141_v10 = vpop.f32.mrf.mxu0 }
 0x23a   : > { %v727_v11 = vpop.f32.mrf.mxu0 }
 0x23c   : > { %v5142_v12 = vpop.f32.mrf.mxu0  ;;  %5158 = vmatmul.mubr.msk.bf16.vlgmr.msra.gmra.mxu1 %vm856_vm2, %v760_v41 }
 0x23d   : > { %v819_v14 = vpack.c.bf16 %v5142_v12, %v5141_v10  ;;  %v4840_v15 = vpack.c.bf16 %v5142_v12, %v5142_v12  ;;  %5162 = vmatpush3.bf16.xpose.msra.mxu1 %v999_v13  ;;  %5163 = vmatprep.mubr.msk.bf16.mxu1 %vm5776_vm1, %v7027_v7 }
 0x23e   : > { %v6100_v16 = vpop.f32.mrf.mxu0  ;;  %5167 = vmatprep.subr.bf16.mxu1 %v7027_v7 }
 0x23f   : > { %v6104_v18 = vrot.slane %v819_v14, %v5997_v17  ;;  %v6107_v19 = vrot.slane %v4840_v15, %v5997_v17  ;;  %v818_v22 = vpack.c.bf16 %v6100_v16, %v727_v11 }
 0x241   : > { %v829_v23 = vrot.slane %v818_v22, %v5997_v17  ;;  %v6113_v24 = vcombine.high %v6104_v18, %v6104_v18  ;;  %v6117_v25 = vcombine.high %v6107_v19, %v6107_v19  ;;  %v6121_v26 = vrot.slane %v6104_v18, %v5997_v17 }
 0x242   : > { %v6125_v27 = vrot.slane %v6107_v19, %v5997_v17 }
 0x243   : > { %v1320_v33 = vsel %vm1318_vm3, %v829_v23, 0  ;;  %v837_v34 = vcombine.high %v829_v23, %v829_v23  ;;  %v6129_v35 = vrot.slane %v829_v23, %v5997_v17  ;;  %v6141_v41 = vrot.slane %v6113_v24, %v5997_v17 }
 0x244   : > { %5164 = vmatmul.mubr.msk.bf16.vlgmr.msra.gmra.mxu1 %vm856_vm2, %v762_v51  ;;  %5192 = vmatpush3.bf16.msra.mxu0 %v1320_v33  ;;  %v6145_v42 = vrot.slane %v6117_v25, %v5997_v17 }
 0x245   : > { %5168 = vmatpush3.bf16.xpose.msra.mxu1 %v1045_v36  ;;  %5169 = vmatprep.mubr.msk.bf16.mxu1 %vm5776_vm1, %v7027_v7  ;;  %v6137_v40 = vrot.slane %v837_v34, %v5997_v17  ;;  %v1366_v37 = vsel %vm1318_vm3, %v837_v34, 0 }
 0x246   : > { %5173 = vmatprep.subr.bf16.mxu1 %v7027_v7  ;;  %5203 = vmatprep.subr.bf16.mxu0 %v7027_v7 }
 0x24c   : > { %5170 = vmatmul.mubr.msk.bf16.vlgmr.msra.gmra.mxu1 %vm856_vm2, %v6000_v30  ;;  %v1183_v30 = vsel %vm856_vm2, %v6032_v56, 0 }
 0x24d   : > { %5174 = vmatpush3.bf16.xpose.msra.mxu1 %v1091_v32  ;;  %5175 = vmatprep.mubr.msk.bf16.mxu1 %vm5776_vm1, %v7027_v7 }
 0x24e   : > { %5179 = vmatprep.subr.bf16.mxu1 %v7027_v7 }
 0x254   : > { %5176 = vmatmul.mubr.msk.bf16.vlgmr.msra.gmra.mxu1 %vm856_vm2, %v6017_v44 }
 0x255   : > { %5180 = vmatpush3.bf16.xpose.msra.mxu1 %v1137_v43  ;;  %5181 = vmatprep.mubr.msk.bf16.mxu1 %vm5776_vm1, %v7027_v7 }
 0x256   : > { %5185 = vmatprep.subr.bf16.mxu1 %v7027_v7 }
 0x25c   : > { %5182 = vmatmul.mubr.msk.bf16.vlgmr.msra.gmra.mxu1 %vm856_vm2, %v6003_v31 }
 0x25d   : > { %5186 = vmatpush3.bf16.xpose.msra.mxu1 %v1183_v30  ;;  %5187 = vmatprep.mubr.msk.bf16.mxu1 %vm5776_vm1, %v7027_v7 }
 0x25e   : > { %5197 = vmatprep.subr.bf16.mxu1 %v7027_v7 }
 0x264   : > { %5188 = vmatmul.mubr.msk.bf16.vlgmr.msra.gmra.mxu1 %vm856_vm2, %v6021_v45 }
 0x265   : > { %5198 = vmatpush3.bf16.msra.mxu1 %v1366_v37  ;;  %5199 = vmatprep.mubr.msk.bf16.mxu1 %vm5776_vm1, %v7027_v7 }
 0x266   : > { %5209 = vmatprep.subr.bf16.mxu1 %v7027_v7 }
 0x2ec   : > { %v6175_v31 = vpop.f32.mrf.mxu1 }
 0x2ed   : > { %v1226_v44 = vsel %vm1225_vm4, %v6175_v31, -inf }
 0x2ee   : > { %1227 = vmax.xlane.f32.xlu0 %v1226_v44  ;;  %v5147_v47 = vpop.f32.mrf.mxu1 }
 0x2f0   : > { %v900_v51 = vpop.f32.mrf.mxu1 }
 0x2f2   : > { %v5148_v28 = vpop.f32.mrf.mxu1 }
 0x2f4   : > { %v6179_v20 = vpop.f32.mrf.mxu1 }
 0x2f5   : > { %v1229_v45 = vsel %vm1225_vm4, %v6179_v20, -inf }
 0x2f6   : > { %1230 = vmax.xlane.f32.xlu1 %v1229_v45  ;;  %v5153_v21 = vpop.f32.mrf.mxu1 }
 0x2f8   : > { %v946_v55 = vpop.f32.mrf.mxu1 }
 0x2fa   : > { %v5154_v56 = vpop.f32.mrf.mxu1 }
 0x2fc   : > { %v6183_v8 = vpop.f32.mrf.mxu1 }
 0x2fd   : > { %v1232_v9 = vsel %vm1225_vm4, %v6183_v8, -inf }
 0x2fe   : > { %1233 = vmax.xlane.f32.xlu0 %v1232_v9  ;;  %v5159_v10 = vpop.f32.mrf.mxu1 }
 0x300   : > { %v992_v11 = vpop.f32.mrf.mxu1 }
 0x302   : > { %v5160_v12 = vpop.f32.mrf.mxu1 }
 0x304   : > { %v6187_v13 = vpop.f32.mrf.mxu1 }
 0x305   : > { %v1235_v14 = vsel %vm1225_vm4, %v6187_v13, -inf }
 0x306   : > { %1236 = vmax.xlane.f32.xlu1 %v1235_v14  ;;  %v5165_v15 = vpop.f32.mrf.mxu1 }
 0x307   : > { %v4839_v15 = vpack.c.bf16 %v6100_v16, %v6100_v16 }
 0x308   : > { %v1038_v22 = vpop.f32.mrf.mxu1 }
 0x30a   : > { %v5166_v23 = vpop.f32.mrf.mxu1 }
 0x30c   : > { %v6191_v33 = vpop.f32.mrf.mxu1 }
 0x30d   : > { %v1238_v34 = vsel %vm1225_vm4, %v6191_v33, -inf }
 0x30e   : > { %1239 = vmax.xlane.f32.xlu0 %v1238_v34  ;;  %v5171_v36 = vpop.f32.mrf.mxu1  ;;  %v836_v34 = vrot.slane %v4839_v15, %v5997_v17 }
 0x310   : > { %v1084_v32 = vpop.f32.mrf.mxu1 }
 0x311   : > { %v6248_v32 = vrot.slane %v836_v34, %v5997_v17 }
 0x312   : > { %v5172_v43 = vpop.f32.mrf.mxu1 }
 0x313   : > { %v838_v43 = vcombine.high %v836_v34, %v836_v34 }
 0x314   : > { %v6195_v30 = vpop.f32.mrf.mxu1 }
 0x315   : > { %v1241_v37 = vsel %vm1225_vm4, %v6195_v30, -inf }
 0x316   : > { %1242 = vmax.xlane.f32.xlu1 %v1241_v37  ;;  %v5177_v44 = vpop.f32.mrf.mxu1 }
 0x317   : > { %v6254_v44 = vrot.slane %v838_v43, %v5997_v17  ;;  %v1412_v17 = vsel %vm1318_vm3, %v836_v34, 0  ;;  %v1504_v34 = vsel %vm1318_vm3, %v6104_v18, 0  ;;  %v1550_v18 = vsel %vm1318_vm3, %v6113_v24, 0 }
 0x318   : > { %v1130_v47 = vpop.f32.mrf.mxu1  ;;  %v1596_v24 = vsel %vm1318_vm3, %v6107_v19, 0 }
 0x31a   : > { %v5178_v51 = vpop.f32.mrf.mxu1 }
 0x31c   : > { %v6199_v28 = vpop.f32.mrf.mxu1 }
 0x31d   : > { %v1244_v45 = vsel %vm1225_vm4, %v6199_v28, -inf }
 0x31e   : > { %1245 = vmax.xlane.f32.xlu0 %v1244_v45  ;;  %v5183_v21 = vpop.f32.mrf.mxu1 }
 0x320   : > { %v1176_v55 = vpop.f32.mrf.mxu1 }
 0x322   : > { %v5184_v56 = vpop.f32.mrf.mxu1 }
 0x324   : > { %v6203_v9 = vpop.f32.mrf.mxu1 }
 0x325   : > { %v1247_v14 = vsel %vm1225_vm4, %v6203_v9, -inf }
 0x326   : > { %v5189_v10 = vpop.f32.mrf.mxu1 }
 0x327   : > { %1772 = vrot.lane.b32.xlu1 %v6039_v57, %s5778_s12 }
 0x328   : > { %v1222_v11 = vpop.f32.mrf.mxu1 }
 0x32a   : > { %v5190_v12 = vpop.f32.mrf.mxu1 }
 0x32b   : > { %1699 = vrot.lane.b32.xlu1 %v6035_v29, %s5778_s12  ;;  %v1458_v12 = vsel %vm1318_vm3, %v838_v43, 0 }
 0x334   : > { %1708 = vrot.lane.b32.xlu0 %v6042_v58, %s5778_s12 }
 0x338   : > { %1836 = vrot.lane.b32.xlu0 %v6045_v59, %s5778_s12 }
 0x33c   : > { %1827 = vrot.lane.b32.xlu0 %v6048_v60, %s5778_s12 }
 0x340   : > { %1964 = vrot.lane.b32.xlu0 %v6025_v46, %s5778_s12 }
 0x344   : > { %1955 = vrot.lane.b32.xlu0 %v6052_v39, %s5778_s12 }
 0x348   : > { %2092 = vrot.lane.b32.xlu0 %v6056_v38, %s5778_s12 }
 0x34c   : > { %2083 = vrot.lane.b32.xlu0 %v6060_v48, %s5778_s12 }
 0x34f   : > { %1248 = vmax.xlane.f32.xlu1 %v1247_v14 }
 0x350   : > { %2299 = vrot.lane.b32.xlu0 %v6129_v35, %s5778_s12 }
 0x360   : > { %1763 = vrot.lane.b32.xlu1 %v6063_v1, %s5778_s12 }
 0x364   : > { %1900 = vrot.lane.b32.xlu1 %v6066_v49, %s5778_s12 }
 0x368   : > { %1891 = vrot.lane.b32.xlu1 %v6069_v2, %s5778_s12 }
 0x36c   : > { %2028 = vrot.lane.b32.xlu1 %v6072_v3, %s5778_s12 }
 0x370   : > { %2019 = vrot.lane.b32.xlu1 %v6076_v4, %s5778_s12 }
 0x374   : > { %2156 = vrot.lane.b32.xlu1 %v6080_v5, %s5778_s12 }
 0x377   : > { %v1228_v22 = vpop.xlane.xlu0 %1227 }
 0x378   : > { %v1250_v23 = vsub.f32 %v6175_v31, %v1228_v22  ;;  %2147 = vrot.lane.b32.xlu1 %v6084_v6, %s5778_s12 }
 0x37a   : > { %v1258_v36 = vmul.f32 1.442695, %v1250_v23 }
 0x37c   : > { %5639 = vpow2.f32 %v1258_v36  ;;  %2354 = vrot.lane.b32.xlu1 %v6137_v40, %s5778_s12 }
 0x37f   : > { %v1231_v37 = vpop.xlane.xlu1 %1230 }
 0x380   : > { %v1251_v16 = vsub.f32 %v6179_v20, %v1231_v37  ;;  %2409 = vrot.lane.b32.xlu1 %v6248_v32, %s5778_s12 }
 0x382   : > { %v1260_v31 = vmul.f32 1.442695, %v1251_v16 }
 0x384   : > { %5641 = vpow2.f32 %v1260_v31  ;;  %2464 = vrot.lane.b32.xlu1 %v6254_v44, %s5778_s12 }
 0x387   : > { %v1234_v47 = vpop.xlane.xlu0 %1233 }
 0x388   : > { %v1252_v51 = vsub.f32 %v6183_v8, %v1234_v47 }
 0x389   : > { %v6259_v45 = vpop.eup %5639 }
 0x38a   : > { %v1262_v21 = vmul.f32 1.442695, %v1252_v51  ;;  %v1306_v20 = vpack.c.bf16 %v6259_v45, %v6259_v45 }
 0x38c   : > { %5643 = vpow2.f32 %v1262_v21  ;;  %5194 = vmatmul.mubr.msk.bf16.vlgmr.msra.gmra.mxu0 %vm1314_vm5, %v1306_v20 }
 0x38d   : > { %5204 = vmatpush3.bf16.msra.mxu0 %v1412_v17  ;;  %5205 = vmatprep.mubr.msk.bf16.mxu0 %vm5776_vm1, %v7027_v7 }
 0x38e   : > { %5215 = vmatprep.subr.bf16.mxu0 %v7027_v7 }
 0x38f   : > { %v1237_v55 = vpop.xlane.xlu1 %1236 }
 0x390   : > { %v1253_v8 = vsub.f32 %v6187_v13, %v1237_v55  ;;  %v1642_v55 = vsel %vm1318_vm3, %v6117_v25, 0 }
 0x391   : > { %v6269_v56 = vpop.eup %5641 }
 0x392   : > { %v1264_v10 = vmul.f32 1.442695, %v1253_v8  ;;  %v1307_v11 = vpack.c.bf16 %v6269_v56, %v6269_v56 }
 0x394   : > { %5645 = vpow2.f32 %v1264_v10  ;;  %5200 = vmatmul.mubr.msk.bf16.vlgmr.msra.gmra.mxu1 %vm1314_vm5, %v1307_v11 }
 0x395   : > { %5210 = vmatpush3.bf16.msra.mxu1 %v1458_v12  ;;  %5211 = vmatprep.mubr.msk.bf16.mxu1 %vm5776_vm1, %v7027_v7 }
 0x396   : > { %5221 = vmatprep.subr.bf16.mxu1 %v7027_v7 }
 0x397   : > { %v1240_v14 = vpop.xlane.xlu0 %1239 }
 0x398   : > { %v1254_v13 = vsub.f32 %v6191_v33, %v1240_v14 }
 0x399   : > { %v6279_v15 = vpop.eup %5643 }
 0x39a   : > { %v1266_v22 = vmul.f32 1.442695, %v1254_v13  ;;  %v1308_v23 = vpack.c.bf16 %v6279_v15, %v6279_v15 }
 0x39c   : > { %5647 = vpow2.f32 %v1266_v22  ;;  %5206 = vmatmul.mubr.msk.bf16.vlgmr.msra.gmra.mxu0 %vm1314_vm5, %v1308_v23 }
 0x39d   : > { %5216 = vmatpush3.bf16.msra.mxu0 %v1504_v34  ;;  %5217 = vmatprep.mubr.msk.bf16.mxu0 %vm5776_vm1, %v7027_v7 }
 0x39e   : > { %5227 = vmatprep.subr.bf16.mxu0 %v7027_v7 }
 0x39f   : > { %v1243_v36 = vpop.xlane.xlu1 %1242 }
 0x3a0   : > { %v1255_v33 = vsub.f32 %v6195_v30, %v1243_v36 }
 0x3a1   : > { %v6290_v43 = vpop.eup %5645 }
 0x3a2   : > { %v1268_v37 = vmul.f32 1.442695, %v1255_v33  ;;  %v1309_v16 = vpack.c.bf16 %v6290_v43, %v6290_v43 }
 0x3a3   : > { %v1773_v14 = vpop.permute.xlu1 %1772 }
 0x3a4   : > { %5649 = vpow2.f32 %v1268_v37  ;;  %5212 = vmatmul.mubr.msk.bf16.vlgmr.msra.gmra.mxu1 %vm1314_vm5, %v1309_v16 }
 0x3a5   : > { %5222 = vmatpush3.bf16.msra.mxu1 %v1550_v18  ;;  %5223 = vmatprep.mubr.msk.bf16.mxu1 %vm5776_vm1, %v7027_v7 }
 0x3a6   : > { %5233 = vmatprep.subr.bf16.mxu1 %v7027_v7 }
 0x3a7   : > { %v1246_v31 = vpop.xlane.xlu0 %1245  ;;  %v1700_v13 = vpop.permute.xlu1 %1699 }
 0x3a8   : > { %v1256_v30 = vsub.f32 %v6199_v28, %v1246_v31 }
 0x3a9   : > { %v6301_v47 = vpop.eup %5647 }
 0x3aa   : > { %v1270_v51 = vmul.f32 1.442695, %v1256_v30  ;;  %v1310_v21 = vpack.c.bf16 %v6301_v47, %v6301_v47 }
 0x3ab   : > { %v1709_v20 = vpop.permute.xlu0 %1708 }
 0x3ac   : > { %5651 = vpow2.f32 %v1270_v51  ;;  %5218 = vmatmul.mubr.msk.bf16.vlgmr.msra.gmra.mxu0 %vm1314_vm5, %v1310_v21  ;;  %v1714_v12 = vsel %vm856_vm2, %v1709_v20, 0 }
 0x3ad   : > { %5228 = vmatpush3.bf16.msra.mxu0 %v1596_v24  ;;  %5229 = vmatprep.mubr.msk.bf16.mxu0 %vm5776_vm1, %v7027_v7 }
 0x3ae   : > { %5239 = vmatprep.subr.bf16.mxu0 %v7027_v7 }
 0x3af   : > { %v1837_v8 = vpop.permute.xlu0 %1836 }
 0x3b0   : > { %v1842_v22 = vsel %vm856_vm2, %v1837_v8, 0 }
 0x3b1   : > { %v6311_v28 = vpop.eup %5649 }
 0x3b2   : > { %v1311_v17 = vpack.c.bf16 %v6311_v28, %v6311_v28 }
 0x3b3   : > { %v1828_v11 = vpop.permute.xlu0 %1827 }
 0x3b4   : > { %5224 = vmatmul.mubr.msk.bf16.vlgmr.msra.gmra.mxu1 %vm1314_vm5, %v1311_v17 }
 0x3b5   : > { %5234 = vmatpush3.bf16.msra.mxu1 %v1642_v55  ;;  %5235 = vmatprep.mubr.msk.bf16.mxu1 %vm5776_vm1, %v7027_v7  ;;  %v1778_v55 = vsel %vm856_vm2, %v1773_v14, 0 }
 0x3b6   : > { %5245 = vmatprep.subr.bf16.mxu1 %v7027_v7 }
 0x3b7   : > { %v1965_v25 = vpop.permute.xlu0 %1964 }
 0x3b8   : > { %v1970_v34 = vsel %vm856_vm2, %v1965_v25, 0 }
 0x3b9   : > { %v6321_v19 = vpop.eup %5651 }
 0x3ba   : > { %v1312_v10 = vpack.c.bf16 %v6321_v19, %v6321_v19 }
 0x3bb   : > { %v1956_v23 = vpop.permute.xlu0 %1955 }
 0x3bc   : > { %5230 = vmatmul.mubr.msk.bf16.vlgmr.msra.gmra.mxu0 %vm1314_vm5, %v1312_v10 }
 0x3bd   : > { %5240 = vmatpush3.bf16.xpose.msra.mxu0 %v1714_v12  ;;  %5241 = vmatprep.mubr.msk.bf16.mxu0 %vm5776_vm1, %v7027_v7 }
 0x3be   : > { %5251 = vmatprep.subr.bf16.mxu0 %v7027_v7 }
 0x3bf   : > { %v2093_v36 = vpop.permute.xlu0 %2092 }
 0x3c0   : > { %v2098_v37 = vsel %vm856_vm2, %v2093_v36, 0 }
 0x3c3   : > { %v2084_v33 = vpop.permute.xlu0 %2083 }
 0x3c4   : > { %5242 = vmatmul.mubr.msk.bf16.vlgmr.msra.gmra.mxu0 %vm856_vm2, %v1700_v13 }
 0x3c5   : > { %5252 = vmatpush3.bf16.xpose.msra.mxu0 %v1842_v22  ;;  %5253 = vmatprep.mubr.msk.bf16.mxu0 %vm5776_vm1, %v7027_v7 }
 0x3c6   : > { %5263 = vmatprep.subr.bf16.mxu0 %v7027_v7 }
 0x3c7   : > { %v2300_v18 = vpop.permute.xlu0 %2299 }
 0x3c8   : > { %v2305_v51 = vsel %vm1318_vm3, %v2300_v18, 0 }
 0x3cc   : > { %5254 = vmatmul.mubr.msk.bf16.vlgmr.msra.gmra.mxu0 %vm856_vm2, %v1828_v11 }
 0x3cd   : > { %5264 = vmatpush3.bf16.xpose.msra.mxu0 %v1970_v34  ;;  %5265 = vmatprep.mubr.msk.bf16.mxu0 %vm5776_vm1, %v7027_v7 }
 0x3ce   : > { %5275 = vmatprep.subr.bf16.mxu0 %v7027_v7 }
 0x3d4   : > { %5266 = vmatmul.mubr.msk.bf16.vlgmr.msra.gmra.mxu0 %vm856_vm2, %v1956_v23 }
 0x3d5   : > { %5276 = vmatpush3.bf16.xpose.msra.mxu0 %v2098_v37  ;;  %5277 = vmatprep.mubr.msk.bf16.mxu0 %vm5776_vm1, %v7027_v7 }
 0x3d6   : > { %5287 = vmatprep.subr.bf16.mxu0 %v7027_v7 }
 0x3d8   : > { %v1249_v16 = vpop.xlane.xlu1 %1248 }
 0x3d9   : > { %v1257_v31 = vsub.f32 %v6203_v9, %v1249_v16 }
 0x3db   : > { %v1272_v30 = vmul.f32 1.442695, %v1257_v31 }
 0x3dc   : > { %5278 = vmatmul.mubr.msk.bf16.vlgmr.msra.gmra.mxu0 %vm856_vm2, %v2084_v33  ;;  %v1764_v21 = vpop.permute.xlu1 %1763 }
 0x3dd   : > { %5653 = vpow2.f32 %v1272_v30  ;;  %5288 = vmatpush3.bf16.msra.mxu0 %v2305_v51  ;;  %5289 = vmatprep.mubr.msk.bf16.mxu0 %vm5776_vm1, %v7027_v7 }
 0x3de   : > { %5299 = vmatprep.subr.bf16.mxu0 %v7027_v7 }
 0x3e0   : > { %v1901_v24 = vpop.permute.xlu1 %1900 }
 0x3e1   : > { %v1906_v10 = vsel %vm856_vm2, %v1901_v24, 0 }
 0x3e4   : > { %v1892_v9 = vpop.permute.xlu1 %1891 }
 0x3e8   : > { %v2029_v8 = vpop.permute.xlu1 %2028 }
 0x3e9   : > { %v2034_v12 = vsel %vm856_vm2, %v2029_v8, 0 }
 0x3ea   : > { %v6351_v20 = vpop.eup %5653 }
 0x3eb   : > { %v1313_v17 = vpack.c.bf16 %v6351_v20, %v6351_v20 }
 0x3ec   : > { %v2020_v11 = vpop.permute.xlu1 %2019 }
 0x3ed   : > { %5236 = vmatmul.mubr.msk.bf16.vlgmr.msra.gmra.mxu1 %vm1314_vm5, %v1313_v17 }
 0x3ee   : > { %5246 = vmatpush3.bf16.xpose.msra.mxu1 %v1778_v55  ;;  %5247 = vmatprep.mubr.msk.bf16.mxu1 %vm5776_vm1, %v7027_v7 }
 0x3ef   : > { %5257 = vmatprep.subr.bf16.mxu1 %v7027_v7 }
 0x3f0   : > { %v2157_v14 = vpop.permute.xlu1 %2156 }
 0x3f1   : > { %v2162_v13 = vsel %vm856_vm2, %v2157_v14, 0 }
 0x3f4   : > { %v2148_v25 = vpop.permute.xlu1 %2147 }
 0x3f5   : > { %5248 = vmatmul.mubr.msk.bf16.vlgmr.msra.gmra.mxu1 %vm856_vm2, %v1764_v21 }
 0x3f6   : > { %5258 = vmatpush3.bf16.xpose.msra.mxu1 %v1906_v10  ;;  %5259 = vmatprep.mubr.msk.bf16.mxu1 %vm5776_vm1, %v7027_v7 }
 0x3f7   : > { %5269 = vmatprep.subr.bf16.mxu1 %v7027_v7 }
 0x3f8   : > { %v2355_v22 = vpop.permute.xlu1 %2354 }
 0x3f9   : > { %v2360_v23 = vsel %vm1318_vm3, %v2355_v22, 0 }
 0x3fd   : > { %5260 = vmatmul.mubr.msk.bf16.vlgmr.msra.gmra.mxu1 %vm856_vm2, %v1892_v9 }
 0x3fe   : > { %5270 = vmatpush3.bf16.xpose.msra.mxu1 %v2034_v12  ;;  %5271 = vmatprep.mubr.msk.bf16.mxu1 %vm5776_vm1, %v7027_v7 }
 0x3ff   : > { %5281 = vmatprep.subr.bf16.mxu1 %v7027_v7 }
 0x405   : > { %5272 = vmatmul.mubr.msk.bf16.vlgmr.msra.gmra.mxu1 %vm856_vm2, %v2020_v11 }
 0x406   : > { %5282 = vmatpush3.bf16.xpose.msra.mxu1 %v2162_v13  ;;  %5283 = vmatprep.mubr.msk.bf16.mxu1 %vm5776_vm1, %v7027_v7 }
 0x407   : > { %5293 = vmatprep.subr.bf16.mxu1 %v7027_v7 }
 0x40d   : > { %5284 = vmatmul.mubr.msk.bf16.vlgmr.msra.gmra.mxu1 %vm856_vm2, %v2148_v25 }
 0x40e   : > { %5294 = vmatpush3.bf16.msra.mxu1 %v2360_v23  ;;  %5295 = vmatprep.mubr.msk.bf16.mxu1 %vm5776_vm1, %v7027_v7 }
 0x40f   : > { %5305 = vmatprep.subr.bf16.mxu1 %v7027_v7 }
 0x44c   : > { %v6380_v34 = vpop.f32.mrf.mxu0 }
 0x44d   : > { %7045 = vst [vmem:[#allocation10_spill] sm:$0xff] %v6380_v34 }
 0x44e   : > { %v5195_v36 = vpop.f32.mrf.mxu0 }
 0x450   : > { %v1359_v33 = vpop.f32.mrf.mxu0 }
 0x452   : > { %v5196_v37 = vpop.f32.mrf.mxu0 }
 0x454   : > { %v6382_v16 = vpop.f32.mrf.mxu1 }
 0x455   : > { %7046 = vst [vmem:[#allocation11_spill] sm:$0xff] %v6382_v16 }
 0x456   : > { %v5201_v18 = vpop.f32.mrf.mxu1 }
 0x458   : > { %v1405_v31 = vpop.f32.mrf.mxu1 }
 0x45a   : > { %v5202_v30 = vpop.f32.mrf.mxu1 }
 0x45c   : > { %v6384_v51 = vpop.f32.mrf.mxu0 }
 0x45d   : > { %7047 = vst [vmem:[#allocation12_spill] sm:$0xff] %v6384_v51 }
 0x45e   : > { %v5207_v21 = vpop.f32.mrf.mxu0 }
 0x460   : > { %v1451_v24 = vpop.f32.mrf.mxu0 }
 0x462   : > { %v5208_v17 = vpop.f32.mrf.mxu0 }
 0x464   : > { %v6386_v9 = vpop.f32.mrf.mxu1 }
 0x465   : > { %7048 = vst [vmem:[#allocation13_spill] sm:$0xff] %v6386_v9 }
 0x466   : > { %v5213_v55 = vpop.f32.mrf.mxu1 }
 0x468   : > { %v1497_v8 = vpop.f32.mrf.mxu1 }
 0x46a   : > { %v5214_v10 = vpop.f32.mrf.mxu1 }
 0x46c   : > { %v6388_v11 = vpop.f32.mrf.mxu0 }
 0x46d   : > { %7049 = vst [vmem:[#allocation14_spill] sm:$0xff] %v6388_v11 }
 0x46e   : > { %v5219_v12 = vpop.f32.mrf.mxu0 }
 0x470   : > { %v1543_v14 = vpop.f32.mrf.mxu0 }
 0x472   : > { %v5220_v25 = vpop.f32.mrf.mxu0 }
 0x474   : > { %v6390_v13 = vpop.f32.mrf.mxu1 }
 0x475   : > { %7050 = vst [vmem:[#allocation15_spill] sm:$0xff] %v6390_v13 }
 0x476   : > { %v5225_v22 = vpop.f32.mrf.mxu1 }
 0x478   : > { %v1589_v23 = vpop.f32.mrf.mxu1 }
 0x47a   : > { %v5226_v36 = vpop.f32.mrf.mxu1 }
 0x47c   : > { %v6392_v33 = vpop.f32.mrf.mxu0 }
 0x47d   : > { %7051 = vst [vmem:[#allocation16_spill] sm:$0xff] %v6392_v33 }
 0x47e   : > { %v5231_v37 = vpop.f32.mrf.mxu0 }
 0x480   : > { %v1635_v18 = vpop.f32.mrf.mxu0 }
 0x482   : > { %v5232_v31 = vpop.f32.mrf.mxu0 }
 0x484   : > { %v1750_v30 = vpop.f32.mrf.mxu0 }
 0x485   : > { %v2204_v21 = vsel %vm1225_vm4, %v1750_v30, -inf }
 0x486   : > { %2205 = vmax.xlane.f32.xlu0 %v2204_v21  ;;  %v5243_v24 = vpop.f32.mrf.mxu0 }
 0x488   : > { %v1753_v17 = vpop.f32.mrf.mxu0 }
 0x48a   : > { %v5244_v55 = vpop.f32.mrf.mxu0 }
 0x48c   : > { %v1878_v8 = vpop.f32.mrf.mxu0 }
 0x48d   : > { %v2210_v10 = vsel %vm1225_vm4, %v1878_v8, -inf }
 0x48e   : > { %2211 = vmax.xlane.f32.xlu0 %v2210_v10  ;;  %v5255_v12 = vpop.f32.mrf.mxu0 }
 0x490   : > { %v1881_v14 = vpop.f32.mrf.mxu0 }
 0x492   : > { %v5256_v25 = vpop.f32.mrf.mxu0 }
 0x494   : > { %v6396_v22 = vpop.f32.mrf.mxu0 }
 0x496   : > { %v5267_v23 = vpop.f32.mrf.mxu0 }
 0x498   : > { %v2009_v36 = vpop.f32.mrf.mxu0 }
 0x49a   : > { %v5268_v37 = vpop.f32.mrf.mxu0 }
 0x49c   : > { %v6398_v18 = vpop.f32.mrf.mxu0 }
 0x49e   : > { %v5279_v31 = vpop.f32.mrf.mxu0 }
 0x4a0   : > { %v2137_v7 = vpop.f32.mrf.mxu0 }
 0x4a2   : > { %v5280_v21 = vpop.f32.mrf.mxu0 }
 0x4ad   : > { %v6400_v24 = vpop.f32.mrf.mxu1 }
 0x4ae   : > { %7052 = vst [vmem:[#allocation17_spill] sm:$0xff] %v6400_v24 }
 0x4af   : > { %v5237_v17 = vpop.f32.mrf.mxu1 }
 0x4b1   : > { %v1681_v55 = vpop.f32.mrf.mxu1 }
 0x4b3   : > { %v5238_v54 = vpop.f32.mrf.mxu1 }
 0x4b4   : > { %v2216_v54 = vsel %vm1225_vm4, %v6396_v22, -inf }
 0x4b5   : > { %v6402_v53 = vpop.f32.mrf.mxu1 }
 0x4b6   : > { %v2207_v10 = vsel %vm1225_vm4, %v6402_v53, -inf }
 0x4b7   : > { %2208 = vmax.xlane.f32.xlu1 %v2207_v10  ;;  %v5249_v12 = vpop.f32.mrf.mxu1 }
 0x4b9   : > { %v1817_v14 = vpop.f32.mrf.mxu1 }
 0x4bb   : > { %v5250_v25 = vpop.f32.mrf.mxu1 }
 0x4bd   : > { %v6406_v23 = vpop.f32.mrf.mxu1 }
 0x4be   : > { %v2213_v7 = vsel %vm1225_vm4, %v6406_v23, -inf }
 0x4bf   : > { %2214 = vmax.xlane.f32.xlu0 %v2213_v7  ;;  %v5261_v36 = vpop.f32.mrf.mxu1 }
 0x4c1   : > { %v1945_v37 = vpop.f32.mrf.mxu1 }
 0x4c2   : > { %v2222_v37 = vsel %vm1225_vm4, %v6398_v18, -inf }
 0x4c3   : > { %2217 = vmax.xlane.f32.xlu0 %v2216_v54  ;;  %v5262_v31 = vpop.f32.mrf.mxu1 }
 0x4c5   : > { %v6412_v21 = vpop.f32.mrf.mxu1 }
 0x4c6   : > { %v2219_v36 = vsel %vm1225_vm4, %v6412_v21, -inf }
 0x4c7   : > { %v5273_v17 = vpop.f32.mrf.mxu1 }
 0x4c8   : > { %2574 = vrot.lane.b32.xlu1 %v6141_v41, %s5778_s12 }
 0x4c9   : > { %v2073_v55 = vpop.f32.mrf.mxu1 }
 0x4cb   : > { %v5274_v10 = vpop.f32.mrf.mxu1 }
 0x4cd   : > { %v6416_v12 = vpop.f32.mrf.mxu1 }
 0x4cf   : > { %v5285_v14 = vpop.f32.mrf.mxu1 }
 0x4d1   : > { %v2201_v25 = vpop.f32.mrf.mxu1 }
 0x4d3   : > { %v5286_v7 = vpop.f32.mrf.mxu1 }
 0x4d9   : > { %2519 = vrot.lane.b32.xlu0 %v6121_v26, %s5778_s12 }
 0x4ec   : > { %2220 = vmax.xlane.f32.xlu1 %v2219_v36 }
 0x4f8   : > { %2223 = vmax.xlane.f32.xlu0 %v2222_v37  ;;  %v7053_v37 = vmov 0.0  }
 0x4fd   : > { %2684 = vrot.lane.b32.xlu1 %v6145_v42, %s5778_s12 }
 0x501   : > { %2792 = vrot.lane.b32.xlu1 %v6039_v57, %s5779_s13 }
 0x50e   : > { %2629 = vrot.lane.b32.xlu0 %v6125_v27, %s5778_s12 }
 0x50f   : > { %v2206_v54 = vpop.xlane.xlu0 %2205 }
 0x510   : > { %v2228_v31 = vsub.f32 %v1750_v30, %v2206_v54  ;;  %v2410_v30 = vpop.permute.xlu1 %2409 }
 0x511   : > { %v2415_v36 = vsel %vm1318_vm3, %v2410_v30, 0 }
 0x512   : > { %v2236_v17 = vmul.f32 1.442695, %v2228_v31  ;;  %2742 = vrot.lane.b32.xlu0 %v6042_v58, %s5779_s13 }
 0x514   : > { %5655 = vpow2.f32 %v2236_v17  ;;  %v2465_v17 = vpop.permute.xlu1 %2464 }
 0x516   : > { %2740 = vrot.lane.b32.xlu0 %v6035_v29, %s5779_s13 }
 0x517   : > { %v2212_v55 = vpop.xlane.xlu0 %2211 }
 0x518   : > { %v2230_v10 = vsub.f32 %v1878_v8, %v2212_v55  ;;  %v2225_v8 = vsel %vm1225_vm4, %v6416_v12, -inf }
 0x51a   : > { %v2240_v14 = vmul.f32 1.442695, %v2230_v10  ;;  %2842 = vrot.lane.b32.xlu0 %v6045_v59, %s5779_s13 }
 0x51c   : > { %5657 = vpow2.f32 %v2240_v14 }
 0x51e   : > { %2840 = vrot.lane.b32.xlu0 %v6048_v60, %s5779_s13 }
 0x521   : > { %v6438_v25 = vpop.eup %5655 }
 0x522   : > { %2942 = vrot.lane.b32.xlu0 %v6025_v46, %s5779_s13  ;;  %v2284_v7 = vpack.c.bf16 %v6438_v25, %v6438_v25 }
 0x524   : > { %5290 = vmatmul.mubr.msk.bf16.vlgmr.msra.gmra.mxu0 %vm1314_vm5, %v2284_v7 }
 0x525   : > { %5300 = vmatpush3.bf16.msra.mxu0 %v2415_v36  ;;  %2226 = vmax.xlane.f32.xlu1 %v2225_v8 }
 0x526   : > { %2940 = vrot.lane.b32.xlu0 %v6052_v39, %s5779_s13  ;;  %5301 = vmatprep.mubr.msk.bf16.mxu0 %vm5776_vm1, %v7053_v37 }
 0x527   : > { %5311 = vmatprep.subr.bf16.mxu0 %v7053_v37 }
 0x529   : > { %v6453_v54 = vpop.eup %5657 }
 0x52a   : > { %3042 = vrot.lane.b32.xlu0 %v6056_v38, %s5779_s13  ;;  %v2286_v31 = vpack.c.bf16 %v6453_v54, %v6453_v54 }
 0x52c   : > { %5302 = vmatmul.mubr.msk.bf16.vlgmr.msra.gmra.mxu0 %vm1314_vm5, %v2286_v31 }
 0x52d   : > { %5313 = vmatprep.mubr.msk.bf16.mxu0 %vm5776_vm1, %v7053_v37 }
 0x52e   : > { %3040 = vrot.lane.b32.xlu0 %v6060_v48, %s5779_s13 }
 0x532   : > { %3228 = vrot.lane.b32.xlu0 %v6129_v35, %s5779_s13 }
 0x536   : > { %2790 = vrot.lane.b32.xlu1 %v6063_v1, %s5779_s13 }
 0x53a   : > { %2892 = vrot.lane.b32.xlu1 %v6066_v49, %s5779_s13 }
 0x53e   : > { %2890 = vrot.lane.b32.xlu1 %v6069_v2, %s5779_s13 }
 0x540   : > { %v2209_v55 = vpop.xlane.xlu1 %2208 }
 0x541   : > { %v2229_v10 = vsub.f32 %v6402_v53, %v2209_v55 }
 0x542   : > { %2992 = vrot.lane.b32.xlu1 %v6072_v3, %s5779_s13 }
 0x543   : > { %v2238_v14 = vmul.f32 1.442695, %v2229_v10 }
 0x545   : > { %5659 = vpow2.f32 %v2238_v14 }
 0x546   : > { %2990 = vrot.lane.b32.xlu1 %v6076_v4, %s5779_s13 }
 0x548   : > { %v2215_v30 = vpop.xlane.xlu0 %2214 }
 0x549   : > { %v2231_v7 = vsub.f32 %v6406_v23, %v2215_v30 }
 0x54a   : > { %3092 = vrot.lane.b32.xlu1 %v6080_v5, %s5779_s13 }
 0x54b   : > { %v2242_v36 = vmul.f32 1.442695, %v2231_v7  ;;  %v2575_v7 = vpop.permute.xlu1 %2574 }
 0x54c   : > { %v2218_v8 = vpop.xlane.xlu0 %2217 }
 0x54d   : > { %5661 = vpow2.f32 %v2242_v36  ;;  %v2232_v31 = vsub.f32 %v6396_v22, %v2218_v8  ;;  %v2470_v22 = vsel %vm1318_vm3, %v2465_v17, 0  ;;  %v2580_v36 = vsel %vm1318_vm3, %v2575_v7, 0 }
 0x54e   : > { %3090 = vrot.lane.b32.xlu1 %v6084_v6, %s5779_s13 }
 0x54f   : > { %v2244_v53 = vmul.f32 1.442695, %v2232_v31 }
 0x550   : > { %v2520_v55 = vpop.permute.xlu0 %2519 }
 0x551   : > { %5663 = vpow2.f32 %v2244_v53  ;;  %v2525_v10 = vsel %vm1318_vm3, %v2520_v55, 0 }
 0x552   : > { %v6484_v14 = vpop.eup %5659  ;;  %5312 = vmatpush3.bf16.msra.mxu0 %v2525_v10  ;;  %3276 = vrot.lane.b32.xlu1 %v6137_v40, %s5779_s13 }
 0x553   : > { %v2285_v23 = vpack.c.bf16 %v6484_v14, %v6484_v14  ;;  %5323 = vmatprep.subr.bf16.mxu0 %v7053_v37 }
 0x555   : > { %5296 = vmatmul.mubr.msk.bf16.vlgmr.msra.gmra.mxu1 %vm1314_vm5, %v2285_v23 }
 0x556   : > { %5306 = vmatpush3.bf16.msra.mxu1 %v2470_v22  ;;  %3324 = vrot.lane.b32.xlu1 %v6248_v32, %s5779_s13 }
 0x557   : > { %5307 = vmatprep.mubr.msk.bf16.mxu1 %vm5776_vm1, %v7053_v37  ;;  %5317 = vmatprep.subr.bf16.mxu1 %v7053_v37 }
 0x55a   : > { %v6498_v30 = vpop.eup %5661  ;;  %3372 = vrot.lane.b32.xlu1 %v6254_v44, %s5779_s13 }
 0x55b   : > { %v2287_v17 = vpack.c.bf16 %v6498_v30, %v6498_v30 }
 0x55d   : > { %5308 = vmatmul.mubr.msk.bf16.vlgmr.msra.gmra.mxu1 %vm1314_vm5, %v2287_v17 }
 0x55e   : > { %v6506_v8 = vpop.eup %5663  ;;  %5318 = vmatpush3.bf16.msra.mxu1 %v2580_v36  ;;  %5319 = vmatprep.mubr.msk.bf16.mxu1 %vm5776_vm1, %v7053_v37 }
 0x55f   : > { %v2288_v31 = vpack.c.bf16 %v6506_v8, %v6506_v8  ;;  %5329 = vmatprep.subr.bf16.mxu1 %v7053_v37 }
 0x561   : > { %5314 = vmatmul.mubr.msk.bf16.vlgmr.msra.gmra.mxu0 %vm1314_vm5, %v2288_v31 }
 0x562   : > { %5325 = vmatprep.mubr.msk.bf16.mxu0 %vm5776_vm1, %v7053_v37 }
 0x575   : > { %v2221_v53 = vpop.xlane.xlu1 %2220 }
 0x576   : > { %v2233_v55 = vsub.f32 %v6412_v21, %v2221_v53 }
 0x578   : > { %v2246_v10 = vmul.f32 1.442695, %v2233_v55 }
 0x579   : > { %v2685_v63 = vpop.permute.xlu1 %2684 }
 0x57a   : > { %5665 = vpow2.f32 %v2246_v10  ;;  %v2690_v53 = vsel %vm1318_vm3, %v2685_v63, 0 }
 0x581   : > { %v2224_v23 = vpop.xlane.xlu0 %2223 }
 0x582   : > { %v2234_v22 = vsub.f32 %v6398_v18, %v2224_v23 }
 0x584   : > { %v2248_v7 = vmul.f32 1.442695, %v2234_v22 }
 0x585   : > { %v2630_v17 = vpop.permute.xlu0 %2629 }
 0x586   : > { %5667 = vpow2.f32 %v2248_v7  ;;  %v2635_v36 = vsel %vm1318_vm3, %v2630_v17, 0 }
 0x587   : > { %v6519_v0 = vpop.eup %5665  ;;  %5324 = vmatpush3.bf16.msra.mxu0 %v2635_v36 }
 0x588   : > { %v2289_v31 = vpack.c.bf16 %v6519_v0, %v6519_v0  ;;  %5335 = vmatprep.subr.bf16.mxu0 %v7053_v37 }
 0x589   : > { %v2743_v21 = vpop.permute.xlu0 %2742 }
 0x58a   : > { %5320 = vmatmul.mubr.msk.bf16.vlgmr.msra.gmra.mxu1 %vm1314_vm5, %v2289_v31  ;;  %v2748_v7 = vsel %vm856_vm2, %v2743_v21, 0 }
 0x58b   : > { %5330 = vmatpush3.bf16.msra.mxu1 %v2690_v53  ;;  %5331 = vmatprep.mubr.msk.bf16.mxu1 %vm5776_vm1, %v7053_v37  ;;  %v2793_v53 = vpop.permute.xlu1 %2792 }
 0x58c   : > { %5341 = vmatprep.subr.bf16.mxu1 %v7053_v37 }
 0x58d   : > { %v2741_v18 = vpop.permute.xlu0 %2740 }
 0x591   : > { %v2843_v55 = vpop.permute.xlu0 %2842 }
 0x592   : > { %v2848_v17 = vsel %vm856_vm2, %v2843_v55, 0 }
 0x593   : > { %v6529_v10 = vpop.eup %5667 }
 0x594   : > { %v2290_v23 = vpack.c.bf16 %v6529_v10, %v6529_v10 }
 0x595   : > { %v2841_v22 = vpop.permute.xlu0 %2840 }
 0x596   : > { %5326 = vmatmul.mubr.msk.bf16.vlgmr.msra.gmra.mxu0 %vm1314_vm5, %v2290_v23 }
 0x597   : > { %5336 = vmatpush3.bf16.xpose.msra.mxu0 %v2748_v7  ;;  %5337 = vmatprep.mubr.msk.bf16.mxu0 %vm5776_vm1, %v7053_v37 }
 0x598   : > { %5347 = vmatprep.subr.bf16.mxu0 %v7053_v37 }
 0x599   : > { %v2943_v63 = vpop.permute.xlu0 %2942 }
 0x59a   : > { %v2948_v31 = vsel %vm856_vm2, %v2943_v63, 0 }
 0x59d   : > { %v2941_v36 = vpop.permute.xlu0 %2940 }
 0x59e   : > { %5338 = vmatmul.mubr.msk.bf16.vlgmr.msra.gmra.mxu0 %vm856_vm2, %v2741_v18 }
 0x59f   : > { %5348 = vmatpush3.bf16.xpose.msra.mxu0 %v2848_v17  ;;  %5349 = vmatprep.mubr.msk.bf16.mxu0 %vm5776_vm1, %v7053_v37 }
 0x5a0   : > { %5359 = vmatprep.subr.bf16.mxu0 %v7053_v37 }
 0x5a1   : > { %v3043_v21 = vpop.permute.xlu0 %3042 }
 0x5a2   : > { %v3048_v55 = vsel %vm856_vm2, %v3043_v21, 0 }
 0x5a5   : > { %v3041_v18 = vpop.permute.xlu0 %3040 }
 0x5a6   : > { %5350 = vmatmul.mubr.msk.bf16.vlgmr.msra.gmra.mxu0 %vm856_vm2, %v2841_v22 }
 0x5a7   : > { %5360 = vmatpush3.bf16.xpose.msra.mxu0 %v2948_v31  ;;  %5361 = vmatprep.mubr.msk.bf16.mxu0 %vm5776_vm1, %v7053_v37 }
 0x5a8   : > { %5371 = vmatprep.subr.bf16.mxu0 %v7053_v37 }
 0x5a9   : > { %v3229_v63 = vpop.permute.xlu0 %3228 }
 0x5aa   : > { %v3234_v17 = vsel %vm1318_vm3, %v3229_v63, 0 }
 0x5ae   : > { %5362 = vmatmul.mubr.msk.bf16.vlgmr.msra.gmra.mxu0 %vm856_vm2, %v2941_v36  ;;  %v2227_v23 = vpop.xlane.xlu1 %2226 }
 0x5af   : > { %5372 = vmatpush3.bf16.xpose.msra.mxu0 %v3048_v55  ;;  %v2235_v7 = vsub.f32 %v6416_v12, %v2227_v23  ;;  %5373 = vmatprep.mubr.msk.bf16.mxu0 %vm5776_vm1, %v7053_v37  ;;  %v2798_v23 = vsel %vm856_vm2, %v2793_v53, 0 }
 0x5b0   : > { %5383 = vmatprep.subr.bf16.mxu0 %v7053_v37 }
 0x5b1   : > { %v2250_v22 = vmul.f32 1.442695, %v2235_v7 }
 0x5b2   : > { %v2791_v31 = vpop.permute.xlu1 %2790 }
 0x5b3   : > { %5669 = vpow2.f32 %v2250_v22 }
 0x5b6   : > { %5374 = vmatmul.mubr.msk.bf16.vlgmr.msra.gmra.mxu0 %vm856_vm2, %v3041_v18  ;;  %v2893_v12 = vpop.permute.xlu1 %2892 }
 0x5b7   : > { %5384 = vmatpush3.bf16.msra.mxu0 %v3234_v17  ;;  %5385 = vmatprep.mubr.msk.bf16.mxu0 %vm5776_vm1, %v7053_v37  ;;  %v2898_v7 = vsel %vm856_vm2, %v2893_v12, 0 }
 0x5b8   : > { %5395 = vmatprep.subr.bf16.mxu0 %v7053_v37 }
 0x5ba   : > { %v2891_v55 = vpop.permute.xlu1 %2890 }
 0x5be   : > { %v2993_v18 = vpop.permute.xlu1 %2992 }
 0x5bf   : > { %v2998_v22 = vsel %vm856_vm2, %v2993_v18, 0 }
 0x5c0   : > { %v6559_v36 = vpop.eup %5669 }
 0x5c1   : > { %v2291_v21 = vpack.c.bf16 %v6559_v36, %v6559_v36 }
 0x5c2   : > { %v2991_v53 = vpop.permute.xlu1 %2990 }
 0x5c3   : > { %5332 = vmatmul.mubr.msk.bf16.vlgmr.msra.gmra.mxu1 %vm1314_vm5, %v2291_v21 }
 0x5c4   : > { %5342 = vmatpush3.bf16.xpose.msra.mxu1 %v2798_v23  ;;  %5343 = vmatprep.mubr.msk.bf16.mxu1 %vm5776_vm1, %v7053_v37 }
 0x5c5   : > { %5353 = vmatprep.subr.bf16.mxu1 %v7053_v37 }
 0x5c6   : > { %v3093_v63 = vpop.permute.xlu1 %3092 }
 0x5ca   : > { %v3091_v17 = vpop.permute.xlu1 %3090 }
 0x5cb   : > { %5344 = vmatmul.mubr.msk.bf16.vlgmr.msra.gmra.mxu1 %vm856_vm2, %v2791_v31  ;;  %v3098_v31 = vsel %vm856_vm2, %v3093_v63, 0 }
 0x5cc   : > { %5354 = vmatpush3.bf16.xpose.msra.mxu1 %v2898_v7  ;;  %5355 = vmatprep.mubr.msk.bf16.mxu1 %vm5776_vm1, %v7053_v37 }
 0x5cd   : > { %5365 = vmatprep.subr.bf16.mxu1 %v7053_v37 }
 0x5ce   : > { %v3277_v12 = vpop.permute.xlu1 %3276 }
 0x5cf   : > { %v3282_v21 = vsel %vm1318_vm3, %v3277_v12, 0 }
 0x5d3   : > { %5356 = vmatmul.mubr.msk.bf16.vlgmr.msra.gmra.mxu1 %vm856_vm2, %v2891_v55 }
 0x5d4   : > { %5366 = vmatpush3.bf16.xpose.msra.mxu1 %v2998_v22  ;;  %5367 = vmatprep.mubr.msk.bf16.mxu1 %vm5776_vm1, %v7053_v37 }
 0x5d5   : > { %5377 = vmatprep.subr.bf16.mxu1 %v7053_v37 }
 0x5db   : > { %5368 = vmatmul.mubr.msk.bf16.vlgmr.msra.gmra.mxu1 %vm856_vm2, %v2991_v53 }
 0x5dc   : > { %5378 = vmatpush3.bf16.xpose.msra.mxu1 %v3098_v31  ;;  %5379 = vmatprep.mubr.msk.bf16.mxu1 %vm5776_vm1, %v7053_v37 }
 0x5dd   : > { %5389 = vmatprep.subr.bf16.mxu1 %v7053_v37 }
 0x5e3   : > { %5380 = vmatmul.mubr.msk.bf16.vlgmr.msra.gmra.mxu1 %vm856_vm2, %v3091_v17 }
 0x5e4   : > { %5390 = vmatpush3.bf16.msra.mxu1 %v3282_v21  ;;  %v6585_v55 = vpop.f32.mrf.mxu0  ;;  %5391 = vmatprep.mubr.msk.bf16.mxu1 %vm5776_vm1, %v7053_v37 }
 0x5e5   : > { %5401 = vmatprep.subr.bf16.mxu1 %v7053_v37 }
 0x5e6   : > { %v5291_v23 = vpop.f32.mrf.mxu0 }
 0x5e8   : > { %v2344_v18 = vpop.f32.mrf.mxu0 }
 0x5ea   : > { %v5292_v7 = vpop.f32.mrf.mxu0 }
 0x5ec   : > { %v6590_v53 = vpop.f32.mrf.mxu0 }
 0x5ee   : > { %v5303_v22 = vpop.f32.mrf.mxu0 }
 0x5f0   : > { %v2454_v63 = vpop.f32.mrf.mxu0 }
 0x5f2   : > { %v5304_v31 = vpop.f32.mrf.mxu0 }
 0x615   : > { %v6592_v50 = vpop.f32.mrf.mxu1 }
 0x617   : > { %v5297_v12 = vpop.f32.mrf.mxu1 }
 0x619   : > { %v2399_v17 = vpop.f32.mrf.mxu1 }
 0x61b   : > { %v5298_v21 = vpop.f32.mrf.mxu1 }
 0x61d   : > { %v6594_v52 = vpop.f32.mrf.mxu1 }
 0x61f   : > { %v5309_v61 = vpop.f32.mrf.mxu1 }
 0x621   : > { %v2509_v62 = vpop.f32.mrf.mxu1  ;;  %v6596_v24 = vpop.f32.mrf.mxu0 }
 0x622   : > { %7054 = vst [vmem:[#allocation18_spill] sm:$0xff] %v6596_v24 }
 0x623   : > { %v5310_v13 = vpop.f32.mrf.mxu1  ;;  %v5315_v23 = vpop.f32.mrf.mxu0 }
 0x625   : > { %v2564_v18 = vpop.f32.mrf.mxu0 }
 0x627   : > { %v5316_v7 = vpop.f32.mrf.mxu0 }
 0x64a   : > { %v6598_v33 = vpop.f32.mrf.mxu1 }
 0x64b   : > { %7055 = vst [vmem:[#allocation19_spill] sm:$0xff] %v6598_v33 }
 0x64c   : > { %v5321_v22 = vpop.f32.mrf.mxu1 }
 0x64e   : > { %v2619_v63 = vpop.f32.mrf.mxu1 }
 0x650   : > { %v5322_v31 = vpop.f32.mrf.mxu1 }
 0x656   : > { %v6600_v11 = vpop.f32.mrf.mxu0 }
 0x657   : > { %7056 = vst [vmem:[#allocation20_spill] sm:$0xff] %v6600_v11 }
 0x658   : > { %v5327_v12 = vpop.f32.mrf.mxu0 }
 0x65a   : > { %v2674_v17 = vpop.f32.mrf.mxu0 }
 0x65c   : > { %v5328_v21 = vpop.f32.mrf.mxu0 }
 0x65e   : > { %v2784_v9 = vpop.f32.mrf.mxu0 }
 0x65f   : > { %v3140_v61 = vsel %vm1225_vm4, %v2784_v9, -inf }
 0x660   : > { %3141 = vmax.xlane.f32.xlu0 %v3140_v61  ;;  %v5339_v62 = vpop.f32.mrf.mxu0 }
 0x662   : > { %v2787_v16 = vpop.f32.mrf.mxu0 }
 0x664   : > { %v5340_v13 = vpop.f32.mrf.mxu0 }
 0x666   : > { %v2884_v23 = vpop.f32.mrf.mxu0 }
 0x667   : > { %v3146_v18 = vsel %vm1225_vm4, %v2884_v23, -inf }
 0x668   : > { %3147 = vmax.xlane.f32.xlu0 %v3146_v18  ;;  %v5351_v7 = vpop.f32.mrf.mxu0 }
 0x66a   : > { %v2887_v22 = vpop.f32.mrf.mxu0 }
 0x66c   : > { %v5352_v63 = vpop.f32.mrf.mxu0 }
 0x66e   : > { %v6604_v31 = vpop.f32.mrf.mxu0 }
 0x670   : > { %v5363_v51 = vpop.f32.mrf.mxu0 }
 0x672   : > { %v2987_v12 = vpop.f32.mrf.mxu0 }
 0x674   : > { %v5364_v17 = vpop.f32.mrf.mxu0 }
 0x676   : > { %v6606_v21 = vpop.f32.mrf.mxu0 }
 0x678   : > { %v5375_v34 = vpop.f32.mrf.mxu0 }
 0x67a   : > { %v3087_v11 = vpop.f32.mrf.mxu0 }
 0x67c   : > { %v5376_v61 = vpop.f32.mrf.mxu0 }
 0x683   : > { %v6608_v62 = vpop.f32.mrf.mxu1 }
 0x685   : > { %v5333_v16 = vpop.f32.mrf.mxu1 }
 0x687   : > { %v2729_v13 = vpop.f32.mrf.mxu1 }
 0x689   : > { %v5334_v33 = vpop.f32.mrf.mxu1 }
 0x68a   : > { %v3152_v33 = vsel %vm1225_vm4, %v6604_v31, -inf }
 0x68b   : > { %v6610_v24 = vpop.f32.mrf.mxu1 }
 0x68c   : > { %v3143_v18 = vsel %vm1225_vm4, %v6610_v24, -inf }
 0x68d   : > { %3144 = vmax.xlane.f32.xlu1 %v3143_v18  ;;  %v5345_v7 = vpop.f32.mrf.mxu1 }
 0x68f   : > { %v2837_v51 = vpop.f32.mrf.mxu1 }
 0x691   : > { %v5346_v22 = vpop.f32.mrf.mxu1 }
 0x693   : > { %v6614_v63 = vpop.f32.mrf.mxu1 }
 0x694   : > { %v3149_v34 = vsel %vm1225_vm4, %v6614_v63, -inf }
 0x695   : > { %3150 = vmax.xlane.f32.xlu0 %v3149_v34  ;;  %v5357_v11 = vpop.f32.mrf.mxu1 }
 0x697   : > { %v2937_v12 = vpop.f32.mrf.mxu1 }
 0x698   : > { %v3158_v12 = vsel %vm1225_vm4, %v6606_v21, -inf }
 0x699   : > { %3153 = vmax.xlane.f32.xlu0 %v3152_v33  ;;  %v5358_v17 = vpop.f32.mrf.mxu1 }
 0x69b   : > { %v6620_v61 = vpop.f32.mrf.mxu1 }
 0x69c   : > { %v3155_v11 = vsel %vm1225_vm4, %v6620_v61, -inf }
 0x69d   : > { %v5369_v16 = vpop.f32.mrf.mxu1 }
 0x69e   : > { %3468 = vrot.lane.b32.xlu1 %v6141_v41, %s5779_s13 }
 0x69f   : > { %v3037_v13 = vpop.f32.mrf.mxu1 }
 0x6a1   : > { %v5370_v18 = vpop.f32.mrf.mxu1 }
 0x6a3   : > { %v6624_v7 = vpop.f32.mrf.mxu1 }
 0x6a5   : > { %v5381_v51 = vpop.f32.mrf.mxu1 }
 0x6a7   : > { %v3137_v22 = vpop.f32.mrf.mxu1 }
 0x6a9   : > { %v5382_v34 = vpop.f32.mrf.mxu1 }
 0x6af   : > { %3420 = vrot.lane.b32.xlu0 %v6121_v26, %s5779_s13 }
 0x6c2   : > { %3156 = vmax.xlane.f32.xlu1 %v3155_v11 }
 0x6ce   : > { %3159 = vmax.xlane.f32.xlu0 %v3158_v12 }
 0x6d3   : > { %3564 = vrot.lane.b32.xlu1 %v6145_v42, %s5779_s13 }
 0x6d7   : > { %3672 = vrot.lane.b32.xlu1 %v6039_v57, %s5780_s14  ;;  %v3161_v57 = vsel %vm1225_vm4, %v6624_v7, -inf }
 0x6e4   : > { %3516 = vrot.lane.b32.xlu0 %v6125_v27, %s5779_s13 }
 0x6e8   : > { %3622 = vrot.lane.b32.xlu0 %v6042_v58, %s5780_s14 }
 0x6e9   : > { %v3142_v33 = vpop.xlane.xlu0 %3141 }
 0x6ea   : > { %v3164_v17 = vsub.f32 %v2784_v9, %v3142_v33 }
 0x6ec   : > { %v3172_v16 = vmul.f32 1.442695, %v3164_v17  ;;  %3620 = vrot.lane.b32.xlu0 %v6035_v29, %s5780_s14  ;;  %v3325_v29 = vpop.permute.xlu1 %3324 }
 0x6ed   : > { %v3330_v9 = vsel %vm1318_vm3, %v3325_v29, 0 }
 0x6ee   : > { %5671 = vpow2.f32 %v3172_v16 }
 0x6f0   : > { %3722 = vrot.lane.b32.xlu0 %v6045_v59, %s5780_s14 }
 0x6f1   : > { %v3148_v13 = vpop.xlane.xlu0 %3147 }
 0x6f2   : > { %v3166_v18 = vsub.f32 %v2884_v23, %v3148_v13 }
 0x6f4   : > { %v3176_v51 = vmul.f32 1.442695, %v3166_v18  ;;  %3720 = vrot.lane.b32.xlu0 %v6048_v60, %s5780_s14 }
 0x6f6   : > { %5673 = vpow2.f32 %v3176_v51 }
 0x6f8   : > { %3822 = vrot.lane.b32.xlu0 %v6025_v46, %s5780_s14 }
 0x6fb   : > { %v6650_v58 = vpop.eup %5671  ;;  %3162 = vmax.xlane.f32.xlu1 %v3161_v57 }
 0x6fc   : > { %3820 = vrot.lane.b32.xlu0 %v6052_v39, %s5780_s14  ;;  %v3220_v59 = vpack.c.bf16 %v6650_v58, %v6650_v58  ;;  %v3373_v39 = vpop.permute.xlu1 %3372 }
 0x6fe   : > { %5386 = vmatmul.mubr.msk.bf16.vlgmr.msra.gmra.mxu0 %vm1314_vm5, %v3220_v59 }
 0x6ff   : > { %5396 = vmatpush3.bf16.msra.mxu0 %v3330_v9  ;;  %5397 = vmatprep.mubr.msk.bf16.mxu0 %vm5776_vm1, %v7053_v37 }
 0x700   : > { %3922 = vrot.lane.b32.xlu0 %v6056_v38, %s5780_s14  ;;  %5407 = vmatprep.subr.bf16.mxu0 %v7053_v37 }
 0x703   : > { %v6663_v46 = vpop.eup %5673 }
 0x704   : > { %3920 = vrot.lane.b32.xlu0 %v6060_v48, %s5780_s14  ;;  %v3222_v60 = vpack.c.bf16 %v6663_v46, %v6663_v46 }
 0x706   : > { %5398 = vmatmul.mubr.msk.bf16.vlgmr.msra.gmra.mxu0 %vm1314_vm5, %v3222_v60 }
 0x707   : > { %5409 = vmatprep.mubr.msk.bf16.mxu0 %vm5776_vm1, %v7053_v37 }
 0x708   : > { %4108 = vrot.lane.b32.xlu0 %v6129_v35, %s5780_s14 }
 0x70c   : > { %3670 = vrot.lane.b32.xlu1 %v6063_v1, %s5780_s14 }
 0x710   : > { %3772 = vrot.lane.b32.xlu1 %v6066_v49, %s5780_s14 }
 0x714   : > { %3770 = vrot.lane.b32.xlu1 %v6069_v2, %s5780_s14 }
 0x716   : > { %v3145_v38 = vpop.xlane.xlu1 %3144 }
 0x717   : > { %v3165_v48 = vsub.f32 %v6610_v24, %v3145_v38 }
 0x718   : > { %3872 = vrot.lane.b32.xlu1 %v6072_v3, %s5780_s14 }
 0x719   : > { %v3174_v23 = vmul.f32 1.442695, %v3165_v48 }
 0x71b   : > { %5675 = vpow2.f32 %v3174_v23 }
 0x71c   : > { %3870 = vrot.lane.b32.xlu1 %v6076_v4, %s5780_s14 }
 0x71e   : > { %v3151_v35 = vpop.xlane.xlu0 %3150 }
 0x71f   : > { %v3167_v1 = vsub.f32 %v6614_v63, %v3151_v35 }
 0x720   : > { %3972 = vrot.lane.b32.xlu1 %v6080_v5, %s5780_s14 }
 0x721   : > { %v3178_v49 = vmul.f32 1.442695, %v3167_v1 }
 0x722   : > { %v3154_v22 = vpop.xlane.xlu0 %3153 }
 0x723   : > { %5677 = vpow2.f32 %v3178_v49  ;;  %v3168_v2 = vsub.f32 %v6604_v31, %v3154_v22  ;;  %v3378_v31 = vsel %vm1318_vm3, %v3373_v39, 0 }
 0x724   : > { %3970 = vrot.lane.b32.xlu1 %v6084_v6, %s5780_s14 }
 0x725   : > { %v3180_v3 = vmul.f32 1.442695, %v3168_v2 }
 0x726   : > { %v3421_v24 = vpop.permute.xlu0 %3420 }
 0x727   : > { %5679 = vpow2.f32 %v3180_v3  ;;  %v3426_v34 = vsel %vm1318_vm3, %v3421_v24, 0 }
 0x728   : > { %v6692_v4 = vpop.eup %5675  ;;  %5408 = vmatpush3.bf16.msra.mxu0 %v3426_v34  ;;  %4156 = vrot.lane.b32.xlu1 %v6137_v40, %s5780_s14  ;;  %v3469_v40 = vpop.permute.xlu1 %3468 }
 0x729   : > { %v3221_v5 = vpack.c.bf16 %v6692_v4, %v6692_v4  ;;  %5419 = vmatprep.subr.bf16.mxu0 %v7053_v37  ;;  %v3474_v11 = vsel %vm1318_vm3, %v3469_v40, 0 }
 0x72b   : > { %5392 = vmatmul.mubr.msk.bf16.vlgmr.msra.gmra.mxu1 %vm1314_vm5, %v3221_v5 }
 0x72c   : > { %5402 = vmatpush3.bf16.msra.mxu1 %v3378_v31  ;;  %4204 = vrot.lane.b32.xlu1 %v6248_v32, %s5780_s14 }
 0x72d   : > { %5403 = vmatprep.mubr.msk.bf16.mxu1 %vm5776_vm1, %v7053_v37  ;;  %5413 = vmatprep.subr.bf16.mxu1 %v7053_v37 }
 0x730   : > { %v6706_v6 = vpop.eup %5677  ;;  %4252 = vrot.lane.b32.xlu1 %v6254_v44, %s5780_s14 }
 0x731   : > { %v3223_v63 = vpack.c.bf16 %v6706_v6, %v6706_v6 }
 0x733   : > { %5404 = vmatmul.mubr.msk.bf16.vlgmr.msra.gmra.mxu1 %vm1314_vm5, %v3223_v63 }
 0x734   : > { %v6714_v12 = vpop.eup %5679  ;;  %5414 = vmatpush3.bf16.msra.mxu1 %v3474_v11  ;;  %5415 = vmatprep.mubr.msk.bf16.mxu1 %vm5776_vm1, %v7053_v37 }
 0x735   : > { %v3224_v32 = vpack.c.bf16 %v6714_v12, %v6714_v12  ;;  %5425 = vmatprep.subr.bf16.mxu1 %v7053_v37 }
 0x737   : > { %5410 = vmatmul.mubr.msk.bf16.vlgmr.msra.gmra.mxu0 %vm1314_vm5, %v3224_v32 }
 0x738   : > { %5421 = vmatprep.mubr.msk.bf16.mxu0 %vm5776_vm1, %v7053_v37 }
 0x74b   : > { %v3157_v44 = vpop.xlane.xlu1 %3156 }
 0x74c   : > { %v3169_v33 = vsub.f32 %v6620_v61, %v3157_v44 }
 0x74e   : > { %v3182_v17 = vmul.f32 1.442695, %v3169_v33 }
 0x74f   : > { %v3565_v59 = vpop.permute.xlu1 %3564 }
 0x750   : > { %5681 = vpow2.f32 %v3182_v17  ;;  %v3570_v60 = vsel %vm1318_vm3, %v3565_v59, 0 }
 0x753   : > { %v3673_v24 = vpop.permute.xlu1 %3672 }
 0x757   : > { %v3160_v16 = vpop.xlane.xlu0 %3159 }
 0x758   : > { %v3170_v13 = vsub.f32 %v6606_v21, %v3160_v16 }
 0x75a   : > { %v3184_v18 = vmul.f32 1.442695, %v3170_v13  ;;  %v3678_v13 = vsel %vm856_vm2, %v3673_v24, 0 }
 0x75b   : > { %v3517_v51 = vpop.permute.xlu0 %3516 }
 0x75c   : > { %5683 = vpow2.f32 %v3184_v18  ;;  %v3522_v57 = vsel %vm1318_vm3, %v3517_v51, 0 }
 0x75d   : > { %v6727_v29 = vpop.eup %5681  ;;  %5420 = vmatpush3.bf16.msra.mxu0 %v3522_v57 }
 0x75e   : > { %v3225_v9 = vpack.c.bf16 %v6727_v29, %v6727_v29  ;;  %5431 = vmatprep.subr.bf16.mxu0 %v7053_v37 }
 0x75f   : > { %v3623_v61 = vpop.permute.xlu0 %3622 }
 0x760   : > { %5416 = vmatmul.mubr.msk.bf16.vlgmr.msra.gmra.mxu1 %vm1314_vm5, %v3225_v9  ;;  %v3628_v35 = vsel %vm856_vm2, %v3623_v61, 0 }
 0x761   : > { %5426 = vmatpush3.bf16.msra.mxu1 %v3570_v60  ;;  %5427 = vmatprep.mubr.msk.bf16.mxu1 %vm5776_vm1, %v7053_v37 }
 0x762   : > { %5437 = vmatprep.subr.bf16.mxu1 %v7053_v37 }
 0x763   : > { %v3621_v21 = vpop.permute.xlu0 %3620 }
 0x767   : > { %v3723_v39 = vpop.permute.xlu0 %3722 }
 0x768   : > { %v3728_v49 = vsel %vm856_vm2, %v3723_v39, 0 }
 0x769   : > { %v6737_v38 = vpop.eup %5683 }
 0x76a   : > { %v3226_v48 = vpack.c.bf16 %v6737_v38, %v6737_v38 }
 0x76b   : > { %v3721_v23 = vpop.permute.xlu0 %3720 }
 0x76c   : > { %5422 = vmatmul.mubr.msk.bf16.vlgmr.msra.gmra.mxu0 %vm1314_vm5, %v3226_v48 }
 0x76d   : > { %5432 = vmatpush3.bf16.xpose.msra.mxu0 %v3628_v35  ;;  %5433 = vmatprep.mubr.msk.bf16.mxu0 %vm5776_vm1, %v7053_v37 }
 0x76e   : > { %5443 = vmatprep.subr.bf16.mxu0 %v7053_v37 }
 0x76f   : > { %v3823_v1 = vpop.permute.xlu0 %3822 }
 0x770   : > { %v3828_v2 = vsel %vm856_vm2, %v3823_v1, 0 }
 0x773   : > { %v3821_v22 = vpop.permute.xlu0 %3820 }
 0x774   : > { %5434 = vmatmul.mubr.msk.bf16.vlgmr.msra.gmra.mxu0 %vm856_vm2, %v3621_v21 }
 0x775   : > { %5444 = vmatpush3.bf16.xpose.msra.mxu0 %v3728_v49  ;;  %5445 = vmatprep.mubr.msk.bf16.mxu0 %vm5776_vm1, %v7053_v37 }
 0x776   : > { %5455 = vmatprep.subr.bf16.mxu0 %v7053_v37 }
 0x777   : > { %v3923_v3 = vpop.permute.xlu0 %3922 }
 0x778   : > { %v3928_v5 = vsel %vm856_vm2, %v3923_v3, 0 }
 0x77b   : > { %v3921_v34 = vpop.permute.xlu0 %3920 }
 0x77c   : > { %5446 = vmatmul.mubr.msk.bf16.vlgmr.msra.gmra.mxu0 %vm856_vm2, %v3721_v23 }
 0x77d   : > { %5456 = vmatpush3.bf16.xpose.msra.mxu0 %v3828_v2  ;;  %5457 = vmatprep.mubr.msk.bf16.mxu0 %vm5776_vm1, %v7053_v37 }
 0x77e   : > { %5467 = vmatprep.subr.bf16.mxu0 %v7053_v37 }
 0x77f   : > { %v4109_v11 = vpop.permute.xlu0 %4108 }
 0x780   : > { %v4114_v32 = vsel %vm1318_vm3, %v4109_v11, 0 }
 0x784   : > { %5458 = vmatmul.mubr.msk.bf16.vlgmr.msra.gmra.mxu0 %vm856_vm2, %v3821_v22  ;;  %v3163_v31 = vpop.xlane.xlu1 %3162 }
 0x785   : > { %5468 = vmatpush3.bf16.xpose.msra.mxu0 %v3928_v5  ;;  %v3171_v40 = vsub.f32 %v6624_v7, %v3163_v31  ;;  %5469 = vmatprep.mubr.msk.bf16.mxu0 %vm5776_vm1, %v7053_v37 }
 0x786   : > { %5479 = vmatprep.subr.bf16.mxu0 %v7053_v37 }
 0x787   : > { %v3186_v63 = vmul.f32 1.442695, %v3171_v40 }
 0x788   : > { %v3671_v44 = vpop.permute.xlu1 %3670 }
 0x789   : > { %5685 = vpow2.f32 %v3186_v63 }
 0x78c   : > { %5470 = vmatmul.mubr.msk.bf16.vlgmr.msra.gmra.mxu0 %vm856_vm2, %v3921_v34  ;;  %v3773_v7 = vpop.permute.xlu1 %3772 }
 0x78d   : > { %5480 = vmatpush3.bf16.msra.mxu0 %v4114_v32  ;;  %5481 = vmatprep.mubr.msk.bf16.mxu0 %vm5776_vm1, %v7053_v37  ;;  %v3778_v51 = vsel %vm856_vm2, %v3773_v7, 0 }
 0x78e   : > { %5491 = vmatprep.subr.bf16.mxu0 %v7053_v37 }
 0x790   : > { %v3771_v16 = vpop.permute.xlu1 %3770 }
 0x794   : > { %v3873_v18 = vpop.permute.xlu1 %3872 }
 0x795   : > { %v3878_v59 = vsel %vm856_vm2, %v3873_v18, 0 }
 0x796   : > { %v6767_v33 = vpop.eup %5685 }
 0x797   : > { %v3227_v17 = vpack.c.bf16 %v6767_v33, %v6767_v33 }
 0x798   : > { %v3871_v57 = vpop.permute.xlu1 %3870 }
 0x799   : > { %5428 = vmatmul.mubr.msk.bf16.vlgmr.msra.gmra.mxu1 %vm1314_vm5, %v3227_v17 }
 0x79a   : > { %5438 = vmatpush3.bf16.xpose.msra.mxu1 %v3678_v13  ;;  %5439 = vmatprep.mubr.msk.bf16.mxu1 %vm5776_vm1, %v7053_v37 }
 0x79b   : > { %5449 = vmatprep.subr.bf16.mxu1 %v7053_v37 }
 0x79c   : > { %v3973_v9 = vpop.permute.xlu1 %3972 }
 0x79d   : > { %v3978_v60 = vsel %vm856_vm2, %v3973_v9, 0 }
 0x7a0   : > { %v3971_v61 = vpop.permute.xlu1 %3970 }
 0x7a1   : > { %5440 = vmatmul.mubr.msk.bf16.vlgmr.msra.gmra.mxu1 %vm856_vm2, %v3671_v44 }
 0x7a2   : > { %5450 = vmatpush3.bf16.xpose.msra.mxu1 %v3778_v51  ;;  %5451 = vmatprep.mubr.msk.bf16.mxu1 %vm5776_vm1, %v7053_v37 }
 0x7a3   : > { %5461 = vmatprep.subr.bf16.mxu1 %v7053_v37 }
 0x7a4   : > { %v4157_v21 = vpop.permute.xlu1 %4156 }
 0x7a5   : > { %v4162_v39 = vsel %vm1318_vm3, %v4157_v21, 0 }
 0x7a9   : > { %5452 = vmatmul.mubr.msk.bf16.vlgmr.msra.gmra.mxu1 %vm856_vm2, %v3771_v16 }
 0x7aa   : > { %5462 = vmatpush3.bf16.xpose.msra.mxu1 %v3878_v59  ;;  %5463 = vmatprep.mubr.msk.bf16.mxu1 %vm5776_vm1, %v7053_v37 }
 0x7ab   : > { %5473 = vmatprep.subr.bf16.mxu1 %v7053_v37 }
 0x7b1   : > { %5464 = vmatmul.mubr.msk.bf16.vlgmr.msra.gmra.mxu1 %vm856_vm2, %v3871_v57 }
 0x7b2   : > { %5474 = vmatpush3.bf16.xpose.msra.mxu1 %v3978_v60  ;;  %5475 = vmatprep.mubr.msk.bf16.mxu1 %vm5776_vm1, %v7053_v37 }
 0x7b3   : > { %5485 = vmatprep.subr.bf16.mxu1 %v7053_v37 }
 0x7b9   : > { %5476 = vmatmul.mubr.msk.bf16.vlgmr.msra.gmra.mxu1 %vm856_vm2, %v3971_v61 }
 0x7ba   : > { %5486 = vmatpush3.bf16.msra.mxu1 %v4162_v39  ;;  %5487 = vmatprep.mubr.msk.bf16.mxu1 %vm5776_vm1, %v7053_v37 }
 0x7bb   : > { %5497 = vmatprep.subr.bf16.mxu1 %v7053_v37 }
 0x7be   : > { %v6796_v48 = vpop.f32.mrf.mxu0 }
 0x7c0   : > { %v5387_v23 = vpop.f32.mrf.mxu0 }
 0x7c2   : > { %v3273_v35 = vpop.f32.mrf.mxu0 }
 0x7c4   : > { %v5388_v1 = vpop.f32.mrf.mxu0 }
 0x7c6   : > { %v6798_v49 = vpop.f32.mrf.mxu0 }
 0x7c8   : > { %v5399_v22 = vpop.f32.mrf.mxu0 }
 0x7ca   : > { %v3369_v2 = vpop.f32.mrf.mxu0 }
 0x7cc   : > { %v5400_v3 = vpop.f32.mrf.mxu0 }
 0x7eb   : > { %v6800_v24 = vpop.f32.mrf.mxu1 }
 0x7ed   : > { %v5393_v34 = vpop.f32.mrf.mxu1 }
 0x7ef   : > { %v3321_v5 = vpop.f32.mrf.mxu1 }
 0x7f1   : > { %v5394_v31 = vpop.f32.mrf.mxu1 }
 0x7f3   : > { %v6802_v40 = vpop.f32.mrf.mxu1 }
 0x7f5   : > { %v5405_v63 = vpop.f32.mrf.mxu1 }
 0x7f7   : > { %v3417_v11 = vpop.f32.mrf.mxu1  ;;  %v6804_v32 = vpop.f32.mrf.mxu0 }
 0x7f9   : > { %v5406_v44 = vpop.f32.mrf.mxu1  ;;  %v5411_v7 = vpop.f32.mrf.mxu0 }
 0x7fb   : > { %v3465_v17 = vpop.f32.mrf.mxu0 }
 0x7fd   : > { %v5412_v16 = vpop.f32.mrf.mxu0 }
 0x820   : > { %v6806_v13 = vpop.f32.mrf.mxu1 }
 0x822   : > { %v5417_v18 = vpop.f32.mrf.mxu1 }
 0x824   : > { %v3513_v51 = vpop.f32.mrf.mxu1 }
 0x826   : > { %v5418_v57 = vpop.f32.mrf.mxu1 }
 0x82c   : > { %v6808_v59 = vpop.f32.mrf.mxu0 }
 0x82e   : > { %v5423_v9 = vpop.f32.mrf.mxu0 }
 0x830   : > { %v3561_v61 = vpop.f32.mrf.mxu0 }
 0x832   : > { %v5424_v60 = vpop.f32.mrf.mxu0 }
 0x834   : > { %v3664_v21 = vpop.f32.mrf.mxu0 }
 0x835   : > { %v4020_v39 = vsel %vm1225_vm4, %v3664_v21, -inf }
 0x836   : > { %4021 = vmax.xlane.f32.xlu0 %v4020_v39  ;;  %v5435_v23 = vpop.f32.mrf.mxu0 }
 0x838   : > { %v3667_v35 = vpop.f32.mrf.mxu0 }
 0x83a   : > { %v5436_v1 = vpop.f32.mrf.mxu0 }
 0x83c   : > { %v3764_v22 = vpop.f32.mrf.mxu0 }
 0x83d   : > { %v4026_v2 = vsel %vm1225_vm4, %v3764_v22, -inf }
 0x83e   : > { %4027 = vmax.xlane.f32.xlu0 %v4026_v2  ;;  %v5447_v3 = vpop.f32.mrf.mxu0 }
 0x840   : > { %v3767_v34 = vpop.f32.mrf.mxu0 }
 0x842   : > { %v5448_v5 = vpop.f32.mrf.mxu0 }
 0x844   : > { %v6812_v31 = vpop.f32.mrf.mxu0 }
 0x846   : > { %v5459_v63 = vpop.f32.mrf.mxu0 }
 0x847   : > { %v4032_v63 = vsel %vm1225_vm4, %v6812_v31, -inf }
 0x848   : > { %v3867_v11 = vpop.f32.mrf.mxu0 }
 0x84a   : > { %v5460_v44 = vpop.f32.mrf.mxu0 }
 0x84c   : > { %v6814_v7 = vpop.f32.mrf.mxu0 }
 0x84e   : > { %v5471_v17 = vpop.f32.mrf.mxu0 }
 0x850   : > { %v3967_v16 = vpop.f32.mrf.mxu0 }
 0x852   : > { %v5472_v18 = vpop.f32.mrf.mxu0 }
 0x859   : > { %v6816_v51 = vpop.f32.mrf.mxu1 }
 0x85b   : > { %v5429_v57 = vpop.f32.mrf.mxu1 }
 0x85d   : > { %v3609_v9 = vpop.f32.mrf.mxu1 }
 0x85f   : > { %v5430_v61 = vpop.f32.mrf.mxu1 }
 0x861   : > { %v6818_v60 = vpop.f32.mrf.mxu1 }
 0x862   : > { %v4023_v39 = vsel %vm1225_vm4, %v6818_v60, -inf }
 0x863   : > { %4024 = vmax.xlane.f32.xlu1 %v4023_v39  ;;  %v5441_v23 = vpop.f32.mrf.mxu1 }
 0x865   : > { %v3717_v35 = vpop.f32.mrf.mxu1 }
 0x867   : > { %v5442_v1 = vpop.f32.mrf.mxu1 }
 0x869   : > { %v6822_v2 = vpop.f32.mrf.mxu1 }
 0x86a   : > { %v4029_v3 = vsel %vm1225_vm4, %v6822_v2, -inf }
 0x86b   : > { %4030 = vmax.xlane.f32.xlu0 %v4029_v3  ;;  %v5453_v34 = vpop.f32.mrf.mxu1 }
 0x86d   : > { %v3817_v5 = vpop.f32.mrf.mxu1 }
 0x86f   : > { %4033 = vmax.xlane.f32.xlu0 %v4032_v63  ;;  %v5454_v11 = vpop.f32.mrf.mxu1 }
 0x870   : > { %v2255_v11 = vsel %vm1225_vm4, %v6484_v14, 0.0  ;;  %v2252_v14 = vsel %vm1225_vm4, %v6438_v25, 0.0  ;;  %v2261_v25 = vsel %vm1225_vm4, %v6498_v30, 0.0  ;;  %v3209_v30 = vsel %vm1225_vm4, %v6767_v33, 0.0 }
 0x871   : > { %v6828_v44 = vpop.f32.mrf.mxu1 }
 0x872   : > { %v4035_v23 = vsel %vm1225_vm4, %v6828_v44, -inf }
 0x873   : > { %v5465_v17 = vpop.f32.mrf.mxu1 }
 0x874   : > { %4348 = vrot.lane.b32.xlu1 %v6141_v41, %s5780_s14  ;;  %v4038_v41 = vsel %vm1225_vm4, %v6814_v7, -inf }
 0x875   : > { %v3917_v16 = vpop.f32.mrf.mxu1 }
 0x876   : > { %v4205_v16 = vpop.permute.xlu1 %4204 }
 0x877   : > { %v5466_v18 = vpop.f32.mrf.mxu1 }
 0x879   : > { %v6832_v57 = vpop.f32.mrf.mxu1 }
 0x87a   : > { %v4041_v35 = vsel %vm1225_vm4, %v6832_v57, -inf }
 0x87b   : > { %v5477_v9 = vpop.f32.mrf.mxu1 }
 0x87d   : > { %v4017_v61 = vpop.f32.mrf.mxu1 }
 0x87e   : > { %v3191_v61 = vsel %vm1225_vm4, %v6692_v4, 0.0  ;;  %v4253_v4 = vpop.permute.xlu1 %4252 }
 0x87f   : > { %v5478_v39 = vpop.f32.mrf.mxu1 }
 0x880   : > { %v2264_v39 = vsel %vm1225_vm4, %v6506_v8, 0.0 }
 0x885   : > { %4300 = vrot.lane.b32.xlu0 %v6121_v26, %s5780_s14 }
 0x898   : > { %4036 = vmax.xlane.f32.xlu1 %v4035_v23  ;;  %v2270_v23 = vsel %vm1225_vm4, %v6529_v10, 0.0  ;;  %v3200_v10 = vsel %vm1225_vm4, %v6714_v12, 0.0 }
 0x89c   : > { %4042 = vmax.xlane.f32.xlu1 %v4041_v35  ;;  %v3188_v35 = vsel %vm1225_vm4, %v6650_v58, 0.0  ;;  %v3206_v58 = vsel %vm1225_vm4, %v6737_v38, 0.0 }
 0x8a4   : > { %4039 = vmax.xlane.f32.xlu0 %v4038_v41 }
 0x8ad   : > { %4444 = vrot.lane.b32.xlu1 %v6145_v42, %s5780_s14  ;;  %v4210_v42 = vsel %vm1318_vm3, %v4205_v16, 0 }
 0x8ba   : > { %4396 = vrot.lane.b32.xlu0 %v6125_v27, %s5780_s14  ;;  %v2267_v27 = vsel %vm1225_vm4, %v6519_v0, 0.0  ;;  %v2258_v0 = vsel %vm1225_vm4, %v6453_v54, 0.0  ;;  %v3203_v54 = vsel %vm1225_vm4, %v6727_v29, 0.0  ;;  %v3194_v29 = vsel %vm1225_vm4, %v6663_v46, 0.0 }
 0x8bf   : > { %v4022_v1 = vpop.xlane.xlu0 %4021 }
 0x8c0   : > { %v4044_v26 = vsub.f32 %v3664_v21, %v4022_v1  ;;  %v2273_v21 = vsel %vm1225_vm4, %v6559_v36, 0.0  ;;  %v3197_v36 = vsel %vm1225_vm4, %v6706_v6, 0.0 }
 0x8c2   : > { %v4052_v3 = vmul.f32 1.442695, %v4044_v26 }
 0x8c4   : > { %5687 = vpow2.f32 %v4052_v3 }
 0x8c7   : > { %v4028_v34 = vpop.xlane.xlu0 %4027 }
 0x8c8   : > { %v4046_v5 = vsub.f32 %v3764_v22, %v4028_v34 }
 0x8ca   : > { %v4056_v63 = vmul.f32 1.442695, %v4046_v5 }
 0x8cc   : > { %5689 = vpow2.f32 %v4056_v63 }
 0x8d1   : > { %v5688_v17 = vpop.eup %5687  ;;  %2256 = vadd.xlane.f32.xlu1 %v2255_v11 }
 0x8d2   : > { %v4100_v18 = vpack.c.bf16 %v5688_v17, %v5688_v17  ;;  %v4068_v5 = vsel %vm1225_vm4, %v5688_v17, 0.0 }
 0x8d4   : > { %5482 = vmatmul.mubr.msk.bf16.vlgmr.msra.gmra.mxu0 %vm1314_vm5, %v4100_v18 }
 0x8d5   : > { %5492 = vmatpush3.bf16.msra.mxu0 %v4210_v42  ;;  %2268 = vadd.xlane.f32.xlu1 %v2267_v27 }
 0x8d6   : > { %5493 = vmatprep.mubr.msk.bf16.mxu0 %vm5776_vm1, %v7053_v37  ;;  %5503 = vmatprep.subr.bf16.mxu0 %v7053_v37 }
 0x8d9   : > { %v5690_v22 = vpop.eup %5689  ;;  %2253 = vadd.xlane.f32.xlu0 %v2252_v14  ;;  %2274 = vadd.xlane.f32.xlu1 %v2273_v21 }
 0x8da   : > { %v4102_v9 = vpack.c.bf16 %v5690_v22, %v5690_v22  ;;  %v4074_v38 = vsel %vm1225_vm4, %v5690_v22, 0.0 }
 0x8dc   : > { %5494 = vmatmul.mubr.msk.bf16.vlgmr.msra.gmra.mxu0 %vm1314_vm5, %v4102_v9 }
 0x8dd   : > { %2259 = vadd.xlane.f32.xlu0 %v2258_v0  ;;  %3192 = vadd.xlane.f32.xlu1 %v3191_v61 }
 0x8de   : > { %5505 = vmatprep.mubr.msk.bf16.mxu0 %vm5776_vm1, %v7053_v37 }
 0x8e1   : > { %2262 = vadd.xlane.f32.xlu0 %v2261_v25  ;;  %3198 = vadd.xlane.f32.xlu1 %v3197_v36 }
 0x8e5   : > { %2265 = vadd.xlane.f32.xlu0 %v2264_v39  ;;  %3204 = vadd.xlane.f32.xlu1 %v3203_v54 }
 0x8e9   : > { %2271 = vadd.xlane.f32.xlu0 %v2270_v23  ;;  %3210 = vadd.xlane.f32.xlu1 %v3209_v30 }
 0x8ec   : > { %v4025_v6 = vpop.xlane.xlu1 %4024 }
 0x8ed   : > { %v4045_v8 = vsub.f32 %v6818_v60, %v4025_v6  ;;  %3189 = vadd.xlane.f32.xlu0 %v3188_v35 }
 0x8ef   : > { %v4054_v41 = vmul.f32 1.442695, %v4045_v8 }
 0x8f0   : > { %v4349_v16 = vpop.permute.xlu1 %4348 }
 0x8f1   : > { %5691 = vpow2.f32 %v4054_v41  ;;  %3195 = vadd.xlane.f32.xlu0 %v3194_v29  ;;  %v4354_v27 = vsel %vm1318_vm3, %v4349_v16, 0 }
 0x8f4   : > { %v4031_v1 = vpop.xlane.xlu0 %4030 }
 0x8f5   : > { %v4047_v33 = vsub.f32 %v6822_v2, %v4031_v1  ;;  %3201 = vadd.xlane.f32.xlu0 %v3200_v10  ;;  %v1277_v10 = vsel %vm1225_vm4, %v6269_v56, 0.0  ;;  %v1289_v56 = vsel %vm1225_vm4, %v6311_v28, 0.0 }
 0x8f7   : > { %v4058_v26 = vmul.f32 1.442695, %v4047_v33 }
 0x8f8   : > { %v4034_v3 = vpop.xlane.xlu0 %4033 }
 0x8f9   : > { %5693 = vpow2.f32 %v4058_v26  ;;  %v4048_v60 = vsub.f32 %v6812_v31, %v4034_v3  ;;  %3207 = vadd.xlane.f32.xlu0 %v3206_v58  ;;  %v4258_v31 = vsel %vm1318_vm3, %v4253_v4, 0  ;;  %v1283_v58 = vsel %vm1225_vm4, %v6290_v43, 0.0 }
 0x8fa   : > { %v1286_v43 = vsel %vm1225_vm4, %v6301_v47, 0.0 }
 0x8fb   : > { %v4060_v34 = vmul.f32 1.442695, %v4048_v60  ;;  %v1280_v60 = vsel %vm1225_vm4, %v6279_v15, 0.0 }
 0x8fc   : > { %v4301_v46 = vpop.permute.xlu0 %4300 }
 0x8fd   : > { %5695 = vpow2.f32 %v4060_v34  ;;  %v4306_v63 = vsel %vm1318_vm3, %v4301_v46, 0  ;;  %4069 = vadd.xlane.f32.xlu0 %v4068_v5  ;;  %v1295_v34 = vsel %vm1225_vm4, %v6351_v20, 0.0 }
 0x8fe   : > { %v5692_v12 = vpop.eup %5691  ;;  %5504 = vmatpush3.bf16.msra.mxu0 %v4306_v63 }
 0x8ff   : > { %v4101_v2 = vpack.c.bf16 %v5692_v12, %v5692_v12  ;;  %v4071_v11 = vsel %vm1225_vm4, %v5692_v12, 0.0  ;;  %5515 = vmatprep.subr.bf16.mxu0 %v7053_v37 }
 0x900   : > { %4072 = vadd.xlane.f32.xlu1 %v4071_v11 }
 0x901   : > { %5488 = vmatmul.mubr.msk.bf16.vlgmr.msra.gmra.mxu1 %vm1314_vm5, %v4101_v2  ;;  %4075 = vadd.xlane.f32.xlu0 %v4074_v38 }
 0x902   : > { %5498 = vmatpush3.bf16.msra.mxu1 %v4258_v31  ;;  %5499 = vmatprep.mubr.msk.bf16.mxu1 %vm5776_vm1, %v7053_v37 }
 0x903   : > { %5509 = vmatprep.subr.bf16.mxu1 %v7053_v37 }
 0x906   : > { %v5694_v17 = vpop.eup %5693 }
 0x907   : > { %v4103_v18 = vpack.c.bf16 %v5694_v17, %v5694_v17  ;;  %v4077_v42 = vsel %vm1225_vm4, %v5694_v17, 0.0 }
 0x908   : > { %4078 = vadd.xlane.f32.xlu1 %v4077_v42 }
 0x909   : > { %5500 = vmatmul.mubr.msk.bf16.vlgmr.msra.gmra.mxu1 %vm1314_vm5, %v4103_v18 }
 0x90a   : > { %v5696_v14 = vpop.eup %5695  ;;  %5510 = vmatpush3.bf16.msra.mxu1 %v4354_v27  ;;  %5511 = vmatprep.mubr.msk.bf16.mxu1 %vm5776_vm1, %v7053_v37 }
 0x90b   : > { %v4104_v21 = vpack.c.bf16 %v5696_v14, %v5696_v14  ;;  %v4080_v22 = vsel %vm1225_vm4, %v5696_v14, 0.0  ;;  %5521 = vmatprep.subr.bf16.mxu1 %v7053_v37 }
 0x90c   : > { %4081 = vadd.xlane.f32.xlu0 %v4080_v22 }
 0x90d   : > { %5506 = vmatmul.mubr.msk.bf16.vlgmr.msra.gmra.mxu0 %vm1314_vm5, %v4104_v21 }
 0x90e   : > { %5517 = vmatprep.mubr.msk.bf16.mxu0 %vm5776_vm1, %v7053_v37 }
 0x921   : > { %v4037_v9 = vpop.xlane.xlu1 %4036 }
 0x922   : > { %v4049_v0 = vsub.f32 %v6828_v44, %v4037_v9 }
 0x924   : > { %v4062_v61 = vmul.f32 1.442695, %v4049_v0 }
 0x925   : > { %v4043_v25 = vpop.xlane.xlu1 %4042 }
 0x926   : > { %5697 = vpow2.f32 %v4062_v61  ;;  %v4051_v36 = vsub.f32 %v6832_v57, %v4043_v25 }
 0x928   : > { %v4066_v39 = vmul.f32 1.442695, %v4051_v36 }
 0x929   : > { %v4445_v8 = vpop.permute.xlu1 %4444 }
 0x92a   : > { %5699 = vpow2.f32 %v4066_v39  ;;  %v4450_v29 = vsel %vm1318_vm3, %v4445_v8, 0 }
 0x92d   : > { %v4040_v54 = vpop.xlane.xlu0 %4039 }
 0x92e   : > { %v4050_v4 = vsub.f32 %v6814_v7, %v4040_v54 }
 0x930   : > { %v4064_v23 = vmul.f32 1.442695, %v4050_v4  ;;  %v7057_v4 = vld [vmem:[#allocation18_spill] sm:$0xff] }
 0x931   : > { %v4397_v30 = vpop.permute.xlu0 %4396 }
 0x932   : > { %5701 = vpow2.f32 %v4064_v23  ;;  %v4402_v6 = vsel %vm1318_vm3, %v4397_v30, 0  ;;  %v7059_v30 = vld [vmem:[#allocation20_spill] sm:$0xff] }
 0x933   : > { %v5698_v35 = vpop.eup %5697  ;;  %5516 = vmatpush3.bf16.msra.mxu0 %v4402_v6 }
 0x934   : > { %v4105_v41 = vpack.c.bf16 %v5698_v35, %v5698_v35  ;;  %v4083_v44 = vsel %vm1225_vm4, %v5698_v35, 0.0 }
 0x935   : > { %4084 = vadd.xlane.f32.xlu1 %v4083_v44 }
 0x936   : > { %5512 = vmatmul.mubr.msk.bf16.vlgmr.msra.gmra.mxu1 %vm1314_vm5, %v4105_v41 }
 0x937   : > { %v5700_v57 = vpop.eup %5699  ;;  %5522 = vmatpush3.bf16.msra.mxu1 %v4450_v29  ;;  %5523 = vmatprep.mubr.msk.bf16.mxu1 %vm5776_vm1, %v7053_v37  ;;  %v1274_v37 = vsel %vm1225_vm4, %v6259_v45, 0.0  ;;  %v1292_v45 = vsel %vm1225_vm4, %v6321_v19, 0.0 }
 0x938   : > { %v4089_v7 = vsel %vm1225_vm4, %v5700_v57, 0.0  ;;  %v4107_v1 = vpack.c.bf16 %v5700_v57, %v5700_v57 }
 0x939   : > { %4090 = vadd.xlane.f32.xlu1 %v4089_v7 }
 0x93d   : > { %1278 = vadd.xlane.f32.xlu1 %v1277_v10 }
 0x93e   : > { %5524 = vmatmul.mubr.msk.bf16.vlgmr.msra.gmra.mxu1 %vm1314_vm5, %v4107_v1 }
 0x93f   : > { %v5702_v33 = vpop.eup %5701 }
 0x940   : > { %v4106_v26 = vpack.c.bf16 %v5702_v33, %v5702_v33  ;;  %v4086_v3 = vsel %vm1225_vm4, %v5702_v33, 0.0 }
 0x941   : > { %4087 = vadd.xlane.f32.xlu0 %v4086_v3  ;;  %1284 = vadd.xlane.f32.xlu1 %v1283_v58 }
 0x942   : > { %5518 = vmatmul.mubr.msk.bf16.vlgmr.msra.gmra.mxu0 %vm1314_vm5, %v4106_v26 }
 0x945   : > { %1275 = vadd.xlane.f32.xlu0 %v1274_v37  ;;  %1290 = vadd.xlane.f32.xlu1 %v1289_v56 }
 0x949   : > { %1281 = vadd.xlane.f32.xlu0 %v1280_v60  ;;  %1296 = vadd.xlane.f32.xlu1 %v1295_v34 }
 0x94d   : > { %1287 = vadd.xlane.f32.xlu0 %v1286_v43 }
 0x951   : > { %1293 = vadd.xlane.f32.xlu0 %v1292_v45 }
 0x95a   : > { %v2257_v46 = vpop.xlane.xlu1 %2256 }
 0x95e   : > { %v2269_v28 = vpop.xlane.xlu1 %2268 }
 0x962   : > { %v2254_v5 = vpop.xlane.xlu0 %2253  ;;  %v2275_v63 = vpop.xlane.xlu1 %2274 }
 0x963   : > { %5703 = vrcp.f32 %v2254_v5 }
 0x964   : > { %5705 = vrcp.f32 %v2257_v46 }
 0x966   : > { %v2260_v12 = vpop.xlane.xlu0 %2259  ;;  %v3193_v20 = vpop.xlane.xlu1 %3192 }
 0x967   : > { %5707 = vrcp.f32 %v2260_v12 }
 0x96a   : > { %v2263_v15 = vpop.xlane.xlu0 %2262  ;;  %v3199_v47 = vpop.xlane.xlu1 %3198 }
 0x96b   : > { %5709 = vrcp.f32 %v2263_v15 }
 0x96e   : > { %v2266_v2 = vpop.xlane.xlu0 %2265  ;;  %v3205_v42 = vpop.xlane.xlu1 %3204 }
 0x96f   : > { %5711 = vrcp.f32 %v2266_v2 }
 0x970   : > { %5713 = vrcp.f32 %v2269_v28  ;;  %v5704_v19 = vpop.eup %5703 }
 0x971   : > { %5715 = vrcp.f32 %v2275_v63  ;;  %v5706_v38 = vpop.eup %5705  ;;  %v2732_v16 = vmul.f32 %v5704_v19, %v6585_v55 }
 0x972   : > { %v2272_v11 = vpop.xlane.xlu0 %2271  ;;  %v2733_v27 = vmul.f32 %v5706_v38, %v6592_v50  ;;  %v3211_v54 = vpop.xlane.xlu1 %3210 }
 0x973   : > { %5717 = vrcp.f32 %v2272_v11 }
 0x974   : > { %v5708_v31 = vpop.eup %5707  ;;  %v4524_v9 = vcombine.low %v2732_v16, %v2733_v27 }
 0x975   : > { %v2734_v14 = vmul.f32 %v5708_v31, %v6590_v53  ;;  %v7058_v53 = vld [vmem:[#allocation19_spill] sm:$0xff] }
 0x976   : > { %v3190_v17 = vpop.xlane.xlu0 %3189 }
 0x977   : > { %5719 = vrcp.f32 %v3190_v17 }
 0x978   : > { %v5710_v18 = vpop.eup %5709  ;;  %5721 = vrcp.f32 %v3193_v20 }
 0x979   : > { %5723 = vrcp.f32 %v3199_v47  ;;  %v2735_v21 = vmul.f32 %v5710_v18, %v6594_v52 }
 0x97a   : > { %v3196_v22 = vpop.xlane.xlu0 %3195 }
 0x97b   : > { %5725 = vrcp.f32 %v3196_v22  ;;  %v4525_v0 = vcombine.low %v2734_v14, %v2735_v21  ;;  %v5615_v21 = vld [vmem:[%s7025_s5 + $0x38] sm:$0xff]   ;;  %v5616_v22 = vld [vmem:[%s7025_s5 + $0x30] sm:$0xff]  }
 0x97c   : > { %v5712_v61 = vpop.eup %5711  ;;  %5527 = vmatprep.subr.bf16.mxu0 %v5615_v21 }
 0x97d   : > { %v5714_v25 = vpop.eup %5713  ;;  %v5561_v36 = vpack.i.bf16 %v4525_v0, %v4524_v9  ;;  %v2736_v23 = vmul.f32 %v5712_v61, %v7057_v4  ;;  %5528 = vmatpush3.bf16.msra.mxu0 %v5615_v21  ;;  %v5617_v4 = vld [vmem:[%s7025_s5 + $0x28] sm:$0xff]   ;;  %v7060_v21 = vld [vmem:[#allocation10_spill] sm:$0xff] }
 0x97e   : > { %v5716_v39 = vpop.eup %5715  ;;  %v3202_v55 = vpop.xlane.xlu0 %3201  ;;  %v2737_v52 = vmul.f32 %v5714_v25, %v7058_v53  ;;  %5529 = vmatprep.subr.bf16.mxu0 %v5616_v22 }
 0x97f   : > { %5727 = vrcp.f32 %v3202_v55  ;;  %5562 = vrot.lane.b32.xlu0 %v5561_v36, %s5780_s14  ;;  %v2739_v35 = vmul.f32 %v5716_v39, %v6608_v62 }
 0x980   : > { %v5718_v50 = vpop.eup %5717  ;;  %5729 = vrcp.f32 %v3205_v42  ;;  %v4526_v41 = vcombine.low %v2736_v23, %v2737_v52 }
 0x981   : > { %5731 = vrcp.f32 %v3211_v54  ;;  %v2738_v6 = vmul.f32 %v5718_v50, %v7059_v30  ;;  %5530 = vmatpush3.bf16.msra.mxu0 %v5616_v22 }
 0x982   : > { %v3208_v8 = vpop.xlane.xlu0 %3207  ;;  %5531 = vmatprep.subr.bf16.mxu0 %v5617_v4 }
 0x983   : > { %5733 = vrcp.f32 %v3208_v8  ;;  %v4527_v44 = vcombine.low %v2738_v6, %v2739_v35  ;;  %v5618_v6 = vld [vmem:[%s7025_s5 + $0x20] sm:$0xff]  }
 0x984   : > { %v5720_v29 = vpop.eup %5719 }
 0x985   : > { %v5722_v57 = vpop.eup %5721  ;;  %v5566_v7 = vpack.i.bf16 %v4527_v44, %v4526_v41  ;;  %v3612_v10 = vmul.f32 %v5720_v29, %v6796_v48  ;;  %5532 = vmatpush3.bf16.msra.mxu0 %v5617_v4  ;;  %v5619_v41 = vld [vmem:[%s7025_s5 + $0x18] sm:$0xff]   ;;  %v5620_v44 = vld [vmem:[%s7025_s5 + $0x10] sm:$0xff]   ;;  %v5621_v29 = vld [vmem:[%s7025_s5 + $0x8] sm:$0xff]  }
 0x986   : > { %v5724_v1 = vpop.eup %5723  ;;  %v3613_v26 = vmul.f32 %v5722_v57, %v6800_v24  ;;  %v4070_v19 = vpop.xlane.xlu0 %4069  ;;  %5533 = vmatprep.subr.bf16.mxu0 %v5618_v6 }
 0x987   : > { %5567 = vrot.lane.b32.xlu1 %v5566_v7, %s5780_s14  ;;  %v3615_v58 = vmul.f32 %v5724_v1, %v6802_v40  ;;  %5735 = vrcp.f32 %v4070_v19 }
 0x988   : > { %v5726_v33 = vpop.eup %5725  ;;  %v4548_v62 = vcombine.low %v3612_v10, %v3613_v26 }
 0x989   : > { %v3614_v3 = vmul.f32 %v5726_v33, %v6798_v49  ;;  %v4073_v38 = vpop.xlane.xlu1 %4072  ;;  %5534 = vmatpush3.bf16.msra.mxu0 %v5618_v6 }
 0x98a   : > { %5737 = vrcp.f32 %v4073_v38  ;;  %5535 = vmatprep.subr.bf16.mxu0 %v5619_v41 }
 0x98b   : > { %v4549_v37 = vcombine.low %v3614_v3, %v3615_v58 }
 0x98c   : > { %v5728_v56 = vpop.eup %5727 }
 0x98d   : > { %v5730_v60 = vpop.eup %5729  ;;  %v5571_v34 = vpack.i.bf16 %v4549_v37, %v4548_v62  ;;  %v3616_v45 = vmul.f32 %v5728_v56, %v6804_v32  ;;  %5536 = vmatpush3.bf16.msra.mxu0 %v5619_v41  ;;  %v5622_v56 = vld [vmem:[%s7025_s5] sm:$0xff]  }
 0x98e   : > { %v5732_v43 = vpop.eup %5731  ;;  %v3617_v48 = vmul.f32 %v5730_v60, %v6806_v13  ;;  %v4076_v13 = vpop.xlane.xlu0 %4075  ;;  %5537 = vmatprep.subr.bf16.mxu0 %v5620_v44 }
 0x98f   : > { %5572 = vrot.lane.b32.xlu1 %v5571_v34, %s5779_s13  ;;  %v3619_v24 = vmul.f32 %v5732_v43, %v6816_v51  ;;  %5739 = vrcp.f32 %v4076_v13 }
 0x990   : > { %v5734_v46 = vpop.eup %5733  ;;  %v4550_v49 = vcombine.low %v3616_v45, %v3617_v48 }
 0x991   : > { %v3618_v28 = vmul.f32 %v5734_v46, %v6808_v59  ;;  %v4079_v59 = vpop.xlane.xlu1 %4078  ;;  %5538 = vmatpush3.bf16.msra.mxu0 %v5620_v44 }
 0x992   : > { %5741 = vrcp.f32 %v4079_v59  ;;  %5539 = vmatprep.subr.bf16.mxu0 %v5621_v29 }
 0x993   : > { %v4551_v5 = vcombine.low %v3618_v28, %v3619_v24 }
 0x994   : > { %v4150_v40 = vpop.f32.mrf.mxu0  ;;  %v5736_v16 = vpop.eup %5735 }
 0x995   : > { %v5576_v63 = vpack.i.bf16 %v4551_v5, %v4550_v49  ;;  %v4492_v61 = vmul.f32 %v5736_v16, %v4150_v40  ;;  %5540 = vmatpush3.bf16.msra.mxu0 %v5621_v29  ;;  %v4082_v7 = vpop.xlane.xlu0 %4081 }
 0x996   : > { %v5483_v12 = vpop.f32.mrf.mxu0  ;;  %5743 = vrcp.f32 %v4082_v7  ;;  %5541 = vmatprep.subr.bf16.mxu0 %v5622_v56 }
 0x997   : > { %5577 = vrot.lane.b32.xlu1 %v5576_v63, %s5779_s13  ;;  %v5738_v18 = vpop.eup %5737 }
 0x998   : > { %v4153_v15 = vpop.f32.mrf.mxu0 }
 0x999   : > { %5542 = vmatpush3.bf16.msra.mxu0 %v5622_v56 }
 0x99a   : > { %v5484_v20 = vpop.f32.mrf.mxu0 }
 0x99c   : > { %v4246_v2 = vpop.f32.mrf.mxu0  ;;  %v5740_v27 = vpop.eup %5739 }
 0x99d   : > { %v4494_v25 = vmul.f32 %v5740_v27, %v4246_v2 }
 0x99e   : > { %v5495_v47 = vpop.f32.mrf.mxu0 }
 0x99f   : > { %v5742_v9 = vpop.eup %5741 }
 0x9a0   : > { %v4249_v11 = vpop.f32.mrf.mxu0 }
 0x9a2   : > { %v5496_v32 = vpop.f32.mrf.mxu0 }
 0x9a3   : > { %v5744_v37 = vpop.eup %5743 }
 0x9be   : > { %v4085_v57 = vpop.xlane.xlu1 %4084 }
 0x9bf   : > { %5745 = vrcp.f32 %v4085_v57 }
 0x9c1   : > { %v4198_v51 = vpop.f32.mrf.mxu1 }
 0x9c2   : > { %v4493_v14 = vmul.f32 %v5738_v18, %v4198_v51  ;;  %v4091_v1 = vpop.xlane.xlu1 %4090 }
 0x9c3   : > { %v5489_v31 = vpop.f32.mrf.mxu1  ;;  %5747 = vrcp.f32 %v4091_v1 }
 0x9c4   : > { %v4572_v54 = vcombine.low %v4492_v61, %v4493_v14 }
 0x9c5   : > { %v4201_v17 = vpop.f32.mrf.mxu1 }
 0x9c6   : > { %v1279_v11 = vpop.xlane.xlu1 %1278 }
 0x9c7   : > { %v5490_v42 = vpop.f32.mrf.mxu1 }
 0x9c9   : > { %v4294_v0 = vpop.f32.mrf.mxu1 }
 0x9ca   : > { %v4495_v36 = vmul.f32 %v5742_v9, %v4294_v0  ;;  %v4088_v10 = vpop.xlane.xlu0 %4087  ;;  %v1285_v19 = vpop.xlane.xlu1 %1284  ;;  %v7061_v9 = vld [vmem:[#allocation12_spill] sm:$0xff] }
 0x9cb   : > { %v5501_v39 = vpop.f32.mrf.mxu1  ;;  %5749 = vrcp.f32 %v4088_v10 }
 0x9cc   : > { %v4573_v55 = vcombine.low %v4494_v25, %v4495_v36  ;;  %v5746_v60 = vpop.eup %5745  ;;  %v7062_v39 = vld [vmem:[#allocation11_spill] sm:$0xff] }
 0x9cd   : > { %v4297_v23 = vpop.f32.mrf.mxu1  ;;  %v4342_v50 = vpop.f32.mrf.mxu0 }
 0x9ce   : > { %v5581_v53 = vpack.i.bf16 %v4573_v55, %v4572_v54  ;;  %v4496_v24 = vmul.f32 %v5744_v37, %v4342_v50  ;;  %v1276_v32 = vpop.xlane.xlu0 %1275  ;;  %v1291_v13 = vpop.xlane.xlu1 %1290  ;;  %v7063_v55 = vld [vmem:[#allocation13_spill] sm:$0xff]  ;;  %v7065_v37 = vld [vmem:[#allocation16_spill] sm:$0xff] }
 0x9cf   : > { %v5502_v52 = vpop.f32.mrf.mxu1  ;;  %v5507_v30 = vpop.f32.mrf.mxu0  ;;  %5751 = vrcp.f32 %v1276_v32 }
 0x9d0   : > { %5582 = vrot.lane.b32.xlu0 %v5581_v53, %s5778_s12  ;;  %v5748_v43 = vpop.eup %5747 }
 0x9d1   : > { %v4345_v35 = vpop.f32.mrf.mxu0 }
 0x9d2   : > { %v1282_v38 = vpop.xlane.xlu0 %1281  ;;  %v1297_v51 = vpop.xlane.xlu1 %1296 }
 0x9d3   : > { %v5508_v8 = vpop.f32.mrf.mxu0  ;;  %5753 = vrcp.f32 %v1282_v38 }
 0x9d4   : > { %5755 = vrcp.f32 %v1279_v11 }
 0x9d5   : > { %5757 = vrcp.f32 %v1285_v19 }
 0x9d6   : > { %v1288_v59 = vpop.xlane.xlu0 %1287 }
 0x9d7   : > { %5759 = vrcp.f32 %v1288_v59 }
 0x9d8   : > { %v5750_v46 = vpop.eup %5749 }
 0x9da   : > { %v1294_v31 = vpop.xlane.xlu0 %1293 }
 0x9db   : > { %5761 = vrcp.f32 %v1294_v31 }
 0x9dc   : > { %v5752_v17 = vpop.eup %5751  ;;  %5763 = vrcp.f32 %v1291_v13 }
 0x9dd   : > { %v1684_v22 = vmul.f32 %v5752_v17, %v7060_v21  ;;  %5765 = vrcp.f32 %v1297_v51  ;;  %v7068_v51 = vld [vmem:[#allocation7_spill] sm:$0xff] }
 0x9e0   : > { %v5754_v18 = vpop.eup %5753 }
 0x9e1   : > { %v5756_v42 = vpop.eup %5755  ;;  %v1686_v0 = vmul.f32 %v5754_v18, %v7061_v9 }
 0x9e2   : > { %v5758_v27 = vpop.eup %5757  ;;  %v1685_v54 = vmul.f32 %v5756_v42, %v7062_v39  ;;  %v7073_v39 = vld [vmem:[#allocation9_spill] sm:$0xff] }
 0x9e3   : > { %v1687_v4 = vmul.f32 %v5758_v27, %v7063_v55  ;;  %v7070_v27 = vld [vmem:[#allocation3_spill] sm:$0xff] }
 0x9e4   : > { %v4508_v53 = vcombine.low %v1684_v22, %v1685_v54  ;;  %v5760_v10 = vpop.eup %5759  ;;  %v7071_v22 = vld [vmem:[#allocation2_spill] sm:$0xff] }
 0x9e5   : > { %v4509_v52 = vcombine.low %v1686_v0, %v1687_v4  ;;  %v7074_v4 = vld [vmem:[#allocation4_spill] sm:$0xff] }
 0x9f1   : > { %v5563_v14 = vpop.permute.xlu0 %5562 }
 0x9f2   : > { %v5565_v25 = vunpack.i.h.bf16 %v5563_v14  ;;  %v5564_v36 = vunpack.i.l.bf16 %v5563_v14 }
 0x9f4   : > { %v4588_v6 = vsel %vm856_vm2, %v4508_v53, %v5564_v36  ;;  %v4589_v35 = vsel %vm856_vm2, %v4509_v52, %v5565_v25 }
 0x9f6   : > { %v4390_v33 = vpop.f32.mrf.mxu1 }
 0x9f7   : > { %v4497_v45 = vmul.f32 %v5746_v60, %v4390_v33  ;;  %v5762_v33 = vpop.eup %5761 }
 0x9f8   : > { %v5513_v26 = vpop.f32.mrf.mxu1  ;;  %v1690_v56 = vmul.f32 %v5762_v33, %v7065_v37 }
 0x9f9   : > { %v4574_v12 = vcombine.low %v4496_v24, %v4497_v45  ;;  %v5568_v16 = vpop.permute.xlu1 %5567  ;;  %v5764_v26 = vpop.eup %5763  ;;  %v7067_v45 = vld [vmem:[#allocation17_spill] sm:$0xff] }
 0x9fa   : > { %v4393_v3 = vpop.f32.mrf.mxu1 }
 0x9fb   : > { %v5766_v3 = vpop.eup %5765 }
 0x9fc   : > { %v5514_v58 = vpop.f32.mrf.mxu1 }
 0x9fd   : > { %v7064_v58 = vld [vmem:[#allocation14_spill] sm:$0xff] }
 0x9fe   : > { %v4486_v62 = vpop.f32.mrf.mxu1 }
 0x9ff   : > { %v4499_v49 = vmul.f32 %v5748_v43, %v4486_v62  ;;  %v1688_v62 = vmul.f32 %v5760_v10, %v7064_v58 }
 0xa00   : > { %v5525_v34 = vpop.f32.mrf.mxu1 }
 0xa01   : > { %v5573_v61 = vpop.permute.xlu1 %5572  ;;  %v7066_v34 = vld [vmem:[#allocation15_spill] sm:$0xff] }
 0xa02   : > { %v4438_v48 = vpop.f32.mrf.mxu0  ;;  %v4489_v28 = vpop.f32.mrf.mxu1  ;;  %v5575_v23 = vunpack.i.h.bf16 %v5573_v61  ;;  %v5574_v50 = vunpack.i.l.bf16 %v5573_v61  ;;  %v1689_v43 = vmul.f32 %v5764_v26, %v7066_v34  ;;  %v7072_v61 = vld [vmem:[#allocation8_spill] sm:$0xff] }
 0xa03   : > { %v4498_v5 = vmul.f32 %v5750_v46, %v4438_v48  ;;  %v1691_v46 = vmul.f32 %v5766_v3, %v7067_v45  ;;  %v5570_v48 = vunpack.i.h.bf16 %v5568_v16  ;;  %v5569_v28 = vunpack.i.l.bf16 %v5568_v16  ;;  %v7069_v16 = vld [vmem:[#allocation6_spill] sm:$0xff] }
 0xa04   : > { %v5519_v40 = vpop.f32.mrf.mxu0  ;;  %v5526_v63 = vpop.f32.mrf.mxu1  ;;  %v4594_v44 = vsel %vm4592_vm6, %v4589_v35, %v5575_v23  ;;  %v4593_v29 = vsel %vm4592_vm6, %v4588_v6, %v5574_v50  ;;  %v7075_v50 = vld [vmem:[#allocation5_spill] sm:$0xff] }
 0xa05   : > { %v4575_v15 = vcombine.low %v4498_v5, %v4499_v49  ;;  %v4510_v5 = vcombine.low %v1688_v62, %v1689_v43  ;;  %v4511_v40 = vcombine.low %v1690_v56, %v1691_v46 }
 0xa06   : > { %v4441_v20 = vpop.f32.mrf.mxu0 }
 0xa07   : > { %v5586_v2 = vpack.i.bf16 %v4575_v15, %v4574_v12  ;;  %v4591_v12 = vsel %vm856_vm2, %v4511_v40, %v5570_v48  ;;  %v4590_v15 = vsel %vm856_vm2, %v4510_v5, %v5569_v28 }
 0xa08   : > { %v5520_v47 = vpop.f32.mrf.mxu0 }
 0xa09   : > { %5587 = vrot.lane.b32.xlu1 %v5586_v2, %s5778_s12  ;;  %v5578_v60 = vpop.permute.xlu1 %5577  ;;  %s253_s12 = scalar_lea.vmem %s7026_s6, %s4807_s24 }
 0xa0a   : > { %v5580_v24 = vunpack.i.h.bf16 %v5578_v60  ;;  %v5579_v49 = vunpack.i.l.bf16 %v5578_v60 }
 0xa0c   : > { %v4595_v47 = vsel %vm4592_vm6, %v4590_v15, %v5579_v49  ;;  %v4596_v11 = vsel %vm4592_vm6, %v4591_v12, %v5580_v24 }
 0xa42   : > { %v5583_v30 = vpop.permute.xlu0 %5582 }
 0xa43   : > { %v5585_v8 = vunpack.i.h.bf16 %v5583_v30  ;;  %v5584_v41 = vunpack.i.l.bf16 %v5583_v30 }
 0xa45   : > { %v4598_v57 = vsel %vm4597_vm7, %v4593_v29, %v5584_v41  ;;  %v4599_v7 = vsel %vm4597_vm7, %v4594_v44, %v5585_v8 }
 0xa46   : > { %v4602_v1 = vpack.c.bf16 %v4599_v7, %v4598_v57 }
 0xa48   : > { %5543 = vmatprep.mubr.bf16.mxu0 %v4602_v1 }
 0xa7b   : > { %v5588_v63 = vpop.permute.xlu1 %5587 }
 0xa7c   : > { %v5590_v20 = vunpack.i.h.bf16 %v5588_v63  ;;  %v5589_v2 = vunpack.i.l.bf16 %v5588_v63 }
 0xa7e   : > { %v4601_v32 = vsel %vm4597_vm7, %v4596_v11, %v5590_v20  ;;  %v4600_v19 = vsel %vm4597_vm7, %v4595_v47, %v5589_v2 }
 0xa7f   : > { %v4603_v38 = vpack.c.bf16 %v4601_v32, %v4600_v19 }
 0xa81   : > { %5544 = vmatmul.mubr.bf16.vlgmr.msra.gmra.mxu0 %v4603_v38 }
 0xb41   : > { %v5545_v13 = vpop.f32.mrf.mxu0 }
 0xb42   : > { %v4723_v59 = vcombine.high %v5545_v13, %v5545_v13  ;;  %v4733_v31 = vadd.f32 %v5545_v13, %v7068_v51 }
 0xb43   : > { %v4702_v17 = vpop.f32.mrf.mxu0 }
 0xb44   : > { %v4734_v18 = vadd.f32 %v4723_v59, %v7069_v16  ;;  %4741 = vst [vmem:[%s253_s12 + $0x10] sm:$0xf] %v4733_v31  ;;  %v4721_v42 = vcombine.high %v4702_v17, %v4702_v17  ;;  %v4729_v14 = vadd.f32 %v4702_v17, %v7070_v27 }
 0xb45   : > { %v5546_v21 = vpop.f32.mrf.mxu0 }
 0xb46   : > { %4742 = vst [vmem:[%s253_s12 + $0x14] sm:$0xf] %v4734_v18  ;;  %v4730_v9 = vadd.f32 %v4721_v42, %v7071_v22  ;;  %4737 = vst [vmem:[%s253_s12] sm:$0xf] %v4729_v14  ;;  %v4724_v0 = vcombine.high %v5546_v21, %v5546_v21  ;;  %v4735_v25 = vadd.f32 %v5546_v21, %v7072_v61 }
 0xb47   : > { %v4705_v36 = vpop.f32.mrf.mxu0 }
 0xb48   : > { %4738 = vst [vmem:[%s253_s12 + $0x4] sm:$0xf] %v4730_v9  ;;  %v4736_v54 = vadd.f32 %v4724_v0, %v7073_v39  ;;  %4743 = vst [vmem:[%s253_s12 + $0x18] sm:$0xf] %v4735_v25  ;;  %v4722_v55 = vcombine.high %v4705_v36, %v4705_v36  ;;  %v4731_v23 = vadd.f32 %v4705_v36, %v7074_v4 }
 0xb4a   : > { %4744 = vst [vmem:[%s253_s12 + $0x1c] sm:$0xf] %v4736_v54  ;;  %v4732_v53 = vadd.f32 %v4722_v55, %v7075_v50  ;;  %4739 = vst [vmem:[%s253_s12 + $0x8] sm:$0xf] %v4731_v23 }
 0xb4c   : > { %4740 = vst [vmem:[%s253_s12 + $0xc] sm:$0xf] %v4732_v53 }
 0xb4d PF: > { %s16_s21 = sadd.s32 1, %s5773_s21  }
 0xb4e   : > { %p13_p4 = scmp.ge.s32.totalorder %s16_s21, 10  }
 0xb50   :  { %15 = sbr.rel (!%p13_p4) target bundleno = 1 (0x1), region = 74 }

// kernel: transformer_block_forward.3
= control target key start
LH: loop header
LB: loop body
LE: loop exit
PB: predicated region body
PF: predicated region fallthrough
CT: control target
= control target key end

     0   :  { %s8035_s0 = inlined_call_operand.vmem [shape: f32[2,4,32,128], index: 0, kind: input, shape index: {}]   ;;  %s8036_s1 = inlined_call_operand.vmem [shape: f32[2,16,128], index: 1, kind: input, shape index: {}]   ;;  %s8037_s2 = inlined_call_operand.vmem [shape: f32[1,128], index: 2, kind: input, shape index: {}]   ;;  %s8038_s3 = inlined_call_operand.vmem [shape: bf16[128,128], index: 3, kind: input, shape index: {}]   ;;  %s8039_s4 = inlined_call_operand.vmem [shape: bf16[128,128], index: 4, kind: input, shape index: {}]   ;;  %s8040_s5 = inlined_call_operand.vmem [shape: bf16[128,128], index: 5, kind: input, shape index: {}]   ;;  %s8041_s6 = inlined_call_operand.vmem [shape: bf16[128,128], index: 6, kind: input, shape index: {}]   ;;  %s8042_s7 = inlined_call_operand.vmem [shape: f32[1,128], index: 7, kind: input, shape index: {}]   ;;  %s8043_s8 = inlined_call_operand.vmem [shape: bf16[128,128], index: 8, kind: input, shape index: {}]   ;;  %s8044_s9 = inlined_call_operand.vmem [shape: bf16[128,128], index: 9, kind: input, shape index: {}]   ;;  %s8045_s10 = inlined_call_operand.vmem [shape: bf16[128,128], index: 10, kind: input, shape index: {}]   ;;  %s8046_s11 = inlined_call_operand.vmem [shape: bf16[128,128], index: 11, kind: input, shape index: {}]   ;;  %s8047_s12 = inlined_call_operand.vmem [shape: f32[4,32], index: 12, kind: input, shape index: {}]   ;;  %s8048_s13 = inlined_call_operand.vmem [shape: f32[4,32], index: 13, kind: input, shape index: {}]   ;;  %s8049_s14 = inlined_call_operand.vmem [shape: bf16[128,512], index: 14, kind: input, shape index: {}]   ;;  %s8050_s15 = inlined_call_operand.vmem [shape: f32[1,512], index: 15, kind: input, shape index: {}]   ;;  %s8051_s16 = inlined_call_operand.vmem [shape: bf16[512,128], index: 16, kind: input, shape index: {}]   ;;  %s8052_s17 = inlined_call_operand.vmem [shape: f32[1,128], index: 17, kind: input, shape index: {}]   ;;  %s8053_s18 = inlined_call_operand.hbm [shape: f32[2,4,32,128], index: 18, kind: output, shape index: {}]  }
   0x1   :  { %8069 = sst [smem:[#allocation14_spill]] %s8035_s0 }
   0x2   :  { %8070 = sst [smem:[#allocation15_spill]] %s8036_s1 }
   0x3   :  { %8071 = sst [smem:[#allocation16_spill]] %s8037_s2 }
   0x4   :  { %8072 = sst [smem:[#allocation17_spill]] %s8052_s17 }
   0x5   :  { %8073 = sst [smem:[#allocation18_spill]] %s8053_s18 }
   0x6   :  { %23 = vsyncpa [#allocation3], 0 }
   0x7   :  { %25 = vsyncpa [#allocation3 + $0x1], 0  ;;  %s6189_s27 = smov 0   ;;  %s6191_s28 = smov 0  }
   0x8   :  { %s6193_s29 = smov 0   ;;  %s6195_s30 = smov 0  }
   0x9   :  { %s6197_s0 = smov 0   ;;  %s6199_s19 = smov 0  }
   0xa   :  { %s6201_s1 = smov 0   ;;  %s6203_s20 = smov 0  }
   0xb LB: > { %8074 = sst [smem:[#allocation5_spill]] %s6055_s27  ;;  %s4797_s21 = sadd.s32 4294967295, %s6083_s20   ;;  %s6083_s20 = sphi %s6203_s20, %s31_s20   ;;  %s6079_s1 = sphi %s6201_s1, %s8107_s1   ;;  %s6075_s19 = sphi %s6199_s19, %s8106_s19   ;;  %s6071_s0 = sphi %s6197_s0, %s8105_s0   ;;  %s6067_s30 = sphi %s6195_s30, %s8104_s30   ;;  %s6063_s29 = sphi %s6193_s29, %s8103_s29   ;;  %s6059_s28 = sphi %s6191_s28, %s8109_s28   ;;  %s6055_s27 = sphi %s6189_s27, %s8108_s27  }
   0xc   : > { %8075 = sst [smem:[#allocation6_spill]] %s6063_s29  ;;  %s4798_s22 = sadd.s32 4294967294, %s6083_s20  }
   0xd   : > { %8076 = sst [smem:[#allocation7_spill]] %s6075_s19  ;;  %s40_s2 = sadd.s32 1, %s6075_s19 }
   0xe   : > { %8077 = sst [smem:[#allocation8_spill]] %s6079_s1  ;;  %p41_p0 = scmp.ge.s32.totalorder %s40_s2, 4 }
   0xf   : > { %s43_s23 = sadd.s32 1, %s6079_s1  ;;  %p452_p1 = scmp.ne.s32.totalorder %s6063_s29, %s6059_s28 }
  0x10   : > { %p453_p2 = scmp.eq.s32.totalorder %s4797_s21, 7  ;;  %s8111_s2 = smov (%p41_p0, %s40_s2), 0 }
  0x11   : > { %8078 = sst [smem:[#allocation9_spill]] %s8111_s2  ;;  %s8113_s23 = smov (!%p41_p0, %s43_s23), %s6079_s1 }
  0x12   : > { %s438_s24 = ssub.s32 %s6075_s19, %s8111_s2  ;;  %p6240_p3 = por %p453_p2, %p452_p1 }
  0x13   : > { %p45_p4 = scmp.ge.s32.totalorder %s8113_s23, 2  ;;  %p458_p5 = scmp.ne.s32.totalorder %s6059_s28, %s6055_s27 }
  0x14   : > { %p459_p6 = scmp.eq.s32.totalorder %s4798_s22, 7  ;;  %p4801_p7 = scmp.ge.s32.totalorder %s6083_s20, 1 }
  0x15   : > { %s8115_s23 = smov (%p45_p4, %s8113_s23), 0  ;;  %p545_p9 = scmp.lt.s32.totalorder %s6083_s20, 9 }
  0x16   : > { %8080 = sst [smem:[#allocation10_spill]] %s8115_s23  ;;  %p6249_p8 = por %p459_p6, %p458_p5 }
  0x17   : > { %s437_s21 = ssub.s32 %s6079_s1, %s8115_s23  ;;  %s442_s18 = sadd.s32 1, %s6063_s29 }
  0x18   : > { %s8081_s26 = scalar_select %p6249_p8, 1, 0 }
  0x19   : > { %s439_s17 = sor.u32 %s438_s24, %s437_s21  ;;  %p546_p10 = pnand %p4801_p7, %p545_p9 }
  0x1a   : > { %8082 = sst [smem:[#allocation11_spill]] %s8081_s26  ;;  %p440_p11 = scmp.eq.s32.totalorder %s439_s17, 0 }
  0x1b   : > { %549 = sbr.rel (%p546_p10) target bundleno = 4990 (0x137e), region = 92 }
  0x1c   : > { %s6258_s2 = scalar_select %p440_p11, %s6063_s29, %s442_s18  }
  0x1e   : > { %8083 = sst [smem:[#allocation12_spill]] %s6258_s2 }
  0x20   : > { %p608_p12 = scmp.lt.s32.totalorder %s6071_s0, 1  ;;  %p610_p13 = scmp.lt.s32.totalorder %s6067_s30, 3  ;;  %v5591_v4 = vld [vmem:[%s8038_s3 + $0x38] sm:$0xff]   ;;  %v5593_v22 = vld [vmem:[%s8038_s3 + $0x30] sm:$0xff]   ;;  %v5595_v24 = vld [vmem:[%s8038_s3 + $0x28] sm:$0xff]   ;;  %vm1030_vm0 = vcmask 261120  }
  0x21   : > { %s8084_s1 = sld [smem:[#allocation14_spill]]  ;;  %5168 = vmatprep.subr.bf16.mxu0 %v5591_v4  ;;  %v5592_v21 = vld [vmem:[%s8039_s4 + $0x38] sm:$0xff]   ;;  %v5594_v23 = vld [vmem:[%s8039_s4 + $0x30] sm:$0xff]   ;;  %v5596_v25 = vld [vmem:[%s8039_s4 + $0x28] sm:$0xff]   ;;  %s8066_s18 = smov 96   ;;  %vm1779_vm1 = vcmask 523264  }
  0x22   : > { %s6263_s22 = scalar_select %p608_p12, %s6071_s0, 1  ;;  %5169 = vmatpush3.bf16.msra.mxu0 %v5591_v4  ;;  %5188 = vmatprep.subr.bf16.mxu1 %v5592_v21  ;;  %v5597_v26 = vld [vmem:[%s8038_s3 + $0x20] sm:$0xff]   ;;  %v5599_v28 = vld [vmem:[%s8038_s3 + $0x18] sm:$0xff]   ;;  %v5601_v30 = vld [vmem:[%s8038_s3 + $0x10] sm:$0xff]   ;;  %vm1784_vm2 = vcmask 785408   ;;  %vm6089_vm3 = vmmov 0  }
  0x23   : > { %s611_s19 = scalar_select %p610_p13, %s6067_s30, 3  ;;  %5189 = vmatpush3.bf16.msra.mxu1 %v5592_v21  ;;  %5170 = vmatprep.subr.bf16.mxu0 %v5593_v22  ;;  %v5598_v27 = vld [vmem:[%s8039_s4 + $0x20] sm:$0xff]   ;;  %v5600_v29 = vld [vmem:[%s8039_s4 + $0x18] sm:$0xff]   ;;  %v5602_v31 = vld [vmem:[%s8039_s4 + $0x10] sm:$0xff]   ;;  %vm2371_vm4 = vcmask 130048  }
  0x24   : > { %s4804_s26 = sshll.u32 %s6263_s22, 4  ;;  %5190 = vmatprep.subr.bf16.mxu1 %v5594_v23  ;;  %v5603_v32 = vld [vmem:[%s8038_s3 + $0x8] sm:$0xff]   ;;  %v5605_v34 = vld [vmem:[%s8038_s3] sm:$0xff]   ;;  %v5607_v36 = vld [vmem:[%s8040_s5 + $0x38] sm:$0xff]   ;;  %s8064_s27 = smov 64  }
  0x25   : > { %s4803_s23 = sshll.u32 %s611_s19, 2  ;;  %v5604_v33 = vld [vmem:[%s8039_s4 + $0x8] sm:$0xff]   ;;  %v5606_v35 = vld [vmem:[%s8039_s4] sm:$0xff]   ;;  %v5612_v4 = vld [vmem:[%s8040_s5 + $0x10] sm:$0xff]   ;;  %s8062_s29 = smov 32  }
  0x26   : > { %s614_s24 = sadd.s32 %s4804_s26, %s4803_s23  ;;  %5171 = vmatpush3.bf16.msra.mxu0 %v5593_v22  ;;  %s8086_s17 = sld [smem:[#allocation15_spill]] }
  0x27   : > { %s4805_s21 = sshll.u32 %s614_s24, 3  ;;  %5191 = vmatpush3.bf16.msra.mxu1 %v5594_v23  ;;  %5172 = vmatprep.subr.bf16.mxu0 %v5595_v24  ;;  %s8088_s23 = smov 64  }
  0x28   : > { %s616_s2 = scalar_lea.vmem %s8084_s1, %s4805_s21  ;;  %5192 = vmatprep.subr.bf16.mxu1 %v5596_v25  ;;  %s605_s22 = sand.u32 1, %s6059_s28  }
  0x29   : > { %v623_v0 = vld [vmem:[%s616_s2] sm:$0xff]  ;;  %v625_v1 = vld [vmem:[%s616_s2 + $0x10] sm:$0xff]  ;;  %v624_v2 = vld [vmem:[%s616_s2 + $0x8] sm:$0xff]  ;;  %s8097_s24 = sld [smem:[#allocation17_spill]] }
  0x2a   : > { %628 = vadd.xlane.f32.xlu0 %v623_v0  ;;  %632 = vadd.xlane.f32.xlu1 %v625_v1  ;;  %v626_v3 = vld [vmem:[%s616_s2 + $0x18] sm:$0xff]  ;;  %s8085_s2 = sld [smem:[#allocation16_spill]] }
  0x2b   : > { %5173 = vmatpush3.bf16.msra.mxu0 %v5595_v24  ;;  %5193 = vmatpush3.bf16.msra.mxu1 %v5596_v25 }
  0x2c   : > { %5174 = vmatprep.subr.bf16.mxu0 %v5597_v26  ;;  %5194 = vmatprep.subr.bf16.mxu1 %v5598_v27  ;;  %s621_s19 = scalar_lea.vmem %s8086_s17, %s4804_s26  ;;  %s8089_s17 = smov 32  }
  0x2e   : > { %630 = vadd.xlane.f32.xlu0 %v624_v2  ;;  %634 = vadd.xlane.f32.xlu1 %v626_v3 }
  0x2f   : > { %5175 = vmatpush3.bf16.msra.mxu0 %v5597_v26  ;;  %5195 = vmatpush3.bf16.msra.mxu1 %v5598_v27 }
  0x30   : > { %5176 = vmatprep.subr.bf16.mxu0 %v5599_v28  ;;  %5196 = vmatprep.subr.bf16.mxu1 %v5600_v29  ;;  %v4808_v52 = vld [vmem:[%s8085_s2] ss:$0 sm:$0xff]  ;;  %s8087_s2 = smov 96  }
  0x33   : > { %5177 = vmatpush3.bf16.msra.mxu0 %v5599_v28  ;;  %5197 = vmatpush3.bf16.msra.mxu1 %v5600_v29 }
  0x34   : > { %5178 = vmatprep.subr.bf16.mxu0 %v5601_v30  ;;  %5198 = vmatprep.subr.bf16.mxu1 %v5602_v31 }
  0x37   : > { %5179 = vmatpush3.bf16.msra.mxu0 %v5601_v30  ;;  %5199 = vmatpush3.bf16.msra.mxu1 %v5602_v31 }
  0x38   : > { %5180 = vmatprep.subr.bf16.mxu0 %v5603_v32  ;;  %5200 = vmatprep.subr.bf16.mxu1 %v5604_v33 }
  0x3b   : > { %5181 = vmatpush3.bf16.msra.mxu0 %v5603_v32  ;;  %5201 = vmatpush3.bf16.msra.mxu1 %v5604_v33 }
  0x3c   : > { %5182 = vmatprep.subr.bf16.mxu0 %v5605_v34  ;;  %5202 = vmatprep.subr.bf16.mxu1 %v5606_v35 }
  0x3f   : > { %5183 = vmatpush3.bf16.msra.mxu0 %v5605_v34  ;;  %5203 = vmatpush3.bf16.msra.mxu1 %v5606_v35 }
  0x40   : > { %5208 = vmatprep.subr.bf16.mxu0 %v5607_v36 }
  0xb3   : > { %v629_v5 = vpop.xlane.xlu0 %628  ;;  %v633_v6 = vpop.xlane.xlu1 %632 }
  0xb4   : > { %v637_v7 = vmul.f32 0.0078125, %v629_v5  ;;  %v639_v8 = vmul.f32 0.0078125, %v633_v6  ;;  %v5613_v5 = vld [vmem:[%s8040_s5 + $0x8] sm:$0xff]   ;;  %v5614_v6 = vld [vmem:[%s8040_s5] sm:$0xff]  }
  0xb6   : > { %v6275_v9 = vsub.f32 %v623_v0, %v637_v7  ;;  %v6277_v10 = vsub.f32 %v625_v1, %v639_v8  ;;  %v5608_v0 = vld [vmem:[%s8040_s5 + $0x30] sm:$0xff]   ;;  %v5609_v1 = vld [vmem:[%s8040_s5 + $0x28] sm:$0xff]  }
  0xb7   : > { %v631_v11 = vpop.xlane.xlu0 %630  ;;  %v635_v12 = vpop.xlane.xlu1 %634 }
  0xb8   : > { %v638_v13 = vmul.f32 0.0078125, %v631_v11  ;;  %v645_v14 = vmul.f32 %v6275_v9, %v6275_v9  ;;  %v640_v15 = vmul.f32 0.0078125, %v635_v12  ;;  %v647_v16 = vmul.f32 %v6277_v10, %v6277_v10 }
  0xba   : > { %649 = vadd.xlane.f32.xlu0 %v645_v14  ;;  %v6283_v17 = vsub.f32 %v624_v2, %v638_v13  ;;  %v6285_v18 = vsub.f32 %v626_v3, %v640_v15  ;;  %v5610_v2 = vld [vmem:[%s8040_s5 + $0x20] sm:$0xff]   ;;  %v5611_v3 = vld [vmem:[%s8040_s5 + $0x18] sm:$0xff]  }
  0xbc   : > { %v646_v19 = vmul.f32 %v6283_v17, %v6283_v17  ;;  %v648_v20 = vmul.f32 %v6285_v18, %v6285_v18 }
  0xbe   : > { %653 = vadd.xlane.f32.xlu0 %v647_v16  ;;  %651 = vadd.xlane.f32.xlu1 %v646_v19 }
  0xc2   : > { %655 = vadd.xlane.f32.xlu1 %v648_v20 }
 0x143   : > { %v650_v37 = vpop.xlane.xlu0 %649 }
 0x144   : > { %v657_v38 = vmul.f32 0.0078125, %v650_v37 }
 0x146   : > { %v661_v39 = vadd.f32 1e-05, %v657_v38 }
 0x147   : > { %v652_v40 = vpop.xlane.xlu1 %651  ;;  %v654_v41 = vpop.xlane.xlu0 %653 }
 0x148   : > { %5735 = vrsqrt.f32 %v661_v39  ;;  %v658_v42 = vmul.f32 0.0078125, %v652_v40  ;;  %v659_v43 = vmul.f32 0.0078125, %v654_v41 }
 0x14a   : > { %v662_v44 = vadd.f32 1e-05, %v658_v42  ;;  %v663_v45 = vadd.f32 1e-05, %v659_v43 }
 0x14b   : > { %v656_v46 = vpop.xlane.xlu1 %655 }
 0x14c   : > { %5737 = vrsqrt.f32 %v662_v44  ;;  %v660_v47 = vmul.f32 0.0078125, %v656_v46 }
 0x14d   : > { %5739 = vrsqrt.f32 %v663_v45 }
 0x14e   : > { %v664_v48 = vadd.f32 1e-05, %v660_v47 }
 0x150   : > { %5741 = vrsqrt.f32 %v664_v48 }
 0x155   : > { %v5736_v49 = vpop.eup %5735 }
 0x156   : > { %v669_v50 = vmul.f32 %v5736_v49, %v6275_v9 }
 0x158   : > { %v6344_v55 = vmul.f32 %v4808_v52, %v669_v50 }
 0x159   : > { %v5738_v51 = vpop.eup %5737 }
 0x15a   : > { %v5740_v53 = vpop.eup %5739  ;;  %v670_v54 = vmul.f32 %v5738_v51, %v6283_v17 }
 0x15b   : > { %v671_v57 = vmul.f32 %v5740_v53, %v6277_v10 }
 0x15c   : > { %v6346_v56 = vmul.f32 %v4808_v52, %v670_v54 }
 0x15d   : > { %v5742_v58 = vpop.eup %5741  ;;  %v6352_v61 = vmul.f32 %v4808_v52, %v671_v57 }
 0x15e   : > { %v683_v59 = vpack.c.bf16 %v6346_v56, %v6344_v55  ;;  %v672_v60 = vmul.f32 %v5742_v58, %v6285_v18 }
 0x160   : > { %5184 = vmatprep.mubr.bf16.mxu0 %v683_v59  ;;  %5204 = vmatprep.mubr.bf16.mxu1 %v683_v59  ;;  %v6354_v62 = vmul.f32 %v4808_v52, %v672_v60 }
 0x162   : > { %v684_v63 = vpack.c.bf16 %v6354_v62, %v6352_v61 }
 0x164   : > { %5185 = vmatmul.mubr.bf16.vlgmr.msra.gmra.mxu0 %v684_v63  ;;  %5205 = vmatmul.mubr.bf16.vlgmr.msra.gmra.mxu1 %v684_v63 }
 0x165   : > { %5209 = vmatpush3.bf16.msra.mxu0 %v5607_v36  ;;  %5224 = vmatprep.mubr.bf16.mxu0 %v683_v59 }
 0x166   : > { %5210 = vmatprep.subr.bf16.mxu0 %v5608_v0 }
 0x169   : > { %5211 = vmatpush3.bf16.msra.mxu0 %v5608_v0 }
 0x16a   : > { %5212 = vmatprep.subr.bf16.mxu0 %v5609_v1 }
 0x16d   : > { %5213 = vmatpush3.bf16.msra.mxu0 %v5609_v1 }
 0x16e   : > { %5214 = vmatprep.subr.bf16.mxu0 %v5610_v2 }
 0x171   : > { %5215 = vmatpush3.bf16.msra.mxu0 %v5610_v2 }
 0x172   : > { %5216 = vmatprep.subr.bf16.mxu0 %v5611_v3 }
 0x175   : > { %5217 = vmatpush3.bf16.msra.mxu0 %v5611_v3 }
 0x176   : > { %5218 = vmatprep.subr.bf16.mxu0 %v5612_v4 }
 0x179   : > { %5219 = vmatpush3.bf16.msra.mxu0 %v5612_v4 }
 0x17a   : > { %5220 = vmatprep.subr.bf16.mxu0 %v5613_v5 }
 0x17d   : > { %5221 = vmatpush3.bf16.msra.mxu0 %v5613_v5 }
 0x17e   : > { %5222 = vmatprep.subr.bf16.mxu0 %v5614_v6 }
 0x181   : > { %5223 = vmatpush3.bf16.msra.mxu0 %v5614_v6 }
 0x184   : > { %5225 = vmatmul.mubr.bf16.vlgmr.msra.gmra.mxu0 %v684_v63 }
 0x224   : > { %v5186_v7 = vpop.f32.mrf.mxu0  ;;  %v5206_v8 = vpop.f32.mrf.mxu1 }
 0x226   : > { %v783_v9 = vpop.f32.mrf.mxu0  ;;  %v896_v10 = vpop.f32.mrf.mxu1 }
 0x228   : > { %v5187_v11 = vpop.f32.mrf.mxu0  ;;  %v5207_v12 = vpop.f32.mrf.mxu1 }
 0x229   : > { %v6379_v13 = vpack.c.bf16 %v5207_v12, %v5206_v8  ;;  %v6395_v20 = vpack.c.bf16 %v5187_v11, %v5186_v7 }
 0x22a   : > { %v786_v14 = vpop.f32.mrf.mxu0  ;;  %v899_v15 = vpop.f32.mrf.mxu1 }
 0x22b   : > { %v6381_v16 = vpack.c.bf16 %v786_v14, %v783_v9  ;;  %v6383_v17 = vpack.c.bf16 %v899_v15, %v896_v10  ;;  %5440 = vmatprep.subr.msk.bf16.mxu1 %vm1030_vm0, %v6379_v13  ;;  %v1041_v18 = vsel %vm1030_vm0, %v6379_v13, 0 }
 0x22c   : > { %5229 = vmatpush3.bf16.xpose.msra.mxu1 %v1041_v18 }
 0x22d   : > { %5441 = vmatprep.subr.msk.bf16.mxu1 %vm1030_vm0, %v6383_v17  ;;  %5232 = vmatprep.mubr.msk.bf16.mxu1 %vm1030_vm0, %v6381_v16  ;;  %v1038_v19 = vsel %vm1030_vm0, %v6383_v17, 0 }
 0x234   : > { %5231 = vmatpush3.bf16.xpose.msra.mxu1 %v1038_v19 }
 0x23b   : > { %5233 = vmatmul.mubr.msk.bf16.vlgmr.msra.gmra.mxu1 %vm1030_vm0, %v6395_v20 }
 0x244   : > { %v5226_v21 = vpop.f32.mrf.mxu0 }
 0x246   : > { %v1009_v22 = vpop.f32.mrf.mxu0 }
 0x248   : > { %v5227_v23 = vpop.f32.mrf.mxu0 }
 0x249   : > { %v6399_v24 = vpack.c.bf16 %v5227_v23, %v5226_v21 }
 0x24a   : > { %v1012_v25 = vpop.f32.mrf.mxu0 }
 0x24b   : > { %v6401_v26 = vpack.c.bf16 %v1012_v25, %v1009_v22  ;;  %5236 = vmatprep.subr.bf16.mxu1 %v6399_v24 }
 0x24c   : > { %5237 = vmatpush3.bf16.msra.mxu1 %v6399_v24 }
 0x24d   : > { %5238 = vmatprep.subr.bf16.mxu1 %v6401_v26 }
 0x250   : > { %5239 = vmatpush3.bf16.msra.mxu1 %v6401_v26 }
 0x2fb   : > { %v5234_v27 = vpop.f32.mrf.mxu1 }
 0x2fc   : > { %v1098_v32 = vsel %vm1030_vm0, %v5234_v27, -inf }
 0x2fd   : > { %v1077_v28 = vpop.f32.mrf.mxu1 }
 0x2fe   : > { %v1092_v29 = vsel %vm1030_vm0, %v1077_v28, -inf }
 0x2ff   : > { %1093 = vmax.xlane.f32.xlu0 %v1092_v29  ;;  %v5235_v30 = vpop.f32.mrf.mxu1 }
 0x300   : > { %v1101_v34 = vsel %vm1030_vm0, %v5235_v30, -inf }
 0x301   : > { %v1080_v31 = vpop.f32.mrf.mxu1 }
 0x302   : > { %v1095_v33 = vsel %vm1030_vm0, %v1080_v31, -inf }
 0x303   : > { %1099 = vmax.xlane.f32.xlu0 %v1098_v32  ;;  %1096 = vmax.xlane.f32.xlu1 %v1095_v33 }
 0x307   : > { %1102 = vmax.xlane.f32.xlu1 %v1101_v34 }
 0x318   : > { %1201 = vrot.lane.b32.xlu1 %v6383_v17, %s8066_s18 }
 0x319   : > { %1203 = vrot.lane.b32.xlu0 %v6379_v13, %s8066_s18 }
 0x31c   : > { %1195 = vrot.lane.b32.xlu1 %v6381_v16, %s8066_s18 }
 0x31d   : > { %1197 = vrot.lane.b32.xlu0 %v6395_v20, %s8066_s18 }
 0x320   : > { %1381 = vrot.lane.b32.xlu1 %v6379_v13, %s8064_s27 }
 0x321   : > { %1375 = vrot.lane.b32.xlu0 %v6381_v16, %s8064_s27 }
 0x324   : > { %1379 = vrot.lane.b32.xlu1 %v6383_v17, %s8064_s27 }
 0x328   : > { %1377 = vrot.lane.b32.xlu1 %v6395_v20, %s8064_s27 }
 0x32c   : > { %1486 = vrot.lane.b32.xlu1 %v6401_v26, %s8064_s27 }
 0x388   : > { %v1094_v35 = vpop.xlane.xlu0 %1093 }
 0x389   : > { %v1104_v36 = vsub.f32 %v1077_v28, %v1094_v35 }
 0x38b   : > { %v1108_v39 = vmul.f32 1.442695, %v1104_v36 }
 0x38c   : > { %v1100_v37 = vpop.xlane.xlu0 %1099  ;;  %v1097_v38 = vpop.xlane.xlu1 %1096 }
 0x38d   : > { %v1106_v40 = vsub.f32 %v5234_v27, %v1100_v37  ;;  %v1105_v41 = vsub.f32 %v1080_v31, %v1097_v38  ;;  %5743 = vpow2.f32 %v1108_v39 }
 0x38f   : > { %v1110_v42 = vmul.f32 1.442695, %v1105_v41  ;;  %v1112_v43 = vmul.f32 1.442695, %v1106_v40 }
 0x390   : > { %v1204_v44 = vpop.permute.xlu0 %1203  ;;  %v1103_v45 = vpop.xlane.xlu1 %1102 }
 0x391   : > { %v1107_v46 = vsub.f32 %v5235_v30, %v1103_v45  ;;  %5442 = vmatprep.subr.msk.bf16.mxu1 %vm1030_vm0, %v1204_v44  ;;  %5745 = vpow2.f32 %v1110_v42  ;;  %v1215_v58 = vsel %vm1030_vm0, %v1204_v44, 0 }
 0x392   : > { %5747 = vpow2.f32 %v1112_v43 }
 0x393   : > { %v1114_v47 = vmul.f32 1.442695, %v1107_v46 }
 0x394   : > { %v1202_v50 = vpop.permute.xlu1 %1201  ;;  %v1198_v63 = vpop.permute.xlu0 %1197 }
 0x395   : > { %5749 = vpow2.f32 %v1114_v47  ;;  %v1212_v59 = vsel %vm1030_vm0, %v1202_v50, 0 }
 0x398   : > { %v1196_v57 = vpop.permute.xlu1 %1195  ;;  %v1376_v0 = vpop.permute.xlu0 %1375 }
 0x39a   : > { %v6430_v48 = vpop.eup %5743 }
 0x39c   : > { %v1382_v60 = vpop.permute.xlu1 %1381 }
 0x39d   : > { %v1393_v1 = vsel %vm1030_vm0, %v1382_v60, 0 }
 0x39e   : > { %v6432_v49 = vpop.eup %5745 }
 0x39f   : > { %v1132_v51 = vpack.c.bf16 %v6432_v49, %v6430_v48  ;;  %v6436_v52 = vpop.eup %5747 }
 0x3a0   : > { %v1380_v2 = vpop.permute.xlu1 %1379 }
 0x3a1   : > { %5240 = vmatprep.mubr.msk.bf16.mxu1 %vm1030_vm0, %v1132_v51  ;;  %v1390_v3 = vsel %vm1030_vm0, %v1380_v2, 0 }
 0x3a2   : > { %v6438_v53 = vpop.eup %5749 }
 0x3a3   : > { %v1133_v54 = vpack.c.bf16 %v6438_v53, %v6436_v52 }
 0x3a4   : > { %v1378_v4 = vpop.permute.xlu1 %1377 }
 0x3a5   : > { %5241 = vmatmul.mubr.msk.bf16.vlgmr.msra.gmra.mxu1 %vm1030_vm0, %v1133_v54 }
 0x3a6   : > { %5245 = vmatpush3.bf16.xpose.msra.mxu1 %v1215_v58  ;;  %5248 = vmatprep.mubr.msk.bf16.mxu1 %vm1030_vm0, %v1196_v57 }
 0x3a7   : > { %5443 = vmatprep.subr.msk.bf16.mxu1 %vm1030_vm0, %v1202_v50 }
 0x3ae   : > { %5247 = vmatpush3.bf16.xpose.msra.mxu1 %v1212_v59 }
 0x3af   : > { %5444 = vmatprep.subr.msk.bf16.mxu1 %vm1030_vm0, %v1382_v60 }
 0x3b5   : > { %5249 = vmatmul.mubr.msk.bf16.vlgmr.msra.gmra.mxu1 %vm1030_vm0, %v1198_v63 }
 0x3b6   : > { %5261 = vmatpush3.bf16.xpose.msra.mxu1 %v1393_v1  ;;  %5264 = vmatprep.mubr.msk.bf16.mxu1 %vm1030_vm0, %v1376_v0 }
 0x3b7   : > { %5445 = vmatprep.subr.msk.bf16.mxu1 %vm1030_vm0, %v1380_v2 }
 0x3be   : > { %5263 = vmatpush3.bf16.xpose.msra.mxu1 %v1390_v3 }
 0x3c5   : > { %5265 = vmatmul.mubr.msk.bf16.vlgmr.msra.gmra.mxu1 %vm1030_vm0, %v1378_v4 }
 0x465   : > { %v6455_v5 = vpop.f32.mrf.mxu1 }
 0x467   : > { %v6457_v6 = vpop.f32.mrf.mxu1 }
 0x469   : > { %v6459_v7 = vpop.f32.mrf.mxu1 }
 0x46b   : > { %v6461_v8 = vpop.f32.mrf.mxu1 }
 0x475   : > { %v6463_v9 = vpop.f32.mrf.mxu1 }
 0x477   : > { %v6465_v10 = vpop.f32.mrf.mxu1 }
 0x478   : > { %v1266_v27 = vsel %vm1030_vm0, %v6465_v10, -inf }
 0x479   : > { %v6467_v11 = vpop.f32.mrf.mxu1 }
 0x47b   : > { %v6469_v12 = vpop.f32.mrf.mxu1 }
 0x47c   : > { %v1269_v28 = vsel %vm1030_vm0, %v6469_v12, -inf }
 0x485   : > { %v5266_v14 = vpop.f32.mrf.mxu1 }
 0x486   : > { %v1450_v15 = vsel %vm1030_vm0, %v5266_v14, -inf }
 0x487   : > { %1451 = vmax.xlane.f32.xlu0 %v1450_v15  ;;  %v1429_v18 = vpop.f32.mrf.mxu1 }
 0x488   : > { %v1444_v21 = vsel %vm1030_vm0, %v1429_v18, -inf }
 0x489   : > { %v5267_v19 = vpop.f32.mrf.mxu1 }
 0x48a   : > { %v1453_v25 = vsel %vm1030_vm0, %v5267_v19, -inf }
 0x48b   : > { %1445 = vmax.xlane.f32.xlu0 %v1444_v21  ;;  %v1432_v22 = vpop.f32.mrf.mxu1 }
 0x48c   : > { %v1447_v23 = vsel %vm1030_vm0, %v1432_v22, -inf }
 0x48d   : > { %1448 = vmax.xlane.f32.xlu1 %v1447_v23 }
 0x48f   : > { %1454 = vmax.xlane.f32.xlu0 %v1453_v25 }
 0x49e   : > { %1557 = vrot.lane.b32.xlu1 %v6379_v13, %s8062_s29  ;;  %v1272_v13 = vsel %vm1030_vm0, %v6463_v9, -inf }
 0x4a2   : > { %1555 = vrot.lane.b32.xlu1 %v6383_v17, %s8062_s29  ;;  %v1275_v17 = vsel %vm1030_vm0, %v6467_v11, -inf }
 0x4a5   : > { %1488 = vrot.lane.b32.xlu0 %v6399_v24, %s8064_s27 }
 0x4a6   : > { %1553 = vrot.lane.b32.xlu1 %v6395_v20, %s8062_s29  ;;  %v1487_v20 = vpop.permute.xlu1 %1486 }
 0x4a9   : > { %1551 = vrot.lane.b32.xlu0 %v6381_v16, %s8062_s29 }
 0x4c8   : > { %1267 = vmax.xlane.f32.xlu0 %v1266_v27 }
 0x4ca   : > { %1270 = vmax.xlane.f32.xlu1 %v1269_v28 }
 0x4cc   : > { %1273 = vmax.xlane.f32.xlu0 %v1272_v13 }
 0x4d0   : > { %1276 = vmax.xlane.f32.xlu0 %v1275_v17 }
 0x4db   : > { %1310 = vrot.lane.b32.xlu1 %v6401_v26, %s8066_s18 }
 0x4df   : > { %1664 = vrot.lane.b32.xlu1 %v6399_v24, %s8062_s29 }
 0x510   : > { %v1452_v16 = vpop.xlane.xlu0 %1451 }
 0x511   : > { %v1458_v29 = vsub.f32 %v5266_v14, %v1452_v16 }
 0x513   : > { %v1464_v35 = vmul.f32 1.442695, %v1458_v29 }
 0x514   : > { %v1446_v30 = vpop.xlane.xlu0 %1445 }
 0x515   : > { %v1456_v31 = vsub.f32 %v1429_v18, %v1446_v30 }
 0x516   : > { %v1449_v32 = vpop.xlane.xlu1 %1448 }
 0x517   : > { %v1460_v33 = vmul.f32 1.442695, %v1456_v31  ;;  %v1457_v34 = vsub.f32 %v1432_v22, %v1449_v32 }
 0x518   : > { %v1455_v36 = vpop.xlane.xlu0 %1454 }
 0x519   : > { %v1462_v37 = vmul.f32 1.442695, %v1457_v34  ;;  %v1459_v38 = vsub.f32 %v5267_v19, %v1455_v36  ;;  %5751 = vpow2.f32 %v1460_v33 }
 0x51a   : > { %v1558_v41 = vpop.permute.xlu1 %1557 }
 0x51b   : > { %5753 = vpow2.f32 %v1462_v37  ;;  %v1466_v39 = vmul.f32 1.442695, %v1459_v38  ;;  %v1569_v51 = vsel %vm1030_vm0, %v1558_v41, 0 }
 0x51c   : > { %5755 = vpow2.f32 %v1464_v35  ;;  %v1489_v40 = vpop.permute.xlu0 %1488 }
 0x51d   : > { %5757 = vpow2.f32 %v1466_v39  ;;  %5268 = vmatprep.subr.bf16.mxu1 %v1489_v40 }
 0x51e   : > { %5269 = vmatpush3.bf16.msra.mxu1 %v1489_v40  ;;  %v1556_v54 = vpop.permute.xlu1 %1555 }
 0x51f   : > { %5270 = vmatprep.subr.bf16.mxu1 %v1487_v20  ;;  %v1566_v57 = vsel %vm1030_vm0, %v1556_v54, 0 }
 0x520   : > { %v1552_v50 = vpop.permute.xlu0 %1551 }
 0x522   : > { %5271 = vmatpush3.bf16.msra.mxu1 %v1487_v20  ;;  %v1554_v58 = vpop.permute.xlu1 %1553 }
 0x523   : > { %5446 = vmatprep.subr.msk.bf16.mxu1 %vm1030_vm0, %v1558_v41 }
 0x526   : > { %v6498_v42 = vpop.eup %5751 }
 0x528   : > { %v6500_v43 = vpop.eup %5753 }
 0x529   : > { %v6502_v44 = vpop.eup %5755  ;;  %v1484_v45 = vpack.c.bf16 %v6500_v43, %v6498_v42  ;;  %v1471_v37 = vsel %vm1030_vm0, %v6500_v43, 0.0 }
 0x52a   : > { %v6506_v46 = vpop.eup %5757  ;;  %v1474_v38 = vsel %vm1030_vm0, %v6502_v44, 0.0 }
 0x52b   : > { %5272 = vmatprep.mubr.msk.bf16.mxu1 %vm1030_vm0, %v1484_v45  ;;  %v1485_v47 = vpack.c.bf16 %v6506_v46, %v6502_v44 }
 0x52d   : > { %5273 = vmatmul.mubr.msk.bf16.vlgmr.msra.gmra.mxu1 %vm1030_vm0, %v1485_v47 }
 0x52e   : > { %5277 = vmatpush3.bf16.xpose.msra.mxu1 %v1569_v51  ;;  %5280 = vmatprep.mubr.msk.bf16.mxu1 %vm1030_vm0, %v1552_v50 }
 0x52f   : > { %5447 = vmatprep.subr.msk.bf16.mxu1 %vm1030_vm0, %v1556_v54 }
 0x536   : > { %5279 = vmatpush3.bf16.xpose.msra.mxu1 %v1566_v57 }
 0x53d   : > { %5281 = vmatmul.mubr.msk.bf16.vlgmr.msra.gmra.mxu1 %vm1030_vm0, %v1554_v58 }
 0x551   : > { %v1268_v59 = vpop.xlane.xlu0 %1267 }
 0x552   : > { %v1278_v60 = vsub.f32 %v6465_v10, %v1268_v59 }
 0x553   : > { %v1271_v63 = vpop.xlane.xlu1 %1270 }
 0x554   : > { %v1282_v0 = vmul.f32 1.442695, %v1278_v60  ;;  %v1279_v1 = vsub.f32 %v6469_v12, %v1271_v63 }
 0x555   : > { %v1274_v2 = vpop.xlane.xlu0 %1273 }
 0x556   : > { %v1284_v3 = vmul.f32 1.442695, %v1279_v1  ;;  %v1280_v4 = vsub.f32 %v6463_v9, %v1274_v2  ;;  %5759 = vpow2.f32 %v1282_v0 }
 0x557   : > { %v1311_v39 = vpop.permute.xlu1 %1310 }
 0x558   : > { %5761 = vpow2.f32 %v1284_v3  ;;  %v1286_v14 = vmul.f32 1.442695, %v1280_v4 }
 0x559   : > { %v1277_v15 = vpop.xlane.xlu0 %1276 }
 0x55a   : > { %v1281_v18 = vsub.f32 %v6467_v11, %v1277_v15  ;;  %5763 = vpow2.f32 %v1286_v14 }
 0x55b   : > { %v1665_v40 = vpop.permute.xlu1 %1664 }
 0x55c   : > { %v1288_v19 = vmul.f32 1.442695, %v1281_v18 }
 0x55e   : > { %5765 = vpow2.f32 %v1288_v19  ;;  %v1116_v19 = vsel %vm1030_vm0, %v6430_v48, 0.0  ;;  %v5615_v48 = vld [vmem:[%s8041_s6 + $0x38] sm:$0xff]  }
 0x563   : > { %v5760_v21 = vpop.eup %5759 }
 0x564   : > { %v1290_v33 = vsel %vm1030_vm0, %v5760_v21, 0.0 }
 0x565   : > { %v5762_v22 = vpop.eup %5761 }
 0x566   : > { %v1306_v10 = vpack.c.bf16 %v5762_v22, %v5760_v21  ;;  %v1293_v35 = vsel %vm1030_vm0, %v5762_v22, 0.0  ;;  %v1122_v22 = vsel %vm1030_vm0, %v6436_v52, 0.0 }
 0x567   : > { %v5764_v23 = vpop.eup %5763 }
 0x568   : > { %5256 = vmatprep.mubr.msk.bf16.mxu0 %vm1030_vm0, %v1306_v10  ;;  %v1296_v34 = vsel %vm1030_vm0, %v5764_v23, 0.0  ;;  %v1119_v10 = vsel %vm1030_vm0, %v6432_v49, 0.0  ;;  %v5617_v49 = vld [vmem:[%s8041_s6 + $0x28] sm:$0xff]  }
 0x56b   : > { %v5766_v12 = vpop.eup %5765 }
 0x56c   : > { %v1307_v25 = vpack.c.bf16 %v5766_v12, %v5764_v23  ;;  %v1299_v36 = vsel %vm1030_vm0, %v5766_v12, 0.0  ;;  %v1125_v23 = vsel %vm1030_vm0, %v6438_v53, 0.0  ;;  %v5616_v12 = vld [vmem:[%s8041_s6 + $0x30] sm:$0xff]  }
 0x5ed   : > { %v6522_v27 = vpop.f32.mrf.mxu1 }
 0x5ef   : > { %v6524_v9 = vpop.f32.mrf.mxu1 }
 0x5f1   : > { %v6526_v28 = vpop.f32.mrf.mxu1 }
 0x5f3   : > { %v6528_v13 = vpop.f32.mrf.mxu1 }
 0x5fd   : > { %v5282_v11 = vpop.f32.mrf.mxu1 }
 0x5fe   : > { %v1626_v17 = vsel %vm1030_vm0, %v5282_v11, -inf }
 0x5ff   : > { %1627 = vmax.xlane.f32.xlu0 %v1626_v17  ;;  %v1605_v16 = vpop.f32.mrf.mxu1 }
 0x600   : > { %v1620_v29 = vsel %vm1030_vm0, %v1605_v16, -inf }
 0x601   : > { %v5283_v20 = vpop.f32.mrf.mxu1 }
 0x602   : > { %v1629_v30 = vsel %vm1030_vm0, %v5283_v20, -inf }
 0x603   : > { %1621 = vmax.xlane.f32.xlu0 %v1620_v29  ;;  %v1608_v31 = vpop.f32.mrf.mxu1  ;;  %1630 = vmax.xlane.f32.xlu1 %v1629_v30 }
 0x604   : > { %v1623_v32 = vsel %vm1030_vm0, %v1608_v31, -inf }
 0x607   : > { %1624 = vmax.xlane.f32.xlu1 %v1623_v32  ;;  %v5618_v32 = vld [vmem:[%s8041_s6 + $0x20] sm:$0xff]  }
 0x618   : > { %1662 = vrot.lane.b32.xlu1 %v6401_v26, %s8062_s29  ;;  %v1468_v26 = vsel %vm1030_vm0, %v6498_v42, 0.0 }
 0x619   : > { %1312 = vrot.lane.b32.xlu0 %v6399_v24, %s8066_s18  ;;  %v1477_v24 = vsel %vm1030_vm0, %v6506_v46, 0.0 }
 0x638   : > { %1291 = vadd.xlane.f32.xlu0 %v1290_v33 }
 0x63c   : > { %1297 = vadd.xlane.f32.xlu0 %v1296_v34  ;;  %1294 = vadd.xlane.f32.xlu1 %v1293_v35  ;;  %v5619_v35 = vld [vmem:[%s8041_s6 + $0x18] sm:$0xff]  }
 0x640   : > { %1300 = vadd.xlane.f32.xlu0 %v1299_v36  ;;  %1472 = vadd.xlane.f32.xlu1 %v1471_v37 }
 0x644   : > { %1469 = vadd.xlane.f32.xlu0 %v1468_v26  ;;  %1478 = vadd.xlane.f32.xlu1 %v1477_v24 }
 0x648   : > { %1475 = vadd.xlane.f32.xlu0 %v1474_v38 }
 0x688   : > { %v1628_v41 = vpop.xlane.xlu0 %1627 }
 0x689   : > { %v1634_v45 = vsub.f32 %v5282_v11, %v1628_v41  ;;  %v5620_v41 = vld [vmem:[%s8041_s6 + $0x10] sm:$0xff]  }
 0x68b   : > { %v1640_v54 = vmul.f32 1.442695, %v1634_v45 }
 0x68c   : > { %v1622_v47 = vpop.xlane.xlu0 %1621  ;;  %v1631_v43 = vpop.xlane.xlu1 %1630 }
 0x68d   : > { %v1632_v50 = vsub.f32 %v1605_v16, %v1622_v47  ;;  %v1635_v51 = vsub.f32 %v5283_v20, %v1631_v43 }
 0x68f   : > { %v1636_v57 = vmul.f32 1.442695, %v1632_v50  ;;  %v1642_v42 = vmul.f32 1.442695, %v1635_v51 }
 0x690   : > { %v1313_v58 = vpop.permute.xlu0 %1312  ;;  %v1625_v59 = vpop.xlane.xlu1 %1624 }
 0x691   : > { %5767 = vpow2.f32 %v1636_v57  ;;  %v1633_v46 = vsub.f32 %v1608_v31, %v1625_v59  ;;  %5252 = vmatprep.subr.bf16.mxu0 %v1313_v58 }
 0x692   : > { %5253 = vmatpush3.bf16.msra.mxu0 %v1313_v58  ;;  %5769 = vpow2.f32 %v1640_v54 }
 0x693   : > { %v1638_v44 = vmul.f32 1.442695, %v1633_v46  ;;  %5254 = vmatprep.subr.bf16.mxu0 %v1311_v39  ;;  %5771 = vpow2.f32 %v1642_v42  ;;  %v5621_v46 = vld [vmem:[%s8041_s6 + $0x8] sm:$0xff]  }
 0x694   : > { %v1663_v60 = vpop.permute.xlu1 %1662 }
 0x695   : > { %5773 = vpow2.f32 %v1638_v44 }
 0x696   : > { %5255 = vmatpush3.bf16.msra.mxu0 %v1311_v39 }
 0x697   : > { %5284 = vmatprep.subr.bf16.mxu0 %v1665_v40 }
 0x699   : > { %5257 = vmatmul.mubr.msk.bf16.vlgmr.msra.gmra.mxu0 %vm1030_vm0, %v1307_v25 }
 0x69a   : > { %5285 = vmatpush3.bf16.msra.mxu0 %v1665_v40 }
 0x69b   : > { %5286 = vmatprep.subr.bf16.mxu0 %v1663_v60 }
 0x69e   : > { %v5768_v63 = vpop.eup %5767  ;;  %5287 = vmatpush3.bf16.msra.mxu0 %v1663_v60 }
 0x69f   : > { %v1644_v0 = vsel %vm1030_vm0, %v5768_v63, 0.0  ;;  %v5770_v1 = vpop.eup %5769  ;;  %5292 = vmatprep.subr.bf16.mxu0 %v5615_v48 }
 0x6a0   : > { %1645 = vadd.xlane.f32.xlu0 %v1644_v0  ;;  %v5772_v2 = vpop.eup %5771  ;;  %v1650_v4 = vsel %vm1030_vm0, %v5770_v1, 0.0 }
 0x6a1   : > { %v1661_v18 = vpack.c.bf16 %v5772_v2, %v5770_v1  ;;  %v1653_v21 = vsel %vm1030_vm0, %v5772_v2, 0.0 }
 0x6a2   : > { %v5774_v3 = vpop.eup %5773 }
 0x6a3   : > { %v1647_v14 = vsel %vm1030_vm0, %v5774_v3, 0.0  ;;  %v1660_v15 = vpack.c.bf16 %v5774_v3, %v5768_v63 }
 0x6a4   : > { %1651 = vadd.xlane.f32.xlu0 %v1650_v4  ;;  %1648 = vadd.xlane.f32.xlu1 %v1647_v14 }
 0x6a5   : > { %5288 = vmatprep.mubr.msk.bf16.mxu0 %vm1030_vm0, %v1660_v15 }
 0x6a6   : > { %5289 = vmatmul.mubr.msk.bf16.vlgmr.msra.gmra.mxu0 %vm1030_vm0, %v1661_v18 }
 0x6a7   : > { %5293 = vmatpush3.bf16.msra.mxu0 %v5615_v48 }
 0x6a8   : > { %1117 = vadd.xlane.f32.xlu0 %v1116_v19  ;;  %1654 = vadd.xlane.f32.xlu1 %v1653_v21 }
 0x6a9   : > { %5294 = vmatprep.subr.bf16.mxu0 %v5616_v12 }
 0x6ab   : > { %5295 = vmatpush3.bf16.msra.mxu0 %v5616_v12 }
 0x6ac   : > { %1123 = vadd.xlane.f32.xlu0 %v1122_v22  ;;  %1120 = vadd.xlane.f32.xlu1 %v1119_v10 }
 0x6ad   : > { %5296 = vmatprep.subr.bf16.mxu0 %v5617_v49 }
 0x6af   : > { %5297 = vmatpush3.bf16.msra.mxu0 %v5617_v49 }
 0x6b0   : > { %1126 = vadd.xlane.f32.xlu1 %v1125_v23  ;;  %5298 = vmatprep.subr.bf16.mxu0 %v5618_v32 }
 0x6b3   : > { %5299 = vmatpush3.bf16.msra.mxu0 %v5618_v32 }
 0x6b4   : > { %5300 = vmatprep.subr.bf16.mxu0 %v5619_v35 }
 0x6b7   : > { %5301 = vmatpush3.bf16.msra.mxu0 %v5619_v35 }
 0x6b8   : > { %5302 = vmatprep.subr.bf16.mxu0 %v5620_v41 }
 0x6bb   : > { %5303 = vmatpush3.bf16.msra.mxu0 %v5620_v41 }
 0x6bc   : > { %5304 = vmatprep.subr.bf16.mxu0 %v5621_v46 }
 0x6bf   : > { %5305 = vmatpush3.bf16.msra.mxu0 %v5621_v46 }
 0x6c1   : > { %v1292_v52 = vpop.xlane.xlu0 %1291 }
 0x6c2   : > { %5775 = vrcp.f32 %v1292_v52 }
 0x6c5   : > { %v1298_v53 = vpop.xlane.xlu0 %1297  ;;  %v1295_v11 = vpop.xlane.xlu1 %1294 }
 0x6c6   : > { %5777 = vrcp.f32 %v1298_v53 }
 0x6c9   : > { %v1301_v25 = vpop.xlane.xlu0 %1300  ;;  %v1473_v16 = vpop.xlane.xlu1 %1472 }
 0x6ca   : > { %5779 = vrcp.f32 %v1301_v25 }
 0x6cd   : > { %v1470_v17 = vpop.xlane.xlu0 %1469  ;;  %v1479_v29 = vpop.xlane.xlu1 %1478 }
 0x6ce   : > { %5781 = vrcp.f32 %v1470_v17 }
 0x6cf   : > { %5783 = vrcp.f32 %v1295_v11  ;;  %v5776_v36 = vpop.eup %5775 }
 0x6d0   : > { %5785 = vrcp.f32 %v1473_v16 }
 0x6d1   : > { %v1476_v20 = vpop.xlane.xlu0 %1475 }
 0x6d2   : > { %5787 = vrcp.f32 %v1476_v20 }
 0x6d3   : > { %5789 = vrcp.f32 %v1479_v29  ;;  %v5778_v26 = vpop.eup %5777 }
 0x6d7   : > { %v5780_v38 = vpop.eup %5779 }
 0x6db   : > { %v5782_v39 = vpop.eup %5781 }
 0x6dc   : > { %v5784_v45 = vpop.eup %5783  ;;  %v1547_v58 = vmul.f32 %v5782_v39, %v6524_v9  ;;  %v5622_v9 = vld [vmem:[%s8041_s6] sm:$0xff]  }
 0x6dd   : > { %v5786_v50 = vpop.eup %5785  ;;  %5306 = vmatprep.subr.bf16.mxu0 %v5622_v9 }
 0x6de   : > { %v1548_v60 = vmul.f32 %v5786_v50, %v6528_v13  ;;  %5307 = vmatpush3.bf16.msra.mxu0 %v5622_v9 }
 0x6df   : > { %v5788_v59 = vpop.eup %5787 }
 0x6e0   : > { %v5790_v63 = vpop.eup %5789  ;;  %v5541_v0 = vpack.i.bf16 %v1548_v60, %v1547_v58  ;;  %v1549_v1 = vmul.f32 %v5788_v59, %v6522_v27 }
 0x6e1   : > { %v1550_v3 = vmul.f32 %v5790_v63, %v6526_v28 }
 0x6e3   : > { %v5546_v13 = vpack.i.bf16 %v1550_v3, %v1549_v1 }
 0x729   : > { %v1646_v30 = vpop.xlane.xlu0 %1645 }
 0x72d   : > { %v1649_v31 = vpop.xlane.xlu1 %1648  ;;  %v1652_v33 = vpop.xlane.xlu0 %1651 }
 0x72e   : > { %5791 = vrcp.f32 %v1652_v33 }
 0x731   : > { %v1655_v37 = vpop.xlane.xlu1 %1654  ;;  %v1118_v28 = vpop.xlane.xlu0 %1117 }
 0x732   : > { %5793 = vrcp.f32 %v1655_v37 }
 0x733   : > { %5795 = vrcp.f32 %v1646_v30 }
 0x734   : > { %5797 = vrcp.f32 %v1649_v31 }
 0x735   : > { %v1121_v52 = vpop.xlane.xlu1 %1120  ;;  %v1124_v53 = vpop.xlane.xlu0 %1123  ;;  %5799 = vrcp.f32 %v1118_v28 }
 0x736   : > { %5801 = vrcp.f32 %v1124_v53 }
 0x737   : > { %5803 = vrcp.f32 %v1121_v52 }
 0x739   : > { %v1127_v25 = vpop.xlane.xlu1 %1126 }
 0x73a   : > { %5805 = vrcp.f32 %v1127_v25 }
 0x73b   : > { %v5792_v14 = vpop.eup %5791 }
 0x73f   : > { %v5794_v15 = vpop.eup %5793 }
 0x740   : > { %v5796_v27 = vpop.eup %5795 }
 0x741   : > { %v5798_v22 = vpop.eup %5797 }
 0x742   : > { %v5800_v16 = vpop.eup %5799 }
 0x743   : > { %v5802_v20 = vpop.eup %5801 }
 0x744   : > { %v5804_v30 = vpop.eup %5803  ;;  %v1191_v35 = vmul.f32 %v5802_v20, %v6455_v5  ;;  %v5625_v20 = vld [vmem:[%s8044_s9 + $0x30] sm:$0xff]  }
 0x747   : > { %v5806_v32 = vpop.eup %5805 }
 0x759   : > { %v5258_v34 = vpop.f32.mrf.mxu0 }
 0x75a   : > { %v1373_v47 = vmul.f32 %v5778_v26, %v5258_v34  ;;  %v1189_v26 = vmul.f32 %v5800_v16, %v6457_v6  ;;  %v5624_v16 = vld [vmem:[%s8043_s8 + $0x38] sm:$0xff]  }
 0x75b   : > { %v1356_v24 = vpop.f32.mrf.mxu0  ;;  %5312 = vmatprep.subr.bf16.mxu1 %v5624_v16 }
 0x75c   : > { %v1371_v54 = vmul.f32 %v5776_v36, %v1356_v24  ;;  %v1192_v24 = vmul.f32 %v5806_v32, %v6459_v7  ;;  %5313 = vmatpush3.bf16.msra.mxu1 %v5624_v16  ;;  %v5629_v32 = vld [vmem:[%s8044_s9 + $0x20] sm:$0xff]  }
 0x75d   : > { %v5259_v40 = vpop.f32.mrf.mxu0 }
 0x75e   : > { %v1374_v43 = vmul.f32 %v5780_v38, %v5259_v40  ;;  %v1190_v38 = vmul.f32 %v5804_v30, %v6461_v8  ;;  %v5627_v30 = vld [vmem:[%s8044_s9 + $0x28] sm:$0xff]  }
 0x75f   : > { %v1359_v51 = vpop.f32.mrf.mxu0 }
 0x760   : > { %v5536_v57 = vpack.i.bf16 %v1374_v43, %v1373_v47  ;;  %v1372_v42 = vmul.f32 %v5784_v45, %v1359_v51 }
 0x762   : > { %v5531_v44 = vpack.i.bf16 %v1372_v42, %v1371_v54  ;;  %5537 = vrot.lane.b32.xlu1 %v5536_v57, %s8062_s29 }
 0x764   : > { %5532 = vrot.lane.b32.xlu0 %v5531_v44, %s8062_s29  ;;  %s4973_s29 = sshll.u32 %s6071_s0, 4 }
 0x766   : > { %v5290_v2 = vpop.f32.mrf.mxu0  ;;  %5542 = vrot.lane.b32.xlu1 %v5541_v0, %s8064_s27 }
 0x767   : > { %v1725_v19 = vmul.f32 %v5792_v14, %v5290_v2 }
 0x768   : > { %v1708_v4 = vpop.f32.mrf.mxu0 }
 0x769   : > { %v1723_v23 = vmul.f32 %v5796_v27, %v1708_v4 }
 0x76a   : > { %v5291_v18 = vpop.f32.mrf.mxu0  ;;  %5547 = vrot.lane.b32.xlu1 %v5546_v13, %s8064_s27  ;;  %s7984_s27 = scalar_lea.sflag [#allocation3], %s605_s22 }
 0x76b   : > { %v1726_v21 = vmul.f32 %v5794_v15, %v5291_v18 }
 0x76c   : > { %v1711_v10 = vpop.f32.mrf.mxu0 }
 0x76d   : > { %v5556_v48 = vpack.i.bf16 %v1726_v21, %v1725_v19  ;;  %v1724_v12 = vmul.f32 %v5798_v22, %v1711_v10  ;;  %v6088_v19 = vmov 0.0  }
 0x76e   : > { %5332 = vmatprep.subr.bf16.mxu0 %v6088_v19 }
 0x76f   : > { %v5551_v49 = vpack.i.bf16 %v1724_v12, %v1723_v23  ;;  %5557 = vrot.lane.b32.xlu1 %v5556_v48, %s8066_s18 }
 0x771   : > { %5552 = vrot.lane.b32.xlu0 %v5551_v49, %s8066_s18  ;;  %s4802_s18 = sshll.u32 %s605_s22, 5 }
 0x772   : > { %s607_s21 = scalar_lea.vmem [#allocation2], %s4802_s18 }
 0x773   : > { %s4700_s1 = sshll.u32 %s607_s21, 4  ;;  %s7975_s1 = int_to_ptr.vmem [resolvable:$true] %s4700_s1 }
 0x7d4   : > { %v5538_v11 = vpop.permute.xlu1 %5537 }
 0x7d5   : > { %v5540_v36 = vunpack.i.h.bf16 %v5538_v11  ;;  %v5539_v37 = vunpack.i.l.bf16 %v5538_v11 }
 0x7d6   : > { %v5533_v29 = vpop.permute.xlu0 %5532 }
 0x7d7   : > { %v5535_v33 = vunpack.i.h.bf16 %v5533_v29  ;;  %v5534_v34 = vunpack.i.l.bf16 %v5533_v29  ;;  %v1778_v54 = vsel %vm1030_vm0, %v1192_v24, %v5540_v36  ;;  %v1777_v6 = vsel %vm1030_vm0, %v1191_v35, %v5539_v37  ;;  %v5626_v29 = vld [vmem:[%s8043_s8 + $0x30] sm:$0xff]   ;;  %v5632_v35 = vld [vmem:[%s8043_s8 + $0x18] sm:$0xff]   ;;  %v5636_v24 = vld [vmem:[%s8043_s8 + $0x8] sm:$0xff]  }
 0x7d8   : > { %v5543_v17 = vpop.permute.xlu1 %5542  ;;  %5314 = vmatprep.subr.bf16.mxu1 %v5626_v29  ;;  %v5633_v36 = vld [vmem:[%s8044_s9 + $0x10] sm:$0xff]  }
 0x7d9   : > { %v5545_v41 = vunpack.i.h.bf16 %v5543_v17  ;;  %v5544_v45 = vunpack.i.l.bf16 %v5543_v17  ;;  %v1775_v43 = vsel %vm1030_vm0, %v1189_v26, %v5534_v34  ;;  %v1776_v50 = vsel %vm1030_vm0, %v1190_v38, %v5535_v33  ;;  %5315 = vmatpush3.bf16.msra.mxu1 %v5626_v29  ;;  %v5630_v33 = vld [vmem:[%s8043_s8 + $0x20] sm:$0xff]   ;;  %v5631_v34 = vld [vmem:[%s8044_s9 + $0x18] sm:$0xff]   ;;  %v5634_v37 = vld [vmem:[%s8043_s8 + $0x10] sm:$0xff]  }
 0x7da   : > { %v5635_v26 = vld [vmem:[%s8044_s9 + $0x8] sm:$0xff]   ;;  %v2074_v38 = vld [vmem:[%s621_s19] sm:$0xff]  ;;  %v5639_v29 = vld [vmem:[%s8045_s10 + $0x38] sm:$0xff]  }
 0x7db   : > { %v1780_v44 = vsel %vm1779_vm1, %v1775_v43, %v5544_v45  ;;  %v1781_v60 = vsel %vm1779_vm1, %v1776_v50, %v5545_v41  ;;  %v5638_v41 = vld [vmem:[%s8043_s8] sm:$0xff]  }
 0x7dc   : > { %v5548_v31 = vpop.permute.xlu1 %5547 }
 0x7dd   : > { %v5550_v39 = vunpack.i.h.bf16 %v5548_v31  ;;  %v5549_v40 = vunpack.i.l.bf16 %v5548_v31  ;;  %v5628_v31 = vld [vmem:[%s8043_s8 + $0x28] sm:$0xff]  }
 0x7de   : > { %5316 = vmatprep.subr.bf16.mxu1 %v5628_v31 }
 0x7df   : > { %v1782_v8 = vsel %vm1779_vm1, %v1777_v6, %v5549_v40  ;;  %v1783_v57 = vsel %vm1779_vm1, %v1778_v54, %v5550_v39  ;;  %5317 = vmatpush3.bf16.msra.mxu1 %v5628_v31  ;;  %v2075_v39 = vld [vmem:[%s621_s19 + $0x8] sm:$0xff]  ;;  %v5637_v40 = vld [vmem:[%s8044_s9] sm:$0xff]   ;;  %v5640_v31 = vld [vmem:[%s8045_s10 + $0x30] sm:$0xff]   ;;  %s4972_s19 = sshll.u32 %s6067_s30, 2  ;;  %s8098_s30 = sld [smem:[#allocation18_spill]] }
 0x7e0   : > { %5318 = vmatprep.subr.bf16.mxu1 %v5630_v33  ;;  %v6714_v45 = vpack.c.bf16 %v2075_v39, %v2074_v38  ;;  %v5644_v39 = vld [vmem:[%s8045_s10 + $0x10] sm:$0xff]  }
 0x7e1   : > { %v5558_v47 = vpop.permute.xlu1 %5557 }
 0x7e2   : > { %v5560_v5 = vunpack.i.h.bf16 %v5558_v47  ;;  %v5559_v51 = vunpack.i.l.bf16 %v5558_v47 }
 0x7e3   : > { %v5553_v7 = vpop.permute.xlu0 %5552  ;;  %5319 = vmatpush3.bf16.msra.mxu1 %v5630_v33 }
 0x7e4   : > { %v5555_v42 = vunpack.i.h.bf16 %v5553_v7  ;;  %v5554_v58 = vunpack.i.l.bf16 %v5553_v7  ;;  %v1787_v59 = vsel %vm1784_vm2, %v1782_v8, %v5559_v51  ;;  %v1788_v46 = vsel %vm1784_vm2, %v1783_v57, %v5560_v5  ;;  %5320 = vmatprep.subr.bf16.mxu1 %v5632_v35 }
 0x7e5   : > { %v1790_v9 = vpack.c.bf16 %v1788_v46, %v1787_v59 }
 0x7e6   : > { %v1785_v63 = vsel %vm1784_vm2, %v1780_v44, %v5554_v58  ;;  %v1786_v0 = vsel %vm1784_vm2, %v1781_v60, %v5555_v42  ;;  %v4857_v60 = vld [vmem:[%s8042_s7] ss:$0 sm:$0xff] }
 0x7e7   : > { %v1789_v1 = vpack.c.bf16 %v1786_v0, %v1785_v63  ;;  %5321 = vmatpush3.bf16.msra.mxu1 %v5632_v35 }
 0x7e8   : > { %5322 = vmatprep.subr.bf16.mxu1 %v5634_v37 }
 0x7e9   : > { %5308 = vmatprep.mubr.bf16.mxu0 %v1789_v1 }
 0x7ea   : > { %5309 = vmatmul.mubr.bf16.vlgmr.msra.gmra.mxu0 %v1790_v9 }
 0x7eb   : > { %5348 = vmatprep.mubr.msk.bf16.mxu0 %vm6089_vm3, %v6088_v19  ;;  %5323 = vmatpush3.bf16.msra.mxu1 %v5634_v37 }
 0x7ec   : > { %5324 = vmatprep.subr.bf16.mxu1 %v5636_v24 }
 0x7ef   : > { %5325 = vmatpush3.bf16.msra.mxu1 %v5636_v24  ;;  %v5643_v24 = vld [vmem:[%s8045_s10 + $0x18] sm:$0xff]  }
 0x7f0   : > { %5326 = vmatprep.subr.bf16.mxu1 %v5638_v41 }
 0x7f3   : > { %5327 = vmatpush3.bf16.msra.mxu1 %v5638_v41  ;;  %v5646_v41 = vld [vmem:[%s8045_s10] sm:$0xff]  }
 0x7f4   : > { %5352 = vmatprep.subr.bf16.mxu1 %v6088_v19 }
 0x8aa   : > { %v5310_v2 = vpop.f32.mrf.mxu0 }
 0x8ab   : > { %v6620_v15 = vadd.f32 %v5310_v2, %v6352_v61 }
 0x8ac   : > { %v1889_v3 = vpop.f32.mrf.mxu0 }
 0x8ad   : > { %v6616_v4 = vadd.f32 %v1889_v3, %v6344_v55  ;;  %v5623_v55 = vld [vmem:[%s8044_s9 + $0x38] sm:$0xff]  }
 0x8ae   : > { %v5311_v13 = vpop.f32.mrf.mxu0  ;;  %5333 = vmatpush3.bf16.msra.mxu0 %v5623_v55 }
 0x8af   : > { %1905 = vadd.xlane.f32.xlu0 %v6616_v4  ;;  %v6628_v27 = vadd.f32 %v5311_v13, %v6354_v62  ;;  %5334 = vmatprep.subr.bf16.mxu0 %v6088_v19 }
 0x8b0   : > { %v1892_v14 = vpop.f32.mrf.mxu0 }
 0x8b1   : > { %v6623_v18 = vadd.f32 %v1892_v14, %v6346_v56 }
 0x8b2   : > { %5335 = vmatpush3.bf16.msra.mxu0 %v5625_v20 }
 0x8b3   : > { %1907 = vadd.xlane.f32.xlu1 %v6623_v18  ;;  %1909 = vadd.xlane.f32.xlu0 %v6620_v15 }
 0x8b4   : > { %5336 = vmatprep.subr.bf16.mxu0 %v6088_v19 }
 0x8b6   : > { %5337 = vmatpush3.bf16.msra.mxu0 %v5627_v30 }
 0x8b7   : > { %1911 = vadd.xlane.f32.xlu0 %v6628_v27  ;;  %5338 = vmatprep.subr.bf16.mxu0 %v6088_v19 }
 0x8ba   : > { %5339 = vmatpush3.bf16.msra.mxu0 %v5629_v32  ;;  %v6766_v32 = vld [vmem:[%s8047_s12] sm:$0xf] }
 0x8bb   : > { %5340 = vmatprep.subr.bf16.mxu0 %v6088_v19 }
 0x8be   : > { %5341 = vmatpush3.bf16.msra.mxu0 %v5631_v34  ;;  %v5641_v34 = vld [vmem:[%s8045_s10 + $0x28] sm:$0xff]  }
 0x8bf   : > { %5342 = vmatprep.subr.bf16.mxu0 %v6088_v19 }
 0x8c2   : > { %5343 = vmatpush3.bf16.msra.mxu0 %v5633_v36  ;;  %v5642_v36 = vld [vmem:[%s8045_s10 + $0x20] sm:$0xff]  }
 0x8c3   : > { %5344 = vmatprep.subr.bf16.mxu0 %v6088_v19 }
 0x8c6   : > { %5345 = vmatpush3.bf16.msra.mxu0 %v5635_v26 }
 0x8c7   : > { %5346 = vmatprep.subr.bf16.mxu0 %v6088_v19 }
 0x8ca   : > { %5347 = vmatpush3.bf16.msra.mxu0 %v5637_v40  ;;  %v5645_v40 = vld [vmem:[%s8045_s10 + $0x8] sm:$0xff]  }
 0x8cd   : > { %5349 = vmatmul.mubr.bf16.vlgmr.msra.gmra.mxu0 %v6714_v45 }
 0x938   : > { %v1906_v56 = vpop.xlane.xlu0 %1905 }
 0x939   : > { %v1913_v61 = vmul.f32 0.0078125, %v1906_v56 }
 0x93b   : > { %v6637_v21 = vsub.f32 %v6616_v4, %v1913_v61 }
 0x93c   : > { %v1908_v22 = vpop.xlane.xlu1 %1907  ;;  %v1910_v62 = vpop.xlane.xlu0 %1909 }
 0x93d   : > { %v1914_v10 = vmul.f32 0.0078125, %v1908_v22  ;;  %v1915_v23 = vmul.f32 0.0078125, %v1910_v62  ;;  %v1921_v48 = vmul.f32 %v6637_v21, %v6637_v21 }
 0x93f   : > { %1925 = vadd.xlane.f32.xlu0 %v1921_v48  ;;  %v6642_v12 = vsub.f32 %v6623_v18, %v1914_v10  ;;  %v6645_v49 = vsub.f32 %v6620_v15, %v1915_v23 }
 0x940   : > { %v1912_v28 = vpop.xlane.xlu0 %1911 }
 0x941   : > { %v1916_v52 = vmul.f32 0.0078125, %v1912_v28  ;;  %v1922_v53 = vmul.f32 %v6642_v12, %v6642_v12  ;;  %v1923_v25 = vmul.f32 %v6645_v49, %v6645_v49 }
 0x943   : > { %1927 = vadd.xlane.f32.xlu1 %v1922_v53  ;;  %1929 = vadd.xlane.f32.xlu0 %v1923_v25  ;;  %v6652_v11 = vsub.f32 %v6628_v27, %v1916_v52 }
 0x945   : > { %v1924_v17 = vmul.f32 %v6652_v11, %v6652_v11 }
 0x947   : > { %1931 = vadd.xlane.f32.xlu1 %v1924_v17  ;;  %v2351_v17 = vlaneseq }
 0x949   : > { %v6749_v20 = vshrl.u32 %v2351_v17, 7 }
 0x94b   : > { %v6756_v30 = vsub.s32 2, %v6749_v20  ;;  %v6777_v35 = vsub.s32 1, %v6749_v20  ;;  %v6788_v26 = vsub.s32 3, %v6749_v20 }
 0x94d   : > { %v2808_v33 = vrot.slane %v6766_v32, %v6756_v30  ;;  %v2571_v37 = vrot.slane %v6766_v32, %v6777_v35  ;;  %v3044_v38 = vrot.slane %v6766_v32, %v6788_v26 }
 0x9c8   : > { %v1926_v47 = vpop.xlane.xlu0 %1925 }
 0x9c9   : > { %v1933_v43 = vmul.f32 0.0078125, %v1926_v47 }
 0x9cb   : > { %v1937_v50 = vadd.f32 1e-05, %v1933_v43 }
 0x9cc   : > { %v1928_v5 = vpop.xlane.xlu1 %1927  ;;  %v1930_v51 = vpop.xlane.xlu0 %1929 }
 0x9cd   : > { %5807 = vrsqrt.f32 %v1937_v50  ;;  %v1934_v54 = vmul.f32 0.0078125, %v1928_v5  ;;  %v1935_v6 = vmul.f32 0.0078125, %v1930_v51 }
 0x9cf   : > { %v1938_v7 = vadd.f32 1e-05, %v1934_v54  ;;  %v1939_v8 = vadd.f32 1e-05, %v1935_v6 }
 0x9d0   : > { %v1932_v57 = vpop.xlane.xlu1 %1931 }
 0x9d1   : > { %5809 = vrsqrt.f32 %v1938_v7  ;;  %v1936_v42 = vmul.f32 0.0078125, %v1932_v57 }
 0x9d2   : > { %5811 = vrsqrt.f32 %v1939_v8 }
 0x9d3   : > { %v1940_v58 = vadd.f32 1e-05, %v1936_v42 }
 0x9d5   : > { %5813 = vrsqrt.f32 %v1940_v58 }
 0x9da   : > { %v5808_v59 = vpop.eup %5807 }
 0x9db   : > { %v1945_v46 = vmul.f32 %v5808_v59, %v6637_v21  ;;  %v2175_v21 = vpop.f32.mrf.mxu0 }
 0x9dd   : > { %v1955_v1 = vmul.f32 %v4857_v60, %v1945_v46  ;;  %v5350_v22 = vpop.f32.mrf.mxu0 }
 0x9de   : > { %v5810_v44 = vpop.eup %5809 }
 0x9df   : > { %v5812_v63 = vpop.eup %5811  ;;  %v1946_v0 = vmul.f32 %v5810_v44, %v6642_v12  ;;  %v2178_v62 = vpop.f32.mrf.mxu0 }
 0x9e0   : > { %v1947_v2 = vmul.f32 %v5812_v63, %v6645_v49  ;;  %v2289_v10 = vpack.c.bf16 %v2178_v62, %v2175_v21 }
 0x9e1   : > { %v1956_v9 = vmul.f32 %v4857_v60, %v1946_v0  ;;  %v5351_v23 = vpop.f32.mrf.mxu0 }
 0x9e2   : > { %v5814_v3 = vpop.eup %5813  ;;  %v1957_v55 = vmul.f32 %v4857_v60, %v1947_v2  ;;  %5448 = vmatprep.subr.msk.bf16.mxu0 %vm1030_vm0, %v2289_v10  ;;  %v2300_v48 = vsel %vm1030_vm0, %v2289_v10, 0  ;;  %2508 = vrot.lane.b32.xlu0 %v2289_v10, %s8087_s2  ;;  %v6840_v2 = vsub.s32 0, %v6749_v20 }
 0x9e3   : > { %v1959_v13 = vpack.c.bf16 %v1956_v9, %v1955_v1  ;;  %v1948_v14 = vmul.f32 %v5814_v3, %v6652_v11  ;;  %5373 = vmatpush3.bf16.xpose.msra.mxu0 %v2300_v48 }
 0x9e4   : > { %v2354_v3 = vrot.slane %v6766_v32, %v6840_v2 }
 0x9e5   : > { %5328 = vmatprep.mubr.bf16.mxu1 %v1959_v13  ;;  %v1958_v56 = vmul.f32 %v4857_v60, %v1948_v14 }
 0x9e7   : > { %v1960_v61 = vpack.c.bf16 %v1958_v56, %v1957_v55 }
 0x9e9   : > { %5329 = vmatmul.mubr.bf16.vlgmr.msra.gmra.mxu1 %v1960_v61 }
 0x9ea   : > { %5368 = vmatprep.mubr.msk.bf16.mxu1 %vm6089_vm3, %v6088_v19  ;;  %5353 = vmatpush3.bf16.msra.mxu1 %v5639_v29 }
 0x9eb   : > { %5354 = vmatprep.subr.bf16.mxu1 %v6088_v19 }
 0x9ee   : > { %5355 = vmatpush3.bf16.msra.mxu1 %v5640_v31 }
 0x9ef   : > { %5356 = vmatprep.subr.bf16.mxu1 %v6088_v19 }
 0x9f2   : > { %5357 = vmatpush3.bf16.msra.mxu1 %v5641_v34 }
 0x9f3   : > { %5358 = vmatprep.subr.bf16.mxu1 %v6088_v19 }
 0x9f6   : > { %5359 = vmatpush3.bf16.msra.mxu1 %v5642_v36 }
 0x9f7   : > { %5360 = vmatprep.subr.bf16.mxu1 %v6088_v19 }
 0x9fa   : > { %5361 = vmatpush3.bf16.msra.mxu1 %v5643_v24 }
 0x9fb   : > { %5362 = vmatprep.subr.bf16.mxu1 %v6088_v19 }
 0x9fe   : > { %5363 = vmatpush3.bf16.msra.mxu1 %v5644_v39 }
 0x9ff   : > { %5364 = vmatprep.subr.bf16.mxu1 %v6088_v19 }
 0xa02   : > { %5365 = vmatpush3.bf16.msra.mxu1 %v5645_v40 }
 0xa03   : > { %5366 = vmatprep.subr.bf16.mxu1 %v6088_v19 }
 0xa06   : > { %5367 = vmatpush3.bf16.msra.mxu1 %v5646_v41 }
 0xa09   : > { %5369 = vmatmul.mubr.bf16.vlgmr.msra.gmra.mxu1 %v6714_v45 }
 0xa54   : > { %v2509_v12 = vpop.permute.xlu0 %2508 }
 0xa55   : > { %5449 = vmatprep.subr.msk.bf16.mxu0 %vm1030_vm0, %v2509_v12  ;;  %v2517_v16 = vsel %vm1030_vm0, %v2509_v12, 0 }
 0xaa9   : > { %v6731_v49 = vpop.f32.mrf.mxu1 }
 0xaaa   : > { %v2357_v61 = vmul.f32 %v6731_v49, %v2354_v3 }
 0xaab   : > { %v6733_v28 = vpop.f32.mrf.mxu1 }
 0xaac   : > { %v2355_v55 = vmul.f32 %v2354_v3, %v6733_v28  ;;  %v2365_v21 = vsel %vm1030_vm0, %v2357_v61, 0.0 }
 0xaad   : > { %v6735_v52 = vpop.f32.mrf.mxu1 }
 0xaae   : > { %v2292_v53 = vpack.c.bf16 %v6735_v52, %v6731_v49  ;;  %v2358_v13 = vmul.f32 %v6735_v52, %v2354_v3  ;;  %v2359_v56 = vsel %vm1030_vm0, %v2355_v55, 0.0 }
 0xaaf   : > { %v6739_v25 = vpop.f32.mrf.mxu1 }
 0xab0   : > { %2505 = vrot.lane.b32.xlu1 %v2292_v53, %s8087_s2  ;;  %v2291_v11 = vpack.c.bf16 %v6739_v25, %v6733_v28  ;;  %v2368_v14 = vsel %vm1030_vm0, %v2358_v13, 0.0 }
 0xab2   : > { %2741 = vrot.lane.b32.xlu0 %v2291_v11, %s8088_s23  ;;  %5374 = vmatprep.mubr.msk.bf16.mxu0 %vm1030_vm0, %v2291_v11 }
 0xab3   : > { %5375 = vmatmul.mubr.msk.bf16.vlgmr.msra.gmra.mxu0 %vm1030_vm0, %v2292_v53 }
 0xab4   : > { %2503 = vrot.lane.b32.xlu1 %v2291_v11, %s8087_s2  ;;  %5385 = vmatpush3.bf16.xpose.msra.mxu0 %v2517_v16 }
 0xab6   : > { %2981 = vrot.lane.b32.xlu0 %v2289_v10, %s8089_s17 }
 0xab8   : > { %2745 = vrot.lane.b32.xlu1 %v2289_v10, %s8088_s23 }
 0xaba   : > { %2979 = vrot.lane.b32.xlu0 %v2292_v53, %s8089_s17 }
 0xabc   : > { %2743 = vrot.lane.b32.xlu1 %v2292_v53, %s8088_s23 }
 0xabe   : > { %2810 = vrot.lane.b32.xlu0 %v2808_v33, %s8088_s23 }
 0xac0   : > { %2977 = vrot.lane.b32.xlu1 %v2291_v11, %s8089_s17 }
 0xac4   : > { %2573 = vrot.lane.b32.xlu1 %v2571_v37, %s8089_s17 }
 0xac8   : > { %3046 = vrot.lane.b32.xlu1 %v3044_v38, %s8087_s2 }
 0xac9   : > { %v2280_v23 = vpop.f32.mrf.mxu1 }
 0xacb   : > { %v5370_v48 = vpop.f32.mrf.mxu1 }
 0xacd   : > { %v2283_v12 = vpop.f32.mrf.mxu1 }
 0xb22   : > { %v2506_v47 = vpop.permute.xlu1 %2505 }
 0xb24   : > { %v2742_v43 = vpop.permute.xlu0 %2741 }
 0xb26   : > { %v2504_v50 = vpop.permute.xlu1 %2503 }
 0xb27   : > { %5386 = vmatprep.mubr.msk.bf16.mxu0 %vm1030_vm0, %v2504_v50 }
 0xb28   : > { %5387 = vmatmul.mubr.msk.bf16.vlgmr.msra.gmra.mxu0 %vm1030_vm0, %v2506_v47  ;;  %v2982_v54 = vpop.permute.xlu0 %2981 }
 0xb29   : > { %5398 = vmatprep.mubr.msk.bf16.mxu0 %vm1030_vm0, %v2742_v43  ;;  %v2990_v7 = vsel %vm1030_vm0, %v2982_v54, 0 }
 0xb2a   : > { %v2746_v5 = vpop.permute.xlu1 %2745 }
 0xb2b   : > { %v2754_v51 = vsel %vm1030_vm0, %v2746_v5, 0  ;;  %5450 = vmatprep.subr.msk.bf16.mxu0 %vm1030_vm0, %v2746_v5 }
 0xb2c   : > { %5397 = vmatpush3.bf16.xpose.msra.mxu0 %v2754_v51  ;;  %v2980_v45 = vpop.permute.xlu0 %2979 }
 0xb2d   : > { %5451 = vmatprep.subr.msk.bf16.mxu0 %vm1030_vm0, %v2982_v54 }
 0xb2e   : > { %v2744_v19 = vpop.permute.xlu1 %2743 }
 0xb30   : > { %v2811_v58 = vpop.permute.xlu0 %2810 }
 0xb31   : > { %v2816_v46 = vmul.f32 %v6735_v52, %v2811_v58  ;;  %v2813_v63 = vmul.f32 %v2811_v58, %v6733_v28  ;;  %v2815_v0 = vmul.f32 %v6731_v49, %v2811_v58  ;;  %v2814_v62 = vmul.f32 %v2811_v58, %v6739_v25 }
 0xb32   : > { %v2978_v6 = vpop.permute.xlu1 %2977 }
 0xb33   : > { %5399 = vmatmul.mubr.msk.bf16.vlgmr.msra.gmra.mxu0 %vm1030_vm0, %v2744_v19 }
 0xb34   : > { %5409 = vmatpush3.bf16.xpose.msra.mxu0 %v2990_v7  ;;  %5410 = vmatprep.mubr.msk.bf16.mxu0 %vm1030_vm0, %v2978_v6 }
 0xb36   : > { %v2574_v8 = vpop.permute.xlu1 %2573 }
 0xb37   : > { %v2579_v57 = vmul.f32 %v6735_v52, %v2574_v8  ;;  %v2576_v42 = vmul.f32 %v2574_v8, %v6733_v28  ;;  %v2578_v59 = vmul.f32 %v6731_v49, %v2574_v8  ;;  %v2577_v22 = vmul.f32 %v2574_v8, %v6739_v25 }
 0xb39   : > { %2590 = vrot.lane.b32.xlu1 %v2579_v57, %s8087_s2  ;;  %2584 = vrot.lane.b32.xlu0 %v2576_v42, %s8087_s2 }
 0xb3a   : > { %v3047_v44 = vpop.permute.xlu1 %3046 }
 0xb3b   : > { %5411 = vmatmul.mubr.msk.bf16.vlgmr.msra.gmra.mxu0 %vm1030_vm0, %v2980_v45  ;;  %v3052_v60 = vmul.f32 %v6735_v52, %v3047_v44  ;;  %v3049_v1 = vmul.f32 %v3047_v44, %v6733_v28  ;;  %v3051_v9 = vmul.f32 %v6731_v49, %v3047_v44  ;;  %v3050_v10 = vmul.f32 %v3047_v44, %v6739_v25  ;;  %v5371_v28 = vpop.f32.mrf.mxu1 }
 0xb3c   : > { %v6856_v49 = vpack.c.bf16 %v2283_v12, %v2280_v23  ;;  %v2356_v52 = vmul.f32 %v2354_v3, %v6739_v25 }
 0xb3d   : > { %2588 = vrot.lane.b32.xlu0 %v2578_v59, %s8087_s2  ;;  %2827 = vrot.lane.b32.xlu1 %v2816_v46, %s8088_s23 }
 0xb3e   : > { %5378 = vmatprep.subr.bf16.mxu1 %v6856_v49  ;;  %v2362_v53 = vsel %vm1030_vm0, %v2356_v52, 0.0 }
 0xb3f   : > { %5379 = vmatpush3.bf16.msra.mxu1 %v6856_v49 }
 0xb41   : > { %3063 = vrot.lane.b32.xlu1 %v3052_v60, %s8089_s17  ;;  %2821 = vrot.lane.b32.xlu0 %v2813_v63, %s8088_s23 }
 0xb45   : > { %2825 = vrot.lane.b32.xlu0 %v2815_v0, %s8088_s23 }
 0xb49   : > { %3057 = vrot.lane.b32.xlu0 %v3049_v1, %s8089_s17 }
 0xb4d   : > { %3061 = vrot.lane.b32.xlu0 %v3051_v9, %s8089_s17 }
 0xb65   : > { %2369 = vadd.xlane.f32.xlu1 %v2368_v14 }
 0xb6c   : > { %2360 = vadd.xlane.f32.xlu0 %v2359_v56 }
 0xb70   : > { %2366 = vadd.xlane.f32.xlu0 %v2365_v21 }
 0xb73   : > { %v6870_v47 = vpop.f32.mrf.mxu0 }
 0xb74   : > { %v2378_v5 = vsel %vm2371_vm4, %v6870_v47, -inf }
 0xb75   : > { %v6873_v50 = vpop.f32.mrf.mxu0 }
 0xb76   : > { %2586 = vrot.lane.b32.xlu1 %v2577_v22, %s8087_s2  ;;  %v2372_v54 = vsel %vm2371_vm4, %v6873_v50, -inf }
 0xb77   : > { %v6877_v51 = vpop.f32.mrf.mxu0 }
 0xb79   : > { %v6881_v19 = vpop.f32.mrf.mxu0 }
 0xb7a   : > { %2823 = vrot.lane.b32.xlu1 %v2814_v62, %s8088_s23  ;;  %v2375_v45 = vsel %vm2371_vm4, %v6881_v19, -inf  ;;  %v2381_v62 = vsel %vm2371_vm4, %v6877_v51, -inf }
 0xb7e   : > { %3059 = vrot.lane.b32.xlu1 %v3050_v10, %s8089_s17 }
 0xba2   : > { %2363 = vadd.xlane.f32.xlu1 %v2362_v53 }
 0xbab   : > { %v2591_v11 = vpop.permute.xlu1 %2590  ;;  %v2585_v17 = vpop.permute.xlu0 %2584 }
 0xbac   : > { %v2605_v16 = vsel %vm1030_vm0, %v2591_v11, 0.0  ;;  %v2596_v40 = vsel %vm1030_vm0, %v2585_v17, 0.0 }
 0xbad   : > { %2606 = vadd.xlane.f32.xlu1 %v2605_v16 }
 0xbaf   : > { %v2828_v20 = vpop.permute.xlu1 %2827  ;;  %v2589_v29 = vpop.permute.xlu0 %2588 }
 0xbb0   : > { %v2842_v31 = vsel %vm1030_vm0, %v2828_v20, 0.0  ;;  %v2602_v32 = vsel %vm1030_vm0, %v2589_v29, 0.0 }
 0xbb1   : > { %2843 = vadd.xlane.f32.xlu1 %v2842_v31  ;;  %2603 = vadd.xlane.f32.xlu0 %v2602_v32 }
 0xbb3   : > { %v3064_v33 = vpop.permute.xlu1 %3063  ;;  %v2822_v25 = vpop.permute.xlu0 %2821 }
 0xbb4   : > { %v3078_v34 = vsel %vm1030_vm0, %v3064_v33, 0.0  ;;  %v2833_v41 = vsel %vm1030_vm0, %v2822_v25, 0.0 }
 0xbb5   : > { %3079 = vadd.xlane.f32.xlu1 %v3078_v34 }
 0xbb7   : > { %v2826_v36 = vpop.permute.xlu0 %2825 }
 0xbb8   : > { %v2839_v37 = vsel %vm1030_vm0, %v2826_v36, 0.0 }
 0xbb9   : > { %2840 = vadd.xlane.f32.xlu0 %v2839_v37 }
 0xbbb   : > { %v3058_v24 = vpop.permute.xlu0 %3057 }
 0xbbc   : > { %v3069_v43 = vsel %vm1030_vm0, %v3058_v24, 0.0 }
 0xbbf   : > { %v3062_v38 = vpop.permute.xlu0 %3061 }
 0xbc0   : > { %v3075_v39 = vsel %vm1030_vm0, %v3062_v38, 0.0 }
 0xbc1   : > { %3076 = vadd.xlane.f32.xlu0 %v3075_v39 }
 0xbc5   : > { %2597 = vadd.xlane.f32.xlu0 %v2596_v40 }
 0xbc9   : > { %2834 = vadd.xlane.f32.xlu0 %v2833_v41 }
 0xbcd   : > { %3070 = vadd.xlane.f32.xlu0 %v3069_v43 }
 0xbd1   : > { %2379 = vmax.xlane.f32.xlu0 %v2378_v5 }
 0xbd5   : > { %2373 = vmax.xlane.f32.xlu0 %v2372_v54 }
 0xbd9   : > { %2376 = vmax.xlane.f32.xlu0 %v2375_v45 }
 0xbe8   : > { %v6885_v6 = vpop.f32.mrf.mxu0 }
 0xbe9   : > { %v2614_v7 = vsel %vm2371_vm4, %v6885_v6, -inf }
 0xbea   : > { %v6889_v8 = vpop.f32.mrf.mxu0  ;;  %2615 = vmax.xlane.f32.xlu0 %v2614_v7 }
 0xbeb   : > { %v2608_v42 = vsel %vm2371_vm4, %v6889_v8, -inf }
 0xbec   : > { %v6891_v57 = vpop.f32.mrf.mxu0 }
 0xbed   : > { %v2617_v23 = vsel %vm2371_vm4, %v6891_v57, -inf }
 0xbee   : > { %v6895_v58 = vpop.xlane.xlu1 %2369  ;;  %2609 = vmax.xlane.f32.xlu0 %v2608_v42  ;;  %v6897_v59 = vpop.f32.mrf.mxu0 }
 0xbef   : > { %v2611_v48 = vsel %vm2371_vm4, %v6897_v59, -inf }
 0xbf2   : > { %v2587_v46 = vpop.permute.xlu1 %2586 }
 0xbf3   : > { %v2599_v44 = vsel %vm1030_vm0, %v2587_v46, 0.0  ;;  %v6900_v60 = vpop.f32.mrf.mxu0 }
 0xbf4   : > { %2600 = vadd.xlane.f32.xlu1 %v2599_v44  ;;  %v2851_v63 = vsel %vm2371_vm4, %v6900_v60, -inf }
 0xbf5   : > { %v6904_v0 = vpop.f32.mrf.mxu0  ;;  %2852 = vmax.xlane.f32.xlu0 %v2851_v63  ;;  %v2361_v52 = vpop.xlane.xlu0 %2360 }
 0xbf6   : > { %v2824_v1 = vpop.permute.xlu1 %2823  ;;  %v2845_v13 = vsel %vm2371_vm4, %v6904_v0, -inf }
 0xbf7   : > { %v2836_v9 = vsel %vm1030_vm0, %v2824_v1, 0.0  ;;  %v6907_v3 = vpop.f32.mrf.mxu0  ;;  %v6966_v1 = vld [vmem:[%s8048_s13] sm:$0xf] }
 0xbf8   : > { %2837 = vadd.xlane.f32.xlu1 %v2836_v9  ;;  %v2854_v12 = vsel %vm2371_vm4, %v6907_v3, -inf }
 0xbf9   : > { %v6911_v14 = vpop.f32.mrf.mxu0  ;;  %2846 = vmax.xlane.f32.xlu0 %v2845_v13  ;;  %v2367_v53 = vpop.xlane.xlu0 %2366 }
 0xbfa   : > { %v3060_v55 = vpop.permute.xlu1 %3059  ;;  %v2848_v28 = vsel %vm2371_vm4, %v6911_v14, -inf }
 0xbfb   : > { %v3072_v56 = vsel %vm1030_vm0, %v3060_v55, 0.0  ;;  %v6914_v61 = vpop.f32.mrf.mxu0 }
 0xbfc   : > { %3073 = vadd.xlane.f32.xlu1 %v3072_v56  ;;  %v3087_v21 = vsel %vm2371_vm4, %v6914_v61, -inf }
 0xbfd   : > { %v6918_v22 = vpop.f32.mrf.mxu0  ;;  %3088 = vmax.xlane.f32.xlu0 %v3087_v21 }
 0xbfe   : > { %v3081_v10 = vsel %vm2371_vm4, %v6918_v22, -inf }
 0xbff   : > { %v6936_v11 = vpop.f32.mrf.mxu0 }
 0xc00   : > { %2382 = vmax.xlane.f32.xlu1 %v2381_v62  ;;  %v3090_v16 = vsel %vm2371_vm4, %v6936_v11, -inf }
 0xc01   : > { %3082 = vmax.xlane.f32.xlu0 %v3081_v10  ;;  %v6942_v20 = vpop.f32.mrf.mxu0 }
 0xc02   : > { %v3084_v31 = vsel %vm2371_vm4, %v6942_v20, -inf }
 0xc04   : > { %2618 = vmax.xlane.f32.xlu1 %v2617_v23 }
 0xc08   : > { %2612 = vmax.xlane.f32.xlu1 %v2611_v48 }
 0xc0c   : > { %2855 = vmax.xlane.f32.xlu1 %v2854_v12 }
 0xc10   : > { %2849 = vmax.xlane.f32.xlu1 %v2848_v28 }
 0xc17   : > { %2679 = vrot.lane.b32.xlu0 %v6856_v49, %s8087_s2 }
 0xc21   : > { %2915 = vrot.lane.b32.xlu1 %v6856_v49, %s8088_s23 }
 0xc2b   : > { %v2364_v5 = vpop.xlane.xlu1 %2363 }
 0xc36   : > { %v6972_v9 = vpop.xlane.xlu1 %2606 }
 0xc3a   : > { %v6938_v17 = vpop.xlane.xlu0 %2603  ;;  %v6982_v56 = vpop.xlane.xlu1 %2843 }
 0xc42   : > { %v6944_v29 = vpop.xlane.xlu0 %2840 }
 0xc45   : > { %3091 = vmax.xlane.f32.xlu1 %v3090_v16 }
 0xc49   : > { %3085 = vmax.xlane.f32.xlu1 %v3084_v31 }
 0xc4a   : > { %v6948_v32 = vpop.xlane.xlu0 %3076 }
 0xc4e   : > { %v6950_v33 = vpop.xlane.xlu0 %2597 }
 0xc52   : > { %v6952_v25 = vpop.xlane.xlu0 %2834 }
 0xc56   : > { %v6954_v34 = vpop.xlane.xlu0 %3070 }
 0xc5a   : > { %3151 = vrot.lane.b32.xlu1 %v6856_v49, %s8089_s17  ;;  %v2380_v36 = vpop.xlane.xlu0 %2379 }
 0xc5b   : > { %v6958_v37 = vmax.f32 %v2380_v36, %v2367_v53 }
 0xc5d   : > { %v2402_v24 = vsub.f32 %v2367_v53, %v6958_v37 }
 0xc5e   : > { %v2374_v38 = vpop.xlane.xlu0 %2373 }
 0xc5f   : > { %v2408_v39 = vmul.f32 1.442695, %v2402_v24  ;;  %v2384_v40 = vmax.f32 %v2374_v38, %v2361_v52  ;;  %v7010_v38 = vpop.xlane.xlu1 %3079 }
 0xc61   : > { %v2388_v41 = vsub.f32 %v6873_v50, %v2384_v40  ;;  %v2400_v43 = vsub.f32 %v2361_v52, %v2384_v40  ;;  %5815 = vpow2.f32 %v2408_v39  ;;  %v6970_v50 = vrot.slane %v6966_v1, %v6840_v2 }
 0xc62   : > { %v2377_v54 = vpop.xlane.xlu0 %2376 }
 0xc63   : > { %v2404_v45 = vmul.f32 1.442695, %v2400_v43  ;;  %v2385_v7 = vmax.f32 %v2377_v54, %v2364_v5  ;;  %v2392_v42 = vmul.f32 1.442695, %v2388_v41 }
 0xc65   : > { %v2389_v46 = vsub.f32 %v6881_v19, %v2385_v7  ;;  %v2401_v49 = vsub.f32 %v2364_v5, %v2385_v7  ;;  %5817 = vpow2.f32 %v2404_v45 }
 0xc66   : > { %5819 = vpow2.f32 %v2392_v42 }
 0xc67   : > { %v2394_v44 = vmul.f32 1.442695, %v2389_v46  ;;  %v2406_v63 = vmul.f32 1.442695, %v2401_v49  ;;  %v2390_v49 = vsub.f32 %v6870_v47, %v6958_v37 }
 0xc69   : > { %5821 = vpow2.f32 %v2394_v44 }
 0xc6a   : > { %5823 = vpow2.f32 %v2406_v63 }
 0xc6e   : > { %v6974_v13 = vpop.eup %5815 }
 0xc6f   : > { %v6978_v19 = vmul.f32 %v6974_v13, %v6970_v50 }
 0xc72   : > { %v6980_v55 = vpop.eup %5817 }
 0xc73   : > { %v2616_v21 = vpop.xlane.xlu0 %2615  ;;  %v6989_v10 = vmul.f32 %v6980_v55, %v6970_v50  ;;  %v6991_v23 = vpop.eup %5819 }
 0xc74   : > { %v6985_v62 = vmax.f32 %v2616_v21, %v6938_v17 }
 0xc76   : > { %v6993_v48 = vpop.eup %5821  ;;  %v2626_v12 = vsub.f32 %v6885_v6, %v6985_v62  ;;  %v2638_v28 = vsub.f32 %v6938_v17, %v6985_v62 }
 0xc77   : > { %v6999_v52 = vpop.eup %5823  ;;  %v2610_v53 = vpop.xlane.xlu0 %2609  ;;  %v2432_v16 = vpack.c.bf16 %v6993_v48, %v6991_v23 }
 0xc78   : > { %v2632_v31 = vmul.f32 1.442695, %v2626_v12  ;;  %v7004_v36 = vmax.f32 %v2610_v53, %v6950_v33  ;;  %v7008_v24 = vmul.f32 %v6999_v52, %v6970_v50 }
 0xc79   : > { %5380 = vmatprep.mubr.msk.bf16.mxu1 %vm2371_vm4, %v2432_v16 }
 0xc7a   : > { %5825 = vpow2.f32 %v2632_v31  ;;  %v2624_v6 = vsub.f32 %v6889_v8, %v7004_v36 }
 0xc7c   : > { %v2628_v40 = vmul.f32 1.442695, %v2624_v6  ;;  %v2396_v6 = vmul.f32 1.442695, %v2390_v49 }
 0xc7d   : > { %v7017_v41 = vpop.xlane.xlu1 %2600 }
 0xc7e   : > { %5827 = vpow2.f32 %v2628_v40  ;;  %v2853_v43 = vpop.xlane.xlu0 %2852 }
 0xc7f   : > { %v7020_v5 = vmax.f32 %v2853_v43, %v6944_v29 }
 0xc81   : > { %v2863_v54 = vsub.f32 %v6900_v60, %v7020_v5  ;;  %v7026_v7 = vpop.xlane.xlu1 %2837  ;;  %v8092_v62 = vsub.f32 %v6944_v29, %v7020_v5 }
 0xc82   : > { %v2847_v8 = vpop.xlane.xlu0 %2846 }
 0xc83   : > { %v2869_v42 = vmul.f32 1.442695, %v2863_v54  ;;  %v7029_v46 = vmax.f32 %v2847_v8, %v6952_v25 }
 0xc85   : > { %5829 = vpow2.f32 %v2869_v42  ;;  %v2861_v44 = vsub.f32 %v6904_v0, %v7029_v46  ;;  %v7037_v63 = vpop.xlane.xlu1 %3073 }
 0xc86   : > { %v3089_v21 = vpop.xlane.xlu0 %3088 }
 0xc87   : > { %v7039_v12 = vpop.eup %5825  ;;  %v2865_v53 = vmul.f32 1.442695, %v2861_v44  ;;  %v3095_v16 = vmax.f32 %v3089_v21, %v6948_v32 }
 0xc88   : > { %v2654_v31 = vsel %vm2371_vm4, %v7039_v12, 0.0 }
 0xc89   : > { %5831 = vpow2.f32 %v2865_v53  ;;  %v3099_v47 = vsub.f32 %v6914_v61, %v3095_v16  ;;  %v3111_v0 = vsub.f32 %v6948_v32, %v3095_v16  ;;  %v2383_v37 = vpop.xlane.xlu1 %2382  ;;  %2655 = vadd.xlane.f32.xlu0 %v2654_v31 }
 0xc8a   : > { %v2387_v40 = vmax.f32 %v2383_v37, %v6895_v58  ;;  %v3083_v43 = vpop.xlane.xlu0 %3082  ;;  %5833 = vpow2.f32 %v2396_v6 }
 0xc8b   : > { %v7047_v54 = vpop.eup %5827  ;;  %v3105_v8 = vmul.f32 1.442695, %v3099_v47  ;;  %v3117_v42 = vmul.f32 1.442695, %v3111_v0  ;;  %v3093_v44 = vmax.f32 %v3083_v43, %v6954_v34 }
 0xc8c   : > { %v2391_v21 = vsub.f32 %v6877_v51, %v2387_v40  ;;  %v2403_v49 = vsub.f32 %v6895_v58, %v2387_v40  ;;  %v2648_v61 = vsel %vm2371_vm4, %v7047_v54, 0.0 }
 0xc8d   : > { %v3097_v32 = vsub.f32 %v6918_v22, %v3093_v44  ;;  %v3109_v53 = vsub.f32 %v6954_v34, %v3093_v44  ;;  %v2619_v16 = vpop.xlane.xlu1 %2618  ;;  %2649 = vadd.xlane.f32.xlu1 %v2648_v61  ;;  %5835 = vpow2.f32 %v3117_v42 }
 0xc8e   : > { %v2398_v31 = vmul.f32 1.442695, %v2391_v21  ;;  %v2410_v47 = vmul.f32 1.442695, %v2403_v49  ;;  %v7057_v0 = vmax.f32 %v2619_v16, %v6972_v9  ;;  %v2680_v37 = vpop.permute.xlu0 %2679  ;;  %5837 = vpow2.f32 %v3105_v8 }
 0xc8f   : > { %v3101_v51 = vmul.f32 1.442695, %v3097_v32  ;;  %v3113_v58 = vmul.f32 1.442695, %v3109_v53  ;;  %5390 = vmatprep.subr.bf16.mxu1 %v2680_v37 }
 0xc90   : > { %5839 = vpow2.f32 %v2398_v31  ;;  %v2627_v6 = vsub.f32 %v6891_v57, %v7057_v0 }
 0xc91   : > { %5841 = vpow2.f32 %v2410_v47  ;;  %v2613_v22 = vpop.xlane.xlu1 %2612 }
 0xc92   : > { %v7061_v34 = vpop.eup %5829  ;;  %5843 = vpow2.f32 %v3101_v51  ;;  %v2634_v40 = vmul.f32 1.442695, %v2627_v6  ;;  %v7064_v43 = vmax.f32 %v2613_v22, %v7017_v41 }
 0xc93   : > { %5845 = vpow2.f32 %v3113_v58  ;;  %v2891_v8 = vsel %vm2371_vm4, %v7061_v34, 0.0 }
 0xc94   : > { %5847 = vpow2.f32 %v2634_v40  ;;  %v2625_v42 = vsub.f32 %v6897_v59, %v7064_v43  ;;  %2892 = vadd.xlane.f32.xlu1 %v2891_v8  ;;  %v7080_v59 = vrot.slane %v6966_v1, %v6788_v26 }
 0xc95   : > { %v2856_v44 = vpop.xlane.xlu1 %2855 }
 0xc96   : > { %v5832_v21 = vpop.eup %5831  ;;  %v2630_v49 = vmul.f32 1.442695, %v2625_v42  ;;  %v7073_v61 = vmax.f32 %v2856_v44, %v6982_v56 }
 0xc97   : > { %v2885_v32 = vsel %vm2371_vm4, %v5832_v21, 0.0  ;;  %v5834_v31 = vpop.eup %5833 }
 0xc98   : > { %5849 = vpow2.f32 %v2630_v49  ;;  %v2864_v53 = vsub.f32 %v6907_v3, %v7073_v61  ;;  %2886 = vadd.xlane.f32.xlu1 %v2885_v32 }
 0xc99   : > { %v2850_v16 = vpop.xlane.xlu1 %2849 }
 0xc9a   : > { %v2871_v47 = vmul.f32 1.442695, %v2864_v53  ;;  %v7083_v51 = vmax.f32 %v2850_v16, %v7026_v7  ;;  %v7085_v58 = vpop.eup %5835 }
 0xc9b   : > { %v7087_v6 = vpop.eup %5837  ;;  %v7095_v40 = vmul.f32 %v7085_v58, %v7080_v59 }
 0xc9c   : > { %5851 = vpow2.f32 %v2871_v47  ;;  %v2862_v22 = vsub.f32 %v6911_v14, %v7083_v51 }
 0xc9d   : > { %v7097_v8 = vpop.eup %5839  ;;  %v2916_v3 = vpop.permute.xlu1 %2915 }
 0xc9e   : > { %v7099_v42 = vpop.eup %5841  ;;  %v2867_v44 = vmul.f32 1.442695, %v2862_v22  ;;  %v2433_v49 = vpack.c.bf16 %v7097_v8, %v5834_v31 }
 0xc9f   : > { %v7102_v32 = vpop.eup %5843  ;;  %v7106_v53 = vmul.f32 %v7099_v42, %v6970_v50 }
 0xca0   : > { %v7108_v14 = vpop.eup %5845  ;;  %5853 = vpow2.f32 %v2867_v44  ;;  %5381 = vmatmul.mubr.msk.bf16.vlgmr.msra.gmra.mxu1 %vm2371_vm4, %v2433_v49  ;;  %v3121_v16 = vsel %vm2371_vm4, %v7102_v32, 0.0  ;;  %v3127_v44 = vsel %vm2371_vm4, %v7087_v6, 0.0 }
 0xca1   : > { %v5848_v47 = vpop.eup %5847  ;;  %3122 = vadd.xlane.f32.xlu1 %v3121_v16  ;;  %5391 = vmatpush3.bf16.msra.mxu1 %v2680_v37  ;;  %v7115_v22 = vmul.f32 %v7108_v14, %v7080_v59  ;;  %v2412_v16 = vsel %vm2371_vm4, %v6991_v23, 0.0 }
 0xca2   : > { %5402 = vmatprep.subr.bf16.mxu1 %v2916_v3  ;;  %v2657_v50 = vsel %vm2371_vm4, %v5848_v47, 0.0  ;;  %v2669_v37 = vpack.c.bf16 %v5848_v47, %v7039_v12 }
 0xca3   : > { %2658 = vadd.xlane.f32.xlu0 %v2657_v50 }
 0xca5   : > { %v5850_v60 = vpop.eup %5849  ;;  %3128 = vadd.xlane.f32.xlu1 %v3127_v44  ;;  %v2418_v44 = vsel %vm2371_vm4, %v5834_v31, 0.0 }
 0xca6   : > { %v2651_v49 = vsel %vm2371_vm4, %v5850_v60, 0.0  ;;  %v2668_v45 = vpack.c.bf16 %v5850_v60, %v7047_v54 }
 0xca7   : > { %2652 = vadd.xlane.f32.xlu0 %v2651_v49 }
 0xca8   : > { %5392 = vmatprep.mubr.msk.bf16.mxu1 %vm2371_vm4, %v2668_v45 }
 0xca9   : > { %v5852_v57 = vpop.eup %5851  ;;  %2413 = vadd.xlane.f32.xlu1 %v2412_v16  ;;  %5393 = vmatmul.mubr.msk.bf16.vlgmr.msra.gmra.mxu1 %vm2371_vm4, %v2669_v37 }
 0xcaa   : > { %5403 = vmatpush3.bf16.msra.mxu1 %v2916_v3  ;;  %v2894_v50 = vsel %vm2371_vm4, %v5852_v57, 0.0  ;;  %v2906_v45 = vpack.c.bf16 %v5852_v57, %v7061_v34 }
 0xcab   : > { %2895 = vadd.xlane.f32.xlu0 %v2894_v50 }
 0xcad   : > { %v5854_v39 = vpop.eup %5853  ;;  %2419 = vadd.xlane.f32.xlu1 %v2418_v44 }
 0xcae   : > { %v2888_v60 = vsel %vm2371_vm4, %v5854_v39, 0.0  ;;  %v2905_v12 = vpack.c.bf16 %v5854_v39, %v5832_v21 }
 0xcaf   : > { %2889 = vadd.xlane.f32.xlu0 %v2888_v60 }
 0xcb0   : > { %5404 = vmatprep.mubr.msk.bf16.mxu1 %vm2371_vm4, %v2905_v12 }
 0xcb1   : > { %5405 = vmatmul.mubr.msk.bf16.vlgmr.msra.gmra.mxu1 %vm2371_vm4, %v2906_v45 }
 0xcce   : > { %v3092_v23 = vpop.xlane.xlu1 %3091 }
 0xccf   : > { %v3096_v54 = vmax.f32 %v3092_v23, %v7010_v38 }
 0xcd1   : > { %v3100_v3 = vsub.f32 %v6936_v11, %v3096_v54  ;;  %v3112_v47 = vsub.f32 %v7010_v38, %v3096_v54 }
 0xcd2   : > { %v3086_v31 = vpop.xlane.xlu1 %3085 }
 0xcd3   : > { %v3119_v49 = vmul.f32 1.442695, %v3112_v47  ;;  %v3094_v37 = vmax.f32 %v3086_v31, %v7037_v63  ;;  %v3107_v16 = vmul.f32 1.442695, %v3100_v3  ;;  %v2415_v3 = vsel %vm2371_vm4, %v6993_v48, 0.0 }
 0xcd4   : > { %v2644_v48 = vmul.f32 1.442695, %v2638_v28  ;;  %v2881_v28 = vmul.f32 1.442695, %v8092_v62 }
 0xcd5   : > { %v3098_v39 = vsub.f32 %v6942_v20, %v3094_v37  ;;  %v3110_v34 = vsub.f32 %v7037_v63, %v3094_v37  ;;  %5855 = vpow2.f32 %v3119_v49  ;;  %v2639_v37 = vsub.f32 %v6972_v9, %v7057_v0 }
 0xcd6   : > { %v3152_v57 = vpop.permute.xlu1 %3151  ;;  %5857 = vpow2.f32 %v3107_v16  ;;  %v2876_v9 = vsub.f32 %v6982_v56, %v7073_v61  ;;  %v8093_v0 = vsub.f32 %v6952_v25, %v7029_v46  ;;  %v8094_v56 = vsub.f32 %v7026_v7, %v7083_v51 }
 0xcd7   : > { %v3103_v21 = vmul.f32 1.442695, %v3098_v39  ;;  %v3115_v50 = vmul.f32 1.442695, %v3110_v34  ;;  %5414 = vmatprep.subr.bf16.mxu1 %v3152_v57  ;;  %v2646_v39 = vmul.f32 1.442695, %v2639_v37 }
 0xcd8   : > { %5415 = vmatpush3.bf16.msra.mxu1 %v3152_v57  ;;  %v8091_v57 = vsub.f32 %v7017_v41, %v7064_v43  ;;  %v2883_v41 = vmul.f32 1.442695, %v2876_v9  ;;  %v2877_v43 = vmul.f32 1.442695, %v8093_v0  ;;  %v2879_v61 = vmul.f32 1.442695, %v8094_v56 }
 0xcd9   : > { %5859 = vpow2.f32 %v3103_v21  ;;  %v2673_v9 = vrot.slane %v6966_v1, %v6777_v35 }
 0xcda   : > { %5861 = vpow2.f32 %v3115_v50  ;;  %v2642_v21 = vmul.f32 1.442695, %v8091_v57 }
 0xcdb   : > { %5863 = vpow2.f32 %v2644_v48 }
 0xcdc   : > { %5865 = vpow2.f32 %v2646_v39 }
 0xce2   : > { %v7139_v11 = vpop.eup %5855 }
 0xce3   : > { %v7143_v38 = vmul.f32 %v7139_v11, %v7080_v59  ;;  %v5858_v44 = vpop.eup %5857 }
 0xce4   : > { %v3142_v45 = vpack.c.bf16 %v5858_v44, %v7087_v6  ;;  %v3130_v54 = vsel %vm2371_vm4, %v5858_v44, 0.0 }
 0xce6   : > { %v5860_v60 = vpop.eup %5859 }
 0xce7   : > { %v7145_v20 = vpop.eup %5861  ;;  %v3124_v63 = vsel %vm2371_vm4, %v5860_v60, 0.0  ;;  %v3141_v12 = vpack.c.bf16 %v5860_v60, %v7102_v32  ;;  %v2421_v32 = vsel %vm2371_vm4, %v7097_v8, 0.0  ;;  %v8090_v8 = vsub.f32 %v6950_v33, %v7004_v36 }
 0xce8   : > { %3125 = vadd.xlane.f32.xlu0 %v3124_v63  ;;  %v7152_v23 = vmul.f32 %v7145_v20, %v7080_v59 }
 0xce9   : > { %5416 = vmatprep.mubr.msk.bf16.mxu1 %vm2371_vm4, %v3141_v12  ;;  %v2640_v34 = vmul.f32 1.442695, %v8090_v8 }
 0xcea   : > { %5417 = vmatmul.mubr.msk.bf16.vlgmr.msra.gmra.mxu1 %vm2371_vm4, %v3142_v45 }
 0xceb   : > { %5867 = vpow2.f32 %v2640_v34 }
 0xcec   : > { %3131 = vadd.xlane.f32.xlu0 %v3130_v54  ;;  %5869 = vpow2.f32 %v2642_v21 }
 0xcf0   : > { %2416 = vadd.xlane.f32.xlu0 %v2415_v3 }
 0xcf4   : > { %2422 = vadd.xlane.f32.xlu0 %v2421_v32 }
 0xd12   : > { %v2656_v44 = vpop.xlane.xlu0 %2655 }
 0xd16   : > { %v2650_v6 = vpop.xlane.xlu1 %2649 }
 0xd1d   : > { %v2893_v47 = vpop.xlane.xlu1 %2892 }
 0xd21   : > { %v2887_v31 = vpop.xlane.xlu1 %2886 }
 0xd2a   : > { %v7161_v59 = vpop.xlane.xlu1 %3122 }
 0xd2c   : > { %v2659_v33 = vpop.xlane.xlu0 %2658 }
 0xd2e   : > { %v7163_v49 = vpop.xlane.xlu1 %3128 }
 0xd30   : > { %v2653_v29 = vpop.xlane.xlu0 %2652 }
 0xd32   : > { %v2414_v16 = vpop.xlane.xlu1 %2413 }
 0xd33   : > { %v2424_v36 = vadd.f32 %v6980_v55, %v2414_v16 }
 0xd34   : > { %v2896_v25 = vpop.xlane.xlu0 %2895 }
 0xd36   : > { %v2420_v50 = vpop.xlane.xlu1 %2419 }
 0xd37   : > { %v2426_v17 = vadd.f32 %v6974_v13, %v2420_v50  ;;  %v5864_v13 = vpop.eup %5863 }
 0xd38   : > { %v5866_v5 = vpop.eup %5865  ;;  %v2662_v60 = vadd.f32 %v5864_v13, %v2656_v44  ;;  %v2890_v34 = vpop.xlane.xlu0 %2889 }
 0xd39   : > { %5871 = vrcp.f32 %v2426_v17  ;;  %v5868_v55 = vpop.eup %5867  ;;  %v2663_v63 = vadd.f32 %v5866_v5, %v2659_v33  ;;  %v2676_v33 = vmul.f32 %v5864_v13, %v2673_v9  ;;  %v2677_v0 = vmul.f32 %v5866_v5, %v2673_v9 }
 0xd3a   : > { %5873 = vpow2.f32 %v2881_v28  ;;  %v5870_v12 = vpop.eup %5869  ;;  %v2660_v45 = vadd.f32 %v5868_v55, %v2650_v6 }
 0xd3b   : > { %5875 = vrcp.f32 %v2424_v36  ;;  %v2661_v46 = vadd.f32 %v5870_v12, %v2653_v29 }
 0xd3c   : > { %5877 = vpow2.f32 %v2883_v41  ;;  %v2674_v41 = vmul.f32 %v5868_v55, %v2673_v9 }
 0xd3d   : > { %5879 = vpow2.f32 %v2877_v43 }
 0xd3e   : > { %5881 = vpow2.f32 %v2879_v61 }
 0xd3f   : > { %5883 = vrcp.f32 %v2662_v60  ;;  %v2675_v60 = vmul.f32 %v5870_v12, %v2673_v9  ;;  %v5648_v9 = vld [vmem:[%s8046_s11 + $0x30] sm:$0xff]  }
 0xd40   : > { %5885 = vrcp.f32 %v2663_v63 }
 0xd41   : > { %5887 = vrcp.f32 %v2660_v45 }
 0xd42   : > { %5889 = vrcp.f32 %v2661_v46 }
 0xd46   : > { %v5872_v7 = vpop.eup %5871 }
 0xd47   : > { %v5874_v32 = vpop.eup %5873 }
 0xd48   : > { %v5876_v48 = vpop.eup %5875  ;;  %v2899_v6 = vadd.f32 %v5874_v32, %v2893_v47 }
 0xd49   : > { %v5878_v8 = vpop.eup %5877 }
 0xd4a   : > { %v2900_v50 = vadd.f32 %v5878_v8, %v2896_v25  ;;  %5891 = vrcp.f32 %v2899_v6 }
 0xd4c   : > { %5893 = vrcp.f32 %v2900_v50 }
 0xd60   : > { %v5382_v54 = vpop.f32.mrf.mxu1 }
 0xd61   : > { %v2491_v3 = vadd.f32 %v5382_v54, %v6978_v19  ;;  %v5880_v19 = vpop.eup %5879 }
 0xd62   : > { %v2482_v51 = vpop.f32.mrf.mxu1  ;;  %v5882_v17 = vpop.eup %5881  ;;  %v2897_v62 = vadd.f32 %v5880_v19, %v2887_v31 }
 0xd63   : > { %v7190_v37 = vmul.f32 %v5872_v7, %v2491_v3  ;;  %v2483_v16 = vadd.f32 %v2482_v51, %v6989_v10  ;;  %v2898_v28 = vadd.f32 %v5882_v17, %v2890_v34  ;;  %v5884_v56 = vpop.eup %5883 }
 0xd64   : > { %v5383_v39 = vpop.f32.mrf.mxu1  ;;  %5895 = vrcp.f32 %v2897_v62  ;;  %v5886_v31 = vpop.eup %5885 }
 0xd65   : > { %v7193_v57 = vmul.f32 %v5876_v48, %v2483_v16  ;;  %v7196_v21 = vadd.f32 %v5383_v39, %v7106_v53  ;;  %5897 = vrcp.f32 %v2898_v28  ;;  %v5888_v45 = vpop.eup %5887 }
 0xd66   : > { %v2485_v44 = vpop.f32.mrf.mxu1  ;;  %v5890_v54 = vpop.eup %5889 }
 0xd67   : > { %v7201_v10 = vadd.f32 %v2485_v44, %v7008_v24  ;;  %v2910_v24 = vrot.slane %v6966_v1, %v6756_v30  ;;  %v5647_v44 = vld [vmem:[%s8046_s11 + $0x38] sm:$0xff]   ;;  %v5892_v62 = vpop.eup %5891 }
 0xd68   : > { %5420 = vmatprep.subr.bf16.mxu0 %v5647_v44 }
 0xd69   : > { %v5394_v47 = vpop.f32.mrf.mxu1  ;;  %v2913_v16 = vmul.f32 %v5874_v32, %v2910_v24  ;;  %v2911_v6 = vmul.f32 %v5880_v19, %v2910_v24  ;;  %v2914_v1 = vmul.f32 %v5878_v8, %v2910_v24  ;;  %v5894_v19 = vpop.eup %5893  ;;  %5421 = vmatpush3.bf16.msra.mxu0 %v5647_v44 }
 0xd6a   : > { %v2731_v53 = vadd.f32 %v5394_v47, %v2676_v33  ;;  %v2912_v47 = vmul.f32 %v5882_v17, %v2910_v24  ;;  %5422 = vmatprep.subr.bf16.mxu0 %v5648_v9 }
 0xd6b   : > { %v2722_v36 = vpop.f32.mrf.mxu1 }
 0xd6c   : > { %v2723_v61 = vadd.f32 %v2722_v36, %v2674_v41  ;;  %v2739_v25 = vmul.f32 %v5884_v56, %v2731_v53  ;;  %v5649_v56 = vld [vmem:[%s8046_s11 + $0x28] sm:$0xff]  }
 0xd6d   : > { %v5395_v43 = vpop.f32.mrf.mxu1  ;;  %5423 = vmatpush3.bf16.msra.mxu0 %v5648_v9 }
 0xd6e   : > { %v2734_v29 = vadd.f32 %v5395_v43, %v2677_v0  ;;  %v2737_v55 = vmul.f32 %v5888_v45, %v2723_v61  ;;  %5424 = vmatprep.subr.bf16.mxu0 %v5649_v56 }
 0xd6f   : > { %v2725_v63 = vpop.f32.mrf.mxu1 }
 0xd70   : > { %v2740_v46 = vmul.f32 %v5886_v31, %v2734_v29  ;;  %v2726_v13 = vadd.f32 %v2725_v63, %v2675_v60  ;;  %v5650_v63 = vld [vmem:[%s8046_s11 + $0x20] sm:$0xff]  }
 0xd71   : > { %v5406_v3 = vpop.f32.mrf.mxu1  ;;  %v7205_v7 = vpop.xlane.xlu0 %3125  ;;  %5425 = vmatpush3.bf16.msra.mxu0 %v5649_v56 }
 0xd72   : > { %v5561_v5 = vpack.i.bf16 %v2740_v46, %v2739_v25  ;;  %v2738_v51 = vmul.f32 %v5890_v54, %v2726_v13  ;;  %v2967_v12 = vadd.f32 %v5406_v3, %v2913_v16  ;;  %v5896_v8 = vpop.eup %5895  ;;  %5426 = vmatprep.subr.bf16.mxu0 %v5650_v63  ;;  %v5652_v25 = vld [vmem:[%s8046_s11 + $0x10] sm:$0xff]   ;;  %v3135_v3 = vadd.f32 %v7085_v58, %v7163_v49 }
 0xd73   : > { %v2958_v48 = vpop.f32.mrf.mxu1  ;;  %v5898_v0 = vpop.eup %5897 }
 0xd74   : > { %v5566_v39 = vpack.i.bf16 %v2738_v51, %v2737_v55  ;;  %5562 = vrot.lane.b32.xlu0 %v5561_v5, %s8089_s17  ;;  %v2959_v28 = vadd.f32 %v2958_v48, %v2911_v6  ;;  %v2975_v36 = vmul.f32 %v5892_v62, %v2967_v12  ;;  %v3133_v55 = vadd.f32 %v7108_v14, %v7161_v59  ;;  %v5654_v14 = vld [vmem:[%s8046_s11] sm:$0xff]  }
 0xd75   : > { %v5407_v34 = vpop.f32.mrf.mxu1  ;;  %v3132_v50 = vpop.xlane.xlu0 %3131  ;;  %5427 = vmatpush3.bf16.msra.mxu0 %v5650_v63  ;;  %v3134_v51 = vadd.f32 %v7145_v20, %v7205_v7 }
 0xd76   : > { %v2970_v32 = vadd.f32 %v5407_v34, %v2914_v1  ;;  %5567 = vrot.lane.b32.xlu1 %v5566_v39, %s8089_s17  ;;  %v2973_v61 = vmul.f32 %v5896_v8, %v2959_v28  ;;  %v3136_v5 = vadd.f32 %v7139_v11, %v3132_v50  ;;  %v5657_v1 = vld [vmem:[%s8049_s14 + $0xe4] ss:$16 sps:$4 sm:$0xff]   ;;  %v5660_v50 = vld [vmem:[%s8049_s14 + $0xec] ss:$16 sps:$4 sm:$0xff]   ;;  %v5661_v28 = vld [vmem:[%s8049_s14 + $0xc0] ss:$16 sps:$4 sm:$0xff]   ;;  %s8099_s17 = smov %s8098_s30 }
 0xd77   : > { %v2961_v33 = vpop.f32.mrf.mxu1  ;;  %3582 = vmatprep.subr.bf16.mxu1 %v5657_v1  ;;  %v5681_v8 = vld [vmem:[%s8049_s14 + $0x64] ss:$16 sps:$4 sm:$0xff]   ;;  %v5676_v1 = vld [vmem:[%s8049_s14 + $0x88] ss:$16 sps:$4 sm:$0xff]  }
 0xd78   : > { %v2976_v53 = vmul.f32 %v5894_v19, %v2970_v32  ;;  %v2962_v41 = vadd.f32 %v2961_v33, %v2912_v47  ;;  %v5669_v32 = vld [vmem:[%s8049_s14 + $0xa4] ss:$16 sps:$4 sm:$0xff]   ;;  %v5667_v47 = vld [vmem:[%s8049_s14 + $0xa0] ss:$16 sps:$4 sm:$0xff]  }
 0xd79   : > { %v2417_v43 = vpop.xlane.xlu0 %2416  ;;  %v5675_v19 = vld [vmem:[%s8049_s14 + $0x84] ss:$16 sps:$4 sm:$0xff]   ;;  %v5673_v33 = vld [vmem:[%s8049_s14 + $0x80] ss:$16 sps:$4 sm:$0xff]  }
 0xd7a   : > { %v5571_v29 = vpack.i.bf16 %v2976_v53, %v2975_v36  ;;  %v2974_v60 = vmul.f32 %v5898_v0, %v2962_v41  ;;  %v2425_v17 = vadd.f32 %v6999_v52, %v2417_v43  ;;  %v5651_v52 = vld [vmem:[%s8046_s11 + $0x18] sm:$0xff]   ;;  %v5679_v36 = vld [vmem:[%s8049_s14 + $0x60] ss:$16 sps:$4 sm:$0xff]   ;;  %v5687_v53 = vld [vmem:[%s8049_s14 + $0x44] ss:$16 sps:$4 sm:$0xff]  }
 0xd7b   : > { %5428 = vmatprep.subr.bf16.mxu0 %v5651_v52  ;;  %v5685_v41 = vld [vmem:[%s8049_s14 + $0x40] ss:$16 sps:$4 sm:$0xff]  }
 0xd7c   : > { %v5576_v24 = vpack.i.bf16 %v2974_v60, %v2973_v61  ;;  %5899 = vrcp.f32 %v2425_v17  ;;  %5572 = vrot.lane.b32.xlu1 %v5571_v29, %s8088_s23  ;;  %5429 = vmatpush3.bf16.msra.mxu0 %v5651_v52 }
 0xd7d   : > { %v2423_v31 = vpop.xlane.xlu0 %2422  ;;  %5430 = vmatprep.subr.bf16.mxu0 %v5652_v25 }
 0xd7e   : > { %v2427_v45 = vadd.f32 %v7099_v42, %v2423_v31 }
 0xd80   : > { %5901 = vrcp.f32 %v2427_v45  ;;  %5577 = vrot.lane.b32.xlu1 %v5576_v24, %s8088_s23  ;;  %5431 = vmatpush3.bf16.msra.mxu0 %v5652_v25  ;;  %s4697_s23 = sadd.s32 %s4973_s29, %s4972_s19  ;;  %s6091_s19 = smov [#allocation2]  }
 0xd81   : > { %5903 = vrcp.f32 %v3135_v3  ;;  %s5995_s29 = sshll.u32 %s6091_s19, 4  ;;  %s5996_s29 = int_to_ptr.vmem [resolvable:$false] %s5995_s29 }
 0xd82   : > { %5905 = vrcp.f32 %v3133_v55  ;;  %p5998_p4 = scmp.lt.s32.totalorder %s7975_s1, %s5996_s29 }
 0xd83   : > { %5907 = vrcp.f32 %v3136_v5 }
 0xd84   : > { %5909 = vrcp.f32 %v3134_v51 }
 0xd89   : > { %v5900_v46 = vpop.eup %5899 }
 0xd8a   : > { %v7232_v42 = vmul.f32 %v5900_v46, %v7201_v10 }
 0xd8d   : > { %v5902_v13 = vpop.eup %5901 }
 0xd8e   : > { %v7235_v54 = vmul.f32 %v5902_v13, %v7196_v21  ;;  %v5653_v21 = vld [vmem:[%s8046_s11 + $0x8] sm:$0xff]   ;;  %v5904_v11 = vpop.eup %5903 }
 0xd8f   : > { %5432 = vmatprep.subr.bf16.mxu0 %v5653_v21  ;;  %v5906_v7 = vpop.eup %5905 }
 0xd90   : > { %5433 = vmatpush3.bf16.msra.mxu0 %v5653_v21  ;;  %v5908_v12 = vpop.eup %5907 }
 0xd91   : > { %5434 = vmatprep.subr.bf16.mxu0 %v5654_v14  ;;  %v5910_v44 = vpop.eup %5909 }
 0xd94   : > { %5435 = vmatpush3.bf16.msra.mxu0 %v5654_v14 }
 0xd95   : > { %3635 = vmatprep.subr.bf16.mxu0 %v5660_v50  ;;  %v5690_v50 = vld [vmem:[%s8049_s14 + $0x4c] ss:$16 sps:$4 sm:$0xff]  }
 0xdaa   : > { %v5418_v10 = vpop.f32.mrf.mxu1 }
 0xdab   : > { %v3203_v58 = vadd.f32 %v5418_v10, %v7095_v40  ;;  %v5655_v40 = vld [vmem:[%s8049_s14 + $0xe0] ss:$16 sps:$4 sm:$0xff]  }
 0xdac   : > { %v3194_v59 = vpop.f32.mrf.mxu1  ;;  %3583 = vmatpush1.bf16.msra.mxu1 %v5655_v40  ;;  %v5678_v40 = vld [vmem:[%s8049_s14 + $0x8c] ss:$16 sps:$4 sm:$0xff]  }
 0xdad   : > { %v3211_v49 = vmul.f32 %v5904_v11, %v3203_v58  ;;  %v3195_v20 = vadd.f32 %v3194_v59, %v7115_v22 }
 0xdae   : > { %v5419_v16 = vpop.f32.mrf.mxu1 }
 0xdaf   : > { %v3209_v48 = vmul.f32 %v5906_v7, %v3195_v20  ;;  %v3206_v39 = vadd.f32 %v5419_v16, %v7143_v38  ;;  %v5663_v38 = vld [vmem:[%s8049_s14 + $0xc4] ss:$16 sps:$4 sm:$0xff]   ;;  %v5658_v16 = vld [vmem:[%s8049_s14 + $0xe8] ss:$16 sps:$4 sm:$0xff]  }
 0xdb0   : > { %v3197_v6 = vpop.f32.mrf.mxu1  ;;  %3584 = vmatprep.subr.bf16.mxu1 %v5663_v38  ;;  %v5688_v38 = vld [vmem:[%s8049_s14 + $0x48] ss:$16 sps:$4 sm:$0xff]  }
 0xdb1   : > { %v3212_v34 = vmul.f32 %v5908_v12, %v3206_v39  ;;  %v3198_v22 = vadd.f32 %v3197_v6, %v7152_v23  ;;  %3585 = vmatpush1.bf16.msra.mxu1 %v5661_v28  ;;  %v5664_v39 = vld [vmem:[%s8049_s14 + $0xc8] ss:$16 sps:$4 sm:$0xff]   ;;  %v5672_v12 = vld [vmem:[%s8049_s14 + $0xac] ss:$16 sps:$4 sm:$0xff]  }
 0xdb2   : > { %3586 = vmatprep.subr.bf16.mxu1 %v5669_v32  ;;  %v5670_v6 = vld [vmem:[%s8049_s14 + $0xa8] ss:$16 sps:$4 sm:$0xff]   ;;  %v5696_v28 = vld [vmem:[%s8049_s14 + $0x2c] ss:$16 sps:$4 sm:$0xff]  }
 0xdb3   : > { %v5586_v9 = vpack.i.bf16 %v3212_v34, %v3211_v49  ;;  %v3210_v62 = vmul.f32 %v5910_v44, %v3198_v22  ;;  %v5684_v34 = vld [vmem:[%s8049_s14 + $0x6c] ss:$16 sps:$4 sm:$0xff]   ;;  %v5682_v22 = vld [vmem:[%s8049_s14 + $0x68] ss:$16 sps:$4 sm:$0xff]   ;;  %v5691_v44 = vld [vmem:[%s8049_s14 + $0x20] ss:$16 sps:$4 sm:$0xff]  }
 0xdb4   : > { %v5702_v32 = vld [vmem:[%s8049_s14 + $0xc] ss:$16 sps:$4 sm:$0xff]  }
 0xdb5   : > { %v5581_v23 = vpack.i.bf16 %v3210_v62, %v3209_v48  ;;  %5587 = vrot.lane.b32.xlu0 %v5586_v9, %s8087_s2  ;;  %3587 = vmatpush1.bf16.msra.mxu1 %v5667_v47  ;;  %v5666_v48 = vld [vmem:[%s8049_s14 + $0xcc] ss:$16 sps:$4 sm:$0xff]   ;;  %v5693_v9 = vld [vmem:[%s8049_s14 + $0x24] ss:$16 sps:$4 sm:$0xff]   ;;  %v5694_v62 = vld [vmem:[%s8049_s14 + $0x28] ss:$16 sps:$4 sm:$0xff]  }
 0xdb6   : > { %3588 = vmatprep.subr.bf16.mxu1 %v5675_v19  ;;  %v5697_v47 = vld [vmem:[%s8049_s14] ss:$16 sps:$4 sm:$0xff]   ;;  %v5700_v19 = vld [vmem:[%s8049_s14 + $0x8] ss:$16 sps:$4 sm:$0xff]  }
 0xdb7   : > { %5582 = vrot.lane.b32.xlu1 %v5581_v23, %s8087_s2  ;;  %v5699_v23 = vld [vmem:[%s8049_s14 + $0x4] ss:$16 sps:$4 sm:$0xff]   ;;  %s4974_s2 = sshll.u32 %s4697_s23, 7  ;;  %s5997_s23 = scalar_lea.vmem %s5996_s29, 1024 }
 0xdb8   : > { %s7980_s0 = scalar_lea.hbm %s8098_s30, %s4974_s2 }
 0xdb9   : > { %3589 = vmatpush1.bf16.msra.mxu1 %v5673_v33  ;;  %v6090_v33 = vmov 0  }
 0xdba   : > { %3590 = vmatprep.subr.bf16.mxu1 %v5681_v8  ;;  %3614 = vmatprep.mubr.bf16.mxu1 %v6090_v33 }
 0xdbd   : > { %3591 = vmatpush1.bf16.msra.mxu1 %v5679_v36 }
 0xdbe   : > { %3592 = vmatprep.subr.bf16.mxu1 %v5687_v53 }
 0xdc1   : > { %3593 = vmatpush1.bf16.msra.mxu1 %v5685_v41 }
 0xdc2   : > { %3594 = vmatprep.subr.bf16.mxu1 %v5693_v9 }
 0xdc5   : > { %3595 = vmatpush1.bf16.msra.mxu1 %v5691_v44 }
 0xdc6   : > { %3596 = vmatprep.subr.bf16.mxu1 %v5699_v23 }
 0xdc9   : > { %3597 = vmatpush1.bf16.msra.mxu1 %v5697_v47 }
 0xde6   : > { %v5563_v56 = vpop.permute.xlu0 %5562 }
 0xde7   : > { %v5565_v61 = vunpack.i.h.bf16 %v5563_v56  ;;  %v5564_v29 = vunpack.i.l.bf16 %v5563_v56 }
 0xde8   : > { %v5568_v0 = vpop.permute.xlu1 %5567 }
 0xde9   : > { %v5570_v17 = vunpack.i.h.bf16 %v5568_v0  ;;  %v5569_v24 = vunpack.i.l.bf16 %v5568_v0  ;;  %v3264_v46 = vsel %vm1030_vm0, %v7235_v54, %v5565_v61  ;;  %v3263_v13 = vsel %vm1030_vm0, %v7190_v37, %v5564_v29 }
 0xdeb   : > { %v3261_v5 = vsel %vm1030_vm0, %v7193_v57, %v5569_v24  ;;  %v3262_v51 = vsel %vm1030_vm0, %v7232_v42, %v5570_v17 }
 0xdee   : > { %v5573_v43 = vpop.permute.xlu1 %5572 }
 0xdef   : > { %v5575_v31 = vunpack.i.h.bf16 %v5573_v43  ;;  %v5574_v63 = vunpack.i.l.bf16 %v5573_v43 }
 0xdf1   : > { %v3267_v21 = vsel %vm1779_vm1, %v3263_v13, %v5574_v63  ;;  %v3268_v10 = vsel %vm1779_vm1, %v3264_v46, %v5575_v31 }
 0xdf2   : > { %v5578_v60 = vpop.permute.xlu1 %5577 }
 0xdf3   : > { %v5580_v45 = vunpack.i.h.bf16 %v5578_v60  ;;  %v5579_v52 = vunpack.i.l.bf16 %v5578_v60 }
 0xdf5   : > { %v3265_v37 = vsel %vm1779_vm1, %v3261_v5, %v5579_v52  ;;  %v3266_v49 = vsel %vm1779_vm1, %v3262_v51, %v5580_v45 }
 0xe27   : > { %v5588_v25 = vpop.permute.xlu0 %5587 }
 0xe28   : > { %v5590_v3 = vunpack.i.h.bf16 %v5588_v25  ;;  %v5589_v55 = vunpack.i.l.bf16 %v5588_v25 }
 0xe29   : > { %v5583_v58 = vpop.permute.xlu1 %5582 }
 0xe2a   : > { %v3271_v14 = vsel %vm1784_vm2, %v3267_v21, %v5589_v55  ;;  %v3272_v54 = vsel %vm1784_vm2, %v3268_v10, %v5590_v3  ;;  %v5585_v11 = vunpack.i.h.bf16 %v5583_v58  ;;  %v5584_v59 = vunpack.i.l.bf16 %v5583_v58 }
 0xe2b   : > { %v3274_v20 = vpack.c.bf16 %v3272_v54, %v3271_v14 }
 0xe2c   : > { %v3269_v57 = vsel %vm1784_vm2, %v3265_v37, %v5584_v59  ;;  %v3270_v42 = vsel %vm1784_vm2, %v3266_v49, %v5585_v11 }
 0xe2d   : > { %v3273_v7 = vpack.c.bf16 %v3270_v42, %v3269_v57 }
 0xe2f   : > { %5436 = vmatprep.mubr.bf16.mxu0 %v3273_v7 }
 0xe30   : > { %5437 = vmatmul.mubr.bf16.vlgmr.msra.gmra.mxu0 %v3274_v20 }
 0xe31   : > { %3636 = vmatpush1.bf16.msra.mxu0 %v5658_v16  ;;  %3667 = vmatprep.mubr.bf16.mxu0 %v6090_v33 }
 0xe32   : > { %3637 = vmatprep.subr.bf16.mxu0 %v5666_v48 }
 0xe35   : > { %3638 = vmatpush1.bf16.msra.mxu0 %v5664_v39 }
 0xe36   : > { %3639 = vmatprep.subr.bf16.mxu0 %v5672_v12 }
 0xe39   : > { %3640 = vmatpush1.bf16.msra.mxu0 %v5670_v6 }
 0xe3a   : > { %3641 = vmatprep.subr.bf16.mxu0 %v5678_v40 }
 0xe3d   : > { %3642 = vmatpush1.bf16.msra.mxu0 %v5676_v1 }
 0xe3e   : > { %3643 = vmatprep.subr.bf16.mxu0 %v5684_v34 }
 0xe41   : > { %3644 = vmatpush1.bf16.msra.mxu0 %v5682_v22 }
 0xe42   : > { %3645 = vmatprep.subr.bf16.mxu0 %v5690_v50 }
 0xe45   : > { %3646 = vmatpush1.bf16.msra.mxu0 %v5688_v38 }
 0xe46   : > { %3647 = vmatprep.subr.bf16.mxu0 %v5696_v28 }
 0xe49   : > { %3648 = vmatpush1.bf16.msra.mxu0 %v5694_v62 }
 0xe4a   : > { %3649 = vmatprep.subr.bf16.mxu0 %v5702_v32 }
 0xe4d   : > { %3650 = vmatpush1.bf16.msra.mxu0 %v5700_v19 }
 0xef0   : > { %v5438_v8 = vpop.f32.mrf.mxu0 }
 0xef1   : > { %v7380_v29 = vadd.f32 %v5438_v8, %v6620_v15 }
 0xef2   : > { %v3373_v36 = vpop.f32.mrf.mxu0 }
 0xef3   : > { %v7369_v0 = vadd.f32 %v3373_v36, %v6616_v4 }
 0xef4   : > { %v5439_v53 = vpop.f32.mrf.mxu0 }
 0xef5   : > { %v7377_v61 = vadd.f32 %v5439_v53, %v6628_v27 }
 0xef6   : > { %v3376_v41 = vpop.f32.mrf.mxu0 }
 0xef7   : > { %v7372_v43 = vadd.f32 %v3376_v41, %v6623_v18  ;;  %8095 = vst [vmem:[#allocation13_spill] sm:$0xff] %v7377_v61  ;;  %v3389_v4 = vpack.c.bf16 %v7377_v61, %v7380_v29 }
 0xef9   : > { %v3388_v56 = vpack.c.bf16 %v7372_v43, %v7369_v0 }
 0xefb   : > { %3615 = vmatmul.mubr.bf16.vlgmr.msra.gmra.mxu1 %v3388_v56  ;;  %3668 = vmatmul.mubr.bf16.vlgmr.msra.gmra.mxu0 %v3388_v56 }
 0xefc   : > { %3624 = vmatprep.mubr.bf16.mxu1 %v6090_v33  ;;  %3677 = vmatprep.mubr.bf16.mxu0 %v6090_v33 }
 0xf03   : > { %3625 = vmatmul.mubr.bf16.gmra.mxu1 %v3389_v4  ;;  %3678 = vmatmul.mubr.bf16.gmra.mxu0 %v3389_v4 }
 0xfbb   : > { %v7384_v18 = vpop.f32.mrf.mxu1  ;;  %v7386_v60 = vpop.f32.mrf.mxu0 }
 0xfbc   : > { %v7389_v17 = vmul.f32 0.70710677, %v7384_v18  ;;  %v7392_v24 = vmul.f32 0.70710677, %v7386_v60 }
 0xfbd   : > { %v7394_v27 = vpop.f32.mrf.mxu1  ;;  %v7396_v31 = vpop.f32.mrf.mxu0 }
 0xfbe   : > { %v3720_v15 = vand.u32 2147483647, %v7389_v17  ;;  %v3722_v63 = vand.u32 2147483647, %v7392_v24  ;;  %v7401_v45 = vmul.f32 0.70710677, %v7394_v27 }
 0xfbf   : > { %v7404_v52 = vmul.f32 0.70710677, %v7396_v31  ;;  %v7410_v51 = vpop.f32.mrf.mxu1  ;;  %v7413_v58 = vpop.f32.mrf.mxu0  ;;  %vm4040_vm5 = vcmp.lt.f32.partialorder %v7389_v17, 0.0  ;;  %vm4042_vm7 = vcmp.lt.f32.partialorder %v7392_v24, 0.0 }
 0xfc0   : > { %v3736_v25 = vmul.f32 0.3275911, %v3720_v15  ;;  %v3738_v46 = vmul.f32 0.3275911, %v3722_v63  ;;  %v3721_v13 = vand.u32 2147483647, %v7401_v45 }
 0xfc1   : > { %v7408_v3 = vand.u32 2147483647, %v7404_v52  ;;  %v7416_v11 = vmul.f32 0.70710677, %v7410_v51  ;;  %v7418_v59 = vpop.f32.mrf.mxu1  ;;  %v7421_v37 = vmul.f32 0.70710677, %v7413_v58  ;;  %v7430_v42 = vpop.f32.mrf.mxu0 }
 0xfc2   : > { %v3752_v55 = vadd.f32 1.0, %v3736_v25  ;;  %v3754_v5 = vadd.f32 1.0, %v3738_v46  ;;  %v3737_v21 = vmul.f32 0.3275911, %v3721_v13  ;;  %v7428_v57 = vmul.f32 0.70710677, %v7418_v59 }
 0xfc3   : > { %v3739_v10 = vmul.f32 0.3275911, %v7408_v3  ;;  %v3724_v49 = vand.u32 2147483647, %v7416_v11  ;;  %v7425_v20 = vand.u32 2147483647, %v7421_v37  ;;  %v7440_v50 = vpop.f32.mrf.mxu1  ;;  %v7448_v32 = vpop.f32.mrf.mxu0 }
 0xfc4   : > { %5911 = vrcp.f32 %v3752_v55  ;;  %v3753_v14 = vadd.f32 1.0, %v3737_v21  ;;  %v3725_v48 = vand.u32 2147483647, %v7428_v57  ;;  %v7435_v12 = vmul.f32 0.70710677, %v7430_v42 }
 0xfc5   : > { %5913 = vrcp.f32 %v3754_v5  ;;  %v3755_v54 = vadd.f32 1.0, %v3739_v10  ;;  %v3740_v7 = vmul.f32 0.3275911, %v3724_v49  ;;  %v3742_v16 = vmul.f32 0.3275911, %v7425_v20 }
 0xfc6   : > { %5915 = vrcp.f32 %v3753_v14  ;;  %v3944_v6 = vsub.f32 0.0, %v3720_v15  ;;  %v3741_v1 = vmul.f32 0.3275911, %v3725_v48  ;;  %v3946_v34 = vsub.f32 0.0, %v3722_v63 }
 0xfc7   : > { %5917 = vrcp.f32 %v3755_v54  ;;  %v3756_v39 = vadd.f32 1.0, %v3740_v7  ;;  %v3758_v40 = vadd.f32 1.0, %v3742_v16  ;;  %v7438_v22 = vand.u32 2147483647, %v7435_v12 }
 0xfc8   : > { %v3945_v38 = vsub.f32 0.0, %v3721_v13  ;;  %v3757_v44 = vadd.f32 1.0, %v3741_v1  ;;  %v3960_v28 = vmul.f32 %v3944_v6, %v3720_v15  ;;  %v7446_v23 = vmul.f32 0.70710677, %v7440_v50 }
 0xfc9   : > { %5919 = vrcp.f32 %v3756_v39  ;;  %v3743_v9 = vmul.f32 0.3275911, %v7438_v22  ;;  %v3962_v33 = vmul.f32 %v3946_v34, %v3722_v63  ;;  %v7458_v4 = vmul.f32 0.70710677, %v7448_v32 }
 0xfca   : > { %5921 = vrcp.f32 %v3758_v40  ;;  %v3961_v53 = vmul.f32 %v3945_v38, %v3721_v13  ;;  %v7455_v41 = vand.u32 2147483647, %v7446_v23  ;;  %v3976_v25 = vmul.f32 1.442695, %v3960_v28 }
 0xfcb   : > { %5923 = vrcp.f32 %v3757_v44  ;;  %v3759_v8 = vadd.f32 1.0, %v3743_v9  ;;  %v3947_v55 = vsub.f32 0.0, %v7408_v3  ;;  %v3948_v63 = vsub.f32 0.0, %v3724_v49 }
 0xfcc   : > { %v3980_v21 = vmul.f32 1.442695, %v3962_v33  ;;  %v7466_v10 = vand.u32 2147483647, %v7458_v4  ;;  %v3978_v7 = vmul.f32 1.442695, %v3961_v53 }
 0xfcd   : > { %5925 = vrcp.f32 %v3759_v8  ;;  %v3949_v16 = vsub.f32 0.0, %v3725_v48  ;;  %v3744_v39 = vmul.f32 0.3275911, %v7455_v41  ;;  %v3964_v38 = vmul.f32 %v3948_v63, %v3724_v49 }
 0xfce   : > { %5927 = vpow2.f32 %v3976_v25  ;;  %v3746_v44 = vmul.f32 0.3275911, %v7466_v10  ;;  %v3950_v8 = vsub.f32 0.0, %v7425_v20  ;;  %vm4041_vm6 = vcmp.lt.f32.partialorder %v7401_v45, 0.0 }
 0xfcf   : > { %5929 = vpow2.f32 %v3980_v21  ;;  %v3760_v53 = vadd.f32 1.0, %v3744_v39  ;;  %v3984_v21 = vmul.f32 1.442695, %v3964_v38  ;;  %vm4044_vm8 = vcmp.lt.f32.partialorder %v7416_v11, 0.0 }
 0xfd0   : > { %5931 = vpow2.f32 %v3978_v7  ;;  %v3762_v63 = vadd.f32 1.0, %v3746_v44  ;;  %vm4045_vm9 = vcmp.lt.f32.partialorder %v7428_v57, 0.0  ;;  %vm4043_vm10 = vcmp.lt.f32.partialorder %v7404_v52, 0.0 }
 0xfd1   : > { %v7443_v62 = vpop.eup %5911  ;;  %5933 = vrcp.f32 %v3760_v53  ;;  %vm4046_vm11 = vcmp.lt.f32.partialorder %v7421_v37, 0.0  ;;  %vm4047_vm12 = vcmp.lt.f32.partialorder %v7435_v12, 0.0  ;;  %vm4048_vm13 = vcmp.lt.f32.partialorder %v7446_v23, 0.0 }
 0xfd2   : > { %v7450_v47 = vpop.eup %5913  ;;  %v3800_v19 = vmul.f32 1.0614054, %v7443_v62  ;;  %5935 = vrcp.f32 %v3762_v63  ;;  %vm4050_vm14 = vcmp.lt.f32.partialorder %v7458_v4, 0.0 }
 0xfd3   : > { %v3802_v36 = vmul.f32 1.0614054, %v7450_v47  ;;  %v7460_v15 = vpop.eup %5915  ;;  %5937 = vpow2.f32 %v3984_v21 }
 0xfd4   : > { %v3816_v56 = vadd.f32 -1.4531521, %v3800_v19  ;;  %v3801_v13 = vmul.f32 1.0614054, %v7460_v15  ;;  %v7468_v14 = vpop.eup %5917 }
 0xfd5   : > { %v3818_v46 = vadd.f32 -1.4531521, %v3802_v36  ;;  %v3803_v1 = vmul.f32 1.0614054, %v7468_v14  ;;  %v3965_v36 = vmul.f32 %v3949_v16, %v3725_v48 }
 0xfd6   : > { %v3832_v5 = vmul.f32 %v7443_v62, %v3816_v56  ;;  %v3817_v40 = vadd.f32 -1.4531521, %v3801_v13  ;;  %v7476_v33 = vpop.eup %5919 }
 0xfd7   : > { %v3834_v54 = vmul.f32 %v7450_v47, %v3818_v46  ;;  %v3819_v19 = vadd.f32 -1.4531521, %v3803_v1  ;;  %v7479_v56 = vpop.eup %5921  ;;  %v3804_v46 = vmul.f32 1.0614054, %v7476_v33  ;;  %v3986_v38 = vmul.f32 1.442695, %v3965_v36 }
 0xfd8   : > { %v3848_v6 = vadd.f32 1.4214138, %v3832_v5  ;;  %v3833_v28 = vmul.f32 %v7460_v15, %v3817_v40  ;;  %v3806_v13 = vmul.f32 1.0614054, %v7479_v56  ;;  %v7487_v39 = vpop.eup %5923  ;;  %v3963_v40 = vmul.f32 %v3947_v55, %v7408_v3 }
 0xfd9   : > { %v3850_v34 = vadd.f32 1.4214138, %v3834_v54  ;;  %v3835_v49 = vmul.f32 %v7468_v14, %v3819_v19  ;;  %v3951_v54 = vsub.f32 0.0, %v7438_v22  ;;  %v3820_v16 = vadd.f32 -1.4531521, %v3804_v46 }
 0xfda   : > { %v3864_v9 = vmul.f32 %v7443_v62, %v3848_v6  ;;  %v3849_v25 = vadd.f32 1.4214138, %v3833_v28  ;;  %v3822_v1 = vadd.f32 -1.4531521, %v3806_v13  ;;  %v3966_v28 = vmul.f32 %v3950_v8, %v7425_v20  ;;  %v7492_v19 = vpop.eup %5925 }
 0xfdb   : > { %v3866_v5 = vmul.f32 %v7450_v47, %v3850_v34  ;;  %v3851_v48 = vadd.f32 1.4214138, %v3835_v49  ;;  %v3836_v34 = vmul.f32 %v7476_v33, %v3820_v16  ;;  %v3805_v49 = vmul.f32 1.0614054, %v7487_v39 }
 0xfdc   : > { %v3880_v7 = vadd.f32 -0.28449672, %v3864_v9  ;;  %v3865_v6 = vmul.f32 %v7460_v15, %v3849_v25  ;;  %v3838_v25 = vmul.f32 %v7479_v56, %v3822_v1  ;;  %v3967_v20 = vmul.f32 %v3951_v54, %v7438_v22  ;;  %v5928_v1 = vpop.eup %5927 }
 0xfdd   : > { %v3882_v9 = vadd.f32 -0.28449672, %v3866_v5  ;;  %v3867_v3 = vmul.f32 %v7468_v14, %v3851_v48  ;;  %v3852_v55 = vadd.f32 1.4214138, %v3836_v34  ;;  %v3821_v36 = vadd.f32 -1.4531521, %v3805_v49  ;;  %v5930_v34 = vpop.eup %5929 }
 0xfde   : > { %v3881_v44 = vadd.f32 -0.28449672, %v3865_v6  ;;  %v3896_v46 = vmul.f32 %v7443_v62, %v3880_v7  ;;  %v3854_v53 = vadd.f32 1.4214138, %v3838_v25  ;;  %v3807_v63 = vmul.f32 1.0614054, %v7492_v19 }
 0xfdf   : > { %v3982_v13 = vmul.f32 1.442695, %v3963_v40  ;;  %v3868_v5 = vmul.f32 %v7476_v33, %v3852_v55  ;;  %v3988_v21 = vmul.f32 1.442695, %v3966_v28  ;;  %5939 = vpow2.f32 %v3986_v38  ;;  %v5932_v55 = vpop.eup %5931 }
 0xfe0   : > { %v3897_v8 = vmul.f32 %v7460_v15, %v3881_v44  ;;  %v3898_v6 = vmul.f32 %v7450_v47, %v3882_v9  ;;  %v3870_v7 = vmul.f32 %v7479_v56, %v3854_v53  ;;  %v3837_v48 = vmul.f32 %v7487_v39, %v3821_v36 }
 0xfe1   : > { %v3823_v16 = vadd.f32 -1.4531521, %v3807_v63  ;;  %v3912_v22 = vadd.f32 0.2548296, %v3896_v46  ;;  %v3883_v54 = vadd.f32 -0.28449672, %v3867_v3  ;;  %5941 = vpow2.f32 %v3982_v13 }
 0xfe2   : > { %v3884_v44 = vadd.f32 -0.28449672, %v3868_v5  ;;  %v3913_v25 = vadd.f32 0.2548296, %v3897_v8  ;;  %v3853_v49 = vadd.f32 1.4214138, %v3837_v48  ;;  %5943 = vpow2.f32 %v3988_v21 }
 0xfe3   : > { %v3839_v40 = vmul.f32 %v7492_v19, %v3823_v16  ;;  %v3990_v61 = vmul.f32 1.442695, %v3967_v20  ;;  %v3886_v38 = vadd.f32 -0.28449672, %v3870_v7  ;;  %v7508_v9 = vmul.f32 0.5, %v7384_v18  ;;  %v7516_v20 = vpop.f32.mrf.mxu1  ;;  %v7519_v18 = vpop.eup %5933 }
 0xfe4   : > { %v3900_v28 = vmul.f32 %v7476_v33, %v3884_v44  ;;  %v3914_v53 = vadd.f32 0.2548296, %v3898_v6  ;;  %v3869_v36 = vmul.f32 %v7487_v39, %v3853_v49  ;;  %v3928_v3 = vmul.f32 %v7443_v62, %v3912_v22  ;;  %v7529_v21 = vpop.eup %5935 }
 0xfe5   : > { %v3855_v46 = vadd.f32 1.4214138, %v3839_v40  ;;  %v7513_v8 = vmul.f32 0.5, %v7386_v60  ;;  %v3899_v63 = vmul.f32 %v7468_v14, %v3883_v54  ;;  %v3929_v13 = vmul.f32 %v7460_v15, %v3913_v25 }
 0xfe6   : > { %v3916_v5 = vadd.f32 0.2548296, %v3900_v28  ;;  %v3885_v7 = vadd.f32 -0.28449672, %v3869_v36  ;;  %5945 = vpow2.f32 %v3990_v61  ;;  %v7522_v6 = vmul.f32 0.5, %v7394_v27  ;;  %v5938_v27 = vpop.eup %5937 }
 0xfe7   : > { %v7525_v62 = vmul.f32 0.5, %v7396_v31  ;;  %v3902_v60 = vmul.f32 %v7479_v56, %v3886_v38  ;;  %v3952_v48 = vsub.f32 0.0, %v7455_v41  ;;  %v3930_v16 = vmul.f32 %v7450_v47, %v3914_v53 }
 0xfe8   : > { %v3901_v15 = vmul.f32 %v7487_v39, %v3885_v7  ;;  %v3871_v61 = vmul.f32 %v7492_v19, %v3855_v46  ;;  %v7535_v22 = vmul.f32 0.70710677, %v7516_v20  ;;  %v7537_v54 = vmul.f32 %v5928_v1, %v3928_v3 }
 0xfe9   : > { %v3915_v31 = vadd.f32 0.2548296, %v3899_v63  ;;  %v7540_v44 = vmul.f32 0.5, %v7410_v51  ;;  %v7543_v25 = vmul.f32 0.5, %v7413_v58  ;;  %v7545_v49 = vmul.f32 %v5932_v55, %v3929_v13 }
 0xfea   : > { %v3932_v47 = vmul.f32 %v7476_v33, %v3916_v5  ;;  %v3917_v40 = vadd.f32 0.2548296, %v3901_v15  ;;  %v3887_v28 = vadd.f32 -0.28449672, %v3871_v61  ;;  %v3918_v38 = vadd.f32 0.2548296, %v3902_v60 }
 0xfeb   : > { %v3808_v53 = vmul.f32 1.0614054, %v7519_v18  ;;  %v3968_v36 = vmul.f32 %v3952_v48, %v7455_v41  ;;  %v3810_v1 = vmul.f32 1.0614054, %v7529_v21  ;;  %v7551_v3 = vmul.f32 %v5930_v34, %v3930_v16 }
 0xfec   : > { %v5940_v46 = vpop.eup %5939  ;;  %v3933_v51 = vmul.f32 %v7487_v39, %v3917_v40  ;;  %v3954_v58 = vsub.f32 0.0, %v7466_v10  ;;  %v7556_v55 = vand.u32 2147483647, %v7535_v22  ;;  %v3931_v33 = vmul.f32 %v7468_v14, %v3915_v31 }
 0xfed   : > { %v3903_v63 = vmul.f32 %v7492_v19, %v3887_v28  ;;  %v3824_v13 = vadd.f32 -1.4531521, %v3808_v53  ;;  %v3826_v41 = vadd.f32 -1.4531521, %v3810_v1  ;;  %v4024_v5 = vsub.f32 1.0, %v7537_v54 }
 0xfee   : > { %v4025_v34 = vsub.f32 1.0, %v7545_v49  ;;  %v4012_v39 = vmul.f32 %v5938_v27, %v3932_v47  ;;  %v4013_v7 = vmul.f32 %v5940_v46, %v3933_v51  ;;  %v3934_v60 = vmul.f32 %v7479_v56, %v3918_v38  ;;  %v5942_v14 = vpop.eup %5941 }
 0xfef   : > { %v3919_v48 = vadd.f32 0.2548296, %v3903_v63  ;;  %v3840_v16 = vmul.f32 %v7519_v18, %v3824_v13  ;;  %v3842_v15 = vmul.f32 %v7529_v21, %v3826_v41  ;;  %v7569_v61 = vmul.f32 0.5, %v7418_v59  ;;  %v5944_v28 = vpop.eup %5943 }
 0xff0   : > { %v4029_v54 = vsub.f32 1.0, %v4013_v7  ;;  %v3970_v31 = vmul.f32 %v3954_v58, %v7466_v10  ;;  %v3745_v49 = vmul.f32 0.3275911, %v7556_v55  ;;  %v4026_v27 = vsub.f32 1.0, %v7551_v3  ;;  %v7581_v3 = vpop.f32.mrf.mxu0  ;;  %v7587_v7 = vpop.f32.mrf.mxu1 }
 0xff1   : > { %v7574_v47 = vmul.f32 %v5942_v14, %v3931_v33  ;;  %v3935_v56 = vmul.f32 %v7492_v19, %v3919_v48  ;;  %v3856_v40 = vadd.f32 1.4214138, %v3840_v16  ;;  %v4056_v38 = vsub.f32 0.0, %v4024_v5 }
 0xff2   : > { %v4028_v53 = vsub.f32 1.0, %v4012_v39  ;;  %v3992_v1 = vmul.f32 1.442695, %v3968_v36  ;;  %v3761_v59 = vadd.f32 1.0, %v3745_v49  ;;  %v4057_v51 = vsub.f32 0.0, %v4025_v34 }
 0xff3   : > { %v5946_v46 = vpop.eup %5945  ;;  %v4014_v63 = vmul.f32 %v5944_v28, %v3934_v60  ;;  %v7579_v10 = vmul.f32 0.5, %v7430_v42  ;;  %v3858_v58 = vadd.f32 1.4214138, %v3842_v15  ;;  %v4061_v33 = vsub.f32 0.0, %v4029_v54 }
 0xff4   : > { %v4015_v13 = vmul.f32 %v5946_v46, %v3935_v56  ;;  %5947 = vrcp.f32 %v3761_v59  ;;  %v4058_v19 = vsub.f32 0.0, %v4026_v27  ;;  %v4027_v41 = vsub.f32 1.0, %v7574_v47 }
 0xff5   : > { %v3872_v36 = vmul.f32 %v7519_v18, %v3856_v40  ;;  %v3996_v39 = vmul.f32 1.442695, %v3970_v31  ;;  %v4072_v42 = vsel %vm4040_vm5, %v4056_v38, %v4024_v5  ;;  %v4060_v60 = vsub.f32 0.0, %v4028_v53  ;;  %v7616_v38 = vpop.f32.mrf.mxu0 }
 0xff6   : > { %5949 = vpow2.f32 %v3992_v1  ;;  %v7593_v48 = vmul.f32 0.70710677, %v7581_v3  ;;  %v4073_v16 = vsel %vm4041_vm6, %v4057_v51, %v4025_v34  ;;  %v4030_v15 = vsub.f32 1.0, %v4014_v63 }
 0xff7   : > { %v3874_v14 = vmul.f32 %v7529_v21, %v3858_v58  ;;  %v3953_v31 = vsub.f32 0.0, %v7556_v55  ;;  %v4077_v17 = vsel %vm4045_vm9, %v4061_v33, %v4029_v54  ;;  %v4031_v5 = vsub.f32 1.0, %v4015_v13 }
 0xff8   : > { %v7603_v49 = vand.u32 2147483647, %v7593_v48  ;;  %v7606_v47 = vmul.f32 0.70710677, %v7587_v7  ;;  %v4074_v45 = vsel %vm4042_vm7, %v4058_v19, %v4026_v27  ;;  %v4059_v34 = vsub.f32 0.0, %v4027_v41  ;;  %v7624_v19 = vpop.f32.mrf.mxu1 }
 0xff9   : > { %v3888_v56 = vadd.f32 -0.28449672, %v3872_v36  ;;  %5951 = vpow2.f32 %v3996_v39  ;;  %v4089_v40 = vadd.f32 1.0, %v4073_v16  ;;  %v4076_v28 = vsel %vm4044_vm8, %v4060_v60, %v4028_v53 }
 0xffa   : > { %v3747_v57 = vmul.f32 0.3275911, %v7603_v49  ;;  %v7614_v54 = vand.u32 2147483647, %v7606_v47  ;;  %v4088_v1 = vadd.f32 1.0, %v4072_v42  ;;  %v4062_v59 = vsub.f32 0.0, %v4030_v15 }
 0xffb   : > { %v4093_v46 = vadd.f32 1.0, %v4077_v17  ;;  %v3969_v24 = vmul.f32 %v3953_v31, %v7556_v55  ;;  %v4063_v27 = vsub.f32 0.0, %v4031_v5  ;;  %v3890_v51 = vadd.f32 -0.28449672, %v3874_v14 }
 0xffc   : > { %v3763_v63 = vadd.f32 1.0, %v3747_v57  ;;  %v3748_v58 = vmul.f32 0.3275911, %v7614_v54  ;;  %v4090_v33 = vadd.f32 1.0, %v4074_v45  ;;  %v4092_v11 = vadd.f32 1.0, %v4076_v28 }
 0xffd   : > { %v3904_v53 = vmul.f32 %v7519_v18, %v3888_v56  ;;  %v7622_v13 = vmul.f32 0.70710677, %v7616_v38  ;;  %v7627_v36 = vmul.f32 %v4089_v40, %v7522_v6  ;;  %v4075_v55 = vsel %vm4043_vm10, %v4059_v34, %v4027_v41  ;;  %v7657_v34 = vpop.f32.mrf.mxu0 }
 0xffe   : > { %5953 = vrcp.f32 %v3763_v63  ;;  %v3764_v39 = vadd.f32 1.0, %v3748_v58  ;;  %v4078_v42 = vsel %vm4046_vm11, %v4062_v59, %v4030_v15  ;;  %v7634_v60 = vmul.f32 %v4093_v46, %v7569_v61 }
 0xfff   : > { %v3994_v16 = vmul.f32 1.442695, %v3969_v24  ;;  %v7637_v14 = vand.u32 2147483647, %v7622_v13  ;;  %v7640_v31 = vmul.f32 %v4088_v1, %v7508_v9  ;;  %v4079_v6 = vsel %vm4047_vm12, %v4063_v27, %v4031_v5 }
0x1000   : > { %v3906_v52 = vmul.f32 %v7529_v21, %v3890_v51  ;;  %v7646_v41 = vmul.f32 0.70710677, %v7624_v19  ;;  %v4091_v15 = vadd.f32 1.0, %v4075_v55  ;;  %v7651_v61 = vmul.f32 %v4092_v11, %v7540_v44 }
0x1001   : > { %v7648_v37 = vpop.eup %5947  ;;  %v3920_v17 = vadd.f32 0.2548296, %v3904_v53  ;;  %5955 = vrcp.f32 %v3764_v39  ;;  %v4121_v9 = vadd.f32 %v7627_v36, %v7640_v31  ;;  %v4094_v45 = vadd.f32 1.0, %v4078_v42 }
0x1002   : > { %v3809_v12 = vmul.f32 1.0614054, %v7648_v37  ;;  %v3750_v5 = vmul.f32 0.3275911, %v7637_v14  ;;  %v4126_v40 = vadd.f32 %v7634_v60, %v7651_v61  ;;  %v4095_v28 = vadd.f32 1.0, %v4079_v6 }
0x1003   : > { %v5950_v56 = vpop.eup %5949  ;;  %5957 = vpow2.f32 %v3994_v16  ;;  %v3733_v44 = vand.u32 2147483647, %v7646_v41  ;;  %v3922_v57 = vadd.f32 0.2548296, %v3906_v52  ;;  %v3955_v59 = vsub.f32 0.0, %v7603_v49 }
0x1004   : > { %v3825_v1 = vadd.f32 -1.4531521, %v3809_v12  ;;  %v3766_v46 = vadd.f32 1.0, %v3750_v5  ;;  %v3936_v24 = vmul.f32 %v7519_v18, %v3920_v17  ;;  %v3956_v27 = vsub.f32 0.0, %v7614_v54 }
0x1005   : > { %v3749_v51 = vmul.f32 0.3275911, %v3733_v44  ;;  %v7666_v63 = vmul.f32 0.70710677, %v7657_v34  ;;  %v7669_v11 = vmul.f32 %v4090_v33, %v7513_v8  ;;  %v7672_v53 = vmul.f32 %v4094_v45, %v7543_v25 }
0x1006   : > { %v5952_v58 = vpop.eup %5951  ;;  %v3841_v55 = vmul.f32 %v7648_v37, %v3825_v1  ;;  %5959 = vrcp.f32 %v3766_v46  ;;  %v7676_v39 = vmul.f32 %v4091_v15, %v7525_v62  ;;  %v7679_v18 = vmul.f32 %v4095_v28, %v7579_v10 }
0x1007   : > { %v3765_v42 = vadd.f32 1.0, %v3749_v51  ;;  %v3735_v16 = vand.u32 2147483647, %v7666_v63  ;;  %v3971_v52 = vmul.f32 %v3955_v59, %v7603_v49  ;;  %v4122_v8 = vadd.f32 %v4121_v9, %v7669_v11 }
0x1008   : > { %v3857_v6 = vadd.f32 1.4214138, %v3841_v55  ;;  %v4127_v25 = vadd.f32 %v4126_v40, %v7672_v53  ;;  %v4016_v33 = vmul.f32 %v5950_v56, %v3936_v24  ;;  %v3938_v17 = vmul.f32 %v7529_v21, %v3922_v57 }
0x1009   : > { %v3972_v45 = vmul.f32 %v3956_v27, %v7614_v54  ;;  %v3751_v62 = vmul.f32 0.3275911, %v3735_v16  ;;  %5961 = vrcp.f32 %v3765_v42  ;;  %v4123_v10 = vadd.f32 %v4122_v8, %v7676_v39 }
0x100a   : > { %v3873_v15 = vmul.f32 %v7648_v37, %v3857_v6  ;;  %v4128_v12 = vadd.f32 %v4127_v25, %v7679_v18  ;;  %v3958_v49 = vsub.f32 0.0, %v7637_v14  ;;  %v3998_v40 = vmul.f32 1.442695, %v3971_v52 }
0x100b   : > { %v7690_v5 = vpop.eup %5953  ;;  %v3767_v9 = vadd.f32 1.0, %v3751_v62  ;;  %4124 = vadd.xlane.f32.xlu1 %v4123_v10  ;;  %v4018_v21 = vmul.f32 %v5952_v58, %v3938_v17  ;;  %v4032_v57 = vsub.f32 1.0, %v4016_v33  ;;  %v4000_v46 = vmul.f32 1.442695, %v3972_v45 }
0x100c   : > { %v3889_v28 = vadd.f32 -0.28449672, %v3873_v15  ;;  %v3811_v56 = vmul.f32 1.0614054, %v7690_v5  ;;  %4129 = vadd.xlane.f32.xlu0 %v4128_v12  ;;  %v3974_v27 = vmul.f32 %v3958_v49, %v7637_v14  ;;  %v3957_v51 = vsub.f32 0.0, %v3733_v44 }
0x100d   : > { %5963 = vrcp.f32 %v3767_v9  ;;  %v4034_v52 = vsub.f32 1.0, %v4018_v21  ;;  %v4064_v8 = vsub.f32 0.0, %v4032_v57  ;;  %v3959_v14 = vsub.f32 0.0, %v3735_v16 }
0x100e   : > { %v7694_v54 = vpop.eup %5955  ;;  %v3905_v1 = vmul.f32 %v7648_v37, %v3889_v28  ;;  %v3827_v59 = vadd.f32 -1.4531521, %v3811_v56  ;;  %5965 = vpow2.f32 %v3998_v40  ;;  %v4004_v62 = vmul.f32 1.442695, %v3974_v27 }
0x100f   : > { %v3812_v24 = vmul.f32 1.0614054, %v7694_v54  ;;  %5967 = vpow2.f32 %v4000_v46  ;;  %v3973_v15 = vmul.f32 %v3957_v51, %v3733_v44  ;;  %v4066_v9 = vsub.f32 0.0, %v4034_v52 }
0x1010   : > { %v5958_v55 = vpop.eup %5957  ;;  %v3921_v42 = vadd.f32 0.2548296, %v3905_v1  ;;  %v3843_v6 = vmul.f32 %v7690_v5, %v3827_v59  ;;  %v4080_v56 = vsel %vm4048_vm13, %v4064_v8, %v4032_v57  ;;  %5969 = vpow2.f32 %v4004_v62 }
0x1011   : > { %v3828_v58 = vadd.f32 -1.4531521, %v3812_v24  ;;  %v4002_v23 = vmul.f32 1.442695, %v3973_v15  ;;  %v3975_v46 = vmul.f32 %v3959_v14, %v3735_v16  ;;  %v4082_v57 = vsel %vm4050_vm14, %v4066_v9, %v4034_v52 }
0x1012   : > { %v3937_v25 = vmul.f32 %v7648_v37, %v3921_v42  ;;  %v3859_v33 = vadd.f32 1.4214138, %v3843_v6  ;;  %v3697_v37 = vmul.f32 0.5, %v7516_v20  ;;  %v4096_v20 = vadd.f32 1.0, %v4080_v56 }
0x1013   : > { %v7701_v17 = vpop.eup %5959  ;;  %v3844_v45 = vmul.f32 %v7694_v54, %v3828_v58  ;;  %vm4049_vm15 = vcmp.lt.f32.partialorder %v7535_v22, 0.0  ;;  %v4006_v15 = vmul.f32 1.442695, %v3975_v46  ;;  %5971 = vpow2.f32 %v4002_v23 }
0x1014   : > { %v4017_v10 = vmul.f32 %v5958_v55, %v3937_v25  ;;  %v3875_v12 = vmul.f32 %v7690_v5, %v3859_v33  ;;  %v3814_v49 = vmul.f32 1.0614054, %v7701_v17  ;;  %v3696_v22 = vmul.f32 0.5, %v7440_v50 }
0x1015   : > { %v3860_v28 = vadd.f32 1.4214138, %v3844_v45  ;;  %5973 = vpow2.f32 %v4006_v15  ;;  %vm4051_vm0 = vcmp.lt.f32.partialorder %v7593_v48, 0.0  ;;  %vm4052_vm1 = vcmp.lt.f32.partialorder %v7606_v47, 0.0 }
0x1016   : > { %v4033_v40 = vsub.f32 1.0, %v4017_v10  ;;  %v3891_v21 = vadd.f32 -0.28449672, %v3875_v12  ;;  %v3830_v1 = vadd.f32 -1.4531521, %v3814_v49  ;;  %v7709_v59 = vpop.eup %5961  ;;  %vm4054_vm2 = vcmp.lt.f32.partialorder %v7622_v13, 0.0 }
0x1017   : > { %v3876_v44 = vmul.f32 %v7694_v54, %v3860_v28  ;;  %v3813_v55 = vmul.f32 1.0614054, %v7709_v59  ;;  %v4098_v28 = vadd.f32 1.0, %v4082_v57  ;;  %vm4053_vm3 = vcmp.lt.f32.partialorder %v7646_v41, 0.0 }
0x1018   : > { %v4065_v24 = vsub.f32 0.0, %v4033_v40  ;;  %v3907_v27 = vmul.f32 %v7690_v5, %v3891_v21  ;;  %v3846_v51 = vmul.f32 %v7701_v17, %v3830_v1  ;;  %v3701_v47 = vmul.f32 0.5, %v7624_v19 }
0x1019   : > { %v3892_v42 = vadd.f32 -0.28449672, %v3876_v44  ;;  %v3829_v33 = vadd.f32 -1.4531521, %v3813_v55  ;;  %v7725_v44 = vmul.f32 %v4096_v20, %v3696_v22  ;;  %vm4055_vm4 = vcmp.lt.f32.partialorder %v7666_v63, 0.0 }
0x101a   : > { %v5964_v6 = vpop.eup %5963  ;;  %v4081_v58 = vsel %vm4049_vm15, %v4065_v24, %v4033_v40  ;;  %v3923_v8 = vadd.f32 0.2548296, %v3907_v27  ;;  %v3862_v25 = vadd.f32 1.4214138, %v3846_v51  ;;  %v3702_v13 = vmul.f32 0.5, %v7616_v38  ;;  %v5703_v38 = vld [vmem:[%s8051_s16 + $0x78] sm:$0xff]  }
0x101b   : > { %v4097_v16 = vadd.f32 1.0, %v4081_v58  ;;  %v3908_v45 = vmul.f32 %v7694_v54, %v3892_v42  ;;  %v3815_v62 = vmul.f32 1.0614054, %v5964_v6  ;;  %v3845_v4 = vmul.f32 %v7709_v59, %v3829_v33  ;;  %v5966_v52 = vpop.eup %5965  ;;  %5112 = vmatprep.subr.bf16.mxu1 %v5703_v38 }
0x101c   : > { %v3939_v14 = vmul.f32 %v7690_v5, %v3923_v8  ;;  %v3878_v10 = vmul.f32 %v7701_v17, %v3862_v25  ;;  %v5968_v1 = vpop.eup %5967 }
0x101d   : > { %v7723_v12 = vmul.f32 %v4097_v16, %v3697_v37  ;;  %v3924_v49 = vadd.f32 0.2548296, %v3908_v45  ;;  %v3831_v9 = vadd.f32 -1.4531521, %v3815_v62  ;;  %v3861_v21 = vadd.f32 1.4214138, %v3845_v4  ;;  %v5970_v8 = vpop.eup %5969 }
0x101e   : > { %v4019_v56 = vmul.f32 %v5966_v52, %v3939_v14  ;;  %v3894_v40 = vadd.f32 -0.28449672, %v3878_v10  ;;  %v3698_v37 = vmul.f32 0.5, %v7448_v32  ;;  %v3699_v45 = vmul.f32 0.5, %v7581_v3 }
0x101f   : > { %v3940_v5 = vmul.f32 %v7694_v54, %v3924_v49  ;;  %v3847_v46 = vmul.f32 %v5964_v6, %v3831_v9  ;;  %v3877_v50 = vmul.f32 %v7709_v59, %v3861_v21  ;;  %v4131_v27 = vadd.f32 %v7723_v12, %v7725_v44 }
0x1020   : > { %v4035_v24 = vsub.f32 1.0, %v4019_v56  ;;  %v3910_v23 = vmul.f32 %v7701_v17, %v3894_v40  ;;  %v7733_v58 = vmul.f32 %v4098_v28, %v3698_v37  ;;  %v5972_v28 = vpop.eup %5971 }
0x1021   : > { %v4020_v51 = vmul.f32 %v5968_v1, %v3940_v5  ;;  %v3863_v55 = vadd.f32 1.4214138, %v3847_v46  ;;  %v3893_v20 = vadd.f32 -0.28449672, %v3877_v50 }
0x1022   : > { %v4067_v57 = vsub.f32 0.0, %v4035_v24  ;;  %v3926_v42 = vadd.f32 0.2548296, %v3910_v23  ;;  %v4132_v14 = vadd.f32 %v4131_v27, %v7733_v58  ;;  %v5974_v1 = vpop.eup %5973  ;;  %v3700_v27 = vmul.f32 0.5, %v7587_v7 }
0x1023   : > { %v3879_v54 = vmul.f32 %v5964_v6, %v3863_v55  ;;  %v4036_v33 = vsub.f32 1.0, %v4020_v51  ;;  %v3909_v32 = vmul.f32 %v7709_v59, %v3893_v20 }
0x1024   : > { %v4083_v25 = vsel %vm4051_vm0, %v4067_v57, %v4035_v24  ;;  %v3942_v16 = vmul.f32 %v7701_v17, %v3926_v42 }
0x1025   : > { %v4099_v62 = vadd.f32 1.0, %v4083_v25  ;;  %v3895_v15 = vadd.f32 -0.28449672, %v3879_v54  ;;  %v3925_v4 = vadd.f32 0.2548296, %v3909_v32  ;;  %v4068_v48 = vsub.f32 0.0, %v4036_v33 }
0x1026   : > { %v4022_v10 = vmul.f32 %v5970_v8, %v3942_v16  ;;  %v3703_v25 = vmul.f32 0.5, %v7657_v34  ;;  %v5704_v16 = vld [vmem:[%s8051_s16 + $0xf8] sm:$0xff]  }
0x1027   : > { %v7740_v52 = vmul.f32 %v4099_v62, %v3699_v45  ;;  %v3911_v22 = vmul.f32 %v5964_v6, %v3895_v15  ;;  %v3941_v9 = vmul.f32 %v7709_v59, %v3925_v4  ;;  %v4084_v5 = vsel %vm4052_vm1, %v4068_v48, %v4036_v33  ;;  %v5705_v32 = vld [vmem:[%s8051_s16 + $0x38] sm:$0xff]   ;;  %5140 = vmatprep.subr.bf16.mxu0 %v5704_v16 }
0x1028   : > { %v4038_v49 = vsub.f32 1.0, %v4022_v10  ;;  %v4100_v37 = vadd.f32 1.0, %v4084_v5  ;;  %v5706_v34 = vld [vmem:[%s8051_s16 + $0xb8] sm:$0xff]   ;;  %5113 = vmatpush3.bf16.msra.mxu1 %v5705_v32 }
0x1029   : > { %v3927_v56 = vadd.f32 0.2548296, %v3911_v22  ;;  %v4133_v17 = vadd.f32 %v4132_v14, %v7740_v52  ;;  %v4021_v21 = vmul.f32 %v5972_v28, %v3941_v9  ;;  %5141 = vmatpush3.bf16.msra.mxu0 %v5706_v34 }
0x102a   : > { %v4070_v40 = vsub.f32 0.0, %v4038_v49  ;;  %v7750_v42 = vmul.f32 %v4100_v37, %v3700_v27  ;;  %v5711_v37 = vld [vmem:[%s8051_s16 + $0x68] sm:$0xff]  }
0x102b   : > { %v3943_v3 = vmul.f32 %v5964_v6, %v3927_v56  ;;  %4134 = vadd.xlane.f32.xlu0 %v4133_v17  ;;  %v4037_v46 = vsub.f32 1.0, %v4021_v21  ;;  %v5713_v27 = vld [vmem:[%s8051_s16 + $0x28] sm:$0xff]  }
0x102c   : > { %v4086_v23 = vsel %vm4054_vm2, %v4070_v40, %v4038_v49 }
0x102d   : > { %v4023_v24 = vmul.f32 %v5974_v1, %v3943_v3  ;;  %v4069_v50 = vsub.f32 0.0, %v4037_v46  ;;  %v4102_v55 = vadd.f32 1.0, %v4086_v23  ;;  %v5709_v23 = vld [vmem:[%s8051_s16 + $0x30] sm:$0xff]  }
0x102f   : > { %v4039_v59 = vsub.f32 1.0, %v4023_v24  ;;  %v4085_v51 = vsel %vm4053_vm3, %v4069_v50, %v4037_v46  ;;  %v7755_v41 = vmul.f32 %v4102_v55, %v3702_v13  ;;  %v5707_v46 = vld [vmem:[%s8051_s16 + $0x70] sm:$0xff]   ;;  %v5714_v55 = vld [vmem:[%s8051_s16 + $0xa8] sm:$0xff]  }
0x1030   : > { %v4101_v6 = vadd.f32 1.0, %v4085_v51  ;;  %v5708_v24 = vld [vmem:[%s8051_s16 + $0xf0] sm:$0xff]   ;;  %5114 = vmatprep.subr.bf16.mxu1 %v5707_v46  ;;  %v5730_v46 = vld [vmem:[%s8051_s16 + $0x88] sm:$0xff]  }
0x1031   : > { %v4071_v57 = vsub.f32 0.0, %v4039_v59  ;;  %v5710_v50 = vld [vmem:[%s8051_s16 + $0xb0] sm:$0xff]   ;;  %5142 = vmatprep.subr.bf16.mxu0 %v5708_v24  ;;  %5115 = vmatpush3.bf16.msra.mxu1 %v5709_v23  ;;  %v5731_v24 = vld [vmem:[%s8051_s16 + $0x40] sm:$0xff]  }
0x1032   : > { %v7753_v20 = vmul.f32 %v4101_v6, %v3701_v47  ;;  %5143 = vmatpush3.bf16.msra.mxu0 %v5710_v50  ;;  %5116 = vmatprep.subr.bf16.mxu1 %v5711_v37  ;;  %v5732_v23 = vld [vmem:[%s8051_s16 + $0xc0] sm:$0xff]  }
0x1033   : > { %v4087_v54 = vsel %vm4055_vm4, %v4071_v57, %v4039_v59  ;;  %v5712_v59 = vld [vmem:[%s8051_s16 + $0xe8] sm:$0xff]   ;;  %v5733_v50 = vld [vmem:[%s8051_s16] sm:$0xff]  }
0x1034   : > { %v4103_v8 = vadd.f32 1.0, %v4087_v54  ;;  %v4136_v7 = vadd.f32 %v7753_v20, %v7750_v42  ;;  %5144 = vmatprep.subr.bf16.mxu0 %v5712_v59  ;;  %v5734_v37 = vld [vmem:[%s8051_s16 + $0x80] sm:$0xff]  }
0x1035   : > { %5117 = vmatpush3.bf16.msra.mxu1 %v5713_v27 }
0x1036   : > { %v7760_v19 = vmul.f32 %v4103_v8, %v3703_v25  ;;  %v4137_v33 = vadd.f32 %v4136_v7, %v7755_v41  ;;  %5145 = vmatpush3.bf16.msra.mxu0 %v5714_v55 }
0x1038   : > { %v4138_v63 = vadd.f32 %v4137_v33, %v7760_v19 }
0x103a   : > { %4139 = vadd.xlane.f32.xlu0 %v4138_v63 }
0x1094   : > { %v4125_v45 = vpop.xlane.xlu1 %4124 }
0x1095   : > { %v4130_v62 = vpop.xlane.xlu0 %4129  ;;  %v4142_v15 = vmul.f32 0.001953125, %v4125_v45 }
0x1096   : > { %v4143_v14 = vmul.f32 0.001953125, %v4130_v62 }
0x1097   : > { %v7777_v10 = vsub.f32 %v7640_v31, %v4142_v15  ;;  %v7780_v4 = vsub.f32 %v7627_v36, %v4142_v15  ;;  %v7783_v22 = vsub.f32 %v7669_v11, %v4142_v15  ;;  %v7795_v28 = vsub.f32 %v7676_v39, %v4142_v15 }
0x1098   : > { %v7786_v48 = vsub.f32 %v7651_v61, %v4143_v14  ;;  %v7789_v49 = vsub.f32 %v7634_v60, %v4143_v14  ;;  %v7792_v9 = vsub.f32 %v7672_v53, %v4143_v14  ;;  %v7804_v61 = vsub.f32 %v7679_v18, %v4143_v14 }
0x1099   : > { %v4162_v31 = vmul.f32 %v7777_v10, %v7777_v10  ;;  %v4163_v36 = vmul.f32 %v7780_v4, %v7780_v4  ;;  %v4164_v53 = vmul.f32 %v7783_v22, %v7783_v22  ;;  %v4165_v40 = vmul.f32 %v7795_v28, %v7795_v28 }
0x109a   : > { %v4166_v11 = vmul.f32 %v7786_v48, %v7786_v48  ;;  %v4167_v60 = vmul.f32 %v7789_v49, %v7789_v49  ;;  %v4168_v56 = vmul.f32 %v7792_v9, %v7792_v9  ;;  %v4169_v3 = vmul.f32 %v7804_v61, %v7804_v61 }
0x109b   : > { %v4178_v39 = vadd.f32 %v4163_v36, %v4162_v31  ;;  %v5717_v36 = vld [vmem:[%s8051_s16 + $0x20] sm:$0xff]  }
0x109c   : > { %v4183_v17 = vadd.f32 %v4167_v60, %v4166_v11  ;;  %v5718_v11 = vld [vmem:[%s8051_s16 + $0xa0] sm:$0xff]   ;;  %v5719_v60 = vld [vmem:[%s8051_s16 + $0x58] sm:$0xff]  }
0x109d   : > { %v4179_v21 = vadd.f32 %v4178_v39, %v4164_v53  ;;  %v5720_v53 = vld [vmem:[%s8051_s16 + $0xd8] sm:$0xff]  }
0x109e   : > { %v4184_v18 = vadd.f32 %v4183_v17, %v4168_v56  ;;  %v5721_v39 = vld [vmem:[%s8051_s16 + $0x18] sm:$0xff]   ;;  %v5723_v17 = vld [vmem:[%s8051_s16 + $0x50] sm:$0xff]  }
0x109f   : > { %v4180_v1 = vadd.f32 %v4179_v21, %v4165_v40  ;;  %v5722_v56 = vld [vmem:[%s8051_s16 + $0x98] sm:$0xff]   ;;  %v5724_v40 = vld [vmem:[%s8051_s16 + $0xd0] sm:$0xff]  }
0x10a0   : > { %v4185_v5 = vadd.f32 %v4184_v18, %v4169_v3  ;;  %v5725_v21 = vld [vmem:[%s8051_s16 + $0x10] sm:$0xff]   ;;  %v5727_v18 = vld [vmem:[%s8051_s16 + $0x48] sm:$0xff]  }
0x10a1   : > { %4181 = vadd.xlane.f32.xlu1 %v4180_v1  ;;  %v5726_v3 = vld [vmem:[%s8051_s16 + $0x90] sm:$0xff]   ;;  %v5728_v1 = vld [vmem:[%s8051_s16 + $0xc8] sm:$0xff]  }
0x10a2   : > { %4186 = vadd.xlane.f32.xlu0 %v4185_v5  ;;  %v5729_v5 = vld [vmem:[%s8051_s16 + $0x8] sm:$0xff]  }
0x10b4   : > { %v4135_v51 = vpop.xlane.xlu0 %4134 }
0x10b5   : > { %v4144_v47 = vmul.f32 0.001953125, %v4135_v51 }
0x10b7   : > { %v7841_v6 = vsub.f32 %v7725_v44, %v4144_v47  ;;  %v7844_v57 = vsub.f32 %v7723_v12, %v4144_v47  ;;  %v7847_v13 = vsub.f32 %v7733_v58, %v4144_v47  ;;  %v7850_v54 = vsub.f32 %v7740_v52, %v4144_v47 }
0x10b9   : > { %v4170_v8 = vmul.f32 %v7841_v6, %v7841_v6  ;;  %v4171_v7 = vmul.f32 %v7844_v57, %v7844_v57  ;;  %v4172_v44 = vmul.f32 %v7847_v13, %v7847_v13  ;;  %v4173_v12 = vmul.f32 %v7850_v54, %v7850_v54 }
0x10bb   : > { %v4188_v25 = vadd.f32 %v4171_v7, %v4170_v8  ;;  %v4120_v7 = vld [vmem:[%s8050_s15] sm:$0xf] }
0x10bd   : > { %v4189_v58 = vadd.f32 %v4188_v25, %v4172_v44  ;;  %v4238_v44 = vrot.slane %v4120_v7, %v6756_v30  ;;  %v4234_v25 = vrot.slane %v4120_v7, %v6777_v35 }
0x10bf   : > { %v4190_v33 = vadd.f32 %v4189_v58, %v4173_v12  ;;  %v4242_v12 = vrot.slane %v4120_v7, %v6788_v26  ;;  %v4230_v58 = vrot.slane %v4120_v7, %v6840_v2 }
0x10c1   : > { %4191 = vadd.xlane.f32.xlu1 %v4190_v33 }
0x10c3   : > { %v4140_v63 = vpop.xlane.xlu0 %4139 }
0x10c4   : > { %v4145_v38 = vmul.f32 0.001953125, %v4140_v63 }
0x10c6   : > { %v7861_v52 = vsub.f32 %v7750_v42, %v4145_v38  ;;  %v7864_v16 = vsub.f32 %v7753_v20, %v4145_v38  ;;  %v7867_v32 = vsub.f32 %v7755_v41, %v4145_v38  ;;  %v7870_v34 = vsub.f32 %v7760_v19, %v4145_v38  ;;  %v5715_v41 = vld [vmem:[%s8051_s16 + $0x60] sm:$0xff]  }
0x10c7   : > { %v5716_v19 = vld [vmem:[%s8051_s16 + $0xe0] sm:$0xff]   ;;  %5118 = vmatprep.subr.bf16.mxu1 %v5715_v41 }
0x10c8   : > { %v4174_v45 = vmul.f32 %v7861_v52, %v7861_v52  ;;  %v4175_v62 = vmul.f32 %v7864_v16, %v7864_v16  ;;  %v4176_v15 = vmul.f32 %v7867_v32, %v7867_v32  ;;  %v4177_v20 = vmul.f32 %v7870_v34, %v7870_v34  ;;  %5146 = vmatprep.subr.bf16.mxu0 %v5716_v19 }
0x10c9   : > { %5119 = vmatpush3.bf16.msra.mxu1 %v5717_v36  ;;  %5147 = vmatpush3.bf16.msra.mxu0 %v5718_v11 }
0x10ca   : > { %v4193_v42 = vadd.f32 %v4175_v62, %v4174_v45  ;;  %5120 = vmatprep.subr.bf16.mxu1 %v5719_v60  ;;  %5148 = vmatprep.subr.bf16.mxu0 %v5720_v53 }
0x10cc   : > { %v4194_v14 = vadd.f32 %v4193_v42, %v4176_v15 }
0x10cd   : > { %5121 = vmatpush3.bf16.msra.mxu1 %v5721_v39  ;;  %5149 = vmatpush3.bf16.msra.mxu0 %v5722_v56 }
0x10ce   : > { %v4195_v31 = vadd.f32 %v4194_v14, %v4177_v20  ;;  %5122 = vmatprep.subr.bf16.mxu1 %v5723_v17  ;;  %5150 = vmatprep.subr.bf16.mxu0 %v5724_v40 }
0x10d0   : > { %4196 = vadd.xlane.f32.xlu0 %v4195_v31 }
0x10d1   : > { %5123 = vmatpush3.bf16.msra.mxu1 %v5725_v21  ;;  %5151 = vmatpush3.bf16.msra.mxu0 %v5726_v3 }
0x10d2   : > { %5124 = vmatprep.subr.bf16.mxu1 %v5727_v18  ;;  %5152 = vmatprep.subr.bf16.mxu0 %v5728_v1 }
0x10d5   : > { %5125 = vmatpush3.bf16.msra.mxu1 %v5729_v5  ;;  %5153 = vmatpush3.bf16.msra.mxu0 %v5730_v46 }
0x10d6   : > { %5126 = vmatprep.subr.bf16.mxu1 %v5731_v24  ;;  %5154 = vmatprep.subr.bf16.mxu0 %v5732_v23 }
0x10d9   : > { %5127 = vmatpush3.bf16.msra.mxu1 %v5733_v50  ;;  %5155 = vmatpush3.bf16.msra.mxu0 %v5734_v37 }
0x112a   : > { %v4182_v59 = vpop.xlane.xlu1 %4181 }
0x112b   : > { %v4198_v27 = vmul.f32 0.001953125, %v4182_v59  ;;  %v4187_v51 = vpop.xlane.xlu0 %4186 }
0x112c   : > { %v4199_v55 = vmul.f32 0.001953125, %v4187_v51 }
0x112d   : > { %v4202_v47 = vadd.f32 1e-05, %v4198_v27 }
0x112e   : > { %v4203_v8 = vadd.f32 1e-05, %v4199_v55 }
0x112f   : > { %5975 = vrsqrt.f32 %v4202_v47 }
0x1130   : > { %5977 = vrsqrt.f32 %v4203_v8 }
0x113c   : > { %v5976_v33 = vpop.eup %5975 }
0x113d   : > { %v5978_v63 = vpop.eup %5977  ;;  %v4211_v38 = vmul.f32 %v5976_v33, %v7780_v4  ;;  %v4213_v45 = vmul.f32 %v5976_v33, %v7795_v28  ;;  %v4210_v62 = vmul.f32 %v5976_v33, %v7777_v10  ;;  %v4212_v15 = vmul.f32 %v5976_v33, %v7783_v22 }
0x113e   : > { %v4215_v42 = vmul.f32 %v5978_v63, %v7789_v49  ;;  %v4217_v30 = vmul.f32 %v5978_v63, %v7804_v61  ;;  %v4214_v35 = vmul.f32 %v5978_v63, %v7786_v48  ;;  %v4216_v26 = vmul.f32 %v5978_v63, %v7792_v9 }
0x113f   : > { %v4248_v20 = vmul.f32 %v4234_v25, %v4211_v38  ;;  %v4250_v2 = vmul.f32 %v4242_v12, %v4213_v45  ;;  %v4247_v14 = vmul.f32 %v4230_v58, %v4210_v62  ;;  %v4249_v31 = vmul.f32 %v4238_v44, %v4212_v15 }
0x1140   : > { %v4252_v41 = vmul.f32 %v4234_v25, %v4215_v42  ;;  %v4254_v4 = vmul.f32 %v4242_v12, %v4217_v30  ;;  %v4251_v19 = vmul.f32 %v4230_v58, %v4214_v35  ;;  %v4253_v28 = vmul.f32 %v4238_v44, %v4216_v26 }
0x1142   : > { %v4264_v36 = vpack.c.bf16 %v4252_v41, %v4248_v20  ;;  %v4266_v10 = vpack.c.bf16 %v4254_v4, %v4250_v2  ;;  %v4263_v11 = vpack.c.bf16 %v4251_v19, %v4247_v14  ;;  %v4265_v22 = vpack.c.bf16 %v4253_v28, %v4249_v31  ;;  %v8096_v28 = vld [vmem:[#allocation13_spill] sm:$0xff] }
0x1144   : > { %4559 = vmatprep.mubr.bf16.mxu1 %v4264_v36  ;;  %4608 = vmatprep.mubr.bf16.mxu0 %v4266_v10 }
0x1145   : > { %4560 = vmatmul.mubr.bf16.vlgmr.msra.gmra.mxu1 %v4263_v11  ;;  %4609 = vmatmul.mubr.bf16.vlgmr.msra.gmra.mxu0 %v4265_v22 }
0x114a   : > { %v4192_v49 = vpop.xlane.xlu1 %4191 }
0x114b   : > { %v4200_v48 = vmul.f32 0.001953125, %v4192_v49 }
0x114d   : > { %v4204_v61 = vadd.f32 1e-05, %v4200_v48 }
0x114f   : > { %5979 = vrsqrt.f32 %v4204_v61 }
0x1159   : > { %v4197_v9 = vpop.xlane.xlu0 %4196 }
0x115a   : > { %v4201_v60 = vmul.f32 0.001953125, %v4197_v9 }
0x115c   : > { %v4205_v53 = vadd.f32 1e-05, %v4201_v60  ;;  %v5980_v39 = vpop.eup %5979 }
0x115d   : > { %v4219_v56 = vmul.f32 %v5980_v39, %v7844_v57  ;;  %v4221_v17 = vmul.f32 %v5980_v39, %v7850_v54  ;;  %v4218_v40 = vmul.f32 %v5980_v39, %v7841_v6  ;;  %v4220_v21 = vmul.f32 %v5980_v39, %v7847_v13 }
0x115e   : > { %5981 = vrsqrt.f32 %v4205_v53 }
0x115f   : > { %v4256_v24 = vmul.f32 %v4234_v25, %v4219_v56  ;;  %v4258_v23 = vmul.f32 %v4242_v12, %v4221_v17  ;;  %v4255_v50 = vmul.f32 %v4230_v58, %v4218_v40  ;;  %v4257_v37 = vmul.f32 %v4238_v44, %v4220_v21 }
0x116b   : > { %v5982_v3 = vpop.eup %5981 }
0x116c   : > { %v4223_v18 = vmul.f32 %v5982_v3, %v7864_v16  ;;  %v4225_v1 = vmul.f32 %v5982_v3, %v7870_v34  ;;  %v4222_v5 = vmul.f32 %v5982_v3, %v7861_v52  ;;  %v4224_v46 = vmul.f32 %v5982_v3, %v7867_v32 }
0x116e   : > { %v4260_v57 = vmul.f32 %v4234_v25, %v4223_v18  ;;  %v4262_v59 = vmul.f32 %v4242_v12, %v4225_v1  ;;  %v4259_v54 = vmul.f32 %v4230_v58, %v4222_v5  ;;  %v4261_v27 = vmul.f32 %v4238_v44, %v4224_v46 }
0x1170   : > { %v4268_v6 = vpack.c.bf16 %v4260_v57, %v4256_v24  ;;  %v4270_v51 = vpack.c.bf16 %v4262_v59, %v4258_v23  ;;  %v4267_v13 = vpack.c.bf16 %v4259_v54, %v4255_v50  ;;  %v4269_v55 = vpack.c.bf16 %v4261_v27, %v4257_v37  ;;  %v4970_v57 = vld [vmem:[%s8097_s24] ss:$0 sm:$0xff]  ;;  %s5991_s24 = scalar_lea.vmem %s7975_s1, 512 }
0x1171   : > { %p5992_p0 = scmp.ne.s32.totalorder %s7975_s1, %s5991_s24  ;;  %p5999_p5 = scmp.lt.s32.totalorder %s5997_s23, %s5991_s24 }
0x1172   : > { %4567 = vmatprep.mubr.bf16.mxu1 %v4268_v6  ;;  %4616 = vmatprep.mubr.bf16.mxu0 %v4270_v51 }
0x1173   : > { %4568 = vmatmul.mubr.bf16.gmra.mxu1 %v4267_v13  ;;  %4617 = vmatmul.mubr.bf16.gmra.mxu0 %v4269_v55  ;;  %p5993_p1 = pnand %p5992_p0, %p6240_p3  ;;  %p6000_p6 = por %p5999_p5, %p5998_p4 }
0x1175   : > { %p5994_p2 = pneg %p5993_p1 }
0x1177   : > { %p6001_p7 = pnand %p6000_p6, %p5994_p2 }
0x1205   : > { %v5128_v16 = vpop.f32.mrf.mxu1  ;;  %v5156_v52 = vpop.f32.mrf.mxu0 }
0x1207   : > { %v5129_v34 = vpop.f32.mrf.mxu1  ;;  %v5157_v32 = vpop.f32.mrf.mxu0 }
0x1208   : > { %v5130_v47 = vadd.f32 %v5129_v34, %v5128_v16  ;;  %v5158_v12 = vadd.f32 %v5157_v32, %v5156_v52 }
0x1209   : > { %v5131_v8 = vpop.f32.mrf.mxu1  ;;  %v5159_v7 = vpop.f32.mrf.mxu0 }
0x120a   : > { %v4562_v25 = vadd.f32 %v5130_v47, %v7369_v0 }
0x120b   : > { %v5132_v58 = vpop.f32.mrf.mxu1  ;;  %v5160_v44 = vpop.f32.mrf.mxu0 }
0x120c   : > { %v4611_v33 = vadd.f32 %v5158_v12, %v4562_v25  ;;  %v5133_v63 = vadd.f32 %v5132_v58, %v5131_v8  ;;  %v5161_v45 = vadd.f32 %v5160_v44, %v5159_v7 }
0x120e   : > { %v4565_v38 = vadd.f32 %v5133_v63, %v7372_v43  ;;  %4626 = vadd.xlane.f32.xlu1 %v4611_v33 }
0x1210   : > { %v4614_v62 = vadd.f32 %v5161_v45, %v4565_v38 }
0x1212   : > { %4628 = vadd.xlane.f32.xlu0 %v4614_v62 }
0x1233   : > { %v5134_v15 = vpop.f32.mrf.mxu1  ;;  %v5162_v42 = vpop.f32.mrf.mxu0 }
0x1235   : > { %v5135_v30 = vpop.f32.mrf.mxu1  ;;  %v5163_v35 = vpop.f32.mrf.mxu0 }
0x1236   : > { %v5136_v26 = vadd.f32 %v5135_v30, %v5134_v15  ;;  %v5164_v14 = vadd.f32 %v5163_v35, %v5162_v42 }
0x1237   : > { %v5137_v20 = vpop.f32.mrf.mxu1  ;;  %v5165_v2 = vpop.f32.mrf.mxu0 }
0x1238   : > { %v4570_v0 = vadd.f32 %v5136_v26, %v7380_v29 }
0x1239   : > { %v5138_v31 = vpop.f32.mrf.mxu1  ;;  %v5166_v41 = vpop.f32.mrf.mxu0 }
0x123a   : > { %v4619_v4 = vadd.f32 %v5164_v14, %v4570_v0  ;;  %v5139_v19 = vadd.f32 %v5138_v31, %v5137_v20  ;;  %v5167_v36 = vadd.f32 %v5166_v41, %v5165_v2 }
0x123c   : > { %v4573_v43 = vadd.f32 %v5139_v19, %v8096_v28  ;;  %4630 = vadd.xlane.f32.xlu1 %v4619_v4 }
0x123e   : > { %v4622_v10 = vadd.f32 %v5167_v36, %v4573_v43 }
0x1240   : > { %4632 = vadd.xlane.f32.xlu0 %v4622_v10 }
0x1297   : > { %v4627_v11 = vpop.xlane.xlu1 %4626 }
0x1298   : > { %v4634_v22 = vmul.f32 0.0078125, %v4627_v11 }
0x129a   : > { %v4638_v49 = vsub.f32 %v4611_v33, %v4634_v22 }
0x129b   : > { %v4629_v48 = vpop.xlane.xlu0 %4628 }
0x129c   : > { %v4635_v61 = vmul.f32 0.0078125, %v4629_v48  ;;  %v4642_v9 = vmul.f32 %v4638_v49, %v4638_v49 }
0x129e   : > { %v4639_v60 = vsub.f32 %v4614_v62, %v4635_v61  ;;  %4646 = vadd.xlane.f32.xlu1 %v4642_v9 }
0x12a0   : > { %v4643_v29 = vmul.f32 %v4639_v60, %v4639_v60 }
0x12a2   : > { %4648 = vadd.xlane.f32.xlu0 %v4643_v29 }
0x12c5   : > { %v4631_v53 = vpop.xlane.xlu1 %4630 }
0x12c6   : > { %v4636_v39 = vmul.f32 0.0078125, %v4631_v53 }
0x12c8   : > { %v4640_v56 = vsub.f32 %v4619_v4, %v4636_v39 }
0x12c9   : > { %v4633_v17 = vpop.xlane.xlu0 %4632 }
0x12ca   : > { %v4637_v40 = vmul.f32 0.0078125, %v4633_v17  ;;  %v4644_v21 = vmul.f32 %v4640_v56, %v4640_v56 }
0x12cc   : > { %v4641_v3 = vsub.f32 %v4622_v10, %v4637_v40  ;;  %4650 = vadd.xlane.f32.xlu1 %v4644_v21 }
0x12ce   : > { %v4645_v18 = vmul.f32 %v4641_v3, %v4641_v3 }
0x12d0   : > { %4652 = vadd.xlane.f32.xlu0 %v4645_v18 }
0x1327   : > { %v4647_v1 = vpop.xlane.xlu1 %4646 }
0x1328   : > { %v4654_v5 = vmul.f32 0.0078125, %v4647_v1 }
0x132a   : > { %v4658_v46 = vadd.f32 1e-05, %v4654_v5 }
0x132b   : > { %v4649_v24 = vpop.xlane.xlu0 %4648 }
0x132c   : > { %5983 = vrsqrt.f32 %v4658_v46  ;;  %v4655_v23 = vmul.f32 0.0078125, %v4649_v24 }
0x132e   : > { %v4659_v50 = vadd.f32 1e-05, %v4655_v23 }
0x1330   : > { %5985 = vrsqrt.f32 %v4659_v50 }
0x1339   : > { %v5984_v37 = vpop.eup %5983 }
0x133a   : > { %v4666_v59 = vmul.f32 %v5984_v37, %v4638_v49 }
0x133c   : > { %v4676_v54 = vmul.f32 %v4970_v57, %v4666_v59 }
0x133d   : > { %v5986_v27 = vpop.eup %5985 }
0x133e   : > { %4680 = vst [vmem:[%s607_s21] sm:$0xff] %v4676_v54  ;;  %v4667_v6 = vmul.f32 %v5986_v27, %v4639_v60 }
0x1340   : > { %v4677_v51 = vmul.f32 %v4970_v57, %v4667_v6 }
0x1342   : > { %4681 = vst [vmem:[%s607_s21 + $0x8] sm:$0xff] %v4677_v51 }
0x1355   : > { %v4651_v13 = vpop.xlane.xlu1 %4650 }
0x1356   : > { %v4656_v55 = vmul.f32 0.0078125, %v4651_v13 }
0x1358   : > { %v4660_v16 = vadd.f32 1e-05, %v4656_v55 }
0x1359   : > { %v4653_v52 = vpop.xlane.xlu0 %4652 }
0x135a   : > { %5987 = vrsqrt.f32 %v4660_v16  ;;  %v4657_v34 = vmul.f32 0.0078125, %v4653_v52 }
0x135c   : > { %v4661_v32 = vadd.f32 1e-05, %v4657_v34 }
0x135e   : > { %5989 = vrsqrt.f32 %v4661_v32 }
0x1367   : > { %v5988_v47 = vpop.eup %5987 }
0x1368   : > { %v4668_v8 = vmul.f32 %v5988_v47, %v4640_v56 }
0x136a   : > { %v4678_v7 = vmul.f32 %v4970_v57, %v4668_v8 }
0x136b   : > { %v5990_v25 = vpop.eup %5989 }
0x136c   : > { %4682 = vst [vmem:[%s607_s21 + $0x10] sm:$0xff] %v4678_v7  ;;  %v4669_v12 = vmul.f32 %v5990_v25, %v4641_v3 }
0x136e   : > { %v4679_v58 = vmul.f32 %v4970_v57, %v4669_v12 }
0x1370   : > { %4683 = vst [vmem:[%s607_s21 + $0x18] sm:$0xff] %v4679_v58 }
0x1371   : > { %6004 = shalt.err (!%p6001_p7)
}
0x1372   : > { %s6005_s22 = scalar_lea.hbm %s7980_s0, 512  ;;  %s6009_s26 = scalar_lea.hbm %s8099_s17, 4096 }
0x1373   : > { %p6006_p9 = scmp.ne.s32.totalorder %s7980_s0, %s6005_s22  ;;  %p6010_p12 = scmp.lt.s32.totalorder %s7980_s0, %s8099_s17 }
0x1374   : > { %p6011_p13 = scmp.lt.s32.totalorder %s6009_s26, %s6005_s22 }
0x1375   : > { %p6007_p10 = pnand %p6006_p9, %p6240_p3 }
0x1376   : > { %p6012_p0 = por %p6011_p13, %p6010_p12 }
0x1377   : > { %p6008_p11 = pneg %p6007_p10 }
0x1379   : > { %p6013_p1 = pnand %p6012_p0, %p6008_p11 }
0x137b   : > { %6016 = shalt.err (!%p6013_p1)
}
0x137c   : > { %s6092_s24 = smov 128   ;;  %s6093_s19 = smov 8  }
0x137d   : > { %5452 = dma.vmem_to_hbm [thread:$0]  (%p6240_p3), %s7975_s1, 512, %s7980_s0, %s7984_s27, %s6092_s24, %s6092_s24, %s6093_s19  }
0x137e PF: > { %s8100_s29 = sld [smem:[#allocation5_spill]]  ;;  %p5458_p2 = scmp.ge.s32.totalorder %s6083_s20, 2 }
0x1380   : > { %p5455_p4 = pnand %p5458_p2, %p6249_p8 }
0x1382   : > { %p5456_p5 = pneg %p5455_p4 }
0x1384   : > { %s4715_s21 = sand.u32 1, %s8100_s29  }
0x1385   : > { %s4716_s22 = scalar_lea.sflag [#allocation3], %s4715_s21 }
0x1386   : > { %6050 = dma.done.wait (%p5456_p5), %s4716_s22, 512  }
0x1387   : > { %6052 = vsyncadd (%p5456_p5), %s4716_s22, 4294966784  ;;  %s31_s20 = sadd.s32 1, %s6083_s20   ;;  %s8102_s2 = sld [smem:[#allocation6_spill]] }
0x1388   : > { %p28_p6 = scmp.ge.s32.totalorder %s31_s20, 10   ;;  %s8103_s29 = sld [smem:[#allocation12_spill]] }
0x1389   : > { %s8104_s30 = sld [smem:[#allocation7_spill]]  ;;  %s8108_s27 = smov %s6059_s28 }
0x138a   : > { %s8105_s0 = sld [smem:[#allocation8_spill]]  ;;  %30 = sbr.rel (!%p28_p6) target bundleno = 11 (0xb), region = 130 }
0x138b   : > { %s8106_s19 = sld [smem:[#allocation9_spill]] }
0x138c   : > { %s8107_s1 = sld [smem:[#allocation10_spill]] }
0x138d   : > { %s8109_s28 = smov %s8102_s2 }
0x138f   :  { %4721 = vsyncpa [#allocation3], 1 }
0x1390   :  { %4723 = vsyncpa [#allocation3 + $0x1], 1 }

</bundles_post_ra>
